<compile_context>
chip_gen: v5e
topology: v5e:2x2
jax: 0.10.0
libtpu: 0.0.40
codegen_flags: <defaults>
</compile_context>

<pallas_src>
import jax
import jax.numpy as jnp
from jax.experimental import pallas as pl
from jax.experimental.pallas import tpu as pltpu

HIDDEN = 768     # BERT hidden size expected by fc1
FC1 = 256        # fc1 output width
NCLASS = 5       # fc2 output width (sentiment classes)
CPAD = 128       # class dim padded to one full lane width (lane-dense stores)
VOCAB = 64       # synthetic vocab
MAXLEN = 8       # synthetic max sequence length
NHEADS = 12
HEAD_DIM = HIDDEN // NHEADS
FFN = 1024

# bias-pack row layout (single [8, FFN] f32 operand, sliced inside the kernel)
_BO, _LN1G, _LN1B, _BF1, _BF2, _LN2G, _LN2B, _HEAD = range(8)


# ----------------------------------------------------------------------------
# helpers (traceable inside and outside the kernel)
# ----------------------------------------------------------------------------
def _layer_norm(x, g, b, eps=1e-12):
    # single-pass mean / E[x^2] variance + rsqrt (EUP slot) instead of a divide
    mu = jnp.mean(x, axis=-1, keepdims=True)
    ex2 = jnp.mean(x * x, axis=-1, keepdims=True)
    var = ex2 - mu * mu
    return (x - mu) * jax.lax.rsqrt(var + eps) * g + b


def _gelu(x):
    # TODO(synk): HF BERT's default is exact (erf) GELU; tanh approximation used here.
    c = jnp.float32(0.7978845608028654)  # sqrt(2/pi)
    return 0.5 * x * (1.0 + jnp.tanh(c * (x + 0.044715 * x * x * x)))


# ----------------------------------------------------------------------------
# Pallas kernel: fused BERT-layer tail + LegalBERT head (positionwise rows)
#   x1  = LN1(x + ctx @ Wo + bo)
#   x2  = LN2(x1 + FFN(x1))
#   out = LogSoftmax(ReLU(x2 @ W1 + b1) @ W2_pad + b2_pad)   (classes masked)
# ----------------------------------------------------------------------------
def fused_tail_kernel(
    x_ref, ctx_ref,                       # [M, 768] f32 / bf16
    wo_ref, wf1_ref, wf2_ref,             # [768,768], [768,1024], [1024,768] bf16
    w1_ref, w2_ref,                       # [768,256], [256,128] bf16
    bias_ref,                             # [8, 1024] f32 packed biases / LN params
    o_ref,                                # [M, 128] f32
):
    f32 = jnp.float32
    bf16 = jnp.bfloat16

    bias = bias_ref[...]                                              # [8, 1024]
    bo   = bias[_BO:_BO + 1, :HIDDEN]
    ln1g = bias[_LN1G:_LN1G + 1, :HIDDEN]
    ln1b = bias[_LN1B:_LN1B + 1, :HIDDEN]
    bf1  = bias[_BF1:_BF1 + 1, :FFN]
    bf2  = bias[_BF2:_BF2 + 1, :HIDDEN]
    ln2g = bias[_LN2G:_LN2G + 1, :HIDDEN]
    ln2b = bias[_LN2B:_LN2B + 1, :HIDDEN]
    b1   = bias[_HEAD:_HEAD + 1, :FC1]
    b2   = bias[_HEAD:_HEAD + 1, FC1:FC1 + CPAD]

    x = x_ref[...]                                                    # [M, 768] f32

    # attention output projection + residual + LN1 (bf16 MXU, f32 accumulate)
    attn = jnp.dot(ctx_ref[...], wo_ref[...], preferred_element_type=f32) + bo
    x1 = _layer_norm(x + attn, ln1g, ln1b)

    # FFN + residual + LN2
    h1 = jnp.dot(x1.astype(bf16), wf1_ref[...], preferred_element_type=f32) + bf1
    ffn = jnp.dot(_gelu(h1).astype(bf16), wf2_ref[...], preferred_element_type=f32) + bf2
    x2 = _layer_norm(x1 + ffn, ln2g, ln2b)

    # classifier head
    # TODO(synk): nn.Dropout(0.2) is implemented as eval-mode identity.
    h = jnp.dot(x2.astype(bf16), w1_ref[...], preferred_element_type=f32) + b1
    h = jnp.maximum(h, 0.0)                                            # ReLU
    logits = jnp.dot(h.astype(bf16), w2_ref[...], preferred_element_type=f32) + b2

    # LogSoftmax over dim=1, restricted to the first NCLASS lanes (padding masked)
    col = jax.lax.broadcasted_iota(jnp.int32, logits.shape, 1)
    valid = col < NCLASS
    masked = jnp.where(valid, logits, jnp.float32(-1e30))
    m = jnp.max(masked, axis=1, keepdims=True)
    p = jnp.where(valid, jnp.exp(masked - m), 0.0)
    lse = m + jnp.log(jnp.sum(p, axis=1, keepdims=True))
    o_ref[...] = logits - lse               # lane-dense store; wrapper slices [:, :5]


def legalbert_fused_tail(x, ctx, fp):
    """x, ctx: [M, 768] selected rows (x f32, ctx cast bf16). Returns [M, 128] f32."""
    M = x.shape[0]
    M_pad = ((M + 15) // 16) * 16             # bf16 sublane packing (16 rows / vreg)
    if M_pad != M:
        pad = ((0, M_pad - M), (0, 0))
        x = jnp.pad(x, pad)
        ctx = jnp.pad(ctx, pad)

    vmem = lambda: pl.BlockSpec(memory_space=pltpu.MemorySpace.VMEM)
    out = pl.pallas_call(
        fused_tail_kernel,
        out_shape=jax.ShapeDtypeStruct((M_pad, CPAD), jnp.float32),
        in_specs=[vmem() for _ in range(8)],
        out_specs=vmem(),
    )(
        x.astype(jnp.float32), ctx.astype(jnp.bfloat16),
        fp["wo"], fp["wf1"], fp["wf2"], fp["w1"], fp["w2"], fp["bias"],
    )
    return out[:M]


# ----------------------------------------------------------------------------
# Deterministic synthetic single-layer BERT encoder, front half (plain JAX glue)
# ----------------------------------------------------------------------------
def init_bert_params(key):
    ks = jax.random.split(key, 8)
    s = 0.02
    return {
        "word_emb": jax.random.normal(ks[0], (VOCAB, HIDDEN)) * s,
        "pos_emb":  jax.random.normal(ks[1], (MAXLEN, HIDDEN)) * s,
        "ln_emb_g": jnp.ones((HIDDEN,)), "ln_emb_b": jnp.zeros((HIDDEN,)),
        "wq": jax.random.normal(ks[2], (HIDDEN, HIDDEN)) * s,
        "wk": jax.random.normal(ks[3], (HIDDEN, HIDDEN)) * s,
        "wv": jax.random.normal(ks[4], (HIDDEN, HIDDEN)) * s,
        "wo": jax.random.normal(ks[5], (HIDDEN, HIDDEN)) * s,
        "bq": jnp.zeros((HIDDEN,)), "bk": jnp.zeros((HIDDEN,)),
        "bv": jnp.zeros((HIDDEN,)), "bo": jnp.zeros((HIDDEN,)),
        "ln1_g": jnp.ones((HIDDEN,)), "ln1_b": jnp.zeros((HIDDEN,)),
        "w_ffn1": jax.random.normal(ks[6], (HIDDEN, FFN)) * s,
        "b_ffn1": jnp.zeros((FFN,)),
        "w_ffn2": jax.random.normal(ks[7], (FFN, HIDDEN)) * s,
        "b_ffn2": jnp.zeros((HIDDEN,)),
        "ln2_g": jnp.ones((HIDDEN,)), "ln2_b": jnp.zeros((HIDDEN,)),
    }


def synthetic_bert_front(p, sent_id, mask):
    """Embeddings + emb-LN + multi-head attention (up to the context tensor).

    Returns x (post-embedding-LN hidden states) and ctx (pre-output-projection
    attention context), both [B, S, 768]; the remainder of the encoder layer is
    fused into the Pallas kernel.  Matmuls use bf16 operands, f32 accumulation.
    """
    B, S = sent_id.shape
    f32, bf16 = jnp.float32, jnp.bfloat16
    x = p["word_emb"][sent_id] + p["pos_emb"][jnp.arange(S)][None, :, :]
    x = _layer_norm(x, p["ln_emb_g"], p["ln_emb_b"])

    xb = x.astype(bf16)
    q = (jnp.dot(xb, p["wq"].astype(bf16), preferred_element_type=f32) + p["bq"])
    k = (jnp.dot(xb, p["wk"].astype(bf16), preferred_element_type=f32) + p["bk"])
    v = (jnp.dot(xb, p["wv"].astype(bf16), preferred_element_type=f32) + p["bv"])
    q = q.reshape(B, S, NHEADS, HEAD_DIM).transpose(0, 2, 1, 3)
    k = k.reshape(B, S, NHEADS, HEAD_DIM).transpose(0, 2, 1, 3)
    v = v.reshape(B, S, NHEADS, HEAD_DIM).transpose(0, 2, 1, 3)

    scores = jnp.einsum("bhqd,bhkd->bhqk", q.astype(bf16), k.astype(bf16),
                        preferred_element_type=f32) / jnp.sqrt(jnp.float32(HEAD_DIM))
    add_mask = (1.0 - mask.astype(f32))[:, None, None, :] * -1e9
    attn = jax.nn.softmax(scores + add_mask, axis=-1)
    ctx = jnp.einsum("bhqk,bhkd->bhqd", attn.astype(bf16), v.astype(bf16),
                     preferred_element_type=f32)
    ctx = ctx.transpose(0, 2, 1, 3).reshape(B, S, HIDDEN)
    return x, ctx


# ----------------------------------------------------------------------------
# Parameter prep for the fused kernel (bf16 matmul operands, padded classes,
# one packed bias operand) — done once, outside the hot path.
# ----------------------------------------------------------------------------
def prepare_fused_params(bp, head_params):
    bf16 = jnp.bfloat16
    w1, b1, w2, b2 = head_params
    w2p = jnp.zeros((FC1, CPAD), jnp.float32).at[:, :NCLASS].set(w2)

    bias = jnp.zeros((8, FFN), jnp.float32)
    bias = bias.at[_BO, :HIDDEN].set(bp["bo"])
    bias = bias.at[_LN1G, :HIDDEN].set(bp["ln1_g"])
    bias = bias.at[_LN1B, :HIDDEN].set(bp["ln1_b"])
    bias = bias.at[_BF1, :FFN].set(bp["b_ffn1"])
    bias = bias.at[_BF2, :HIDDEN].set(bp["b_ffn2"])
    bias = bias.at[_LN2G, :HIDDEN].set(bp["ln2_g"])
    bias = bias.at[_LN2B, :HIDDEN].set(bp["ln2_b"])
    bias = bias.at[_HEAD, :FC1].set(b1.reshape(FC1))
    bias = bias.at[_HEAD, FC1:FC1 + NCLASS].set(b2.reshape(NCLASS))

    return {
        "wo": bp["wo"].astype(bf16),
        "wf1": bp["w_ffn1"].astype(bf16),
        "wf2": bp["w_ffn2"].astype(bf16),
        "w1": w1.astype(bf16),
        "w2": w2p.astype(bf16),
        "bias": bias,
    }


# ----------------------------------------------------------------------------
# LegalBERT forward: bert front half -> last-token slice -> fused Pallas tail
# ----------------------------------------------------------------------------
def legalbert_forward(bert_params, fused_params, sent_id, mask):
    B, S = sent_id.shape
    x, ctx = synthetic_bert_front(bert_params, sent_id, mask)        # [B, S, 768]
    # Last-token selection BEFORE the fused kernel (matches bert(...)[0][:, -1, :]);
    # the entire tail is positionwise, so other rows would be dead work.
    x_last = x[:, -1, :]                                              # [B, 768]
    ctx_last = ctx[:, -1, :]                                          # [B, 768]
    out = legalbert_fused_tail(x_last, ctx_last, fused_params)        # [B, 128]
    return out[:, :NCLASS].reshape(B, NCLASS)                         # [B, 5] log-probs


if __name__ == "__main__":
    key = jax.random.PRNGKey(0)
    k_bert, k_w1, k_b1, k_w2, k_b2, k_ids = jax.random.split(key, 6)

    B, S = 2, MAXLEN
    sent_id = jax.random.randint(k_ids, (B, S), 0, VOCAB, dtype=jnp.int32)
    mask = jnp.ones((B, S), dtype=jnp.int32)

    bert_params = init_bert_params(k_bert)

    # Head params (torch nn.Linear: weight [out,in]; we store the transpose).
    lim1 = 1.0 / jnp.sqrt(jnp.float32(HIDDEN))
    lim2 = 1.0 / jnp.sqrt(jnp.float32(FC1))
    w1 = jax.random.uniform(k_w1, (HIDDEN, FC1), minval=-lim1, maxval=lim1)
    b1 = jax.random.uniform(k_b1, (1, FC1), minval=-lim1, maxval=lim1)
    w2 = jax.random.uniform(k_w2, (FC1, NCLASS), minval=-lim2, maxval=lim2)
    b2 = jax.random.uniform(k_b2, (1, NCLASS), minval=-lim2, maxval=lim2)
    head_params = (w1.astype(jnp.float32), b1.astype(jnp.float32),
                   w2.astype(jnp.float32), b2.astype(jnp.float32))

    fused_params = prepare_fused_params(bert_params, head_params)

    out = legalbert_forward(bert_params, fused_params, sent_id, mask)
    jax.block_until_ready(out)

    assert out.shape == (B, NCLASS)
    # log-softmax sanity: rows should (approximately) exponentiate to sum 1
    row_sums = jnp.sum(jnp.exp(out), axis=1)
    assert jnp.allclose(row_sums, jnp.ones((B,)), atol=1e-3)

    print("KERNEL_OK")
</pallas_src>

<mosaic_0001>
module attributes {stable_mosaic.version = 11 : i64} {
  func.func @fused_tail_kernel(%arg0: memref<16x768xf32, #tpu.memory_space<vmem>>, %arg1: memref<16x768xbf16, #tpu.memory_space<vmem>>, %arg2: memref<768x768xbf16, #tpu.memory_space<vmem>>, %arg3: memref<768x1024xbf16, #tpu.memory_space<vmem>>, %arg4: memref<1024x768xbf16, #tpu.memory_space<vmem>>, %arg5: memref<768x256xbf16, #tpu.memory_space<vmem>>, %arg6: memref<256x128xbf16, #tpu.memory_space<vmem>>, %arg7: memref<8x1024xf32, #tpu.memory_space<vmem>>, %arg8: memref<16x128xf32, #tpu.memory_space<vmem>>) attributes {dimension_semantics = [], scalar_prefetch = 0 : i64, scratch_operands = 0 : i64, tpu.core_type = #tpu.core_type<tc>} {
    %c0 = arith.constant 0 : index
    %c0_0 = arith.constant 0 : index
    %0 = vector.load %arg7[%c0, %c0_0] : memref<8x1024xf32, #tpu.memory_space<vmem>>, vector<8x1024xf32>
    %1 = vector.extract_strided_slice %0 {offsets = [0, 0], sizes = [1, 768], strides = [1, 1]} : vector<8x1024xf32> to vector<1x768xf32>
    %2 = vector.extract_strided_slice %0 {offsets = [1, 0], sizes = [1, 768], strides = [1, 1]} : vector<8x1024xf32> to vector<1x768xf32>
    %3 = vector.extract_strided_slice %0 {offsets = [2, 0], sizes = [1, 768], strides = [1, 1]} : vector<8x1024xf32> to vector<1x768xf32>
    %4 = vector.extract_strided_slice %0 {offsets = [3, 0], sizes = [1, 1024], strides = [1, 1]} : vector<8x1024xf32> to vector<1x1024xf32>
    %5 = vector.extract_strided_slice %0 {offsets = [4, 0], sizes = [1, 768], strides = [1, 1]} : vector<8x1024xf32> to vector<1x768xf32>
    %6 = vector.extract_strided_slice %0 {offsets = [5, 0], sizes = [1, 768], strides = [1, 1]} : vector<8x1024xf32> to vector<1x768xf32>
    %7 = vector.extract_strided_slice %0 {offsets = [6, 0], sizes = [1, 768], strides = [1, 1]} : vector<8x1024xf32> to vector<1x768xf32>
    %8 = vector.extract_strided_slice %0 {offsets = [7, 0], sizes = [1, 256], strides = [1, 1]} : vector<8x1024xf32> to vector<1x256xf32>
    %9 = vector.extract_strided_slice %0 {offsets = [7, 256], sizes = [1, 128], strides = [1, 1]} : vector<8x1024xf32> to vector<1x128xf32>
    %c0_1 = arith.constant 0 : index
    %c0_2 = arith.constant 0 : index
    %10 = vector.load %arg0[%c0_1, %c0_2] : memref<16x768xf32, #tpu.memory_space<vmem>>, vector<16x768xf32>
    %c0_3 = arith.constant 0 : index
    %c0_4 = arith.constant 0 : index
    %11 = vector.load %arg1[%c0_3, %c0_4] : memref<16x768xbf16, #tpu.memory_space<vmem>>, vector<16x768xbf16>
    %c0_5 = arith.constant 0 : index
    %c0_6 = arith.constant 0 : index
    %12 = vector.load %arg2[%c0_5, %c0_6] : memref<768x768xbf16, #tpu.memory_space<vmem>>, vector<768x768xbf16>
    %cst = arith.constant dense<0.000000e+00> : vector<16x768xf32>
    %13 = tpu.matmul %11, %12, %cst {dimension_numbers = #tpu.dot_dimension_numbers<[1], [0], [0], [1], [0, 0, 1, 1], [], []>} : vector<16x768xbf16>, vector<768x768xbf16>, vector<16x768xf32> -> vector<16x768xf32>
    %14 = vector.broadcast %1 : vector<1x768xf32> to vector<16x768xf32>
    %15 = arith.addf %13, %14 : vector<16x768xf32>
    %16 = arith.addf %10, %15 : vector<16x768xf32>
    %cst_7 = arith.constant dense<0.000000e+00> : vector<16xf32>
    %17 = vector.multi_reduction <add>, %16, %cst_7 [1] : vector<16x768xf32> to vector<16xf32>
    %18 = vector.shape_cast %17 : vector<16xf32> to vector<16x1xf32>
    %cst_8 = arith.constant 7.680000e+02 : f32
    %19 = vector.broadcast %cst_8 : f32 to vector<16x1xf32>
    %20 = arith.divf %18, %19 : vector<16x1xf32>
    %21 = arith.mulf %16, %16 : vector<16x768xf32>
    %cst_9 = arith.constant dense<0.000000e+00> : vector<16xf32>
    %22 = vector.multi_reduction <add>, %21, %cst_9 [1] : vector<16x768xf32> to vector<16xf32>
    %23 = vector.shape_cast %22 : vector<16xf32> to vector<16x1xf32>
    %cst_10 = arith.constant 7.680000e+02 : f32
    %24 = vector.broadcast %cst_10 : f32 to vector<16x1xf32>
    %25 = arith.divf %23, %24 : vector<16x1xf32>
    %26 = arith.mulf %20, %20 : vector<16x1xf32>
    %27 = arith.subf %25, %26 : vector<16x1xf32>
    %28 = vector.broadcast %20 : vector<16x1xf32> to vector<16x768xf32>
    %29 = arith.subf %16, %28 : vector<16x768xf32>
    %cst_11 = arith.constant 9.99999996E-13 : f32
    %30 = vector.broadcast %cst_11 : f32 to vector<16x1xf32>
    %31 = arith.addf %27, %30 : vector<16x1xf32>
    %32 = math.rsqrt %31 : vector<16x1xf32>
    %33 = vector.broadcast %32 : vector<16x1xf32> to vector<16x768xf32>
    %34 = arith.mulf %29, %33 : vector<16x768xf32>
    %35 = vector.broadcast %2 : vector<1x768xf32> to vector<16x768xf32>
    %36 = arith.mulf %34, %35 : vector<16x768xf32>
    %37 = vector.broadcast %3 : vector<1x768xf32> to vector<16x768xf32>
    %38 = arith.addf %36, %37 : vector<16x768xf32>
    %39 = arith.truncf %38 : vector<16x768xf32> to vector<16x768xbf16>
    %c0_12 = arith.constant 0 : index
    %c0_13 = arith.constant 0 : index
    %40 = vector.load %arg3[%c0_12, %c0_13] : memref<768x1024xbf16, #tpu.memory_space<vmem>>, vector<768x1024xbf16>
    %cst_14 = arith.constant dense<0.000000e+00> : vector<16x1024xf32>
    %41 = tpu.matmul %39, %40, %cst_14 {dimension_numbers = #tpu.dot_dimension_numbers<[1], [0], [0], [1], [0, 0, 1, 1], [], []>} : vector<16x768xbf16>, vector<768x1024xbf16>, vector<16x1024xf32> -> vector<16x1024xf32>
    %42 = vector.broadcast %4 : vector<1x1024xf32> to vector<16x1024xf32>
    %43 = arith.addf %41, %42 : vector<16x1024xf32>
    %cst_15 = arith.constant 5.000000e-01 : f32
    %44 = vector.broadcast %cst_15 : f32 to vector<16x1024xf32>
    %45 = arith.mulf %44, %43 : vector<16x1024xf32>
    %cst_16 = arith.constant 4.471500e-02 : f32
    %46 = vector.broadcast %cst_16 : f32 to vector<16x1024xf32>
    %47 = arith.mulf %46, %43 : vector<16x1024xf32>
    %48 = arith.mulf %47, %43 : vector<16x1024xf32>
    %49 = arith.mulf %48, %43 : vector<16x1024xf32>
    %50 = arith.addf %43, %49 : vector<16x1024xf32>
    %cst_17 = arith.constant 0.797884583 : f32
    %51 = vector.broadcast %cst_17 : f32 to vector<16x1024xf32>
    %52 = arith.mulf %51, %50 : vector<16x1024xf32>
    %53 = math.tanh %52 : vector<16x1024xf32>
    %cst_18 = arith.constant 1.000000e+00 : f32
    %54 = vector.broadcast %cst_18 : f32 to vector<16x1024xf32>
    %55 = arith.addf %54, %53 : vector<16x1024xf32>
    %56 = arith.mulf %45, %55 : vector<16x1024xf32>
    %57 = arith.truncf %56 : vector<16x1024xf32> to vector<16x1024xbf16>
    %c0_19 = arith.constant 0 : index
    %c0_20 = arith.constant 0 : index
    %58 = vector.load %arg4[%c0_19, %c0_20] : memref<1024x768xbf16, #tpu.memory_space<vmem>>, vector<1024x768xbf16>
    %cst_21 = arith.constant dense<0.000000e+00> : vector<16x768xf32>
    %59 = tpu.matmul %57, %58, %cst_21 {dimension_numbers = #tpu.dot_dimension_numbers<[1], [0], [0], [1], [0, 0, 1, 1], [], []>} : vector<16x1024xbf16>, vector<1024x768xbf16>, vector<16x768xf32> -> vector<16x768xf32>
    %60 = vector.broadcast %5 : vector<1x768xf32> to vector<16x768xf32>
    %61 = arith.addf %59, %60 : vector<16x768xf32>
    %62 = arith.addf %38, %61 : vector<16x768xf32>
    %cst_22 = arith.constant dense<0.000000e+00> : vector<16xf32>
    %63 = vector.multi_reduction <add>, %62, %cst_22 [1] : vector<16x768xf32> to vector<16xf32>
    %64 = vector.shape_cast %63 : vector<16xf32> to vector<16x1xf32>
    %cst_23 = arith.constant 7.680000e+02 : f32
    %65 = vector.broadcast %cst_23 : f32 to vector<16x1xf32>
    %66 = arith.divf %64, %65 : vector<16x1xf32>
    %67 = arith.mulf %62, %62 : vector<16x768xf32>
    %cst_24 = arith.constant dense<0.000000e+00> : vector<16xf32>
    %68 = vector.multi_reduction <add>, %67, %cst_24 [1] : vector<16x768xf32> to vector<16xf32>
    %69 = vector.shape_cast %68 : vector<16xf32> to vector<16x1xf32>
    %cst_25 = arith.constant 7.680000e+02 : f32
    %70 = vector.broadcast %cst_25 : f32 to vector<16x1xf32>
    %71 = arith.divf %69, %70 : vector<16x1xf32>
    %72 = arith.mulf %66, %66 : vector<16x1xf32>
    %73 = arith.subf %71, %72 : vector<16x1xf32>
    %74 = vector.broadcast %66 : vector<16x1xf32> to vector<16x768xf32>
    %75 = arith.subf %62, %74 : vector<16x768xf32>
    %cst_26 = arith.constant 9.99999996E-13 : f32
    %76 = vector.broadcast %cst_26 : f32 to vector<16x1xf32>
    %77 = arith.addf %73, %76 : vector<16x1xf32>
    %78 = math.rsqrt %77 : vector<16x1xf32>
    %79 = vector.broadcast %78 : vector<16x1xf32> to vector<16x768xf32>
    %80 = arith.mulf %75, %79 : vector<16x768xf32>
    %81 = vector.broadcast %6 : vector<1x768xf32> to vector<16x768xf32>
    %82 = arith.mulf %80, %81 : vector<16x768xf32>
    %83 = vector.broadcast %7 : vector<1x768xf32> to vector<16x768xf32>
    %84 = arith.addf %82, %83 : vector<16x768xf32>
    %85 = arith.truncf %84 : vector<16x768xf32> to vector<16x768xbf16>
    %c0_27 = arith.constant 0 : index
    %c0_28 = arith.constant 0 : index
    %86 = vector.load %arg5[%c0_27, %c0_28] : memref<768x256xbf16, #tpu.memory_space<vmem>>, vector<768x256xbf16>
    %cst_29 = arith.constant dense<0.000000e+00> : vector<16x256xf32>
    %87 = tpu.matmul %85, %86, %cst_29 {dimension_numbers = #tpu.dot_dimension_numbers<[1], [0], [0], [1], [0, 0, 1, 1], [], []>} : vector<16x768xbf16>, vector<768x256xbf16>, vector<16x256xf32> -> vector<16x256xf32>
    %88 = vector.broadcast %8 : vector<1x256xf32> to vector<16x256xf32>
    %89 = arith.addf %87, %88 : vector<16x256xf32>
    %cst_30 = arith.constant 0.000000e+00 : f32
    %90 = vector.broadcast %cst_30 : f32 to vector<16x256xf32>
    %91 = arith.maximumf %89, %90 : vector<16x256xf32>
    %92 = arith.truncf %91 : vector<16x256xf32> to vector<16x256xbf16>
    %c0_31 = arith.constant 0 : index
    %c0_32 = arith.constant 0 : index
    %93 = vector.load %arg6[%c0_31, %c0_32] : memref<256x128xbf16, #tpu.memory_space<vmem>>, vector<256x128xbf16>
    %cst_33 = arith.constant dense<0.000000e+00> : vector<16x128xf32>
    %94 = tpu.matmul %92, %93, %cst_33 {dimension_numbers = #tpu.dot_dimension_numbers<[1], [0], [0], [1], [0, 0, 1, 1], [], []>} : vector<16x256xbf16>, vector<256x128xbf16>, vector<16x128xf32> -> vector<16x128xf32>
    %95 = vector.broadcast %9 : vector<1x128xf32> to vector<16x128xf32>
    %96 = arith.addf %94, %95 : vector<16x128xf32>
    %97 = tpu.iota {dimensions = array<i32: 1>} : vector<16x128xi32>
    %c5_i32 = arith.constant 5 : i32
    %98 = vector.broadcast %c5_i32 : i32 to vector<16x128xi32>
    %99 = arith.cmpi slt, %97, %98 : vector<16x128xi32>
    %cst_34 = arith.constant -1.000000e+30 : f32
    %100 = vector.broadcast %cst_34 : f32 to vector<16x128xf32>
    %101 = arith.select %99, %96, %100 : vector<16x128xi1>, vector<16x128xf32>
    %cst_35 = arith.constant dense<0xFF800000> : vector<16xf32>
    %102 = vector.multi_reduction <maximumf>, %101, %cst_35 [1] : vector<16x128xf32> to vector<16xf32>
    %103 = vector.shape_cast %102 : vector<16xf32> to vector<16x1xf32>
    %104 = vector.broadcast %103 : vector<16x1xf32> to vector<16x128xf32>
    %105 = arith.subf %101, %104 : vector<16x128xf32>
    %106 = math.exp %105 : vector<16x128xf32>
    %cst_36 = arith.constant 0.000000e+00 : f32
    %107 = vector.broadcast %cst_36 : f32 to vector<16x128xf32>
    %108 = arith.select %99, %106, %107 : vector<16x128xi1>, vector<16x128xf32>
    %cst_37 = arith.constant dense<0.000000e+00> : vector<16xf32>
    %109 = vector.multi_reduction <add>, %108, %cst_37 [1] : vector<16x128xf32> to vector<16xf32>
    %110 = vector.shape_cast %109 : vector<16xf32> to vector<16x1xf32>
    %111 = math.log %110 : vector<16x1xf32>
    %112 = arith.addf %103, %111 : vector<16x1xf32>
    %113 = vector.broadcast %112 : vector<16x1xf32> to vector<16x128xf32>
    %114 = arith.subf %96, %113 : vector<16x128xf32>
    %c0_38 = arith.constant 0 : index
    %c0_39 = arith.constant 0 : index
    %115 = vector.load %arg8[%c0_38, %c0_39] : memref<16x128xf32, #tpu.memory_space<vmem>>, vector<16x128xf32>
    tpu.vector_store %arg8[%c0_38, %c0_39], %114 {strides = array<i32>} : memref<16x128xf32, #tpu.memory_space<vmem>>, vector<16x128xf32>,
    return
  }
}

</mosaic_0001>

<bundles_post_ra>
// kernel: tpu_custom_call.1
= control target key start
LH: loop header
LB: loop body
LE: loop exit
PB: predicated region body
PF: predicated region fallthrough
CT: control target
= control target key end

     0   :  { %13 = vsyncpa [#allocation3], 0  ;;  %s17205_s0 = inlined_call_operand.hbm [shape: f32[16,768], index: 0, kind: input, shape index: {}]   ;;  %s17206_s1 = inlined_call_operand.hbm [shape: bf16[16,768], index: 1, kind: input, shape index: {}]   ;;  %s17207_s2 = inlined_call_operand.hbm [shape: bf16[768,768], index: 2, kind: input, shape index: {}]   ;;  %s17208_s3 = inlined_call_operand.hbm [shape: bf16[768,1024], index: 3, kind: input, shape index: {}]   ;;  %s17209_s4 = inlined_call_operand.hbm [shape: bf16[1024,768], index: 4, kind: input, shape index: {}]   ;;  %s17210_s5 = inlined_call_operand.hbm [shape: bf16[768,256], index: 5, kind: input, shape index: {}]   ;;  %s17211_s6 = inlined_call_operand.hbm [shape: bf16[256,128], index: 6, kind: input, shape index: {}]   ;;  %s17212_s7 = inlined_call_operand.hbm [shape: f32[8,1024], index: 7, kind: input, shape index: {}]   ;;  %s17213_s8 = inlined_call_operand.hbm [shape: f32[16,128], index: 8, kind: output, shape index: {}]  }
   0x1   :  { %14 = vsyncpa [#allocation6], 0 }
   0x2   :  { %15 = vsyncpa [#allocation9], 0 }
   0x3   :  { %16 = vsyncpa [#allocation12], 0 }
   0x4   :  { %17 = vsyncpa [#allocation15], 0  ;;  %s36_s29 = sshll.u32 %s17206_s1, 4  ;;  %s37_s29 = int_to_ptr.hbm [resolvable:$true] %s36_s29 }
   0x5   :  { %18 = vsyncpa [#allocation4], 0  ;;  %s16020_s30 = smov [#allocation5]   ;;  %s62_s12 = sshll.u32 %s17208_s3, 4  ;;  %s63_s12 = int_to_ptr.hbm [resolvable:$true] %s62_s12 }
   0x6   :  { %s38_s9 = sshll.u32 %s16020_s30, 4  ;;  %s16021_s13 = smov 384   ;;  %s39_s9 = int_to_ptr.vmem [resolvable:$true] %s38_s9 }
   0x7   :  { %s16022_s14 = smov 24   ;;  %s16023_s15 = smov [#allocation8]  }
   0x8   :  { %44 = dma.hbm_to_vmem [thread:$0]  %s37_s29, 768, %s39_s9, [#allocation6], %s16021_s13, %s16021_s13, %s16022_s14  }
   0x9   :  { %s64_s16 = sshll.u32 %s16023_s15, 4  ;;  %s16024_s1 = smov 512   ;;  %s65_s16 = int_to_ptr.vmem [resolvable:$true] %s64_s16 }
   0xa   :  { %s16025_s17 = smov 32   ;;  %s88_s20 = sshll.u32 %s17210_s5, 4  ;;  %s89_s20 = int_to_ptr.hbm [resolvable:$true] %s88_s20 }
   0xb   :  { %70 = dma.hbm_to_vmem [thread:$0]  %s63_s12, 49152, %s65_s16, [#allocation9], %s16024_s1, %s16024_s1, %s16025_s17  }
   0xc   :  { %s16026_s21 = smov [#allocation11]   ;;  %s23_s24 = sshll.u32 %s17205_s0, 4  ;;  %s24_s24 = int_to_ptr.hbm [resolvable:$true] %s23_s24 }
   0xd   :  { %s90_s3 = sshll.u32 %s16026_s21, 4  ;;  %s16027_s25 = smov 128   ;;  %s91_s3 = int_to_ptr.vmem [resolvable:$true] %s90_s3 }
   0xe   :  { %s16028_s26 = smov 8   ;;  %s16029_s27 = smov [#allocation2]  }
   0xf   :  { %96 = dma.hbm_to_vmem [thread:$0]  %s89_s20, 12288, %s91_s3, [#allocation12], %s16027_s25, %s16027_s25, %s16028_s26  }
  0x10   :  { %s25_s28 = sshll.u32 %s16029_s27, 4  ;;  %s16030_s29 = smov 768   ;;  %s26_s28 = int_to_ptr.vmem [resolvable:$true] %s25_s28 }
  0x11   :  { %s16031_s5 = smov 48   ;;  %s49_s10 = sshll.u32 %s17207_s2, 4  ;;  %s50_s10 = int_to_ptr.hbm [resolvable:$true] %s49_s10 }
  0x12   :  { %31 = dma.hbm_to_vmem [thread:$0]  %s24_s24, 1536, %s26_s28, [#allocation3], %s16030_s29, %s16030_s29, %s16031_s5  }
  0x13   :  { %s16032_s11 = smov [#allocation7]   ;;  %s75_s16 = sshll.u32 %s17209_s4, 4  ;;  %s76_s16 = int_to_ptr.hbm [resolvable:$true] %s75_s16 }
  0x14   :  { %s51_s0 = sshll.u32 %s16032_s11, 4  ;;  %s16033_s1 = smov [#allocation10]   ;;  %s52_s0 = int_to_ptr.vmem [resolvable:$true] %s51_s0 }
  0x15   :  { %57 = dma.hbm_to_vmem [thread:$0]  %s50_s10, 36864, %s52_s0, [#allocation6], %s16021_s13, %s16021_s13, %s16022_s14  }
  0x16   :  { %s77_s17 = sshll.u32 %s16033_s1, 4  ;;  %s101_s20 = sshll.u32 %s17211_s6, 4  ;;  %s78_s17 = int_to_ptr.vmem [resolvable:$true] %s77_s17  ;;  %s102_s20 = int_to_ptr.hbm [resolvable:$true] %s101_s20 }
  0x17   :  { %83 = dma.hbm_to_vmem [thread:$0]  %s76_s16, 49152, %s78_s17, [#allocation9], %s16021_s13, %s16021_s13, %s16022_s14  }
  0x18   :  { %s16034_s2 = smov [#allocation13]   ;;  %s115_s22 = sshll.u32 %s17212_s7, 4  ;;  %s116_s22 = int_to_ptr.hbm [resolvable:$true] %s115_s22 }
  0x19   :  { %s103_s21 = sshll.u32 %s16034_s2, 4  ;;  %s16035_s23 = smov 64   ;;  %s104_s21 = int_to_ptr.vmem [resolvable:$true] %s103_s21 }
  0x1a   :  { %s16036_s24 = smov 4   ;;  %s16037_s27 = smov [#allocation14]  }
  0x1b   :  { %109 = dma.hbm_to_vmem [thread:$0]  %s102_s20, 2048, %s104_s21, [#allocation12], %s16035_s23, %s16035_s23, %s16036_s24  }
  0x1c   :  { %s117_s28 = sshll.u32 %s16037_s27, 4  ;;  %s118_s28 = int_to_ptr.vmem [resolvable:$true] %s117_s28 }
  0x1d   :  { %120 = dma.hbm_to_vmem [thread:$0]  %s116_s22, 1024, %s118_s28, [#allocation15]  }
  0x1e   :  { %16008 = dma.done.wait [#allocation3], 1536  }
  0x1f   :  { %16009 = vsyncadd [#allocation3], 4294965760 }
  0x20   :  { %16010 = dma.done.wait [#allocation6], 37632  }
  0x21   :  { %16011 = vsyncadd [#allocation6], 4294929664 }
  0x22   :  { %16012 = dma.done.wait [#allocation9], 98304  }
  0x23   :  { %16013 = vsyncadd [#allocation9], 4294868992 }
  0x24   :  { %16014 = dma.done.wait [#allocation12], 14336  }
  0x25   :  { %16015 = vsyncadd [#allocation12], 4294952960 }
  0x26   :  { %16016 = dma.done.wait [#allocation15], 1024  }
  0x27   :  { %16017 = vsyncadd [#allocation15], 4294966272  ;;  %v10025_v0 = vld [vmem:[#allocation7 + $0x150] sm:$0xf]  ;;  %v14578_v1 = vld [vmem:[#allocation7 + $0x164] sm:$0xf0] }
  0x28   :  { %v10217_v2 = vld [vmem:[#allocation7 + $0x2d0] sm:$0xf]  ;;  %v10026_v3 = vor.u32 %v14578_v1, %v10025_v0  ;;  %v14626_v4 = vld [vmem:[#allocation7 + $0x2e4] sm:$0xf0]  ;;  %v10001_v11 = vld [vmem:[#allocation7 + $0x120] sm:$0xf] }
  0x29   :  { %v10409_v5 = vld [vmem:[#allocation7 + $0x450] sm:$0xf]  ;;  %v14674_v6 = vld [vmem:[#allocation7 + $0x464] sm:$0xf0]  ;;  %v10218_v7 = vor.u32 %v14626_v4, %v10217_v2  ;;  %v14572_v13 = vld [vmem:[#allocation7 + $0x134] sm:$0xf0] }
  0x2a   :  { %v10410_v8 = vor.u32 %v14674_v6, %v10409_v5  ;;  %v10601_v9 = vld [vmem:[#allocation7 + $0x5d0] sm:$0xf]  ;;  %v14722_v10 = vld [vmem:[#allocation7 + $0x5e4] sm:$0xf0]  ;;  %1943 = vmatpush.bf16.msra.mxu0 %v10026_v3  ;;  %v10193_v14 = vld [vmem:[#allocation7 + $0x2a0] sm:$0xf]  ;;  %v10002_v16 = vor.u32 %v14572_v13, %v10001_v11 }
  0x2b   :  { %v10602_v12 = vor.u32 %v14722_v10, %v10601_v9  ;;  %v14620_v15 = vld [vmem:[#allocation7 + $0x2b4] sm:$0xf0]  ;;  %1957 = vmatpush.bf16.msra.mxu1 %v10218_v7  ;;  %v10385_v18 = vld [vmem:[#allocation7 + $0x420] sm:$0xf]  ;;  %v9977_v23 = vld [vmem:[#allocation7 + $0xf0] sm:$0xf] }
  0x2c   :  { %1971 = vmatpush.bf16.msra.mxu2 %v10410_v8  ;;  %v10194_v17 = vor.u32 %v14620_v15, %v10193_v14  ;;  %v14668_v19 = vld [vmem:[#allocation7 + $0x434] sm:$0xf0]  ;;  %v10577_v20 = vld [vmem:[#allocation7 + $0x5a0] sm:$0xf]  ;;  %v14566_v24 = vld [vmem:[#allocation7 + $0x104] sm:$0xf0] }
  0x2d   :  { %1985 = vmatpush.bf16.msra.mxu3 %v10602_v12  ;;  %v10386_v21 = vor.u32 %v14668_v19, %v10385_v18  ;;  %v14716_v22 = vld [vmem:[#allocation7 + $0x5b4] sm:$0xf0]  ;;  %v10169_v26 = vld [vmem:[#allocation7 + $0x270] sm:$0xf]  ;;  %v14614_v27 = vld [vmem:[#allocation7 + $0x284] sm:$0xf0]  ;;  %v9978_v29 = vor.u32 %v14566_v24, %v9977_v23 }
  0x2e   :  { %v10578_v25 = vor.u32 %v14716_v22, %v10577_v20  ;;  %v10361_v28 = vld [vmem:[#allocation7 + $0x3f0] sm:$0xf]  ;;  %1944 = vmatpush.bf16.msra.mxu0 %v10002_v16  ;;  %v14662_v30 = vld [vmem:[#allocation7 + $0x404] sm:$0xf0]  ;;  %v10170_v33 = vor.u32 %v14614_v27, %v10169_v26  ;;  %v9953_v35 = vld [vmem:[#allocation7 + $0xc0] sm:$0xf] }
  0x2f   :  { %v10553_v31 = vld [vmem:[#allocation7 + $0x570] sm:$0xf]  ;;  %v14710_v32 = vld [vmem:[#allocation7 + $0x584] sm:$0xf0]  ;;  %1958 = vmatpush.bf16.msra.mxu1 %v10194_v17  ;;  %v10362_v34 = vor.u32 %v14662_v30, %v10361_v28  ;;  %v14560_v36 = vld [vmem:[#allocation7 + $0xd4] sm:$0xf0] }
  0x30   :  { %1972 = vmatpush.bf16.msra.mxu2 %v10386_v21  ;;  %v10145_v37 = vld [vmem:[#allocation7 + $0x240] sm:$0xf]  ;;  %v10554_v38 = vor.u32 %v14710_v32, %v10553_v31  ;;  %v14608_v39 = vld [vmem:[#allocation7 + $0x254] sm:$0xf0]  ;;  %v9954_v44 = vor.u32 %v14560_v36, %v9953_v35  ;;  %v9929_v47 = vld [vmem:[#allocation7 + $0x90] sm:$0xf] }
  0x31   :  { %1986 = vmatpush.bf16.msra.mxu3 %v10578_v25  ;;  %v10337_v40 = vld [vmem:[#allocation7 + $0x3c0] sm:$0xf]  ;;  %v14656_v41 = vld [vmem:[#allocation7 + $0x3d4] sm:$0xf0]  ;;  %v10146_v45 = vor.u32 %v14608_v39, %v10145_v37  ;;  %v14554_v48 = vld [vmem:[#allocation7 + $0xa4] sm:$0xf0] }
  0x32   :  { %v10529_v42 = vld [vmem:[#allocation7 + $0x540] sm:$0xf]  ;;  %v14704_v43 = vld [vmem:[#allocation7 + $0x554] sm:$0xf0]  ;;  %1945 = vmatpush.bf16.msra.mxu0 %v9978_v29  ;;  %v10338_v46 = vor.u32 %v14656_v41, %v10337_v40  ;;  %v10121_v49 = vld [vmem:[#allocation7 + $0x210] sm:$0xf]  ;;  %v9930_v56 = vor.u32 %v14554_v48, %v9929_v47 }
  0x33   :  { %1959 = vmatpush.bf16.msra.mxu1 %v10170_v33  ;;  %v10530_v50 = vor.u32 %v14704_v43, %v10529_v42  ;;  %v14602_v51 = vld [vmem:[#allocation7 + $0x224] sm:$0xf0]  ;;  %v10313_v52 = vld [vmem:[#allocation7 + $0x390] sm:$0xf]  ;;  %v9905_v59 = vld [vmem:[#allocation7 + $0x60] sm:$0xf] }
  0x34   :  { %1973 = vmatpush.bf16.msra.mxu2 %v10362_v34  ;;  %v14650_v53 = vld [vmem:[#allocation7 + $0x3a4] sm:$0xf0]  ;;  %v10505_v54 = vld [vmem:[#allocation7 + $0x510] sm:$0xf]  ;;  %v10122_v57 = vor.u32 %v14602_v51, %v10121_v49  ;;  %v14548_v60 = vld [vmem:[#allocation7 + $0x74] sm:$0xf0] }
  0x35   :  { %1987 = vmatpush.bf16.msra.mxu3 %v10554_v38  ;;  %v14698_v55 = vld [vmem:[#allocation7 + $0x524] sm:$0xf0]  ;;  %v10314_v58 = vor.u32 %v14650_v53, %v10313_v52  ;;  %v10097_v61 = vld [vmem:[#allocation7 + $0x1e0] sm:$0xf]  ;;  %v14596_v63 = vld [vmem:[#allocation7 + $0x1f4] sm:$0xf0]  ;;  %v9906_v4 = vor.u32 %v14548_v60, %v9905_v59 }
  0x36   :  { %1946 = vmatpush.bf16.msra.mxu0 %v9954_v44  ;;  %v10506_v62 = vor.u32 %v14698_v55, %v10505_v54  ;;  %v10289_v0 = vld [vmem:[#allocation7 + $0x360] sm:$0xf]  ;;  %v14644_v1 = vld [vmem:[#allocation7 + $0x374] sm:$0xf0]  ;;  %v10098_v5 = vor.u32 %v14596_v63, %v10097_v61  ;;  %v9881_v7 = vld [vmem:[#allocation7 + $0x30] sm:$0xf] }
  0x37   :  { %1960 = vmatpush.bf16.msra.mxu1 %v10146_v45  ;;  %v10481_v2 = vld [vmem:[#allocation7 + $0x4e0] sm:$0xf]  ;;  %v14692_v3 = vld [vmem:[#allocation7 + $0x4f4] sm:$0xf0]  ;;  %v10290_v6 = vor.u32 %v14644_v1, %v10289_v0  ;;  %v14542_v8 = vld [vmem:[#allocation7 + $0x44] sm:$0xf0] }
  0x38   :  { %1974 = vmatpush.bf16.msra.mxu2 %v10338_v46  ;;  %v10073_v9 = vld [vmem:[#allocation7 + $0x1b0] sm:$0xf]  ;;  %v10482_v10 = vor.u32 %v14692_v3, %v10481_v2  ;;  %v14590_v11 = vld [vmem:[#allocation7 + $0x1c4] sm:$0xf0]  ;;  %v9882_v16 = vor.u32 %v14542_v8, %v9881_v7  ;;  %v9857_v17 = vld [vmem:[#allocation7] sm:$0xf] }
  0x39   :  { %1988 = vmatpush.bf16.msra.mxu3 %v10530_v50  ;;  %v10265_v12 = vld [vmem:[#allocation7 + $0x330] sm:$0xf]  ;;  %v14638_v13 = vld [vmem:[#allocation7 + $0x344] sm:$0xf0]  ;;  %v14536_v18 = vld [vmem:[#allocation7 + $0x14] sm:$0xf0]  ;;  %v10074_v19 = vor.u32 %v14590_v11, %v10073_v9 }
  0x3a   :  { %1947 = vmatpush.bf16.msra.mxu0 %v9930_v56  ;;  %v10457_v14 = vld [vmem:[#allocation7 + $0x4b0] sm:$0xf]  ;;  %v14686_v15 = vld [vmem:[#allocation7 + $0x4c4] sm:$0xf0]  ;;  %v10266_v20 = vor.u32 %v14638_v13, %v10265_v12  ;;  %v10049_v21 = vld [vmem:[#allocation7 + $0x180] sm:$0xf]  ;;  %v9858_v31 = vor.u32 %v14536_v18, %v9857_v17 }
  0x3b   :  { %1961 = vmatpush.bf16.msra.mxu1 %v10122_v57  ;;  %v14584_v22 = vld [vmem:[#allocation7 + $0x194] sm:$0xf0]  ;;  %v10241_v23 = vld [vmem:[#allocation7 + $0x300] sm:$0xf]  ;;  %v10458_v24 = vor.u32 %v14686_v15, %v10457_v14  ;;  %v10793_v28 = vld [vmem:[#allocation7 + $0x750] sm:$0xf] }
  0x3c   :  { %1975 = vmatpush.bf16.msra.mxu2 %v10314_v58  ;;  %v14632_v25 = vld [vmem:[#allocation7 + $0x314] sm:$0xf0]  ;;  %v10433_v26 = vld [vmem:[#allocation7 + $0x480] sm:$0xf]  ;;  %v14770_v29 = vld [vmem:[#allocation7 + $0x764] sm:$0xf0]  ;;  %v10050_v35 = vor.u32 %v14584_v22, %v10049_v21 }
  0x3d   :  { %1989 = vmatpush.bf16.msra.mxu3 %v10506_v62  ;;  %v14680_v27 = vld [vmem:[#allocation7 + $0x494] sm:$0xf0]  ;;  %v10985_v30 = vld [vmem:[#allocation7 + $0x8d0] sm:$0xf]  ;;  %v14818_v32 = vld [vmem:[#allocation7 + $0x8e4] sm:$0xf0]  ;;  %v10242_v36 = vor.u32 %v14632_v25, %v10241_v23  ;;  %v10794_v40 = vor.u32 %v14770_v29, %v10793_v28 }
  0x3e   :  { %1948 = vmatpush.bf16.msra.mxu0 %v9906_v4  ;;  %v14575_v33 = vld [vmem:[#allocation7 + $0x154] sm:$0xf]  ;;  %v10027_v34 = vld [vmem:[#allocation7 + $0x168] sm:$0xf0]  ;;  %v10434_v39 = vor.u32 %v14680_v27, %v10433_v26  ;;  %v10769_v41 = vld [vmem:[#allocation7 + $0x720] sm:$0xf]  ;;  %v10986_v42 = vor.u32 %v14818_v32, %v10985_v30 }
  0x3f   :  { %1962 = vmatpush.bf16.msra.mxu1 %v10098_v5  ;;  %v14623_v37 = vld [vmem:[#allocation7 + $0x2d4] sm:$0xf]  ;;  %v10219_v38 = vld [vmem:[#allocation7 + $0x2e8] sm:$0xf0]  ;;  %v10030_v43 = vor.u32 %v14575_v33, %v10027_v34  ;;  %v14764_v44 = vld [vmem:[#allocation7 + $0x734] sm:$0xf0] }
  0x40   :  { %1976 = vmatpush.bf16.msra.mxu2 %v10290_v6  ;;  %v10961_v45 = vld [vmem:[#allocation7 + $0x8a0] sm:$0xf]  ;;  %v14812_v46 = vld [vmem:[#allocation7 + $0x8b4] sm:$0xf0]  ;;  %v10222_v47 = vor.u32 %v14623_v37, %v10219_v38  ;;  %v14569_v48 = vld [vmem:[#allocation7 + $0x124] sm:$0xf]  ;;  %v10770_v54 = vor.u32 %v14764_v44, %v10769_v41 }
  0x41   :  { %1990 = vmatpush.bf16.msra.mxu3 %v10482_v10  ;;  %v10003_v49 = vld [vmem:[#allocation7 + $0x138] sm:$0xf0]  ;;  %v14617_v50 = vld [vmem:[#allocation7 + $0x2a4] sm:$0xf]  ;;  %v9833_v52 = vld [vmem:[#allocation5] sm:$0xf]  ;;  %v10962_v58 = vor.u32 %v14812_v46, %v10961_v45 }
  0x42   :  { %1949 = vmatpush.bf16.msra.mxu0 %v9882_v16  ;;  %v10195_v51 = vld [vmem:[#allocation7 + $0x2b8] sm:$0xf0]  ;;  %v14530_v53 = vld [vmem:[#allocation5 + $0x14] sm:$0xf0]  ;;  %v10745_v55 = vld [vmem:[#allocation7 + $0x6f0] sm:$0xf]  ;;  %v10006_v59 = vor.u32 %v14569_v48, %v10003_v49 }
  0x43   :  { %1963 = vmatpush.bf16.msra.mxu1 %v10074_v19  ;;  %v14758_v56 = vld [vmem:[#allocation7 + $0x704] sm:$0xf0]  ;;  %v16121_v57 = vor.u32 %v14530_v53, %v9833_v52  ;;  %v10937_v60 = vld [vmem:[#allocation7 + $0x870] sm:$0xf]  ;;  %v14563_v62 = vld [vmem:[#allocation7 + $0xf4] sm:$0xf]  ;;  %v10198_v63 = vor.u32 %v14617_v50, %v10195_v51 }
  0x44   :  { %1977 = vmatpush.bf16.msra.mxu2 %v10266_v20  ;;  %v14806_v61 = vld [vmem:[#allocation7 + $0x884] sm:$0xf0]  ;;  %v9979_v0 = vld [vmem:[#allocation7 + $0x108] sm:$0xf0]  ;;  %v14527_v1 = vld [vmem:[#allocation5 + $0x4] sm:$0xf]  ;;  %v10746_v7 = vor.u32 %v14758_v56, %v10745_v55 }
  0x45   :  { %1991 = vmatpush.bf16.msra.mxu3 %v10458_v24  ;;  %v9835_v2 = vld [vmem:[#allocation5 + $0x18] sm:$0xf0]  ;;  %v14611_v3 = vld [vmem:[#allocation7 + $0x274] sm:$0xf]  ;;  %v10721_v5 = vld [vmem:[#allocation7 + $0x6c0] sm:$0xf]  ;;  %v10938_v11 = vor.u32 %v14806_v61, %v10937_v60  ;;  %v9982_v12 = vor.u32 %v14563_v62, %v9979_v0 }
  0x46   :  { %1950 = vmatpush.bf16.msra.mxu0 %v9858_v31  ;;  %v10171_v4 = vld [vmem:[#allocation7 + $0x288] sm:$0xf0]  ;;  %v16124_v6 = vor.u32 %v14527_v1, %v9835_v2  ;;  %v14752_v8 = vld [vmem:[#allocation7 + $0x6d4] sm:$0xf0]  ;;  %v10913_v9 = vld [vmem:[#allocation7 + $0x840] sm:$0xf] }
  0x47   :  { %1964 = vmatpush.bf16.msra.mxu1 %v10050_v35  ;;  %v14800_v10 = vld [vmem:[#allocation7 + $0x854] sm:$0xf0]  ;;  %v14557_v13 = vld [vmem:[#allocation7 + $0xc4] sm:$0xf]  ;;  %v9955_v14 = vld [vmem:[#allocation7 + $0xd8] sm:$0xf0]  ;;  %v10174_v16 = vor.u32 %v14611_v3, %v10171_v4  ;;  %v10722_v24 = vor.u32 %v14752_v8, %v10721_v5 }
  0x48   :  { %1978 = vmatpush.bf16.msra.mxu2 %v10242_v36  ;;  %v9841_v15 = vld [vmem:[#allocation5 + $0x8] sm:$0xf]  ;;  %v14531_v17 = vld [vmem:[#allocation5 + $0x1c] sm:$0xf0]  ;;  %v14528_v18 = vld [vmem:[#allocation5 + $0xc] sm:$0xf]  ;;  %v10914_v25 = vor.u32 %v14800_v10, %v10913_v9  ;;  %v9958_v26 = vor.u32 %v14557_v13, %v9955_v14 }
  0x49   :  { %1992 = vmatpush.bf16.msra.mxu3 %v10434_v39  ;;  %1951 = vmatmul.bf16.vlgmr.msra.gmra.mxu0 %v16121_v57  ;;  %v9843_v19 = vld [vmem:[#allocation5 + $0x20] sm:$0xf0]  ;;  %v14605_v20 = vld [vmem:[#allocation7 + $0x244] sm:$0xf]  ;;  %v10147_v21 = vld [vmem:[#allocation7 + $0x258] sm:$0xf0]  ;;  %v16127_v22 = vor.u32 %v14531_v17, %v9841_v15 }
  0x4a   :  { %1999 = vmatpush.bf16.msrb.mxu0 %v10794_v40  ;;  %1965 = vmatmul.bf16.vlgmr.msra.gmra.mxu1 %v16124_v6  ;;  %v16129_v23 = vor.u32 %v14528_v18, %v9843_v19  ;;  %v10697_v27 = vld [vmem:[#allocation7 + $0x690] sm:$0xf]  ;;  %v14746_v28 = vld [vmem:[#allocation7 + $0x6a4] sm:$0xf0]  ;;  %v10150_v30 = vor.u32 %v14605_v20, %v10147_v21  ;;  %v14551_v32 = vld [vmem:[#allocation7 + $0x94] sm:$0xf] }
  0x4b   :  { %2013 = vmatpush.bf16.msrb.mxu1 %v10986_v42  ;;  %v10889_v29 = vld [vmem:[#allocation7 + $0x810] sm:$0xf]  ;;  %v14794_v31 = vld [vmem:[#allocation7 + $0x824] sm:$0xf0]  ;;  %v9931_v33 = vld [vmem:[#allocation7 + $0xa8] sm:$0xf0]  ;;  %1979 = vmatmul.bf16.vlgmr.msra.gmra.mxu2 %v16127_v22  ;;  %v10698_v36 = vor.u32 %v14746_v28, %v10697_v27 }
  0x4c   :  { %2027 = vmatpush.bf16.msrb.mxu2 %v10030_v43  ;;  %v14599_v34 = vld [vmem:[#allocation7 + $0x214] sm:$0xf]  ;;  %v10123_v35 = vld [vmem:[#allocation7 + $0x228] sm:$0xf0]  ;;  %1993 = vmatmul.bf16.vlgmr.msra.gmra.mxu3 %v16129_v23  ;;  %v10890_v37 = vor.u32 %v14794_v31, %v10889_v29  ;;  %v9934_v38 = vor.u32 %v14551_v32, %v9931_v33  ;;  %v10673_v39 = vld [vmem:[#allocation7 + $0x660] sm:$0xf] }
  0x4d   :  { %2041 = vmatpush.bf16.msrb.mxu3 %v10222_v47  ;;  %v14740_v40 = vld [vmem:[#allocation7 + $0x674] sm:$0xf0]  ;;  %v10865_v41 = vld [vmem:[#allocation7 + $0x7e0] sm:$0xf]  ;;  %v10126_v42 = vor.u32 %v14599_v34, %v10123_v35  ;;  %v14545_v44 = vld [vmem:[#allocation7 + $0x64] sm:$0xf] }
  0x4e   :  { %2000 = vmatpush.bf16.msrb.mxu0 %v10770_v54  ;;  %v14788_v43 = vld [vmem:[#allocation7 + $0x7f4] sm:$0xf0]  ;;  %v9907_v45 = vld [vmem:[#allocation7 + $0x78] sm:$0xf0]  ;;  %v14593_v46 = vld [vmem:[#allocation7 + $0x1e4] sm:$0xf]  ;;  %v10674_v48 = vor.u32 %v14740_v40, %v10673_v39 }
  0x4f   :  { %2014 = vmatpush.bf16.msrb.mxu1 %v10962_v58  ;;  %v10099_v47 = vld [vmem:[#allocation7 + $0x1f8] sm:$0xf0]  ;;  %v10866_v49 = vor.u32 %v14788_v43, %v10865_v41  ;;  %v9910_v50 = vor.u32 %v14545_v44, %v9907_v45  ;;  %v10649_v51 = vld [vmem:[#allocation7 + $0x630] sm:$0xf]  ;;  %v14734_v52 = vld [vmem:[#allocation7 + $0x644] sm:$0xf0] }
  0x50   :  { %2028 = vmatpush.bf16.msrb.mxu2 %v10006_v59  ;;  %v10841_v53 = vld [vmem:[#allocation7 + $0x7b0] sm:$0xf]  ;;  %v10102_v54 = vor.u32 %v14593_v46, %v10099_v47  ;;  %v14782_v55 = vld [vmem:[#allocation7 + $0x7c4] sm:$0xf0]  ;;  %v14539_v56 = vld [vmem:[#allocation7 + $0x34] sm:$0xf]  ;;  %v10650_v61 = vor.u32 %v14734_v52, %v10649_v51 }
  0x51   :  { %2042 = vmatpush.bf16.msrb.mxu3 %v10198_v63  ;;  %v9883_v58 = vld [vmem:[#allocation7 + $0x48] sm:$0xf0]  ;;  %v14587_v59 = vld [vmem:[#allocation7 + $0x1b4] sm:$0xf]  ;;  %v10625_v62 = vld [vmem:[#allocation7 + $0x600] sm:$0xf]  ;;  %v10842_v1 = vor.u32 %v14782_v55, %v10841_v53 }
  0x52   :  { %2001 = vmatpush.bf16.msrb.mxu0 %v10746_v7  ;;  %v10075_v60 = vld [vmem:[#allocation7 + $0x1c8] sm:$0xf0]  ;;  %v14728_v63 = vld [vmem:[#allocation7 + $0x614] sm:$0xf0]  ;;  %v10817_v0 = vld [vmem:[#allocation7 + $0x780] sm:$0xf]  ;;  %v9886_v2 = vor.u32 %v14539_v56, %v9883_v58 }
  0x53   :  { %2015 = vmatpush.bf16.msrb.mxu1 %v10938_v11  ;;  %v14776_v3 = vld [vmem:[#allocation7 + $0x794] sm:$0xf0]  ;;  %v14533_v4 = vld [vmem:[#allocation7 + $0x4] sm:$0xf]  ;;  %v9859_v5 = vld [vmem:[#allocation7 + $0x18] sm:$0xf0]  ;;  %v10078_v7 = vor.u32 %v14587_v59, %v10075_v60  ;;  %v10626_v14 = vor.u32 %v14728_v63, %v10625_v62 }
  0x54   :  { %2029 = vmatpush.bf16.msrb.mxu2 %v9982_v12  ;;  %v14581_v8 = vld [vmem:[#allocation7 + $0x184] sm:$0xf]  ;;  %v10051_v9 = vld [vmem:[#allocation7 + $0x198] sm:$0xf0]  ;;  %v14671_v10 = vld [vmem:[#allocation7 + $0x454] sm:$0xf]  ;;  %v10818_v18 = vor.u32 %v14776_v3, %v10817_v0  ;;  %v9862_v19 = vor.u32 %v14533_v4, %v9859_v5 }
  0x55   :  { %2043 = vmatpush.bf16.msrb.mxu3 %v10174_v16  ;;  %v10411_v11 = vld [vmem:[#allocation7 + $0x468] sm:$0xf0]  ;;  %v14719_v12 = vld [vmem:[#allocation7 + $0x5d4] sm:$0xf]  ;;  %v9849_v21 = vld [vmem:[#allocation5 + $0x10] sm:$0xf] }
  0x56   :  { %2002 = vmatpush.bf16.msrb.mxu0 %v10722_v24  ;;  %v10603_v13 = vld [vmem:[#allocation7 + $0x5e8] sm:$0xf0]  ;;  %v14767_v15 = vld [vmem:[#allocation7 + $0x754] sm:$0xf]  ;;  %v14532_v24 = vld [vmem:[#allocation5 + $0x24] sm:$0xf0] }
  0x57   :  { %2016 = vmatpush.bf16.msrb.mxu1 %v10914_v25  ;;  %v10795_v16 = vld [vmem:[#allocation7 + $0x768] sm:$0xf0]  ;;  %v14815_v17 = vld [vmem:[#allocation7 + $0x8d4] sm:$0xf]  ;;  %v10054_v25 = vor.u32 %v14581_v8, %v10051_v9  ;;  %v14529_v27 = vld [vmem:[#allocation5 + $0x14] sm:$0xf]  ;;  %v10606_v29 = vor.u32 %v14719_v12, %v10603_v13  ;;  %v16133_v35 = vor.u32 %v14532_v24, %v9849_v21 }
  0x58   :  { %2030 = vmatpush.bf16.msrb.mxu2 %v9958_v26  ;;  %v10987_v20 = vld [vmem:[#allocation7 + $0x8e8] sm:$0xf0]  ;;  %v10414_v26 = vor.u32 %v14671_v10, %v10411_v11  ;;  %v9851_v28 = vld [vmem:[#allocation5 + $0x28] sm:$0xf0]  ;;  %v14665_v31 = vld [vmem:[#allocation7 + $0x424] sm:$0xf] }
  0x59   :  { %2044 = vmatpush.bf16.msrb.mxu3 %v10150_v30  ;;  %v10798_v30 = vor.u32 %v14767_v15, %v10795_v16  ;;  %v10387_v32 = vld [vmem:[#allocation7 + $0x438] sm:$0xf0]  ;;  %v14713_v33 = vld [vmem:[#allocation7 + $0x5a4] sm:$0xf]  ;;  %v10990_v34 = vor.u32 %v14815_v17, %v10987_v20  ;;  %v16135_v39 = vor.u32 %v14529_v27, %v9851_v28  ;;  %v14659_v45 = vld [vmem:[#allocation7 + $0x3f4] sm:$0xf] }
  0x5a   :  { %2003 = vmatpush.bf16.msrb.mxu0 %v10698_v36  ;;  %v10579_v36 = vld [vmem:[#allocation7 + $0x5b8] sm:$0xf0]  ;;  %v14809_v40 = vld [vmem:[#allocation7 + $0x8a4] sm:$0xf]  ;;  %v10363_v46 = vld [vmem:[#allocation7 + $0x408] sm:$0xf0] }
  0x5b   :  { %2017 = vmatpush.bf16.msrb.mxu1 %v10890_v37  ;;  %v14761_v37 = vld [vmem:[#allocation7 + $0x724] sm:$0xf]  ;;  %v10963_v41 = vld [vmem:[#allocation7 + $0x8b8] sm:$0xf0]  ;;  %v10582_v43 = vor.u32 %v14713_v33, %v10579_v36  ;;  %v14707_v47 = vld [vmem:[#allocation7 + $0x574] sm:$0xf] }
  0x5c   :  { %2031 = vmatpush.bf16.msrb.mxu2 %v9934_v38  ;;  %v10771_v38 = vld [vmem:[#allocation7 + $0x738] sm:$0xf0]  ;;  %v10747_v51 = vld [vmem:[#allocation7 + $0x708] sm:$0xf0]  ;;  %v14803_v52 = vld [vmem:[#allocation7 + $0x874] sm:$0xf] }
  0x5d   :  { %2045 = vmatpush.bf16.msrb.mxu3 %v10126_v42  ;;  %v10390_v42 = vor.u32 %v14665_v31, %v10387_v32  ;;  %v10774_v44 = vor.u32 %v14761_v37, %v10771_v38  ;;  %v10939_v53 = vld [vmem:[#allocation7 + $0x888] sm:$0xf0]  ;;  %v14653_v58 = vld [vmem:[#allocation7 + $0x3c4] sm:$0xf]  ;;  %v10339_v59 = vld [vmem:[#allocation7 + $0x3d8] sm:$0xf0] }
  0x5e   :  { %2004 = vmatpush.bf16.msrb.mxu0 %v10674_v48  ;;  %v10966_v48 = vor.u32 %v14809_v40, %v10963_v41  ;;  %v14701_v60 = vld [vmem:[#allocation7 + $0x544] sm:$0xf]  ;;  %v10531_v62 = vld [vmem:[#allocation7 + $0x558] sm:$0xf0]  ;;  %v10342_v3 = vor.u32 %v14653_v58, %v10339_v59  ;;  %v10315_v8 = vld [vmem:[#allocation7 + $0x3a8] sm:$0xf0] }
  0x5f   :  { %2018 = vmatpush.bf16.msrb.mxu1 %v10866_v49  ;;  %v10555_v49 = vld [vmem:[#allocation7 + $0x588] sm:$0xf0]  ;;  %v14749_v63 = vld [vmem:[#allocation7 + $0x6c4] sm:$0xf]  ;;  %v10723_v0 = vld [vmem:[#allocation7 + $0x6d8] sm:$0xf0]  ;;  %v10534_v4 = vor.u32 %v14701_v60, %v10531_v62 }
  0x60   :  { %2032 = vmatpush.bf16.msrb.mxu2 %v9910_v50  ;;  %v14755_v50 = vld [vmem:[#allocation7 + $0x6f4] sm:$0xf]  ;;  %v10558_v55 = vor.u32 %v14707_v47, %v10555_v49  ;;  %v10726_v5 = vor.u32 %v14749_v63, %v10723_v0  ;;  %v10507_v11 = vld [vmem:[#allocation7 + $0x528] sm:$0xf0]  ;;  %v10291_v20 = vld [vmem:[#allocation7 + $0x378] sm:$0xf0] }
  0x61   :  { %2046 = vmatpush.bf16.msrb.mxu3 %v10102_v54  ;;  %v10366_v54 = vor.u32 %v14659_v45, %v10363_v46  ;;  %v10750_v56 = vor.u32 %v14755_v50, %v10747_v51  ;;  %v14695_v9 = vld [vmem:[#allocation7 + $0x514] sm:$0xf]  ;;  %v10699_v13 = vld [vmem:[#allocation7 + $0x6a8] sm:$0xf0]  ;;  %v14689_v21 = vld [vmem:[#allocation7 + $0x4e4] sm:$0xf] }
  0x62   :  { %2005 = vmatpush.bf16.msrb.mxu0 %v10650_v61  ;;  %v10942_v61 = vor.u32 %v14803_v52, %v10939_v53  ;;  %v14743_v12 = vld [vmem:[#allocation7 + $0x694] sm:$0xf]  ;;  %v10891_v15 = vld [vmem:[#allocation7 + $0x828] sm:$0xf0]  ;;  %v10510_v17 = vor.u32 %v14695_v9, %v10507_v11  ;;  %v10675_v27 = vld [vmem:[#allocation7 + $0x678] sm:$0xf0] }
  0x63   :  { %2019 = vmatpush.bf16.msrb.mxu1 %v10842_v1  ;;  %v14797_v1 = vld [vmem:[#allocation7 + $0x844] sm:$0xf]  ;;  %v14635_v33 = vld [vmem:[#allocation7 + $0x334] sm:$0xf]  ;;  %v10459_v38 = vld [vmem:[#allocation7 + $0x4c8] sm:$0xf0] }
  0x64   :  { %2033 = vmatpush.bf16.msrb.mxu2 %v9886_v2  ;;  %v10915_v2 = vld [vmem:[#allocation7 + $0x858] sm:$0xf0]  ;;  %v14785_v28 = vld [vmem:[#allocation7 + $0x7e4] sm:$0xf]  ;;  %v14683_v36 = vld [vmem:[#allocation7 + $0x4b4] sm:$0xf] }
  0x65   :  { %2047 = vmatpush.bf16.msrb.mxu3 %v10078_v7  ;;  %v14647_v7 = vld [vmem:[#allocation7 + $0x394] sm:$0xf]  ;;  %v10918_v10 = vor.u32 %v14797_v1, %v10915_v2  ;;  %v10651_v41 = vld [vmem:[#allocation7 + $0x648] sm:$0xf0]  ;;  %v14629_v45 = vld [vmem:[#allocation7 + $0x304] sm:$0xf]  ;;  %v10462_v47 = vor.u32 %v14683_v36, %v10459_v38 }
  0x66   :  { %2006 = vmatpush.bf16.msrb.mxu0 %v10626_v14  ;;  %v14791_v14 = vld [vmem:[#allocation7 + $0x814] sm:$0xf]  ;;  %v10318_v16 = vor.u32 %v14647_v7, %v10315_v8  ;;  %v10243_v46 = vld [vmem:[#allocation7 + $0x318] sm:$0xf0]  ;;  %v14677_v49 = vld [vmem:[#allocation7 + $0x484] sm:$0xf] }
  0x67   :  { %2020 = vmatpush.bf16.msrb.mxu1 %v10818_v18  ;;  %v10702_v18 = vor.u32 %v14743_v12, %v10699_v13  ;;  %v10894_v24 = vor.u32 %v14791_v14, %v10891_v15  ;;  %v14731_v40 = vld [vmem:[#allocation7 + $0x634] sm:$0xf]  ;;  %v10435_v50 = vld [vmem:[#allocation7 + $0x498] sm:$0xf0]  ;;  %v14725_v51 = vld [vmem:[#allocation7 + $0x604] sm:$0xf]  ;;  %v10246_v60 = vor.u32 %v14629_v45, %v10243_v46 }
  0x68   :  { %2034 = vmatpush.bf16.msrb.mxu2 %v9862_v19  ;;  %v14641_v19 = vld [vmem:[#allocation7 + $0x364] sm:$0xf]  ;;  %v10627_v53 = vld [vmem:[#allocation7 + $0x618] sm:$0xf0]  ;;  %v14579_v58 = vld [vmem:[#allocation7 + $0x16c] sm:$0xf0]  ;;  %v10438_v0 = vor.u32 %v14677_v49, %v10435_v50 }
  0x69   :  { %2048 = vmatpush.bf16.msrb.mxu3 %v10054_v25  ;;  %2007 = vmatmul.bf16.vlgmr.msrb.gmra.mxu0 %v16133_v35  ;;  %v10483_v25 = vld [vmem:[#allocation7 + $0x4f8] sm:$0xf0]  ;;  %v10225_v59 = vld [vmem:[#allocation7 + $0x2d8] sm:$0xf]  ;;  %v14675_v63 = vld [vmem:[#allocation7 + $0x46c] sm:$0xf0]  ;;  %v10630_v1 = vor.u32 %v14725_v51, %v10627_v53 }
  0x6a   :  { %2055 = vmatpush.bf16.msra.mxu0 %v10414_v26  ;;  %2021 = vmatmul.bf16.vlgmr.msrb.gmra.mxu1 %v16135_v39  ;;  %v14737_v26 = vld [vmem:[#allocation7 + $0x664] sm:$0xf]  ;;  %v10486_v31 = vor.u32 %v14689_v21, %v10483_v25  ;;  %v10417_v62 = vld [vmem:[#allocation7 + $0x458] sm:$0xf]  ;;  %v10009_v9 = vld [vmem:[#allocation7 + $0x128] sm:$0xf] }
  0x6b   :  { %2069 = vmatpush.bf16.msra.mxu1 %v10606_v29  ;;  %2035 = vmatmul.bf16.vlgmr.msrb.gmra.mxu2 %v16121_v57  ;;  %v10867_v29 = vld [vmem:[#allocation7 + $0x7f8] sm:$0xf0]  ;;  %v10678_v32 = vor.u32 %v14737_v26, %v10675_v27  ;;  %v10609_v2 = vld [vmem:[#allocation7 + $0x5d8] sm:$0xf]  ;;  %v10418_v8 = vor.u32 %v14675_v63, %v10417_v62  ;;  %v10201_v11 = vld [vmem:[#allocation7 + $0x2a8] sm:$0xf] }
  0x6c   :  { %2083 = vmatpush.bf16.msra.mxu2 %v10798_v30  ;;  %2049 = vmatmul.bf16.vlgmr.msrb.gmra.mxu3 %v16124_v6  ;;  %v10294_v30 = vor.u32 %v14641_v19, %v10291_v20  ;;  %v10870_v37 = vor.u32 %v14785_v28, %v10867_v29  ;;  %v14621_v13 = vld [vmem:[#allocation7 + $0x2bc] sm:$0xf0]  ;;  %v10393_v14 = vld [vmem:[#allocation7 + $0x428] sm:$0xf]  ;;  %v9985_v21 = vld [vmem:[#allocation7 + $0xf8] sm:$0xf] }
  0x6d   :  { %2097 = vmatpush.bf16.msra.mxu3 %v10990_v34  ;;  %v10267_v34 = vld [vmem:[#allocation7 + $0x348] sm:$0xf0]  ;;  %v14669_v15 = vld [vmem:[#allocation7 + $0x43c] sm:$0xf0]  ;;  %v10202_v19 = vor.u32 %v14621_v13, %v10201_v11  ;;  %v10177_v25 = vld [vmem:[#allocation7 + $0x278] sm:$0xf] }
  0x6e   :  { %2056 = vmatpush.bf16.msra.mxu0 %v10390_v42  ;;  %v14779_v42 = vld [vmem:[#allocation7 + $0x7b4] sm:$0xf]  ;;  %v10394_v20 = vor.u32 %v14669_v15, %v10393_v14  ;;  %v14615_v27 = vld [vmem:[#allocation7 + $0x28c] sm:$0xf0]  ;;  %v10369_v28 = vld [vmem:[#allocation7 + $0x3f8] sm:$0xf] }
  0x6f   :  { %2070 = vmatpush.bf16.msra.mxu1 %v10582_v43  ;;  %v10843_v43 = vld [vmem:[#allocation7 + $0x7c8] sm:$0xf0]  ;;  %v14663_v29 = vld [vmem:[#allocation7 + $0x40c] sm:$0xf0]  ;;  %v9961_v36 = vld [vmem:[#allocation7 + $0xc8] sm:$0xf] }
  0x70   :  { %2084 = vmatpush.bf16.msra.mxu2 %v10774_v44  ;;  %v10270_v44 = vor.u32 %v14635_v33, %v10267_v34  ;;  %v10846_v52 = vor.u32 %v14779_v42, %v10843_v43  ;;  %v10178_v33 = vor.u32 %v14615_v27, %v10177_v25  ;;  %v10370_v34 = vor.u32 %v14663_v29, %v10369_v28  ;;  %v10153_v38 = vld [vmem:[#allocation7 + $0x248] sm:$0xf]  ;;  %v14657_v43 = vld [vmem:[#allocation7 + $0x3dc] sm:$0xf0]  ;;  %v9937_v49 = vld [vmem:[#allocation7 + $0x98] sm:$0xf] }
  0x71   :  { %2098 = vmatpush.bf16.msra.mxu3 %v10966_v48  ;;  %v10654_v48 = vor.u32 %v14731_v40, %v10651_v41  ;;  %v14609_v41 = vld [vmem:[#allocation7 + $0x25c] sm:$0xf0]  ;;  %v10345_v42 = vld [vmem:[#allocation7 + $0x3c8] sm:$0xf]  ;;  %v14555_v50 = vld [vmem:[#allocation7 + $0xac] sm:$0xf0] }
  0x72   :  { %2057 = vmatpush.bf16.msra.mxu0 %v10366_v54  ;;  %v14773_v54 = vld [vmem:[#allocation7 + $0x784] sm:$0xf]  ;;  %v14705_v45 = vld [vmem:[#allocation7 + $0x55c] sm:$0xf0]  ;;  %v10129_v51 = vld [vmem:[#allocation7 + $0x218] sm:$0xf] }
  0x73   :  { %2071 = vmatpush.bf16.msra.mxu1 %v10558_v55  ;;  %v10819_v55 = vld [vmem:[#allocation7 + $0x798] sm:$0xf0]  ;;  %v14603_v53 = vld [vmem:[#allocation7 + $0x22c] sm:$0xf0]  ;;  %v9913_v62 = vld [vmem:[#allocation7 + $0x68] sm:$0xf] }
  0x74   :  { %2085 = vmatpush.bf16.msra.mxu2 %v10750_v56  ;;  %v10033_v56 = vld [vmem:[#allocation7 + $0x158] sm:$0xf]  ;;  %v14549_v63 = vld [vmem:[#allocation7 + $0x7c] sm:$0xf0]  ;;  %v14591_v15 = vld [vmem:[#allocation7 + $0x1cc] sm:$0xf0] }
  0x75   :  { %2099 = vmatpush.bf16.msra.mxu3 %v10942_v61  ;;  %v14627_v61 = vld [vmem:[#allocation7 + $0x2ec] sm:$0xf0]  ;;  %v9889_v11 = vld [vmem:[#allocation7 + $0x38] sm:$0xf]  ;;  %v10057_v27 = vld [vmem:[#allocation7 + $0x188] sm:$0xf] }
  0x76   :  { %2058 = vmatpush.bf16.msra.mxu0 %v10342_v3  ;;  %v14723_v3 = vld [vmem:[#allocation7 + $0x5ec] sm:$0xf0]  ;;  %v10226_v7 = vor.u32 %v14627_v61, %v10225_v59  ;;  %v9938_v59 = vor.u32 %v14555_v50, %v9937_v49  ;;  %v10081_v13 = vld [vmem:[#allocation7 + $0x1b8] sm:$0xf]  ;;  %v14585_v28 = vld [vmem:[#allocation7 + $0x19c] sm:$0xf0] }
  0x77   :  { %2072 = vmatpush.bf16.msra.mxu1 %v10534_v4  ;;  %v10822_v4 = vor.u32 %v14773_v54, %v10819_v55  ;;  %v10610_v12 = vor.u32 %v14723_v3, %v10609_v2  ;;  %v10321_v54 = vld [vmem:[#allocation7 + $0x398] sm:$0xf]  ;;  %v14651_v55 = vld [vmem:[#allocation7 + $0x3ac] sm:$0xf0]  ;;  %v14597_v2 = vld [vmem:[#allocation7 + $0x1fc] sm:$0xf0]  ;;  %v10082_v25 = vor.u32 %v14591_v15, %v10081_v13 }
  0x78   :  { %2086 = vmatpush.bf16.msra.mxu2 %v10726_v5  ;;  %v10034_v5 = vor.u32 %v14579_v58, %v10033_v56  ;;  %v10513_v56 = vld [vmem:[#allocation7 + $0x518] sm:$0xf]  ;;  %v14699_v58 = vld [vmem:[#allocation7 + $0x52c] sm:$0xf0]  ;;  %v10322_v61 = vor.u32 %v14651_v55, %v10321_v54  ;;  %v10297_v3 = vld [vmem:[#allocation7 + $0x368] sm:$0xf] }
  0x79   :  { %2100 = vmatpush.bf16.msra.mxu3 %v10918_v10  ;;  %v14573_v10 = vld [vmem:[#allocation7 + $0x13c] sm:$0xf0]  ;;  %v10249_v29 = vld [vmem:[#allocation7 + $0x308] sm:$0xf]  ;;  %s16039_s6 = smov [#allocation16]   ;;  %s9814_s29 = sshll.u32 %s17213_s8, 4  ;;  %s9815_s29 = int_to_ptr.hbm [resolvable:$true] %s9814_s29 }
  0x7a   :  { %2059 = vmatpush.bf16.msra.mxu0 %v10318_v16  ;;  %v10585_v16 = vld [vmem:[#allocation7 + $0x5a8] sm:$0xf]  ;;  %v14813_v55 = vld [vmem:[#allocation7 + $0x8bc] sm:$0xf0]  ;;  %s9812_s7 = sshll.u32 %s16039_s6, 4  ;;  %s9813_s7 = int_to_ptr.vmem [resolvable:$true] %s9812_s7 }
  0x7b   :  { %2073 = vmatpush.bf16.msra.mxu1 %v10510_v17  ;;  %v14717_v17 = vld [vmem:[#allocation7 + $0x5bc] sm:$0xf0]  ;;  %v10729_v13 = vld [vmem:[#allocation7 + $0x6c8] sm:$0xf] }
  0x7c   :  { %2087 = vmatpush.bf16.msra.mxu2 %v10702_v18  ;;  %v10010_v18 = vor.u32 %v14573_v10, %v10009_v9  ;;  %v10586_v26 = vor.u32 %v14717_v17, %v10585_v16  ;;  %v10273_v16 = vld [vmem:[#allocation7 + $0x338] sm:$0xf]  ;;  %v14639_v17 = vld [vmem:[#allocation7 + $0x34c] sm:$0xf0]  ;;  %v10921_v15 = vld [vmem:[#allocation7 + $0x848] sm:$0xf] }
  0x7d   :  { %2101 = vmatpush.bf16.msra.mxu3 %v10894_v24  ;;  %v14567_v24 = vld [vmem:[#allocation7 + $0x10c] sm:$0xf0] }
  0x7e   :  { %2060 = vmatpush.bf16.msra.mxu0 %v10294_v30  ;;  %v10561_v30 = vld [vmem:[#allocation7 + $0x578] sm:$0xf] }
  0x7f   :  { %2074 = vmatpush.bf16.msra.mxu1 %v10486_v31  ;;  %v14711_v31 = vld [vmem:[#allocation7 + $0x58c] sm:$0xf0] }
  0x80   :  { %2088 = vmatpush.bf16.msra.mxu2 %v10678_v32  ;;  %v9986_v32 = vor.u32 %v14567_v24, %v9985_v21  ;;  %v10562_v40 = vor.u32 %v14711_v31, %v10561_v30  ;;  %v9865_v21 = vld [vmem:[#allocation7 + $0x8] sm:$0xf]  ;;  %v14537_v24 = vld [vmem:[#allocation7 + $0x1c] sm:$0xf0] }
  0x81   :  { %2102 = vmatpush.bf16.msra.mxu3 %v10870_v37  ;;  %v14561_v37 = vld [vmem:[#allocation7 + $0xdc] sm:$0xf0] }
  0x82   :  { %2061 = vmatpush.bf16.msra.mxu0 %v10270_v44  ;;  %v10537_v44 = vld [vmem:[#allocation7 + $0x548] sm:$0xf]  ;;  %v9962_v46 = vor.u32 %v14561_v37, %v9961_v36  ;;  %v14633_v31 = vld [vmem:[#allocation7 + $0x31c] sm:$0xf0]  ;;  %v14771_v36 = vld [vmem:[#allocation7 + $0x76c] sm:$0xf0] }
  0x83   :  { %2075 = vmatpush.bf16.msra.mxu1 %v10462_v47  ;;  %v10154_v47 = vor.u32 %v14609_v41, %v10153_v38  ;;  %v10993_v37 = vld [vmem:[#allocation7 + $0x8d8] sm:$0xf]  ;;  %v9866_v38 = vor.u32 %v14537_v24, %v9865_v21  ;;  %v14576_v41 = vld [vmem:[#allocation7 + $0x15c] sm:$0xf]  ;;  %v10155_v21 = vld [vmem:[#allocation7 + $0x260] sm:$0xf0] }
  0x84   :  { %2089 = vmatpush.bf16.msra.mxu2 %v10654_v48  ;;  %v10346_v48 = vor.u32 %v14657_v43, %v10345_v42  ;;  %v10035_v42 = vld [vmem:[#allocation7 + $0x170] sm:$0xf0]  ;;  %v10058_v43 = vor.u32 %v14585_v28, %v10057_v27  ;;  %v10705_v27 = vld [vmem:[#allocation7 + $0x698] sm:$0xf]  ;;  %v14747_v28 = vld [vmem:[#allocation7 + $0x6ac] sm:$0xf0] }
  0x85   :  { %2103 = vmatpush.bf16.msra.mxu3 %v10846_v52  ;;  %v10538_v52 = vor.u32 %v14705_v45, %v10537_v44  ;;  %v10250_v44 = vor.u32 %v14633_v31, %v10249_v29  ;;  %v14624_v45 = vld [vmem:[#allocation7 + $0x2dc] sm:$0xf]  ;;  %v10038_v50 = vor.u32 %v14576_v41, %v10035_v42  ;;  %v10897_v29 = vld [vmem:[#allocation7 + $0x818] sm:$0xf]  ;;  %v14795_v31 = vld [vmem:[#allocation7 + $0x82c] sm:$0xf0] }
  0x86   :  { %2062 = vmatpush.bf16.msra.mxu0 %v10246_v60  ;;  %v10130_v60 = vor.u32 %v14603_v53, %v10129_v51  ;;  %v10777_v51 = vld [vmem:[#allocation7 + $0x728] sm:$0xf]  ;;  %v14741_v42 = vld [vmem:[#allocation7 + $0x67c] sm:$0xf0] }
  0x87   :  { %2076 = vmatpush.bf16.msra.mxu1 %v10438_v0  ;;  %v10105_v0 = vld [vmem:[#allocation7 + $0x1e8] sm:$0xf] }
  0x88   :  { %2090 = vmatpush.bf16.msra.mxu2 %v10630_v1  ;;  %v10514_v1 = vor.u32 %v14699_v58, %v10513_v56  ;;  %v10106_v9 = vor.u32 %v14597_v2, %v10105_v0  ;;  %v10969_v53 = vld [vmem:[#allocation7 + $0x8a8] sm:$0xf]  ;;  %v14570_v56 = vld [vmem:[#allocation7 + $0x12c] sm:$0xf]  ;;  %v10011_v58 = vld [vmem:[#allocation7 + $0x140] sm:$0xf0] }
  0x89   :  { %2104 = vmatpush.bf16.msra.mxu3 %v10822_v4  ;;  %2063 = vmatmul.bf16.vlgmr.msra.gmra.mxu0 %v16127_v22  ;;  %v14645_v4 = vld [vmem:[#allocation7 + $0x37c] sm:$0xf0]  ;;  %v10753_v0 = vld [vmem:[#allocation7 + $0x6f8] sm:$0xf]  ;;  %v10681_v41 = vld [vmem:[#allocation7 + $0x668] sm:$0xf] }
  0x8a   :  { %2111 = vmatpush.bf16.msrb.mxu0 %v10034_v5  ;;  %2077 = vmatmul.bf16.vlgmr.msra.gmra.mxu1 %v16129_v23  ;;  %v10489_v5 = vld [vmem:[#allocation7 + $0x4e8] sm:$0xf]  ;;  %v10298_v10 = vor.u32 %v14645_v4, %v10297_v3  ;;  %v10945_v2 = vld [vmem:[#allocation7 + $0x878] sm:$0xf]  ;;  %v14807_v4 = vld [vmem:[#allocation7 + $0x88c] sm:$0xf0] }
  0x8b   :  { %2125 = vmatpush.bf16.msrb.mxu1 %v10226_v7  ;;  %2091 = vmatmul.bf16.vlgmr.msra.gmra.mxu2 %v16133_v35  ;;  %v14693_v7 = vld [vmem:[#allocation7 + $0x4fc] sm:$0xf0] }
  0x8c   :  { %2139 = vmatpush.bf16.msrb.mxu2 %v10418_v8  ;;  %2105 = vmatmul.bf16.vlgmr.msra.gmra.mxu3 %v16135_v39  ;;  %v9914_v8 = vor.u32 %v14549_v63, %v9913_v62  ;;  %v10490_v14 = vor.u32 %v14693_v7, %v10489_v5  ;;  %v10970_v62 = vor.u32 %v14813_v55, %v10969_v53  ;;  %v14564_v5 = vld [vmem:[#allocation7 + $0xfc] sm:$0xf]  ;;  %v9987_v7 = vld [vmem:[#allocation7 + $0x110] sm:$0xf0]  ;;  %v10657_v53 = vld [vmem:[#allocation7 + $0x638] sm:$0xf] }
  0x8d   :  { %2153 = vmatpush.bf16.msrb.mxu3 %v10610_v12  ;;  %v14543_v12 = vld [vmem:[#allocation7 + $0x4c] sm:$0xf0]  ;;  %v10014_v63 = vor.u32 %v14570_v56, %v10011_v58  ;;  %v10849_v55 = vld [vmem:[#allocation7 + $0x7b8] sm:$0xf] }
  0x8e   :  { %2112 = vmatpush.bf16.msrb.mxu0 %v10010_v18  ;;  %v10465_v18 = vld [vmem:[#allocation7 + $0x4b8] sm:$0xf]  ;;  %v14783_v58 = vld [vmem:[#allocation7 + $0x7cc] sm:$0xf0] }
  0x8f   :  { %2126 = vmatpush.bf16.msrb.mxu1 %v10202_v19  ;;  %v14687_v19 = vld [vmem:[#allocation7 + $0x4cc] sm:$0xf0] }
  0x90   :  { %2140 = vmatpush.bf16.msrb.mxu2 %v10394_v20  ;;  %v9890_v20 = vor.u32 %v14543_v12, %v9889_v11  ;;  %v10466_v30 = vor.u32 %v14687_v19, %v10465_v18  ;;  %v10946_v11 = vor.u32 %v14807_v4, %v10945_v2  ;;  %v9990_v12 = vor.u32 %v14564_v5, %v9987_v7  ;;  %v14558_v18 = vld [vmem:[#allocation7 + $0xcc] sm:$0xf]  ;;  %v9963_v19 = vld [vmem:[#allocation7 + $0xe0] sm:$0xf0]  ;;  %v10825_v4 = vld [vmem:[#allocation7 + $0x788] sm:$0xf] }
  0x91   :  { %2154 = vmatpush.bf16.msrb.mxu3 %v10586_v26  ;;  %v10274_v26 = vor.u32 %v14639_v17, %v10273_v16  ;;  %v14801_v17 = vld [vmem:[#allocation7 + $0x85c] sm:$0xf0]  ;;  %v10850_v2 = vor.u32 %v14783_v58, %v10849_v55  ;;  %v14534_v7 = vld [vmem:[#allocation7 + $0xc] sm:$0xf] }
  0x92   :  { %2113 = vmatpush.bf16.msrb.mxu0 %v9986_v32  ;;  %v10441_v32 = vld [vmem:[#allocation7 + $0x488] sm:$0xf]  ;;  %v14777_v5 = vld [vmem:[#allocation7 + $0x79c] sm:$0xf0]  ;;  %v14654_v58 = vld [vmem:[#allocation7 + $0x3cc] sm:$0xf] }
  0x93   :  { %2127 = vmatpush.bf16.msrb.mxu1 %v10178_v33  ;;  %v14681_v33 = vld [vmem:[#allocation7 + $0x49c] sm:$0xf0] }
  0x94   :  { %2141 = vmatpush.bf16.msrb.mxu2 %v10370_v34  ;;  %v10801_v34 = vld [vmem:[#allocation7 + $0x758] sm:$0xf] }
  0x95   :  { %2155 = vmatpush.bf16.msrb.mxu3 %v10562_v40  ;;  %v14819_v40 = vld [vmem:[#allocation7 + $0x8ec] sm:$0xf0] }
  0x96   :  { %2114 = vmatpush.bf16.msrb.mxu0 %v9962_v46  ;;  %v10227_v46 = vld [vmem:[#allocation7 + $0x2f0] sm:$0xf0]  ;;  %v10994_v49 = vor.u32 %v14819_v40, %v10993_v37  ;;  %v10706_v37 = vor.u32 %v14747_v28, %v10705_v27 }
  0x97   :  { %2128 = vmatpush.bf16.msrb.mxu1 %v10154_v47  ;;  %v10442_v47 = vor.u32 %v14681_v33, %v10441_v32  ;;  %v10230_v54 = vor.u32 %v14624_v45, %v10227_v46  ;;  %v14552_v32 = vld [vmem:[#allocation7 + $0x9c] sm:$0xf]  ;;  %v9939_v33 = vld [vmem:[#allocation7 + $0xb0] sm:$0xf0]  ;;  %v14789_v45 = vld [vmem:[#allocation7 + $0x7fc] sm:$0xf0] }
  0x98   :  { %2142 = vmatpush.bf16.msrb.mxu2 %v10346_v48  ;;  %v10802_v48 = vor.u32 %v14771_v36, %v10801_v34  ;;  %v14600_v34 = vld [vmem:[#allocation7 + $0x21c] sm:$0xf]  ;;  %v10131_v36 = vld [vmem:[#allocation7 + $0x230] sm:$0xf0]  ;;  %v9942_v40 = vor.u32 %v14552_v32, %v9939_v33  ;;  %v14546_v46 = vld [vmem:[#allocation7 + $0x6c] sm:$0xf] }
  0x99   :  { %2156 = vmatpush.bf16.msrb.mxu3 %v10538_v52  ;;  %v14765_v52 = vld [vmem:[#allocation7 + $0x73c] sm:$0xf0]  ;;  %v10587_v33 = vld [vmem:[#allocation7 + $0x5c0] sm:$0xf0] }
  0x9a   :  { %2115 = vmatpush.bf16.msrb.mxu0 %v9938_v59  ;;  %v14618_v59 = vld [vmem:[#allocation7 + $0x2ac] sm:$0xf] }
  0x9b   :  { %2129 = vmatpush.bf16.msrb.mxu1 %v10130_v60  ;;  %v10203_v60 = vld [vmem:[#allocation7 + $0x2c0] sm:$0xf0] }
  0x9c   :  { %2143 = vmatpush.bf16.msrb.mxu2 %v10322_v61  ;;  %v10778_v61 = vor.u32 %v14765_v52, %v10777_v51  ;;  %v10206_v3 = vor.u32 %v14618_v59, %v10203_v60  ;;  %v14540_v59 = vld [vmem:[#allocation7 + $0x3c] sm:$0xf]  ;;  %v9891_v60 = vld [vmem:[#allocation7 + $0x50] sm:$0xf0] }
  0x9d   :  { %2157 = vmatpush.bf16.msrb.mxu3 %v10514_v1  ;;  %v14759_v1 = vld [vmem:[#allocation7 + $0x70c] sm:$0xf0] }
  0x9e   :  { %2116 = vmatpush.bf16.msrb.mxu0 %v9914_v8  ;;  %v14612_v8 = vld [vmem:[#allocation7 + $0x27c] sm:$0xf] }
  0x9f   :  { %2130 = vmatpush.bf16.msrb.mxu1 %v10106_v9  ;;  %v10179_v9 = vld [vmem:[#allocation7 + $0x290] sm:$0xf0] }
  0xa0   :  { %2144 = vmatpush.bf16.msrb.mxu2 %v10298_v10  ;;  %v10754_v10 = vor.u32 %v14759_v1, %v10753_v0  ;;  %v10182_v16 = vor.u32 %v14612_v8, %v10179_v9  ;;  %v10633_v0 = vld [vmem:[#allocation7 + $0x608] sm:$0xf]  ;;  %v14729_v1 = vld [vmem:[#allocation7 + $0x61c] sm:$0xf0]  ;;  %v9867_v9 = vld [vmem:[#allocation7 + $0x20] sm:$0xf0] }
  0xa1   :  { %2158 = vmatpush.bf16.msrb.mxu3 %v10490_v14  ;;  %v14753_v14 = vld [vmem:[#allocation7 + $0x6dc] sm:$0xf0] }
  0xa2   :  { %2117 = vmatpush.bf16.msrb.mxu0 %v9890_v20  ;;  %v14606_v20 = vld [vmem:[#allocation7 + $0x24c] sm:$0xf]  ;;  %v10730_v24 = vor.u32 %v14753_v14, %v10729_v13  ;;  %v10419_v13 = vld [vmem:[#allocation7 + $0x470] sm:$0xf0]  ;;  %v14720_v14 = vld [vmem:[#allocation7 + $0x5dc] sm:$0xf] }
  0xa3   :  { %2131 = vmatpush.bf16.msrb.mxu1 %v10082_v25  ;;  %v10922_v25 = vor.u32 %v14801_v17, %v10921_v15  ;;  %v10634_v15 = vor.u32 %v14729_v1, %v10633_v0  ;;  %v14768_v17 = vld [vmem:[#allocation7 + $0x75c] sm:$0xf]  ;;  %v10731_v0 = vld [vmem:[#allocation7 + $0x6e0] sm:$0xf0]  ;;  %v14798_v1 = vld [vmem:[#allocation7 + $0x84c] sm:$0xf] }
  0xa4   :  { %2145 = vmatpush.bf16.msrb.mxu2 %v10274_v26  ;;  %v9966_v26 = vor.u32 %v14558_v18, %v9963_v19  ;;  %v10803_v18 = vld [vmem:[#allocation7 + $0x770] sm:$0xf0]  ;;  %v10826_v19 = vor.u32 %v14777_v5, %v10825_v4 }
  0xa5   :  { %2159 = vmatpush.bf16.msrb.mxu3 %v10466_v30  ;;  %v10158_v30 = vor.u32 %v14606_v20, %v10155_v21  ;;  %v9870_v20 = vor.u32 %v14534_v7, %v9867_v9  ;;  %v14816_v21 = vld [vmem:[#allocation7 + $0x8dc] sm:$0xf]  ;;  %v10806_v28 = vor.u32 %v14768_v17, %v10803_v18  ;;  %v10899_v17 = vld [vmem:[#allocation7 + $0x830] sm:$0xf0] }
  0xa6   :  { %2118 = vmatpush.bf16.msrb.mxu0 %v9866_v38  ;;  %v10898_v38 = vor.u32 %v14795_v31, %v10897_v29  ;;  %v14666_v29 = vld [vmem:[#allocation7 + $0x42c] sm:$0xf]  ;;  %v14648_v9 = vld [vmem:[#allocation7 + $0x39c] sm:$0xf] }
  0xa7   :  { %2132 = vmatpush.bf16.msrb.mxu1 %v10058_v43  ;;  %v10873_v43 = vld [vmem:[#allocation7 + $0x7e8] sm:$0xf]  ;;  %v14714_v31 = vld [vmem:[#allocation7 + $0x5ac] sm:$0xf] }
  0xa8   :  { %2146 = vmatpush.bf16.msrb.mxu2 %v10250_v44  ;;  %v10134_v44 = vor.u32 %v14600_v34, %v10131_v36  ;;  %v10874_v51 = vor.u32 %v14789_v45, %v10873_v43  ;;  %v14762_v34 = vld [vmem:[#allocation7 + $0x72c] sm:$0xf]  ;;  %v10779_v36 = vld [vmem:[#allocation7 + $0x740] sm:$0xf0]  ;;  %v14708_v45 = vld [vmem:[#allocation7 + $0x57c] sm:$0xf] }
  0xa9   :  { %2160 = vmatpush.bf16.msrb.mxu3 %v10442_v47  ;;  %2119 = vmatmul.bf16.vlgmr.msrb.gmra.mxu0 %v16121_v57  ;;  %v9915_v47 = vld [vmem:[#allocation7 + $0x80] sm:$0xf0]  ;;  %v10782_v43 = vor.u32 %v14762_v34, %v10779_v36 }
  0xaa   :  { %2167 = vmatpush.bf16.msra.mxu0 %v10802_v48  ;;  %2133 = vmatmul.bf16.vlgmr.msrb.gmra.mxu1 %v16124_v6  ;;  %v14594_v48 = vld [vmem:[#allocation7 + $0x1ec] sm:$0xf]  ;;  %v9918_v52 = vor.u32 %v14546_v46, %v9915_v47  ;;  %v16149_v46 = vld [vmem:[#allocation14] sm:$0xff] }
  0xab   :  { %2181 = vmatpush.bf16.msra.mxu1 %v10994_v49  ;;  %2147 = vmatmul.bf16.vlgmr.msrb.gmra.mxu2 %v16127_v22  ;;  %v10107_v49 = vld [vmem:[#allocation7 + $0x200] sm:$0xf0] }
  0xac   :  { %2195 = vmatpush.bf16.msra.mxu2 %v10038_v50  ;;  %2161 = vmatmul.bf16.vlgmr.msrb.gmra.mxu3 %v16129_v23  ;;  %v10682_v50 = vor.u32 %v14741_v42, %v10681_v41  ;;  %v10110_v56 = vor.u32 %v14594_v48, %v10107_v49  ;;  %v14660_v41 = vld [vmem:[#allocation7 + $0x3fc] sm:$0xf]  ;;  %v10590_v42 = vor.u32 %v14714_v31, %v10587_v33  ;;  %v10563_v48 = vld [vmem:[#allocation7 + $0x590] sm:$0xf0]  ;;  %v10683_v31 = vld [vmem:[#allocation7 + $0x680] sm:$0xf0] }
  0xad   :  { %2209 = vmatpush.bf16.msra.mxu3 %v10230_v54  ;;  %v14735_v54 = vld [vmem:[#allocation7 + $0x64c] sm:$0xf0]  ;;  %v14756_v49 = vld [vmem:[#allocation7 + $0x6fc] sm:$0xf]  ;;  %v10566_v55 = vor.u32 %v14708_v45, %v10563_v48  ;;  %v10875_v33 = vld [vmem:[#allocation7 + $0x800] sm:$0xf0] }
  0xae   :  { %2168 = vmatpush.bf16.msra.mxu0 %v10778_v61  ;;  %v14588_v61 = vld [vmem:[#allocation7 + $0x1bc] sm:$0xf]  ;;  %v10659_v45 = vld [vmem:[#allocation7 + $0x650] sm:$0xf0] }
  0xaf   :  { %2182 = vmatpush.bf16.msra.mxu1 %v10970_v62  ;;  %v10083_v62 = vld [vmem:[#allocation7 + $0x1d0] sm:$0xf0] }
  0xb0   :  { %2196 = vmatpush.bf16.msra.mxu2 %v10014_v63  ;;  %v10658_v63 = vor.u32 %v14735_v54, %v10657_v53  ;;  %v10086_v8 = vor.u32 %v14588_v61, %v10083_v62  ;;  %v467_v54 = vperm.slane %v16149_v46, 0  ;;  %v10539_v62 = vld [vmem:[#allocation7 + $0x560] sm:$0xf0]  ;;  %v10851_v48 = vld [vmem:[#allocation7 + $0x7d0] sm:$0xf0] }
  0xb1   :  { %2210 = vmatpush.bf16.msra.mxu3 %v10206_v3  ;;  %v9894_v3 = vor.u32 %v14540_v59, %v9891_v60  ;;  %v10347_v59 = vld [vmem:[#allocation7 + $0x3e0] sm:$0xf0]  ;;  %v14702_v60 = vld [vmem:[#allocation7 + $0x54c] sm:$0xf] }
  0xb2   :  { %2169 = vmatpush.bf16.msra.mxu0 %v10754_v10  ;;  %v14582_v10 = vld [vmem:[#allocation7 + $0x18c] sm:$0xf]  ;;  %v10350_v4 = vor.u32 %v14654_v58, %v10347_v59  ;;  %v10542_v7 = vor.u32 %v14702_v60, %v10539_v62 }
  0xb3   :  { %2183 = vmatpush.bf16.msra.mxu1 %v10946_v11  ;;  %v10059_v11 = vld [vmem:[#allocation7 + $0x1a0] sm:$0xf0]  ;;  %v14726_v58 = vld [vmem:[#allocation7 + $0x60c] sm:$0xf] }
  0xb4   :  { %2197 = vmatpush.bf16.msra.mxu2 %v9990_v12  ;;  %v14672_v12 = vld [vmem:[#allocation7 + $0x45c] sm:$0xf]  ;;  %v14774_v62 = vld [vmem:[#allocation7 + $0x78c] sm:$0xf] }
  0xb5   :  { %2211 = vmatpush.bf16.msra.mxu3 %v10182_v16  ;;  %v10611_v16 = vld [vmem:[#allocation7 + $0x5f0] sm:$0xf0] }
  0xb6   :  { %2170 = vmatpush.bf16.msra.mxu0 %v10730_v24  ;;  %v10995_v24 = vld [vmem:[#allocation7 + $0x8f0] sm:$0xf0]  ;;  %v10614_v27 = vor.u32 %v14720_v14, %v10611_v16  ;;  %v14744_v14 = vld [vmem:[#allocation7 + $0x69c] sm:$0xf] }
  0xb7   :  { %2184 = vmatpush.bf16.msra.mxu1 %v10922_v25  ;;  %v10062_v25 = vor.u32 %v14582_v10, %v10059_v11  ;;  %v10998_v32 = vor.u32 %v14816_v21, %v10995_v24  ;;  %v10323_v10 = vld [vmem:[#allocation7 + $0x3b0] sm:$0xf0]  ;;  %v14696_v11 = vld [vmem:[#allocation7 + $0x51c] sm:$0xf] }
  0xb8   :  { %2198 = vmatpush.bf16.msra.mxu2 %v9966_v26  ;;  %v10422_v26 = vor.u32 %v14672_v12, %v10419_v13  ;;  %v10515_v13 = vld [vmem:[#allocation7 + $0x530] sm:$0xf0]  ;;  %v14792_v16 = vld [vmem:[#allocation7 + $0x81c] sm:$0xf] }
  0xb9   :  { %2212 = vmatpush.bf16.msra.mxu3 %v10158_v30  ;;  %v10395_v30 = vld [vmem:[#allocation7 + $0x440] sm:$0xf0]  ;;  %v10518_v21 = vor.u32 %v14696_v11, %v10515_v13  ;;  %v10617_v13 = vld [vmem:[#allocation7 + $0x5e0] sm:$0xf] }
  0xba   :  { %2171 = vmatpush.bf16.msra.mxu0 %v10706_v37  ;;  %v14810_v37 = vld [vmem:[#allocation7 + $0x8ac] sm:$0xf] }
  0xbb   :  { %2185 = vmatpush.bf16.msra.mxu1 %v10898_v38  ;;  %v10971_v38 = vld [vmem:[#allocation7 + $0x8c0] sm:$0xf0] }
  0xbc   :  { %2199 = vmatpush.bf16.msra.mxu2 %v9942_v40  ;;  %v10398_v40 = vor.u32 %v14666_v29, %v10395_v30  ;;  %v10974_v47 = vor.u32 %v14810_v37, %v10971_v38  ;;  %v10491_v29 = vld [vmem:[#allocation7 + $0x500] sm:$0xf0]  ;;  %v14738_v30 = vld [vmem:[#allocation7 + $0x66c] sm:$0xf]  ;;  %v14636_v38 = vld [vmem:[#allocation7 + $0x33c] sm:$0xf] }
  0xbd   :  { %2213 = vmatpush.bf16.msra.mxu3 %v10134_v44  ;;  %v10371_v44 = vld [vmem:[#allocation7 + $0x410] sm:$0xf0]  ;;  %v10686_v37 = vor.u32 %v14738_v30, %v10683_v31  ;;  %v14718_v30 = vld [vmem:[#allocation7 + $0x5c4] sm:$0xf0] }
  0xbe   :  { %2172 = vmatpush.bf16.msra.mxu0 %v10682_v50  ;;  %v10755_v50 = vld [vmem:[#allocation7 + $0x710] sm:$0xf0]  ;;  %v10374_v53 = vor.u32 %v14660_v41, %v10371_v44  ;;  %v14684_v41 = vld [vmem:[#allocation7 + $0x4bc] sm:$0xf] }
  0xbf   :  { %2186 = vmatpush.bf16.msra.mxu1 %v10874_v51  ;;  %v14804_v51 = vld [vmem:[#allocation7 + $0x87c] sm:$0xf] }
  0xc0   :  { %2200 = vmatpush.bf16.msra.mxu2 %v9918_v52  ;;  %v10947_v52 = vld [vmem:[#allocation7 + $0x890] sm:$0xf0]  ;;  %v14732_v44 = vld [vmem:[#allocation7 + $0x63c] sm:$0xf] }
  0xc1   :  { %2214 = vmatpush.bf16.msra.mxu3 %v10110_v56  ;;  %v10758_v56 = vor.u32 %v14756_v49, %v10755_v50  ;;  %v10950_v61 = vor.u32 %v14804_v51, %v10947_v52  ;;  %v14630_v50 = vld [vmem:[#allocation7 + $0x30c] sm:$0xf]  ;;  %v10251_v51 = vld [vmem:[#allocation7 + $0x320] sm:$0xf0] }
  0xc2   :  { %2173 = vmatpush.bf16.msra.mxu0 %v10658_v63  ;;  %v14750_v63 = vld [vmem:[#allocation7 + $0x6cc] sm:$0xf] }
  0xc3   :  { %2187 = vmatpush.bf16.msra.mxu1 %v10850_v2  ;;  %v10923_v2 = vld [vmem:[#allocation7 + $0x860] sm:$0xf0] }
  0xc4   :  { %2201 = vmatpush.bf16.msra.mxu2 %v9894_v3  ;;  %v10926_v12 = vor.u32 %v14798_v1, %v10923_v2  ;;  %v10041_v1 = vld [vmem:[#allocation7 + $0x160] sm:$0xf]  ;;  %v14580_v2 = vld [vmem:[#allocation7 + $0x174] sm:$0xf0] }
  0xc5   :  { %2215 = vmatpush.bf16.msra.mxu3 %v10086_v8  ;;  %v10734_v8 = vor.u32 %v14750_v63, %v10731_v0  ;;  %v10827_v63 = vld [vmem:[#allocation7 + $0x7a0] sm:$0xf0] }
  0xc6   :  { %2174 = vmatpush.bf16.msra.mxu0 %v10634_v15  ;;  %v1952_v3 = vpop.f32.mrf.mxu0  ;;  %v10707_v15 = vld [vmem:[#allocation7 + $0x6b0] sm:$0xf0] }
  0xc7   :  { %2188 = vmatpush.bf16.msra.mxu1 %v10826_v19  ;;  %v1953_v5 = vadd.f32 %v1952_v3, %v467_v54  ;;  %v1966_v18 = vpop.f32.mrf.mxu1  ;;  %v10326_v19 = vor.u32 %v14648_v9, %v10323_v10  ;;  %v10710_v24 = vor.u32 %v14744_v14, %v10707_v15  ;;  %v10233_v3 = vld [vmem:[#allocation7 + $0x2e0] sm:$0xf]  ;;  %v14676_v9 = vld [vmem:[#allocation7 + $0x474] sm:$0xf0]  ;;  %v10830_v15 = vor.u32 %v14774_v62, %v10827_v63  ;;  %v14706_v62 = vld [vmem:[#allocation7 + $0x564] sm:$0xf0] }
  0xc8   :  { %2202 = vmatpush.bf16.msra.mxu2 %v9870_v20  ;;  %v14724_v14 = vld [vmem:[#allocation7 + $0x5f4] sm:$0xf0] }
  0xc9   :  { %2216 = vmatpush.bf16.msra.mxu3 %v10062_v25  ;;  %2175 = vmatmul.bf16.vlgmr.msra.gmra.mxu0 %v16133_v35  ;;  %v1967_v20 = vadd.f32 %v1966_v18, %v1953_v5  ;;  %v14642_v25 = vld [vmem:[#allocation7 + $0x36c] sm:$0xf]  ;;  %v10254_v5 = vor.u32 %v14630_v50, %v10251_v51  ;;  %v9969_v50 = vld [vmem:[#allocation7 + $0xd0] sm:$0xf]  ;;  %v14562_v51 = vld [vmem:[#allocation7 + $0xe4] sm:$0xf0] }
  0xca   :  { %2223 = vmatpush.bf16.msrb.mxu0 %v10422_v26  ;;  %2189 = vmatmul.bf16.vlgmr.msra.gmra.mxu1 %v16135_v39  ;;  %v10299_v26 = vld [vmem:[#allocation7 + $0x380] sm:$0xf0] }
  0xcb   :  { %2237 = vmatpush.bf16.msrb.mxu1 %v10614_v27  ;;  %2203 = vmatmul.bf16.vlgmr.msra.gmra.mxu2 %v16121_v57  ;;  %v14690_v27 = vld [vmem:[#allocation7 + $0x4ec] sm:$0xf]  ;;  %v10302_v34 = vor.u32 %v14642_v25, %v10299_v26  ;;  %v10618_v25 = vor.u32 %v14724_v14, %v10617_v13  ;;  %v14622_v26 = vld [vmem:[#allocation7 + $0x2c4] sm:$0xf0]  ;;  %v14604_v13 = vld [vmem:[#allocation7 + $0x234] sm:$0xf0] }
  0xcc   :  { %2251 = vmatpush.bf16.msrb.mxu2 %v10806_v28  ;;  %2217 = vmatmul.bf16.vlgmr.msra.gmra.mxu3 %v16124_v6  ;;  %v10902_v28 = vor.u32 %v14792_v16, %v10899_v17  ;;  %v10494_v36 = vor.u32 %v14690_v27, %v10491_v29  ;;  %v10042_v16 = vor.u32 %v14580_v2, %v10041_v1  ;;  %v10401_v27 = vld [vmem:[#allocation7 + $0x430] sm:$0xf]  ;;  %v16173_v2 = vld [vmem:[#allocation14 + $0x8] sm:$0xff]  ;;  %v10329_v14 = vld [vmem:[#allocation7 + $0x3a0] sm:$0xf] }
  0xcd   :  { %2265 = vmatpush.bf16.msrb.mxu3 %v10998_v32  ;;  %v14786_v32 = vld [vmem:[#allocation7 + $0x7ec] sm:$0xf]  ;;  %v10593_v29 = vld [vmem:[#allocation7 + $0x5b0] sm:$0xf] }
  0xce   :  { %2224 = vmatpush.bf16.msrb.mxu0 %v10398_v40  ;;  %v10275_v40 = vld [vmem:[#allocation7 + $0x350] sm:$0xf0]  ;;  %v1980_v59 = vpop.f32.mrf.mxu2 }
  0xcf   :  { %2238 = vmatpush.bf16.msrb.mxu1 %v10590_v42  ;;  %v10878_v42 = vor.u32 %v14786_v32, %v10875_v33  ;;  %v10278_v49 = vor.u32 %v14636_v38, %v10275_v40  ;;  %v1981_v0 = vadd.f32 %v1980_v59, %v1967_v20  ;;  %v10017_v20 = vld [vmem:[#allocation7 + $0x130] sm:$0xf]  ;;  %v16162_v31 = vpop.f32.mrf.mxu1  ;;  %v10185_v38 = vld [vmem:[#allocation7 + $0x280] sm:$0xf]  ;;  %v10594_v40 = vor.u32 %v14718_v30, %v10593_v29  ;;  %v14646_v30 = vld [vmem:[#allocation7 + $0x384] sm:$0xf0] }
  0xd0   :  { %2252 = vmatpush.bf16.msrb.mxu2 %v10782_v43  ;;  %v10467_v43 = vld [vmem:[#allocation7 + $0x4d0] sm:$0xf0]  ;;  %v10305_v29 = vld [vmem:[#allocation7 + $0x370] sm:$0xf] }
  0xd1   :  { %2266 = vmatpush.bf16.msrb.mxu3 %v10974_v47  ;;  %v14780_v47 = vld [vmem:[#allocation7 + $0x7bc] sm:$0xf]  ;;  %v10470_v52 = vor.u32 %v14684_v41, %v10467_v43  ;;  %v14616_v41 = vld [vmem:[#allocation7 + $0x294] sm:$0xf0] }
  0xd2   :  { %2225 = vmatpush.bf16.msrb.mxu0 %v10374_v53  ;;  %v10662_v53 = vor.u32 %v14732_v44, %v10659_v45  ;;  %v10854_v60 = vor.u32 %v14780_v47, %v10851_v48  ;;  %v14664_v43 = vld [vmem:[#allocation7 + $0x414] sm:$0xf0]  ;;  %v10569_v44 = vld [vmem:[#allocation7 + $0x580] sm:$0xf]  ;;  %v10186_v48 = vor.u32 %v14616_v41, %v10185_v38  ;;  %v10306_v41 = vor.u32 %v14646_v30, %v10305_v29  ;;  %v10977_v29 = vld [vmem:[#allocation7 + $0x8b0] sm:$0xf] }
  0xd3   :  { %2239 = vmatpush.bf16.msrb.mxu1 %v10566_v55  ;;  %v14678_v55 = vld [vmem:[#allocation7 + $0x48c] sm:$0xf]  ;;  %v14712_v45 = vld [vmem:[#allocation7 + $0x594] sm:$0xf0] }
  0xd4   :  { %2253 = vmatpush.bf16.msrb.mxu2 %v10758_v56  ;;  %v10443_v56 = vld [vmem:[#allocation7 + $0x4a0] sm:$0xf0] }
  0xd5   :  { %2267 = vmatpush.bf16.msrb.mxu3 %v10950_v61  ;;  %v10635_v61 = vld [vmem:[#allocation7 + $0x620] sm:$0xf0]  ;;  %v10446_v11 = vor.u32 %v14678_v55, %v10443_v56  ;;  %v14610_v55 = vld [vmem:[#allocation7 + $0x264] sm:$0xf0]  ;;  %v10353_v56 = vld [vmem:[#allocation7 + $0x3d0] sm:$0xf] }
  0xd6   :  { %2226 = vmatpush.bf16.msrb.mxu0 %v10350_v4  ;;  %v1994_v4 = vpop.f32.mrf.mxu3  ;;  %v16168_v59 = vpop.f32.mrf.mxu2 }
  0xd7   :  { %2240 = vmatpush.bf16.msrb.mxu1 %v10542_v7  ;;  %v14628_v7 = vld [vmem:[#allocation7 + $0x2f4] sm:$0xf0]  ;;  %v16158_v10 = vadd.f32 %v1994_v4, %v1981_v0  ;;  %v9970_v0 = vor.u32 %v14562_v51, %v9969_v50  ;;  %v10473_v51 = vld [vmem:[#allocation7 + $0x4c0] sm:$0xf] }
  0xd8   :  { %2254 = vmatpush.bf16.msrb.mxu2 %v10734_v8  ;;  %v10425_v8 = vld [vmem:[#allocation7 + $0x460] sm:$0xf]  ;;  %v10234_v17 = vor.u32 %v14628_v7, %v10233_v3  ;;  %v14640_v50 = vld [vmem:[#allocation7 + $0x354] sm:$0xf0] }
  0xd9   :  { %2268 = vmatpush.bf16.msrb.mxu3 %v10926_v12  ;;  %v10638_v12 = vor.u32 %v14726_v58, %v10635_v61  ;;  %v10426_v18 = vor.u32 %v14676_v9, %v10425_v8  ;;  %v14658_v58 = vld [vmem:[#allocation7 + $0x3e4] sm:$0xf0]  ;;  %v10545_v61 = vld [vmem:[#allocation7 + $0x550] sm:$0xf]  ;;  %v9945_v7 = vld [vmem:[#allocation7 + $0xa0] sm:$0xf] }
  0xda   :  { %2227 = vmatpush.bf16.msrb.mxu0 %v10326_v19  ;;  %v16160_v19 = vpop.f32.mrf.mxu0  ;;  %v10354_v4 = vor.u32 %v14658_v58, %v10353_v56  ;;  %v14556_v8 = vld [vmem:[#allocation7 + $0xb4] sm:$0xf0]  ;;  %v10137_v9 = vld [vmem:[#allocation7 + $0x220] sm:$0xf]  ;;  %v14538_v56 = vld [vmem:[#allocation7 + $0x24] sm:$0xf0] }
  0xdb   :  { %2241 = vmatpush.bf16.msrb.mxu1 %v10518_v21  ;;  %v14574_v21 = vld [vmem:[#allocation7 + $0x144] sm:$0xf0] }
  0xdc   :  { %2255 = vmatpush.bf16.msrb.mxu2 %v10710_v24  ;;  %v10209_v24 = vld [vmem:[#allocation7 + $0x2b0] sm:$0xf]  ;;  %v10018_v32 = vor.u32 %v14574_v21, %v10017_v20  ;;  %v10138_v20 = vor.u32 %v14604_v13, %v10137_v9  ;;  %v11001_v9 = vld [vmem:[#allocation7 + $0x8e0] sm:$0xf]  ;;  %v14820_v13 = vld [vmem:[#allocation7 + $0x8f4] sm:$0xf0] }
  0xdd   :  { %2269 = vmatpush.bf16.msrb.mxu3 %v10902_v28  ;;  %v14670_v28 = vld [vmem:[#allocation7 + $0x444] sm:$0xf0]  ;;  %v10210_v33 = vor.u32 %v14622_v26, %v10209_v24  ;;  %v9921_v24 = vld [vmem:[#allocation7 + $0x70] sm:$0xf] }
  0xde   :  { %2228 = vmatpush.bf16.msrb.mxu0 %v10302_v34  ;;  %v10402_v34 = vor.u32 %v14670_v28, %v10401_v27  ;;  %v16171_v1 = vpop.f32.mrf.mxu3  ;;  %v10113_v26 = vld [vmem:[#allocation7 + $0x1f0] sm:$0xf]  ;;  %v14598_v28 = vld [vmem:[#allocation7 + $0x204] sm:$0xf0] }
  0xdf   :  { %2242 = vmatpush.bf16.msrb.mxu1 %v10494_v36  ;;  %v9993_v36 = vld [vmem:[#allocation7 + $0x100] sm:$0xf] }
  0xe0   :  { %2256 = vmatpush.bf16.msrb.mxu2 %v10686_v37  ;;  %v14568_v37 = vld [vmem:[#allocation7 + $0x114] sm:$0xf0] }
  0xe1   :  { %2270 = vmatpush.bf16.msrb.mxu3 %v10878_v42  ;;  %v10377_v42 = vld [vmem:[#allocation7 + $0x400] sm:$0xf]  ;;  %v9994_v47 = vor.u32 %v14568_v37, %v9993_v36 }
  0xe2   :  { %2229 = vmatpush.bf16.msrb.mxu0 %v10278_v49  ;;  %v10378_v49 = vor.u32 %v14664_v43, %v10377_v42  ;;  %v9897_v42 = vld [vmem:[#allocation7 + $0x40] sm:$0xf]  ;;  %v14544_v43 = vld [vmem:[#allocation7 + $0x54] sm:$0xf0] }
  0xe3   :  { %2243 = vmatpush.bf16.msrb.mxu1 %v10470_v52  ;;  %v10161_v52 = vld [vmem:[#allocation7 + $0x250] sm:$0xf] }
  0xe4   :  { %2257 = vmatpush.bf16.msrb.mxu2 %v10662_v53  ;;  %v10570_v53 = vor.u32 %v14712_v45, %v10569_v44  ;;  %v10162_v3 = vor.u32 %v14610_v55, %v10161_v52  ;;  %v10089_v44 = vld [vmem:[#allocation7 + $0x1c0] sm:$0xf]  ;;  %v14688_v52 = vld [vmem:[#allocation7 + $0x4d4] sm:$0xf0]  ;;  %v9873_v55 = vld [vmem:[#allocation7 + $0x10] sm:$0xf] }
  0xe5   :  { %2271 = vmatpush.bf16.msrb.mxu3 %v10854_v60 }
  0xe6   :  { %2230 = vmatpush.bf16.msrb.mxu0 %v10254_v5  ;;  %v2008_v60 = vpop.f32.mrf.mxu0 }
  0xe7   :  { %2244 = vmatpush.bf16.msrb.mxu1 %v10446_v11  ;;  %v2009_v63 = vadd.f32 %v2008_v60, %v16158_v10  ;;  %v2022_v5 = vpop.f32.mrf.mxu1  ;;  %v10546_v11 = vor.u32 %v14706_v62, %v10545_v61  ;;  %v14652_v10 = vld [vmem:[#allocation7 + $0x3b4] sm:$0xf0]  ;;  %v10065_v61 = vld [vmem:[#allocation7 + $0x190] sm:$0xf]  ;;  %v14586_v62 = vld [vmem:[#allocation7 + $0x1a4] sm:$0xf0] }
  0xe8   :  { %2258 = vmatpush.bf16.msrb.mxu2 %v10638_v12  ;;  %v10330_v21 = vor.u32 %v14652_v10, %v10329_v14  ;;  %v14577_v14 = vld [vmem:[#allocation7 + $0x164] sm:$0xf]  ;;  %v10043_v10 = vld [vmem:[#allocation7 + $0x178] sm:$0xf0] }
  0xe9   :  { %2272 = vmatpush.bf16.msrb.mxu3 %v10830_v15  ;;  %2231 = vmatmul.bf16.vlgmr.msrb.gmra.mxu0 %v16127_v22  ;;  %v16175_v12 = vadd.f32 %v2022_v5, %v2009_v63  ;;  %v10521_v15 = vld [vmem:[#allocation7 + $0x520] sm:$0xf]  ;;  %v10257_v63 = vld [vmem:[#allocation7 + $0x310] sm:$0xf]  ;;  %v14682_v5 = vld [vmem:[#allocation7 + $0x4a4] sm:$0xf0] }
  0xea   :  { %2279 = vmatpush.bf16.msra.mxu0 %v10042_v16  ;;  %2245 = vmatmul.bf16.vlgmr.msrb.gmra.mxu1 %v16129_v23  ;;  %v14700_v16 = vld [vmem:[#allocation7 + $0x534] sm:$0xf0] }
  0xeb   :  { %2293 = vmatpush.bf16.msra.mxu1 %v10234_v17  ;;  %2259 = vmatmul.bf16.vlgmr.msrb.gmra.mxu2 %v16133_v35  ;;  %v468_v17 = vperm.slane %v16173_v2, 0  ;;  %v10522_v27 = vor.u32 %v14700_v16, %v10521_v15  ;;  %v10066_v15 = vor.u32 %v14586_v62, %v10065_v61 }
  0xec   :  { %2307 = vmatpush.bf16.msra.mxu2 %v10426_v18  ;;  %2273 = vmatmul.bf16.vlgmr.msrb.gmra.mxu3 %v16135_v39  ;;  %v9946_v18 = vor.u32 %v14556_v8, %v9945_v7  ;;  %v10809_v7 = vld [vmem:[#allocation7 + $0x760] sm:$0xf]  ;;  %v14772_v8 = vld [vmem:[#allocation7 + $0x774] sm:$0xf0] }
  0xed   :  { %2321 = vmatpush.bf16.msra.mxu3 %v10618_v25  ;;  %v14550_v25 = vld [vmem:[#allocation7 + $0x84] sm:$0xf0] }
  0xee   :  { %2280 = vmatpush.bf16.msra.mxu0 %v10018_v32  ;;  %v2036_v32 = vpop.f32.mrf.mxu2  ;;  %v9922_v37 = vor.u32 %v14550_v25, %v9921_v24  ;;  %v10810_v24 = vor.u32 %v14772_v8, %v10809_v7  ;;  %v11002_v25 = vor.u32 %v14820_v13, %v11001_v9  ;;  %v14559_v7 = vld [vmem:[#allocation7 + $0xd4] sm:$0xf]  ;;  %v9971_v8 = vld [vmem:[#allocation7 + $0xe8] sm:$0xf0] }
  0xef   :  { %2294 = vmatpush.bf16.msra.mxu1 %v10210_v33  ;;  %v10497_v33 = vld [vmem:[#allocation7 + $0x4f0] sm:$0xf]  ;;  %v2037_v36 = vadd.f32 %v2036_v32, %v468_v17  ;;  %v2050_v38 = vpop.f32.mrf.mxu3  ;;  %v14814_v32 = vld [vmem:[#allocation7 + $0x8c4] sm:$0xf0]  ;;  %v10163_v13 = vld [vmem:[#allocation7 + $0x268] sm:$0xf0] }
  0xf0   :  { %2308 = vmatpush.bf16.msra.mxu2 %v10402_v34  ;;  %v14694_v34 = vld [vmem:[#allocation7 + $0x504] sm:$0xf0] }
  0xf1   :  { %2322 = vmatpush.bf16.msra.mxu3 %v10594_v40  ;;  %v10114_v40 = vor.u32 %v14598_v28, %v10113_v26  ;;  %v16180_v45 = vadd.f32 %v2050_v38, %v2037_v36  ;;  %v10046_v26 = vor.u32 %v14577_v14, %v10043_v10  ;;  %v14766_v28 = vld [vmem:[#allocation7 + $0x744] sm:$0xf0]  ;;  %v16182_v36 = vpop.f32.mrf.mxu0  ;;  %v10211_v38 = vld [vmem:[#allocation7 + $0x2c8] sm:$0xf0] }
  0xf2   :  { %2281 = vmatpush.bf16.msra.mxu0 %v9994_v47  ;;  %v10498_v47 = vor.u32 %v14694_v34, %v10497_v33  ;;  %v14571_v33 = vld [vmem:[#allocation7 + $0x134] sm:$0xf]  ;;  %v10019_v34 = vld [vmem:[#allocation7 + $0x148] sm:$0xf0] }
  0xf3   :  { %2295 = vmatpush.bf16.msra.mxu1 %v10186_v48  ;;  %v14592_v48 = vld [vmem:[#allocation7 + $0x1d4] sm:$0xf0] }
  0xf4   :  { %2309 = vmatpush.bf16.msra.mxu2 %v10378_v49  ;;  %v10281_v49 = vld [vmem:[#allocation7 + $0x340] sm:$0xf]  ;;  %v10090_v58 = vor.u32 %v14592_v48, %v10089_v44 }
  0xf5   :  { %2323 = vmatpush.bf16.msra.mxu3 %v10570_v53  ;;  %v9898_v53 = vor.u32 %v14544_v43, %v9897_v42  ;;  %v10282_v60 = vor.u32 %v14640_v50, %v10281_v49  ;;  %v10978_v42 = vor.u32 %v14814_v32, %v10977_v29  ;;  %v10022_v43 = vor.u32 %v14571_v33, %v10019_v34  ;;  %v10761_v44 = vld [vmem:[#allocation7 + $0x700] sm:$0xf]  ;;  %v14808_v50 = vld [vmem:[#allocation7 + $0x894] sm:$0xf0]  ;;  %v9947_v29 = vld [vmem:[#allocation7 + $0xb8] sm:$0xf0] }
  0xf6   :  { %2282 = vmatpush.bf16.msra.mxu0 %v9970_v0  ;;  %v10474_v0 = vor.u32 %v14688_v52, %v10473_v51  ;;  %v10953_v48 = vld [vmem:[#allocation7 + $0x880] sm:$0xf]  ;;  %v14565_v51 = vld [vmem:[#allocation7 + $0x104] sm:$0xf]  ;;  %v9995_v52 = vld [vmem:[#allocation7 + $0x118] sm:$0xf0] }
  0xf7   :  { %2296 = vmatpush.bf16.msra.mxu1 %v10162_v3  ;;  %v14634_v3 = vld [vmem:[#allocation7 + $0x324] sm:$0xf0]  ;;  %v9998_v61 = vor.u32 %v14565_v51, %v9995_v52  ;;  %v16192_v62 = vpop.f32.mrf.mxu3  ;;  %v10139_v32 = vld [vmem:[#allocation7 + $0x238] sm:$0xf0]  ;;  %v14595_v51 = vld [vmem:[#allocation7 + $0x1f4] sm:$0xf] }
  0xf8   :  { %2310 = vmatpush.bf16.msra.mxu2 %v10354_v4  ;;  %v10449_v4 = vld [vmem:[#allocation7 + $0x490] sm:$0xf]  ;;  %v10258_v16 = vor.u32 %v14634_v3, %v10257_v63  ;;  %v10115_v52 = vld [vmem:[#allocation7 + $0x208] sm:$0xf0] }
  0xf9   :  { %2324 = vmatpush.bf16.msra.mxu3 %v10546_v11  ;;  %v9874_v11 = vor.u32 %v14538_v56, %v9873_v55  ;;  %v10187_v55 = vld [vmem:[#allocation7 + $0x298] sm:$0xf0]  ;;  %v10737_v63 = vld [vmem:[#allocation7 + $0x6d0] sm:$0xf] }
  0xfa   :  { %2283 = vmatpush.bf16.msra.mxu0 %v9946_v18  ;;  %v14625_v18 = vld [vmem:[#allocation7 + $0x2e4] sm:$0xf]  ;;  %v10929_v3 = vld [vmem:[#allocation7 + $0x850] sm:$0xf] }
  0xfb   :  { %2297 = vmatpush.bf16.msra.mxu1 %v10138_v20  ;;  %v10235_v20 = vld [vmem:[#allocation7 + $0x2f8] sm:$0xf0] }
  0xfc   :  { %2311 = vmatpush.bf16.msra.mxu2 %v10330_v21  ;;  %v10450_v21 = vor.u32 %v14682_v5, %v10449_v4  ;;  %v10238_v30 = vor.u32 %v14625_v18, %v10235_v20  ;;  %v14802_v5 = vld [vmem:[#allocation7 + $0x864] sm:$0xf0]  ;;  %v10713_v20 = vld [vmem:[#allocation7 + $0x6a0] sm:$0xf] }
  0xfd   :  { %2325 = vmatpush.bf16.msra.mxu3 %v10522_v27  ;;  %v10785_v27 = vld [vmem:[#allocation7 + $0x730] sm:$0xf] }
  0xfe   :  { %2284 = vmatpush.bf16.msra.mxu0 %v9922_v37  ;;  %v14619_v37 = vld [vmem:[#allocation7 + $0x2b4] sm:$0xf] }
  0xff   :  { %2298 = vmatpush.bf16.msra.mxu1 %v10114_v40  ;;  %v10786_v40 = vor.u32 %v14766_v28, %v10785_v27  ;;  %v10214_v49 = vor.u32 %v14619_v37, %v10211_v38  ;;  %v14796_v27 = vld [vmem:[#allocation7 + $0x834] sm:$0xf0]  ;;  %v14553_v28 = vld [vmem:[#allocation7 + $0xa4] sm:$0xf]  ;;  %v10689_v37 = vld [vmem:[#allocation7 + $0x670] sm:$0xf] }
 0x100   :  { %2312 = vmatpush.bf16.msra.mxu2 %v10306_v41  ;;  %v16184_v41 = vpop.f32.mrf.mxu1  ;;  %v9950_v34 = vor.u32 %v14553_v28, %v9947_v29  ;;  %v14742_v38 = vld [vmem:[#allocation7 + $0x684] sm:$0xf0]  ;;  %v10427_v28 = vld [vmem:[#allocation7 + $0x478] sm:$0xf0]  ;;  %v14721_v29 = vld [vmem:[#allocation7 + $0x5e4] sm:$0xf] }
 0x101   :  { %2326 = vmatpush.bf16.msra.mxu3 %v10498_v47  ;;  %v14760_v47 = vld [vmem:[#allocation7 + $0x714] sm:$0xf0] }
 0x102   :  { %2285 = vmatpush.bf16.msra.mxu0 %v9898_v53  ;;  %v14613_v53 = vld [vmem:[#allocation7 + $0x284] sm:$0xf]  ;;  %v10762_v56 = vor.u32 %v14760_v47, %v10761_v44  ;;  %v14790_v44 = vld [vmem:[#allocation7 + $0x804] sm:$0xf0]  ;;  %v14547_v47 = vld [vmem:[#allocation7 + $0x74] sm:$0xf] }
 0x103   :  { %2299 = vmatpush.bf16.msra.mxu1 %v10090_v58  ;;  %v16189_v58 = vpop.f32.mrf.mxu2  ;;  %v10190_v4 = vor.u32 %v14613_v53, %v10187_v55  ;;  %v10690_v53 = vor.u32 %v14742_v38, %v10689_v37  ;;  %v14817_v38 = vld [vmem:[#allocation7 + $0x8e4] sm:$0xf] }
 0x104   :  { %2313 = vmatpush.bf16.msra.mxu2 %v10282_v60  ;;  %v10954_v60 = vor.u32 %v14808_v50, %v10953_v48  ;;  %v9923_v48 = vld [vmem:[#allocation7 + $0x88] sm:$0xf0] }
 0x105   :  { %2327 = vmatpush.bf16.msra.mxu3 %v10474_v0  ;;  %v14754_v0 = vld [vmem:[#allocation7 + $0x6e4] sm:$0xf0] }
 0x106   :  { %2286 = vmatpush.bf16.msra.mxu0 %v9874_v11  ;;  %v2064_v9 = vpop.f32.mrf.mxu0  ;;  %v14607_v11 = vld [vmem:[#allocation7 + $0x254] sm:$0xf]  ;;  %v10738_v10 = vor.u32 %v14754_v0, %v10737_v63  ;;  %v14736_v63 = vld [vmem:[#allocation7 + $0x654] sm:$0xf0]  ;;  %v10857_v0 = vld [vmem:[#allocation7 + $0x7c0] sm:$0xf] }
 0x107   :  { %2300 = vmatpush.bf16.msra.mxu1 %v10066_v15  ;;  %v2065_v14 = vadd.f32 %v2064_v9, %v16180_v45  ;;  %v10930_v15 = vor.u32 %v14802_v5, %v10929_v3  ;;  %v10118_v3 = vor.u32 %v14595_v51, %v10115_v52  ;;  %v14541_v5 = vld [vmem:[#allocation7 + $0x44] sm:$0xf]  ;;  %v10091_v9 = vld [vmem:[#allocation7 + $0x1d8] sm:$0xf0]  ;;  %v10595_v52 = vld [vmem:[#allocation7 + $0x5c8] sm:$0xf0] }
 0x108   :  { %2314 = vmatpush.bf16.msra.mxu2 %v10258_v16  ;;  %v9974_v16 = vor.u32 %v14559_v7, %v9971_v8  ;;  %v2078_v18 = vpop.f32.mrf.mxu1  ;;  %v9899_v7 = vld [vmem:[#allocation7 + $0x58] sm:$0xf0]  ;;  %v14589_v8 = vld [vmem:[#allocation7 + $0x1c4] sm:$0xf] }
 0x109   :  { %2328 = vmatpush.bf16.msra.mxu3 %v10450_v21  ;;  %2287 = vmatmul.bf16.vlgmr.msra.gmra.mxu0 %v16121_v57  ;;  %v14748_v21 = vld [vmem:[#allocation7 + $0x6b4] sm:$0xf0] }
 0x10a   :  { %2335 = vmatpush.bf16.msrb.mxu0 %v10810_v24  ;;  %2301 = vmatmul.bf16.vlgmr.msra.gmra.mxu1 %v16124_v6  ;;  %v10905_v24 = vld [vmem:[#allocation7 + $0x820] sm:$0xf]  ;;  %v10714_v33 = vor.u32 %v14748_v21, %v10713_v20  ;;  %v14535_v20 = vld [vmem:[#allocation7 + $0x14] sm:$0xf]  ;;  %v10094_v21 = vor.u32 %v14589_v8, %v10091_v9  ;;  %v10379_v8 = vld [vmem:[#allocation7 + $0x418] sm:$0xf0] }
 0x10b   :  { %2349 = vmatpush.bf16.msrb.mxu1 %v11002_v25  ;;  %2315 = vmatmul.bf16.vlgmr.msra.gmra.mxu2 %v16127_v22  ;;  %v10166_v25 = vor.u32 %v14607_v11, %v10163_v13  ;;  %v10906_v45 = vor.u32 %v14796_v27, %v10905_v24  ;;  %v10641_v13 = vld [vmem:[#allocation7 + $0x610] sm:$0xf]  ;;  %v9875_v24 = vld [vmem:[#allocation7 + $0x28] sm:$0xf0]  ;;  %v14673_v27 = vld [vmem:[#allocation7 + $0x464] sm:$0xf] }
 0x10c   :  { %2363 = vmatpush.bf16.msrb.mxu2 %v10046_v26  ;;  %2329 = vmatmul.bf16.vlgmr.msra.gmra.mxu3 %v16129_v23  ;;  %v2079_v26 = vadd.f32 %v2078_v18, %v2065_v14  ;;  %v14730_v14 = vld [vmem:[#allocation7 + $0x624] sm:$0xf0]  ;;  %v9878_v37 = vor.u32 %v14535_v20, %v9875_v24  ;;  %v14709_v9 = vld [vmem:[#allocation7 + $0x584] sm:$0xf] }
 0x10d   :  { %2377 = vmatpush.bf16.msrb.mxu3 %v10238_v30  ;;  %v14601_v30 = vld [vmem:[#allocation7 + $0x224] sm:$0xf]  ;;  %v14778_v18 = vld [vmem:[#allocation7 + $0x7a4] sm:$0xf0] }
 0x10e   :  { %2336 = vmatpush.bf16.msrb.mxu0 %v10786_v40  ;;  %v10881_v40 = vld [vmem:[#allocation7 + $0x7f0] sm:$0xf] }
 0x10f   :  { %2350 = vmatpush.bf16.msrb.mxu1 %v10978_v42  ;;  %v10142_v42 = vor.u32 %v14601_v30, %v10139_v32  ;;  %v2106_v50 = vpop.f32.mrf.mxu3  ;;  %v10642_v30 = vor.u32 %v14730_v14, %v10641_v13  ;;  %v10619_v32 = vld [vmem:[#allocation7 + $0x5f8] sm:$0xf0] }
 0x110   :  { %2364 = vmatpush.bf16.msrb.mxu2 %v10022_v43  ;;  %v2092_v43 = vpop.f32.mrf.mxu2  ;;  %v10571_v14 = vld [vmem:[#allocation7 + $0x598] sm:$0xf0] }
 0x111   :  { %2378 = vmatpush.bf16.msrb.mxu3 %v10214_v49  ;;  %v2093_v49 = vadd.f32 %v2092_v43, %v2079_v26  ;;  %v10067_v26 = vld [vmem:[#allocation7 + $0x1a8] sm:$0xf0]  ;;  %v10430_v43 = vor.u32 %v14673_v27, %v10427_v28  ;;  %v10574_v24 = vor.u32 %v14709_v9, %v10571_v14  ;;  %v14703_v28 = vld [vmem:[#allocation7 + $0x554] sm:$0xf] }
 0x112   :  { %2337 = vmatpush.bf16.msrb.mxu0 %v10762_v56  ;;  %v10882_v56 = vor.u32 %v14790_v44, %v10881_v40  ;;  %v11003_v40 = vld [vmem:[#allocation7 + $0x8f8] sm:$0xf0]  ;;  %v10622_v44 = vor.u32 %v14721_v29, %v10619_v32  ;;  %v10355_v27 = vld [vmem:[#allocation7 + $0x3e8] sm:$0xf0]  ;;  %v14751_v32 = vld [vmem:[#allocation7 + $0x6d4] sm:$0xf] }
 0x113   :  { %2351 = vmatpush.bf16.msrb.mxu1 %v10954_v60  ;;  %v16195_v55 = vadd.f32 %v2106_v50, %v2093_v49  ;;  %v9926_v60 = vor.u32 %v14547_v47, %v9923_v48  ;;  %v14667_v48 = vld [vmem:[#allocation7 + $0x434] sm:$0xf]  ;;  %v10403_v49 = vld [vmem:[#allocation7 + $0x448] sm:$0xf0]  ;;  %v11006_v51 = vor.u32 %v14817_v38, %v11003_v40 }
 0x114   :  { %2365 = vmatpush.bf16.msrb.mxu2 %v9998_v61  ;;  %v10665_v61 = vld [vmem:[#allocation7 + $0x640] sm:$0xf]  ;;  %v14715_v50 = vld [vmem:[#allocation7 + $0x5b4] sm:$0xf]  ;;  %v10499_v14 = vld [vmem:[#allocation7 + $0x508] sm:$0xf0] }
 0x115   :  { %2379 = vmatpush.bf16.msrb.mxu3 %v10190_v4  ;;  %v14784_v4 = vld [vmem:[#allocation7 + $0x7d4] sm:$0xf0]  ;;  %v10666_v11 = vor.u32 %v14736_v63, %v10665_v61  ;;  %v14811_v61 = vld [vmem:[#allocation7 + $0x8b4] sm:$0xf]  ;;  %v10979_v63 = vld [vmem:[#allocation7 + $0x8c8] sm:$0xf0] }
 0x116   :  { %2338 = vmatpush.bf16.msrb.mxu0 %v10738_v10  ;;  %v10858_v10 = vor.u32 %v14784_v4, %v10857_v0  ;;  %v10406_v0 = vor.u32 %v14667_v48, %v10403_v49  ;;  %v16199_v4 = vpop.f32.mrf.mxu1  ;;  %v10982_v13 = vor.u32 %v14811_v61, %v10979_v63  ;;  %v14697_v48 = vld [vmem:[#allocation7 + $0x524] sm:$0xf]  ;;  %v10907_v63 = vld [vmem:[#allocation7 + $0x838] sm:$0xf0]  ;;  %v14691_v9 = vld [vmem:[#allocation7 + $0x4f4] sm:$0xf] }
 0x117   :  { %2352 = vmatpush.bf16.msrb.mxu1 %v10930_v15  ;;  %v9902_v15 = vor.u32 %v14541_v5, %v9899_v7  ;;  %v10598_v5 = vor.u32 %v14715_v50, %v10595_v52  ;;  %v14745_v52 = vld [vmem:[#allocation7 + $0x6a4] sm:$0xf] }
 0x118   :  { %2366 = vmatpush.bf16.msrb.mxu2 %v9974_v16  ;;  %v10833_v16 = vld [vmem:[#allocation7 + $0x790] sm:$0xf]  ;;  %v16208_v29 = vpop.f32.mrf.mxu2  ;;  %v14793_v61 = vld [vmem:[#allocation7 + $0x824] sm:$0xf] }
 0x119   :  { %2380 = vmatpush.bf16.msrb.mxu3 %v10166_v25  ;;  %v14583_v25 = vld [vmem:[#allocation7 + $0x194] sm:$0xf] }
 0x11a   :  { %2339 = vmatpush.bf16.msrb.mxu0 %v10714_v33  ;;  %v14769_v33 = vld [vmem:[#allocation7 + $0x764] sm:$0xf] }
 0x11b   :  { %2353 = vmatpush.bf16.msrb.mxu1 %v10906_v45  ;;  %v10811_v45 = vld [vmem:[#allocation7 + $0x778] sm:$0xf0] }
 0x11c   :  { %2367 = vmatpush.bf16.msrb.mxu2 %v9950_v34  ;;  %v10834_v34 = vor.u32 %v14778_v18, %v10833_v16  ;;  %v10814_v47 = vor.u32 %v14769_v33, %v10811_v45  ;;  %v14805_v16 = vld [vmem:[#allocation7 + $0x884] sm:$0xf]  ;;  %v10955_v18 = vld [vmem:[#allocation7 + $0x898] sm:$0xf0]  ;;  %v10739_v33 = vld [vmem:[#allocation7 + $0x6e8] sm:$0xf0]  ;;  %v16210_v45 = vpop.f32.mrf.mxu3 }
 0x11d   :  { %2381 = vmatpush.bf16.msrb.mxu3 %v10142_v42  ;;  %v10070_v42 = vor.u32 %v14583_v25, %v10067_v26  ;;  %v14655_v26 = vld [vmem:[#allocation7 + $0x3d4] sm:$0xf] }
 0x11e   :  { %2340 = vmatpush.bf16.msrb.mxu0 %v10690_v53  ;;  %v14763_v53 = vld [vmem:[#allocation7 + $0x734] sm:$0xf]  ;;  %v10358_v38 = vor.u32 %v14655_v26, %v10355_v27  ;;  %v10502_v27 = vor.u32 %v14691_v9, %v10499_v14 }
 0x11f   :  { %2354 = vmatpush.bf16.msrb.mxu1 %v10882_v56  ;;  %v10787_v56 = vld [vmem:[#allocation7 + $0x748] sm:$0xf0] }
 0x120   :  { %2368 = vmatpush.bf16.msrb.mxu2 %v9926_v60  ;;  %v16197_v60 = vpop.f32.mrf.mxu0  ;;  %v10790_v7 = vor.u32 %v14763_v53, %v10787_v56  ;;  %v10715_v53 = vld [vmem:[#allocation7 + $0x6b8] sm:$0xf0] }
 0x121   :  { %2382 = vmatpush.bf16.msrb.mxu3 %v10118_v3  ;;  %v14661_v3 = vld [vmem:[#allocation7 + $0x404] sm:$0xf] }
 0x122   :  { %2341 = vmatpush.bf16.msrb.mxu0 %v10666_v11  ;;  %v16201_v11 = vld [vmem:[#allocation14 + $0x10] sm:$0xff]  ;;  %v10382_v20 = vor.u32 %v14661_v3, %v10379_v8  ;;  %v10307_v8 = vld [vmem:[#allocation7 + $0x388] sm:$0xf0] }
 0x123   :  { %2355 = vmatpush.bf16.msrb.mxu1 %v10858_v10  ;;  %v14757_v10 = vld [vmem:[#allocation7 + $0x704] sm:$0xf] }
 0x124   :  { %2369 = vmatpush.bf16.msrb.mxu2 %v9902_v15  ;;  %v10763_v15 = vld [vmem:[#allocation7 + $0x718] sm:$0xf0] }
 0x125   :  { %2383 = vmatpush.bf16.msrb.mxu3 %v10094_v21  ;;  %v469_v21 = vperm.slane %v16201_v11, 0  ;;  %v10766_v25 = vor.u32 %v14757_v10, %v10763_v15  ;;  %v14739_v10 = vld [vmem:[#allocation7 + $0x674] sm:$0xf]  ;;  %v10691_v15 = vld [vmem:[#allocation7 + $0x688] sm:$0xf0] }
 0x126   :  { %2342 = vmatpush.bf16.msrb.mxu0 %v10642_v30  ;;  %v10958_v30 = vor.u32 %v14805_v16, %v10955_v18  ;;  %v14787_v18 = vld [vmem:[#allocation7 + $0x7f4] sm:$0xf] }
 0x127   :  { %2356 = vmatpush.bf16.msrb.mxu1 %v10834_v34  ;;  %v14799_v34 = vld [vmem:[#allocation7 + $0x854] sm:$0xf]  ;;  %v2134_v49 = vpop.f32.mrf.mxu1 }
 0x128   :  { %2370 = vmatpush.bf16.msrb.mxu2 %v9878_v37  ;;  %v2120_v37 = vpop.f32.mrf.mxu0 }
 0x129   :  { %2384 = vmatpush.bf16.msrb.mxu3 %v10070_v42  ;;  %2343 = vmatmul.bf16.vlgmr.msrb.gmra.mxu0 %v16133_v35  ;;  %v2121_v40 = vadd.f32 %v2120_v37, %v469_v21  ;;  %v14733_v37 = vld [vmem:[#allocation7 + $0x644] sm:$0xf] }
 0x12a   :  { %2391 = vmatpush.bf16.msra.mxu0 %v10430_v43  ;;  %2357 = vmatmul.bf16.vlgmr.msrb.gmra.mxu1 %v16135_v39  ;;  %v10742_v43 = vor.u32 %v14751_v32, %v10739_v33  ;;  %v14685_v32 = vld [vmem:[#allocation7 + $0x4c4] sm:$0xf] }
 0x12b   :  { %2405 = vmatpush.bf16.msra.mxu1 %v10622_v44  ;;  %2371 = vmatmul.bf16.vlgmr.msrb.gmra.mxu2 %v16121_v57  ;;  %v10547_v57 = vld [vmem:[#allocation7 + $0x568] sm:$0xf0]  ;;  %v14649_v44 = vld [vmem:[#allocation7 + $0x3a4] sm:$0xf]  ;;  %v2135_v56 = vadd.f32 %v2134_v49, %v2121_v40 }
 0x12c   :  { %2419 = vmatpush.bf16.msra.mxu2 %v10814_v47  ;;  %2385 = vmatmul.bf16.vlgmr.msrb.gmra.mxu3 %v16124_v6  ;;  %v10931_v6 = vld [vmem:[#allocation7 + $0x868] sm:$0xf0]  ;;  %v10550_v42 = vor.u32 %v14703_v28, %v10547_v57  ;;  %v10331_v47 = vld [vmem:[#allocation7 + $0x3b8] sm:$0xf0]  ;;  %v10694_v28 = vor.u32 %v14739_v10, %v10691_v15  ;;  %v14781_v40 = vld [vmem:[#allocation7 + $0x7c4] sm:$0xf] }
 0x12d   :  { %2433 = vmatpush.bf16.msra.mxu3 %v11006_v51  ;;  %v10934_v50 = vor.u32 %v14799_v34, %v10931_v6  ;;  %v10523_v51 = vld [vmem:[#allocation7 + $0x538] sm:$0xf0]  ;;  %v10259_v49 = vld [vmem:[#allocation7 + $0x328] sm:$0xf0] }
 0x12e   :  { %2392 = vmatpush.bf16.msra.mxu0 %v10406_v0  ;;  %v10334_v0 = vor.u32 %v14649_v44, %v10331_v47  ;;  %v10526_v3 = vor.u32 %v14697_v48, %v10523_v51  ;;  %v2148_v16 = vpop.f32.mrf.mxu2  ;;  %v10283_v57 = vld [vmem:[#allocation7 + $0x358] sm:$0xf0]  ;;  %v14631_v48 = vld [vmem:[#allocation7 + $0x314] sm:$0xf] }
 0x12f   :  { %2406 = vmatpush.bf16.msra.mxu1 %v10598_v5  ;;  %v10718_v5 = vor.u32 %v14745_v52, %v10715_v53  ;;  %v10475_v6 = vld [vmem:[#allocation7 + $0x4d8] sm:$0xf0]  ;;  %v10451_v52 = vld [vmem:[#allocation7 + $0x4a8] sm:$0xf0]  ;;  %v14727_v53 = vld [vmem:[#allocation7 + $0x614] sm:$0xf]  ;;  %v2136_v9 = vpop.f32.mrf.mxu1 }
 0x130   :  { %2420 = vmatpush.bf16.msra.mxu2 %v10790_v7  ;;  %v14643_v7 = vld [vmem:[#allocation7 + $0x374] sm:$0xf]  ;;  %v10478_v44 = vor.u32 %v14685_v32, %v10475_v6 }
 0x131   :  { %2434 = vmatpush.bf16.msra.mxu3 %v10982_v13  ;;  %v10910_v13 = vor.u32 %v14793_v61, %v10907_v63  ;;  %v10310_v26 = vor.u32 %v14643_v7, %v10307_v8  ;;  %v14775_v61 = vld [vmem:[#allocation7 + $0x794] sm:$0xf]  ;;  %v10835_v63 = vld [vmem:[#allocation7 + $0x7a8] sm:$0xf0]  ;;  %v2122_v8 = vpop.f32.mrf.mxu0 }
 0x132   :  { %2393 = vmatpush.bf16.msra.mxu0 %v10382_v20  ;;  %v10883_v20 = vld [vmem:[#allocation7 + $0x808] sm:$0xf0]  ;;  %v10838_v7 = vor.u32 %v14775_v61, %v10835_v63  ;;  %v2123_v63 = vadd.f32 %v2122_v8, %v469_v21 }
 0x133   :  { %2407 = vmatpush.bf16.msra.mxu1 %v10574_v24  ;;  %v2149_v24 = vadd.f32 %v2148_v16, %v2135_v56  ;;  %v10886_v34 = vor.u32 %v14787_v18, %v10883_v20  ;;  %v10643_v56 = vld [vmem:[#allocation7 + $0x628] sm:$0xf0] }
 0x134   :  { %2421 = vmatpush.bf16.msra.mxu2 %v10766_v25  ;;  %v2162_v25 = vpop.f32.mrf.mxu3 }
 0x135   :  { %2435 = vmatpush.bf16.msra.mxu3 %v10958_v30  ;;  %v14637_v30 = vld [vmem:[#allocation7 + $0x344] sm:$0xf]  ;;  %v16214_v33 = vadd.f32 %v2162_v25, %v2149_v24 }
 0x136   :  { %2394 = vmatpush.bf16.msra.mxu0 %v10358_v38  ;;  %v10667_v38 = vld [vmem:[#allocation7 + $0x658] sm:$0xf0] }
 0x137   :  { %2408 = vmatpush.bf16.msra.mxu1 %v10550_v42  ;;  %v10859_v42 = vld [vmem:[#allocation7 + $0x7d8] sm:$0xf0]  ;;  %v10670_v47 = vor.u32 %v14733_v37, %v10667_v38 }
 0x138   :  { %2422 = vmatpush.bf16.msra.mxu2 %v10742_v43  ;;  %v10286_v43 = vor.u32 %v14637_v30, %v10283_v57  ;;  %v10862_v51 = vor.u32 %v14781_v40, %v10859_v42  ;;  %v16238_v38 = vld [vmem:[#allocation14 + $0x18] sm:$0xff]  ;;  %v16240_v42 = vld [vmem:[#allocation14 + $0x20] sm:$0xff] }
 0x139   :  { %2436 = vmatpush.bf16.msra.mxu3 %v10934_v50  ;;  %v14679_v50 = vld [vmem:[#allocation7 + $0x494] sm:$0xf] }
 0x13a   :  { %2395 = vmatpush.bf16.msra.mxu0 %v10334_v0  ;;  %v10262_v0 = vor.u32 %v14631_v48, %v10259_v49  ;;  %v1955_v48 = vadd.f32 %v16160_v19, %v467_v54 }
 0x13b   :  { %2409 = vmatpush.bf16.msra.mxu1 %v10526_v3  ;;  %v10454_v3 = vor.u32 %v14679_v50, %v10451_v52 }
 0x13c   :  { %2423 = vmatpush.bf16.msra.mxu2 %v10718_v5  ;;  %v10646_v5 = vor.u32 %v14727_v53, %v10643_v56  ;;  %v16220_v14 = vpop.f32.mrf.mxu3  ;;  %v1969_v53 = vadd.f32 %v16162_v31, %v1955_v48  ;;  %v2039_v56 = vadd.f32 %v16189_v58, %v468_v17  ;;  %v16259_v48 = vld [vmem:[#allocation14 + $0x28] sm:$0xff] }
 0x13d   :  { %2437 = vmatpush.bf16.msra.mxu3 %v10910_v13  ;;  %v2150_v13 = vpop.f32.mrf.mxu2 }
 0x13e   :  { %2396 = vmatpush.bf16.msra.mxu0 %v10310_v26  ;;  %v1983_v54 = vadd.f32 %v16168_v59, %v1969_v53  ;;  %v2053_v19 = vadd.f32 %v16192_v62, %v2039_v56  ;;  %v162_v62 = vld [vmem:[#allocation2 + $0x8] sm:$0xff]  ;;  %v15009_v53 = vld [vmem:[#allocation8 + $0x5dc] sm:$0xf0] }
 0x13f   :  { %2410 = vmatpush.bf16.msra.mxu1 %v10502_v27 }
 0x140   :  { %2424 = vmatpush.bf16.msra.mxu2 %v10694_v28  ;;  %v1997_v11 = vadd.f32 %v16171_v1, %v1983_v54  ;;  %v2067_v21 = vadd.f32 %v16197_v60, %v2053_v19 }
 0x141   :  { %2438 = vmatpush.bf16.msra.mxu3 %v10886_v34 }
 0x142   :  { %2397 = vmatpush.bf16.msra.mxu0 %v10286_v43  ;;  %v470_v43 = vperm.slane %v16238_v38, 0  ;;  %v2011_v1 = vadd.f32 %v16182_v36, %v1997_v11  ;;  %v2081_v60 = vadd.f32 %v16199_v4, %v2067_v21  ;;  %v15001_v11 = vld [vmem:[#allocation8 + $0x59c] sm:$0xf0] }
 0x143   :  { %2411 = vmatpush.bf16.msra.mxu1 %v10478_v44  ;;  %v11969_v21 = vld [vmem:[#allocation8 + $0x780] sm:$0xf] }
 0x144   :  { %2425 = vmatpush.bf16.msra.mxu2 %v10670_v47  ;;  %v471_v47 = vperm.slane %v16240_v42, 0 }
 0x145   :  { %2439 = vmatpush.bf16.msra.mxu3 %v10862_v51 }
 0x146   :  { %2398 = vmatpush.bf16.msra.mxu0 %v10262_v0  ;;  %v2176_v10 = vpop.f32.mrf.mxu0 }
 0x147   :  { %2412 = vmatpush.bf16.msra.mxu1 %v10454_v3  ;;  %v16222_v15 = vpop.f32.mrf.mxu1 }
 0x148   :  { %2426 = vmatpush.bf16.msra.mxu2 %v10646_v5  ;;  %v161_v5 = vld [vmem:[#allocation2] sm:$0xff] }
 0x149   :  { %2440 = vmatpush.bf16.msra.mxu3 %v10838_v7  ;;  %2399 = vmatmul.bf16.vlgmr.msra.gmra.mxu0 %v16127_v22  ;;  %v2137_v7 = vadd.f32 %v2136_v9, %v2123_v63  ;;  %v16262_v58 = vadd.f32 %v16175_v12, %v161_v5  ;;  %v2177_v9 = vadd.f32 %v2176_v10, %v16214_v33  ;;  %v163_v10 = vld [vmem:[#allocation2 + $0x10] sm:$0xff] }
 0x14a   :  { %2413 = vmatmul.bf16.vlgmr.msra.gmra.mxu1 %v16129_v23  ;;  %v16277_v33 = vadd.f32 %v16195_v55, %v162_v62  ;;  %v15073_v55 = vld [vmem:[#allocation8 + $0x7dc] sm:$0xf0] }
 0x14b   :  { %2427 = vmatmul.bf16.vlgmr.msra.gmra.mxu2 %v16133_v35  ;;  %v2151_v59 = vadd.f32 %v2150_v13, %v2137_v7  ;;  %v16272_v12 = vmul.f32 %v16262_v58, %v16262_v58  ;;  %v11233_v13 = vld [vmem:[#allocation8 + $0x1c0] sm:$0xf]  ;;  %v2191_v36 = vadd.f32 %v16222_v15, %v2177_v9  ;;  %v164_v15 = vld [vmem:[#allocation2 + $0x18] sm:$0xff] }
 0x14c   :  { %2441 = vmatmul.bf16.vlgmr.msra.gmra.mxu3 %v16135_v39  ;;  %v14873_v5 = vld [vmem:[#allocation8 + $0x19c] sm:$0xf0] }
 0x14d   :  { %v11457_v7 = vld [vmem:[#allocation8 + $0x380] sm:$0xf] }
 0x14e   :  { %v2204_v16 = vpop.f32.mrf.mxu2  ;;  %v16224_v20 = vpop.f32.mrf.mxu0  ;;  %v11169_v62 = vld [vmem:[#allocation8 + $0x140] sm:$0xf] }
 0x14f   :  { %v2218_v18 = vpop.f32.mrf.mxu3  ;;  %v16226_v24 = vpop.f32.mrf.mxu1  ;;  %v2205_v49 = vadd.f32 %v2204_v16, %v470_v43  ;;  %v14865_v9 = vld [vmem:[#allocation8 + $0x15c] sm:$0xf0] }
 0x151   :  { %v2219_v0 = vadd.f32 %v2218_v18, %v2205_v49  ;;  %v14945_v49 = vld [vmem:[#allocation8 + $0x3dc] sm:$0xf0] }
 0x156   :  { %v2206_v22 = vpop.f32.mrf.mxu2 }
 0x157   :  { %v2220_v23 = vpop.f32.mrf.mxu3  ;;  %v2207_v31 = vadd.f32 %v2206_v22, %v470_v43  ;;  %v472_v22 = vperm.slane %v16259_v48, 0  ;;  %v11489_v43 = vld [vmem:[#allocation8 + $0x3c0] sm:$0xf] }
 0x158   :  { %v11490_v56 = vor.u32 %v14945_v49, %v11489_v43  ;;  %v14929_v49 = vld [vmem:[#allocation8 + $0x35c] sm:$0xf0] }
 0x15a   :  { %4928 = vmatpush.bf16.msrb.mxu1 %v11490_v56  ;;  %v14857_v56 = vld [vmem:[#allocation8 + $0x11c] sm:$0xf0] }
 0x166   :  { %v2232_v25 = vpop.f32.mrf.mxu0 }
 0x167   :  { %v2246_v35 = vpop.f32.mrf.mxu1  ;;  %v2233_v16 = vadd.f32 %v2232_v25, %v2219_v0  ;;  %v12001_v0 = vld [vmem:[#allocation8 + $0x7c0] sm:$0xf] }
 0x168   :  { %v12002_v19 = vor.u32 %v15073_v55, %v12001_v0 }
 0x169   :  { %v2247_v18 = vadd.f32 %v2246_v35, %v2233_v16  ;;  %v14881_v35 = vld [vmem:[#allocation8 + $0x1dc] sm:$0xf0] }
 0x16a   :  { %v14937_v16 = vld [vmem:[#allocation8 + $0x39c] sm:$0xf0]  ;;  %4956 = vmatpush.bf16.msrb.mxu3 %v12002_v19 }
 0x16e   :  { %v2260_v26 = vpop.f32.mrf.mxu2  ;;  %v16230_v27 = vpop.f32.mrf.mxu0 }
 0x16f   :  { %v16228_v39 = vpop.f32.mrf.mxu3  ;;  %v16232_v28 = vpop.f32.mrf.mxu1 }
 0x176   :  { %v16234_v30 = vpop.f32.mrf.mxu2 }
 0x177   :  { %v16236_v57 = vpop.f32.mrf.mxu3 }
 0x186   :  { %v2288_v32 = vpop.f32.mrf.mxu0 }
 0x187   :  { %v2302_v34 = vpop.f32.mrf.mxu1  ;;  %v2289_v52 = vadd.f32 %v2288_v32, %v471_v47 }
 0x189   :  { %v2303_v3 = vadd.f32 %v2302_v34, %v2289_v52  ;;  %v2221_v34 = vadd.f32 %v2220_v23, %v2207_v31  ;;  %v2261_v23 = vadd.f32 %v2260_v26, %v2247_v18  ;;  %v11745_v52 = vld [vmem:[#allocation8 + $0x5c0] sm:$0xf]  ;;  %v16287_v31 = vadd.f32 %v16184_v41, %v2011_v1 }
 0x18a   :  { %v11746_v63 = vor.u32 %v15009_v53, %v11745_v52  ;;  %v15065_v41 = vld [vmem:[#allocation8 + $0x79c] sm:$0xf0]  ;;  %v11170_v52 = vor.u32 %v14865_v9, %v11169_v62 }
 0x18b   :  { %v2235_v54 = vadd.f32 %v16230_v27, %v2221_v34  ;;  %v2483_v27 = vmul.f32 %v16277_v33, %v16277_v33  ;;  %v16293_v34 = vadd.f32 %v2191_v36, %v163_v10  ;;  %v11970_v43 = vor.u32 %v15065_v41, %v11969_v21  ;;  %v14993_v10 = vld [vmem:[#allocation8 + $0x55c] sm:$0xf0] }
 0x18c   :  { %4942 = vmatpush.bf16.msrb.mxu2 %v11746_v63  ;;  %v11937_v53 = vld [vmem:[#allocation8 + $0x740] sm:$0xf] }
 0x18d   :  { %v15057_v36 = vld [vmem:[#allocation8 + $0x75c] sm:$0xf0]  ;;  %4957 = vmatpush.bf16.msrb.mxu3 %v11970_v43  ;;  %v2484_v19 = vmul.f32 %v16293_v34, %v16293_v34  ;;  %v166_v43 = vld [vmem:[#allocation2 + $0x28] sm:$0xff] }
 0x18e   :  { %v2316_v6 = vpop.f32.mrf.mxu2  ;;  %v2290_v40 = vpop.f32.mrf.mxu0  ;;  %v11393_v63 = vld [vmem:[#allocation8 + $0x300] sm:$0xf]  ;;  %v11938_v55 = vor.u32 %v15057_v36, %v11937_v53 }
 0x18f   :  { %v2330_v37 = vpop.f32.mrf.mxu3  ;;  %v2304_v44 = vpop.f32.mrf.mxu1  ;;  %v2291_v32 = vadd.f32 %v2290_v40, %v471_v47  ;;  %v2317_v2 = vadd.f32 %v2316_v6, %v2303_v3  ;;  %v2165_v47 = vadd.f32 %v16220_v14, %v2151_v59  ;;  %v11201_v3 = vld [vmem:[#allocation8 + $0x180] sm:$0xf] }
 0x191   :  { %v2305_v6 = vadd.f32 %v2304_v44, %v2291_v32  ;;  %v2331_v40 = vadd.f32 %v2330_v37, %v2317_v2  ;;  %v11234_v37 = vor.u32 %v14881_v35, %v11233_v13  ;;  %v11202_v32 = vor.u32 %v14873_v5, %v11201_v3  ;;  %v14921_v3 = vld [vmem:[#allocation8 + $0x31c] sm:$0xf0]  ;;  %4958 = vmatpush.bf16.msrb.mxu3 %v11938_v55 }
 0x192   :  { %v11458_v2 = vor.u32 %v14937_v16, %v11457_v7  ;;  %v2494_v16 = vadd.f32 %v2483_v27, %v16272_v12 }
 0x193   :  { %4914 = vmatpush.bf16.msrb.mxu0 %v11234_v37  ;;  %v11425_v37 = vld [vmem:[#allocation8 + $0x340] sm:$0xf] }
 0x194   :  { %4929 = vmatpush.bf16.msrb.mxu1 %v11458_v2 }
 0x196   :  { %v2318_v50 = vpop.f32.mrf.mxu2 }
 0x197   :  { %v16247_v51 = vpop.f32.mrf.mxu3  ;;  %v2319_v26 = vadd.f32 %v2318_v50, %v2305_v6  ;;  %v2095_v50 = vadd.f32 %v16208_v29, %v2081_v60  ;;  %v2179_v6 = vadd.f32 %v16224_v20, %v2165_v47  ;;  %v11681_v29 = vld [vmem:[#allocation8 + $0x540] sm:$0xf]  ;;  %4915 = vmatpush.bf16.msrb.mxu0 %v11202_v32 }
 0x198   :  { %v11682_v47 = vor.u32 %v14993_v10, %v11681_v29  ;;  %v167_v32 = vld [vmem:[#allocation2 + $0x30] sm:$0xff]  ;;  %v2495_v29 = vadd.f32 %v2494_v16, %v2484_v19 }
 0x199   :  { %v2193_v2 = vadd.f32 %v16226_v24, %v2179_v6 }
 0x19b   :  { %4916 = vmatpush.bf16.msrb.mxu0 %v11170_v52 }
 0x1a6   :  { %v2344_v61 = vpop.f32.mrf.mxu0 }
 0x1a7   :  { %v16255_v46 = vpop.f32.mrf.mxu1  ;;  %v2345_v14 = vadd.f32 %v2344_v61, %v2331_v40  ;;  %v2275_v61 = vadd.f32 %v16228_v39, %v2261_v23  ;;  %v165_v40 = vld [vmem:[#allocation2 + $0x20] sm:$0xff]  ;;  %v2249_v39 = vadd.f32 %v16232_v28, %v2235_v54  ;;  %v2333_v23 = vadd.f32 %v16247_v51, %v2319_v26  ;;  %v11649_v54 = vld [vmem:[#allocation8 + $0x500] sm:$0xf]  ;;  %v168_v26 = vld [vmem:[#allocation2 + $0x38] sm:$0xff] }
 0x1a8   :  { %v2459_v28 = vadd.f32 %v16277_v33, %v16262_v58 }
 0x1a9   :  { %v2359_v60 = vadd.f32 %v16255_v46, %v2345_v14  ;;  %v2109_v46 = vadd.f32 %v16210_v45, %v2095_v50  ;;  %v16302_v0 = vadd.f32 %v2275_v61, %v164_v15  ;;  %v14985_v14 = vld [vmem:[#allocation8 + $0x51c] sm:$0xf0]  ;;  %v2263_v5 = vadd.f32 %v16234_v30, %v2249_v39  ;;  %v169_v50 = vld [vmem:[#allocation2 + $0x40] sm:$0xff] }
 0x1aa   :  { %v11905_v45 = vld [vmem:[#allocation8 + $0x700] sm:$0xf]  ;;  %v11394_v30 = vor.u32 %v14921_v3, %v11393_v63  ;;  %v2460_v27 = vadd.f32 %v2459_v28, %v16293_v34 }
 0x1ab   :  { %v15049_v15 = vld [vmem:[#allocation8 + $0x71c] sm:$0xf0]  ;;  %v2485_v24 = vmul.f32 %v16302_v0, %v16302_v0  ;;  %v2277_v41 = vadd.f32 %v16236_v57, %v2263_v5 }
 0x1ae   :  { %v2372_v17 = vpop.f32.mrf.mxu2  ;;  %v16267_v25 = vpop.f32.mrf.mxu0 }
 0x1af   :  { %v2386_v8 = vpop.f32.mrf.mxu3  ;;  %v16280_v44 = vpop.f32.mrf.mxu1  ;;  %v2373_v4 = vadd.f32 %v2372_v17, %v472_v22  ;;  %v11713_v17 = vld [vmem:[#allocation8 + $0x580] sm:$0xf] }
 0x1b0   :  { %v11714_v18 = vor.u32 %v15001_v11, %v11713_v17  ;;  %v16311_v17 = vadd.f32 %v2359_v60, %v165_v40  ;;  %v2347_v11 = vadd.f32 %v16267_v25, %v2333_v23  ;;  %v16320_v25 = vadd.f32 %v16287_v31, %v167_v32 }
 0x1b1   :  { %v2387_v1 = vadd.f32 %v2386_v8, %v2373_v4  ;;  %v11426_v8 = vor.u32 %v14929_v49, %v11425_v37  ;;  %v11137_v4 = vld [vmem:[#allocation8 + $0x100] sm:$0xf]  ;;  %v2461_v37 = vadd.f32 %v2460_v27, %v16302_v0  ;;  %v2496_v23 = vadd.f32 %v2495_v29, %v2485_v24 }
 0x1b2   :  { %4943 = vmatpush.bf16.msrb.mxu2 %v11714_v18  ;;  %v11138_v21 = vor.u32 %v14857_v56, %v11137_v4  ;;  %v11650_v18 = vor.u32 %v14985_v14, %v11649_v54  ;;  %v2486_v49 = vmul.f32 %v16311_v17, %v16311_v17  ;;  %v2361_v31 = vadd.f32 %v16280_v44, %v2347_v11  ;;  %v11361_v27 = vld [vmem:[#allocation8 + $0x2c0] sm:$0xf] }
 0x1b3   :  { %4930 = vmatpush.bf16.msrb.mxu1 %v11426_v8  ;;  %v2462_v53 = vadd.f32 %v2461_v37, %v16311_v17  ;;  %v2488_v36 = vmul.f32 %v16320_v25, %v16320_v25 }
 0x1b4   :  { %4917 = vmatpush.bf16.msrb.mxu0 %v11138_v21 }
 0x1b6   :  { %v2374_v59 = vpop.f32.mrf.mxu2  ;;  %4944 = vmatpush.bf16.msrb.mxu2 %v11682_v47  ;;  %v2497_v47 = vadd.f32 %v2496_v23, %v2486_v49  ;;  %v11073_v49 = vld [vmem:[#allocation8 + $0x80] sm:$0xf] }
 0x1b7   :  { %v2388_v13 = vpop.f32.mrf.mxu3  ;;  %v2375_v7 = vadd.f32 %v2374_v59, %v472_v22  ;;  %v16314_v22 = vadd.f32 %v2109_v46, %v168_v26  ;;  %v11906_v59 = vor.u32 %v15049_v15, %v11905_v45  ;;  %4931 = vmatpush.bf16.msrb.mxu1 %v11394_v30  ;;  %v172_v26 = vld [vmem:[#allocation2 + $0x58] sm:$0xff]  ;;  %v16038_v30 = vmov 768.0  }
 0x1b8   :  { %15721 = vrcp.f32 %v16038_v30  ;;  %v11777_v30 = vld [vmem:[#allocation8 + $0x600] sm:$0xf] }
 0x1b9   :  { %v2389_v62 = vadd.f32 %v2388_v13, %v2375_v7  ;;  %v2489_v57 = vmul.f32 %v16314_v22, %v16314_v22  ;;  %v171_v13 = vld [vmem:[#allocation2 + $0x50] sm:$0xff]  ;;  %4959 = vmatpush.bf16.msrb.mxu3 %v11906_v59  ;;  %v2466_v44 = vadd.f32 %v16314_v22, %v16320_v25 }
 0x1ba   :  { %4945 = vmatpush.bf16.msrb.mxu2 %v11650_v18  ;;  %v16342_v4 = vadd.f32 %v2361_v31, %v171_v13  ;;  %v11105_v18 = vld [vmem:[#allocation8 + $0xc0] sm:$0xf] }
 0x1bb   :  { %v14913_v59 = vld [vmem:[#allocation8 + $0x2dc] sm:$0xf0] }
 0x1bc   :  { %v2492_v16 = vmul.f32 %v16342_v4, %v16342_v4  ;;  %v14841_v31 = vld [vmem:[#allocation8 + $0x9c] sm:$0xf0] }
 0x1bd   :  { %v11585_v13 = vld [vmem:[#allocation8 + $0x480] sm:$0xf] }
 0x1c6   :  { %v2400_v35 = vpop.f32.mrf.mxu0 }
 0x1c7   :  { %v2401_v20 = vadd.f32 %v2400_v35, %v2387_v1  ;;  %v2414_v51 = vpop.f32.mrf.mxu1  ;;  %v16323_v1 = vadd.f32 %v2193_v2, %v169_v50  ;;  %v170_v35 = vld [vmem:[#allocation2 + $0x48] sm:$0xff] }
 0x1c8   :  { %v16331_v52 = vadd.f32 %v2277_v41, %v170_v35  ;;  %v11617_v41 = vld [vmem:[#allocation8 + $0x4c0] sm:$0xf] }
 0x1c9   :  { %v2415_v61 = vadd.f32 %v2414_v51, %v2401_v20  ;;  %v2490_v20 = vmul.f32 %v16323_v1, %v16323_v1  ;;  %v2501_v51 = vadd.f32 %v2489_v57, %v2488_v36  ;;  %v2467_v54 = vadd.f32 %v2466_v44, %v16323_v1  ;;  %v11873_v35 = vld [vmem:[#allocation8 + $0x6c0] sm:$0xf] }
 0x1ca   :  { %v2491_v14 = vmul.f32 %v16331_v52, %v16331_v52  ;;  %v14905_v57 = vld [vmem:[#allocation8 + $0x29c] sm:$0xf0] }
 0x1cb   :  { %v2468_v7 = vadd.f32 %v2467_v54, %v16331_v52  ;;  %v2502_v45 = vadd.f32 %v2501_v51, %v2490_v20  ;;  %v11841_v36 = vld [vmem:[#allocation8 + $0x680] sm:$0xf] }
 0x1cc   :  { %v15033_v44 = vld [vmem:[#allocation8 + $0x69c] sm:$0xf0] }
 0x1cd   :  { %v2469_v32 = vadd.f32 %v2468_v7, %v16342_v4  ;;  %v2503_v2 = vadd.f32 %v2502_v45, %v2491_v14  ;;  %v11553_v51 = vld [vmem:[#allocation8 + $0x440] sm:$0xf] }
 0x1ce   :  { %v2428_v12 = vpop.f32.mrf.mxu2  ;;  %v2402_v40 = vpop.f32.mrf.mxu0  ;;  %v11809_v14 = vld [vmem:[#allocation8 + $0x640] sm:$0xf] }
 0x1cf   :  { %v2429_v9 = vadd.f32 %v2428_v12, %v2415_v61  ;;  %v2442_v6 = vpop.f32.mrf.mxu3  ;;  %v2403_v60 = vadd.f32 %v2402_v40, %v2389_v62  ;;  %v2416_v8 = vpop.f32.mrf.mxu1  ;;  %v2504_v50 = vadd.f32 %v2503_v2, %v2492_v16  ;;  %v14849_v12 = vld [vmem:[#allocation8 + $0xdc] sm:$0xf0] }
 0x1d0   :  { %v11106_v24 = vor.u32 %v14849_v12, %v11105_v18  ;;  %v14977_v62 = vld [vmem:[#allocation8 + $0x4dc] sm:$0xf0] }
 0x1d1   :  { %v2443_v39 = vadd.f32 %v2442_v6, %v2429_v9  ;;  %v2417_v56 = vadd.f32 %v2416_v8, %v2403_v60  ;;  %v16359_v9 = vpop.eup %15721  ;;  %v11362_v6 = vor.u32 %v14913_v59, %v11361_v27  ;;  %v11618_v40 = vor.u32 %v14977_v62, %v11617_v41  ;;  %v11329_v60 = vld [vmem:[#allocation8 + $0x280] sm:$0xf] }
 0x1d2   :  { %4918 = vmatpush.bf16.msrb.mxu0 %v11106_v24  ;;  %v16362_v29 = vmul.f32 768.0, %v16359_v9  ;;  %v11330_v23 = vor.u32 %v14905_v57, %v11329_v60  ;;  %v11842_v8 = vor.u32 %v15033_v44, %v11841_v36  ;;  %v11009_v7 = vld [vmem:[#allocation8] sm:$0xf]  ;;  %v11203_v36 = vld [vmem:[#allocation8 + $0x1a0] sm:$0xf0]  ;;  %vm2478_vm0 = vweird.f32 %v16359_v9 }
 0x1d3   :  { %v16333_v10 = vadd.f32 %v2443_v39, %v166_v43  ;;  %v15041_v43 = vld [vmem:[#allocation8 + $0x6dc] sm:$0xf0]  ;;  %4932 = vmatpush.bf16.msrb.mxu1 %v11362_v6  ;;  %4946 = vmatpush.bf16.msrb.mxu2 %v11618_v40  ;;  %v11074_v39 = vor.u32 %v14841_v31, %v11073_v49  ;;  %v14877_v40 = vld [vmem:[#allocation8 + $0x1c4] sm:$0xf] }
 0x1d4   :  { %v11874_v37 = vor.u32 %v15041_v43, %v11873_v35  ;;  %v14825_v16 = vld [vmem:[#allocation8 + $0x1c] sm:$0xf0]  ;;  %v11235_v35 = vld [vmem:[#allocation8 + $0x1e0] sm:$0xf0] }
 0x1d5   :  { %v2463_v63 = vadd.f32 %v2462_v53, %v16333_v10  ;;  %v2487_v28 = vmul.f32 %v16333_v10, %v16333_v10  ;;  %v14969_v53 = vld [vmem:[#allocation8 + $0x49c] sm:$0xf0]  ;;  %v14941_v43 = vld [vmem:[#allocation8 + $0x3c4] sm:$0xf] }
 0x1d6   :  { %v2430_v46 = vpop.f32.mrf.mxu2  ;;  %4960 = vmatpush.bf16.msrb.mxu3 %v11874_v37  ;;  %4919 = vmatpush.bf16.msrb.mxu0 %v11074_v39  ;;  %v11586_v20 = vor.u32 %v14969_v53, %v11585_v13  ;;  %v11265_v45 = vld [vmem:[#allocation8 + $0x200] sm:$0xf]  ;;  %v11238_v37 = vor.u32 %v14877_v40, %v11235_v35  ;;  %v11491_v49 = vld [vmem:[#allocation8 + $0x3e0] sm:$0xf0] }
 0x1d7   :  { %v2431_v55 = vadd.f32 %v2430_v46, %v2417_v56  ;;  %2464 = vadd.xlane.f32.xlu0 %v2463_v63  ;;  %v2498_v3 = vadd.f32 %v2497_v47, %v2487_v28  ;;  %v2444_v19 = vpop.f32.mrf.mxu3  ;;  %v11041_v47 = vld [vmem:[#allocation8 + $0x40] sm:$0xf]  ;;  %4933 = vmatpush.bf16.msrb.mxu1 %v11330_v23  ;;  %v11494_v39 = vor.u32 %v14941_v43, %v11491_v49  ;;  %v14869_v13 = vld [vmem:[#allocation8 + $0x184] sm:$0xf] }
 0x1d8   :  { %v14833_v56 = vld [vmem:[#allocation8 + $0x5c] sm:$0xf0]  ;;  %4947 = vmatpush.bf16.msrb.mxu2 %v11586_v20  ;;  %v14933_v44 = vld [vmem:[#allocation8 + $0x384] sm:$0xf] }
 0x1d9   :  { %v2445_v5 = vadd.f32 %v2444_v19, %v2431_v55  ;;  %2499 = vadd.xlane.f32.xlu1 %v2498_v3  ;;  %v11297_v63 = vld [vmem:[#allocation8 + $0x240] sm:$0xf]  ;;  %v11042_v28 = vor.u32 %v14833_v56, %v11041_v47  ;;  %v2475_v19 = vsub.f32 1.0, %v16362_v29  ;;  %v11459_v20 = vld [vmem:[#allocation8 + $0x3a0] sm:$0xf0] }
 0x1da   :  { %v14897_v46 = vld [vmem:[#allocation8 + $0x25c] sm:$0xf0]  ;;  %4961 = vmatpush.bf16.msrb.mxu3 %v11842_v8  ;;  %v11206_v8 = vor.u32 %v14869_v13, %v11203_v36  ;;  %v11462_v47 = vor.u32 %v14933_v44, %v11459_v20  ;;  %v14845_v40 = vld [vmem:[#allocation8 + $0xc4] sm:$0xf] }
 0x1db   :  { %v16353_v15 = vadd.f32 %v2445_v5, %v172_v26  ;;  %v14961_v55 = vld [vmem:[#allocation8 + $0x45c] sm:$0xf0]  ;;  %v11298_v3 = vor.u32 %v14897_v46, %v11297_v63  ;;  %4920 = vmatpush.bf16.msrb.mxu0 %v11042_v28  ;;  %v11107_v35 = vld [vmem:[#allocation8 + $0xe0] sm:$0xf0] }
 0x1dc   :  { %v11554_v54 = vor.u32 %v14961_v55, %v11553_v51  ;;  %v15025_v26 = vld [vmem:[#allocation8 + $0x65c] sm:$0xf0]  ;;  %v14861_v51 = vld [vmem:[#allocation8 + $0x144] sm:$0xf] }
 0x1dd   :  { %v2470_v11 = vadd.f32 %v2469_v32, %v16353_v15  ;;  %v2493_v21 = vmul.f32 %v16353_v15, %v16353_v15  ;;  %v11810_v5 = vor.u32 %v15025_v26, %v11809_v14  ;;  %4934 = vmatpush.bf16.msrb.mxu1 %v11298_v3  ;;  %v11010_v32 = vor.u32 %v14825_v16, %v11009_v7  ;;  %v14889_v2 = vld [vmem:[#allocation8 + $0x21c] sm:$0xf0]  ;;  %v11171_v55 = vld [vmem:[#allocation8 + $0x160] sm:$0xf0] }
 0x1de   :  { %4948 = vmatpush.bf16.msrb.mxu2 %v11554_v54  ;;  %v15017_v18 = vld [vmem:[#allocation8 + $0x61c] sm:$0xf0]  ;;  %v2476_v3 = vmul.f32 %v16359_v9, %v2475_v19  ;;  %v14925_v26 = vld [vmem:[#allocation8 + $0x344] sm:$0xf]  ;;  %v11174_v7 = vor.u32 %v14861_v51, %v11171_v55 }
 0x1df   :  { %2471 = vadd.xlane.f32.xlu0 %v2470_v11  ;;  %v2505_v61 = vadd.f32 %v2504_v50, %v2493_v21  ;;  %v11521_v11 = vld [vmem:[#allocation8 + $0x400] sm:$0xf]  ;;  %4962 = vmatpush.bf16.msrb.mxu3 %v11810_v5  ;;  %v11266_v50 = vor.u32 %v14889_v2, %v11265_v45  ;;  %v11778_v27 = vor.u32 %v15017_v18, %v11777_v30  ;;  %v11427_v5 = vld [vmem:[#allocation8 + $0x360] sm:$0xf0] }
 0x1e0   :  { %v14953_v21 = vld [vmem:[#allocation8 + $0x41c] sm:$0xf0]  ;;  %4921 = vmatpush.bf16.msrb.mxu0 %v11010_v32  ;;  %v11430_v16 = vor.u32 %v14925_v26, %v11427_v5  ;;  %v14917_v18 = vld [vmem:[#allocation8 + $0x304] sm:$0xf] }
 0x1e1   :  { %2506 = vadd.xlane.f32.xlu1 %v2505_v61  ;;  %v11522_v61 = vor.u32 %v14953_v21, %v11521_v11  ;;  %v12257_v12 = vld [vmem:[#allocation8 + $0x9c0] sm:$0xf]  ;;  %4935 = vmatpush.bf16.msrb.mxu1 %v11266_v50  ;;  %v14853_v21 = vld [vmem:[#allocation8 + $0x104] sm:$0xf] }
 0x1e2   :  { %v15137_v24 = vld [vmem:[#allocation8 + $0x9dc] sm:$0xf0]  ;;  %v11139_v50 = vld [vmem:[#allocation8 + $0x120] sm:$0xf0] }
 0x1e3   :  { %v12513_v59 = vld [vmem:[#allocation8 + $0xbc0] sm:$0xf]  ;;  %v12258_v62 = vor.u32 %v15137_v24, %v12257_v12  ;;  %4949 = vmatpush.bf16.msrb.mxu2 %v11522_v61  ;;  %4963 = vmatpush.bf16.msrb.mxu3 %v11778_v27  ;;  %v2477_v61 = vadd.f32 %v16359_v9, %v2476_v3  ;;  %v11395_v12 = vld [vmem:[#allocation8 + $0x320] sm:$0xf0]  ;;  %v11142_v27 = vor.u32 %v14853_v21, %v11139_v50 }
 0x1e4   :  { %v15201_v41 = vld [vmem:[#allocation8 + $0xbdc] sm:$0xf0]  ;;  %v11398_v24 = vor.u32 %v14917_v18, %v11395_v12  ;;  %v11075_v20 = vld [vmem:[#allocation8 + $0xa0] sm:$0xf0] }
 0x1e5   :  { %v12514_v6 = vor.u32 %v15201_v41, %v12513_v59  ;;  %v12225_v29 = vld [vmem:[#allocation8 + $0x980] sm:$0xf]  ;;  %4970 = vmatpush.bf16.msra.mxu0 %v12258_v62  ;;  %v16369_v43 = vsel %vm2478_vm0, %v16359_v9, %v2477_v61  ;;  %v14837_v9 = vld [vmem:[#allocation8 + $0x84] sm:$0xf] }
 0x1e6   :  { %v15129_v31 = vld [vmem:[#allocation8 + $0x99c] sm:$0xf0]  ;;  %17231 = vst [vmem:[#allocation23_spill] sm:$0xff] %v16369_v43  ;;  %v11078_v55 = vor.u32 %v14837_v9, %v11075_v20  ;;  %v11299_v21 = vld [vmem:[#allocation8 + $0x260] sm:$0xf0] }
 0x1e7   :  { %v12481_v60 = vld [vmem:[#allocation8 + $0xb80] sm:$0xf]  ;;  %4984 = vmatpush.bf16.msra.mxu1 %v12514_v6  ;;  %v12226_v23 = vor.u32 %v15129_v31, %v12225_v29  ;;  %4998 = vmatpush.bf16.msra.mxu2 %v11238_v37  ;;  %v14909_v29 = vld [vmem:[#allocation8 + $0x2c4] sm:$0xf] }
 0x1e8   :  { %v15193_v57 = vld [vmem:[#allocation8 + $0xb9c] sm:$0xf0]  ;;  %5012 = vmatpush.bf16.msra.mxu3 %v11494_v39  ;;  %v11363_v31 = vld [vmem:[#allocation8 + $0x2e0] sm:$0xf0]  ;;  %v11110_v39 = vor.u32 %v14845_v40, %v11107_v35 }
 0x1e9   :  { %v12482_v53 = vor.u32 %v15193_v57, %v12481_v60  ;;  %v12193_v56 = vld [vmem:[#allocation8 + $0x940] sm:$0xf]  ;;  %4971 = vmatpush.bf16.msra.mxu0 %v12226_v23  ;;  %v11366_v57 = vor.u32 %v14909_v29, %v11363_v31 }
 0x1ea   :  { %v15121_v63 = vld [vmem:[#allocation8 + $0x95c] sm:$0xf0] }
 0x1eb   :  { %v12449_v28 = vld [vmem:[#allocation8 + $0xb40] sm:$0xf]  ;;  %4985 = vmatpush.bf16.msra.mxu1 %v12482_v53  ;;  %v12194_v54 = vor.u32 %v15121_v63, %v12193_v56  ;;  %4999 = vmatpush.bf16.msra.mxu2 %v11206_v8  ;;  %v14901_v63 = vld [vmem:[#allocation8 + $0x284] sm:$0xf] }
 0x1ec   :  { %v15185_v46 = vld [vmem:[#allocation8 + $0xb5c] sm:$0xf0]  ;;  %5013 = vmatpush.bf16.msra.mxu3 %v11462_v47 }
 0x1ed   :  { %v12450_v14 = vor.u32 %v15185_v46, %v12449_v28  ;;  %v12161_v45 = vld [vmem:[#allocation8 + $0x900] sm:$0xf]  ;;  %4972 = vmatpush.bf16.msra.mxu0 %v12194_v54  ;;  %v11331_v28 = vld [vmem:[#allocation8 + $0x2a0] sm:$0xf0] }
 0x1ee   :  { %v15113_v32 = vld [vmem:[#allocation8 + $0x91c] sm:$0xf0]  ;;  %v11334_v5 = vor.u32 %v14901_v63, %v11331_v28 }
 0x1ef   :  { %v12417_v2 = vld [vmem:[#allocation8 + $0xb00] sm:$0xf]  ;;  %4986 = vmatpush.bf16.msra.mxu1 %v12450_v14  ;;  %v12162_v19 = vor.u32 %v15113_v32, %v12161_v45  ;;  %5000 = vmatpush.bf16.msra.mxu2 %v11174_v7  ;;  %v11043_v45 = vld [vmem:[#allocation8 + $0x60] sm:$0xf0] }
 0x1f0   :  { %v15177_v11 = vld [vmem:[#allocation8 + $0xb1c] sm:$0xf0]  ;;  %5014 = vmatpush.bf16.msra.mxu3 %v11430_v16  ;;  %v14829_v16 = vld [vmem:[#allocation8 + $0x44] sm:$0xf] }
 0x1f1   :  { %v12418_v30 = vor.u32 %v15177_v11, %v12417_v2  ;;  %v12129_v59 = vld [vmem:[#allocation8 + $0x8c0] sm:$0xf]  ;;  %4973 = vmatpush.bf16.msra.mxu0 %v12162_v19  ;;  %v14893_v11 = vld [vmem:[#allocation8 + $0x244] sm:$0xf]  ;;  %v11046_v61 = vor.u32 %v14829_v16, %v11043_v45  ;;  %v15773_v16 = vld [vmem:[#allocation14 + $0x10] sm:$0xff] }
 0x1f2   :  { %v15105_v41 = vld [vmem:[#allocation8 + $0x8dc] sm:$0xf0]  ;;  %v2562_v45 = vperm.slane %v15773_v16, 1 }
 0x1f3   :  { %v12385_v62 = vld [vmem:[#allocation8 + $0xac0] sm:$0xf]  ;;  %4987 = vmatpush.bf16.msra.mxu1 %v12418_v30  ;;  %v12130_v37 = vor.u32 %v15105_v41, %v12129_v59  ;;  %5001 = vmatpush.bf16.msra.mxu2 %v11142_v27  ;;  %v11302_v30 = vor.u32 %v14893_v11, %v11299_v21  ;;  %v14821_v41 = vld [vmem:[#allocation8 + $0x4] sm:$0xf] }
 0x1f4   :  { %v15169_v6 = vld [vmem:[#allocation8 + $0xadc] sm:$0xf0]  ;;  %5015 = vmatpush.bf16.msra.mxu3 %v11398_v24 }
 0x1f5   :  { %v12386_v49 = vor.u32 %v15169_v6, %v12385_v62  ;;  %v12097_v13 = vld [vmem:[#allocation8 + $0x880] sm:$0xf]  ;;  %4974 = vmatpush.bf16.msra.mxu0 %v12130_v37  ;;  %v11011_v62 = vld [vmem:[#allocation8 + $0x20] sm:$0xf0] }
 0x1f6   :  { %v15097_v23 = vld [vmem:[#allocation8 + $0x89c] sm:$0xf0]  ;;  %v14885_v37 = vld [vmem:[#allocation8 + $0x204] sm:$0xf] }
 0x1f7   :  { %v12353_v53 = vld [vmem:[#allocation8 + $0xa80] sm:$0xf]  ;;  %4988 = vmatpush.bf16.msra.mxu1 %v12386_v49  ;;  %v12098_v47 = vor.u32 %v15097_v23, %v12097_v13  ;;  %5002 = vmatpush.bf16.msra.mxu2 %v11110_v39  ;;  %v11267_v49 = vld [vmem:[#allocation8 + $0x220] sm:$0xf0]  ;;  %v11014_v39 = vor.u32 %v14821_v41, %v11011_v62 }
 0x1f8   :  { %v15161_v44 = vld [vmem:[#allocation8 + $0xa9c] sm:$0xf0]  ;;  %5016 = vmatpush.bf16.msra.mxu3 %v11366_v57  ;;  %v11270_v57 = vor.u32 %v14885_v37, %v11267_v49  ;;  %v15005_v49 = vld [vmem:[#allocation8 + $0x5c4] sm:$0xf] }
 0x1f9   :  { %v12354_v56 = vor.u32 %v15161_v44, %v12353_v53  ;;  %v12065_v3 = vld [vmem:[#allocation8 + $0x840] sm:$0xf]  ;;  %4975 = vmatpush.bf16.msra.mxu0 %v12098_v47 }
 0x1fa   :  { %v15089_v54 = vld [vmem:[#allocation8 + $0x85c] sm:$0xf0] }
 0x1fb   :  { %v12321_v14 = vld [vmem:[#allocation8 + $0xa40] sm:$0xf]  ;;  %4989 = vmatpush.bf16.msra.mxu1 %v12354_v56  ;;  %v12066_v32 = vor.u32 %v15089_v54, %v12065_v3  ;;  %5003 = vmatpush.bf16.msra.mxu2 %v11078_v55  ;;  %v15772_v55 = vld [vmem:[#allocation14 + $0x8] sm:$0xff] }
 0x1fc   :  { %v15153_v7 = vld [vmem:[#allocation8 + $0xa5c] sm:$0xf0]  ;;  %5017 = vmatpush.bf16.msra.mxu3 %v11334_v5  ;;  %v2561_v3 = vperm.slane %v15772_v55, 1 }
 0x1fd   :  { %v12322_v2 = vor.u32 %v15153_v7, %v12321_v14  ;;  %v12033_v18 = vld [vmem:[#allocation8 + $0x800] sm:$0xf]  ;;  %4976 = vmatpush.bf16.msra.mxu0 %v12066_v32  ;;  %v2563_v32 = vperm.slane %v16238_v38, 1 }
 0x1fe   :  { %v15081_v12 = vld [vmem:[#allocation8 + $0x81c] sm:$0xf0] }
 0x1ff   :  { %v12289_v27 = vld [vmem:[#allocation8 + $0xa00] sm:$0xf]  ;;  %4990 = vmatpush.bf16.msra.mxu1 %v12322_v2  ;;  %v12034_v40 = vor.u32 %v15081_v12, %v12033_v18  ;;  %5004 = vmatpush.bf16.msra.mxu2 %v11046_v61  ;;  %v2580_v61 = vperm.slane %v15773_v16, 2 }
 0x200   :  { %v15145_v59 = vld [vmem:[#allocation8 + $0xa1c] sm:$0xf0]  ;;  %5018 = vmatpush.bf16.msra.mxu3 %v11302_v30 }
 0x201   :  { %v12290_v35 = vor.u32 %v15145_v59, %v12289_v27  ;;  %4977 = vmatpush.bf16.msra.mxu0 %v12034_v40 }
 0x203   :  { %4991 = vmatpush.bf16.msra.mxu1 %v12290_v35  ;;  %5005 = vmatpush.bf16.msra.mxu2 %v11014_v39 }
 0x204   :  { %5019 = vmatpush.bf16.msra.mxu3 %v11270_v57  ;;  %v12003_v57 = vld [vmem:[#allocation8 + $0x7e0] sm:$0xf0] }
 0x24a   :  { %v2465_v60 = vpop.xlane.xlu0 %2464 }
 0x24b   :  { %v16372_v36 = vmul.f32 %v16369_v43, %v2465_v60 }
 0x24c   :  { %v2500_v8 = vpop.xlane.xlu1 %2499 }
 0x24d   :  { %v2508_v46 = vmul.f32 %v2500_v8, %v16369_v43  ;;  %v2510_v51 = vmul.f32 %v16372_v36, %v16372_v36  ;;  %v2514_v54 = vsub.f32 %v16262_v58, %v16372_v36  ;;  %v2515_v14 = vsub.f32 %v16277_v33, %v16372_v36 }
 0x24e   :  { %v2517_v5 = vsub.f32 %v16302_v0, %v16372_v36  ;;  %v2581_v0 = vperm.slane %v16238_v38, 2 }
 0x24f   :  { %v2512_v26 = vsub.f32 %v2508_v46, %v2510_v51  ;;  %v15771_v46 = vld [vmem:[#allocation14] sm:$0xff] }
 0x250   :  { %v2560_v51 = vperm.slane %v15771_v46, 1 }
 0x251   :  { %v2526_v50 = vadd.f32 1e-12, %v2512_v26  ;;  %v2516_v26 = vsub.f32 %v16293_v34, %v16372_v36  ;;  %v2579_v34 = vperm.slane %v15772_v55, 2 }
 0x252   :  { %v2472_v19 = vpop.xlane.xlu0 %2471 }
 0x253   :  { %15723 = vrsqrt.f32 %v2526_v50  ;;  %v16378_v24 = vmul.f32 %v16369_v43, %v2472_v19  ;;  %vm2534_vm2 = vweird.f32 %v2526_v50 }
 0x254   :  { %v2507_v6 = vpop.xlane.xlu1 %2506 }
 0x255   :  { %v2509_v29 = vmul.f32 %v2507_v6, %v16369_v43  ;;  %v2511_v31 = vmul.f32 %v16378_v24, %v16378_v24  ;;  %v2520_v19 = vsub.f32 %v16320_v25, %v16378_v24  ;;  %v2521_v12 = vsub.f32 %v16314_v22, %v16378_v24  ;;  %v11033_v43 = vld [vmem:[#allocation8 + $0x18] sm:$0xf] }
 0x256   :  { %v2522_v27 = vsub.f32 %v16323_v1, %v16378_v24  ;;  %v2523_v59 = vsub.f32 %v16331_v52, %v16378_v24  ;;  %v15069_v1 = vld [vmem:[#allocation8 + $0x7c4] sm:$0xf] }
 0x257   :  { %v2513_v60 = vsub.f32 %v2509_v29, %v2511_v31  ;;  %v12006_v55 = vor.u32 %v15069_v1, %v12003_v57 }
 0x259   :  { %v15724_v13 = vpop.eup %15723  ;;  %v2527_v23 = vadd.f32 1e-12, %v2513_v60  ;;  %v11747_v60 = vld [vmem:[#allocation8 + $0x5e0] sm:$0xf0] }
 0x25a   :  { %v2529_v53 = vmul.f32 %v15724_v13, %v2526_v50  ;;  %vm2535_vm1 = vweird.f32 %v15724_v13  ;;  %v2578_v50 = vperm.slane %v15771_v46, 2  ;;  %v12515_v46 = vld [vmem:[#allocation8 + $0xbe0] sm:$0xf0] }
 0x25b   :  { %15725 = vrsqrt.f32 %v2527_v23  ;;  %vm2536_vm3 = vmor %vm2534_vm2, %vm2535_vm1  ;;  %vm2544_vm5 = vweird.f32 %v2527_v23 }
 0x25c   :  { %v2530_v44 = vmul.f32 %v15724_v13, %v2529_v53 }
 0x25e   :  { %v2531_v9 = vmul.f32 0.5, %v2530_v44  ;;  %v15133_v44 = vld [vmem:[#allocation8 + $0x9c4] sm:$0xf] }
 0x260   :  { %v2532_v20 = vsub.f32 1.5, %v2531_v9 }
 0x261   :  { %v15726_v8 = vpop.eup %15725 }
 0x262   :  { %v2533_v47 = vmul.f32 %v15724_v13, %v2532_v20  ;;  %v2539_v56 = vmul.f32 %v15726_v8, %v2527_v23  ;;  %vm2545_vm4 = vweird.f32 %v15726_v8 }
 0x263   :  { %vm2546_vm6 = vmor %vm2544_vm5, %vm2545_vm4 }
 0x264   :  { %v16383_v63 = vsel %vm2536_vm3, %v15724_v13, %v2533_v47  ;;  %v2540_v28 = vmul.f32 %v15726_v8, %v2539_v56  ;;  %v12259_v56 = vld [vmem:[#allocation8 + $0x9e0] sm:$0xf0] }
 0x265   :  { %v2548_v2 = vmul.f32 %v16383_v63, %v2514_v54  ;;  %v2549_v11 = vmul.f32 %v16383_v63, %v2515_v14  ;;  %v2550_v58 = vmul.f32 %v16383_v63, %v2516_v26  ;;  %v2551_v33 = vmul.f32 %v16383_v63, %v2517_v5  ;;  %v14997_v5 = vld [vmem:[#allocation8 + $0x584] sm:$0xf] }
 0x266   :  { %v2541_v7 = vmul.f32 0.5, %v2540_v28  ;;  %v15197_v28 = vld [vmem:[#allocation8 + $0xbc4] sm:$0xf]  ;;  %v12262_v16 = vor.u32 %v15133_v44, %v12259_v56 }
 0x267   :  { %v2566_v18 = vmul.f32 %v2560_v51, %v2548_v2  ;;  %v2567_v41 = vmul.f32 %v2561_v3, %v2549_v11  ;;  %v2568_v62 = vmul.f32 %v2562_v45, %v2550_v58  ;;  %v2569_v38 = vmul.f32 %v2563_v32, %v2551_v33  ;;  %v11971_v2 = vld [vmem:[#allocation8 + $0x7a0] sm:$0xf0] }
 0x268   :  { %v2542_v21 = vsub.f32 1.5, %v2541_v7  ;;  %v11715_v7 = vld [vmem:[#allocation8 + $0x5a0] sm:$0xf0]  ;;  %v2524_v58 = vsub.f32 %v16342_v4, %v16378_v24  ;;  %v2525_v33 = vsub.f32 %v16353_v15, %v16378_v24  ;;  %v2565_v15 = vperm.slane %v16259_v48, 1 }
 0x269   :  { %v16408_v13 = vadd.f32 %v2578_v50, %v2566_v18  ;;  %v16410_v52 = vadd.f32 %v2579_v34, %v2567_v41  ;;  %v16412_v23 = vadd.f32 %v2580_v61, %v2568_v62  ;;  %v16414_v53 = vadd.f32 %v2581_v0, %v2569_v38  ;;  %v15125_v11 = vld [vmem:[#allocation8 + $0x984] sm:$0xf] }
 0x26a   :  { %v2543_v30 = vmul.f32 %v15726_v8, %v2542_v21  ;;  %v12227_v21 = vld [vmem:[#allocation8 + $0x9a0] sm:$0xf0]  ;;  %v11718_v4 = vor.u32 %v14997_v5, %v11715_v7 }
 0x26b   :  { %17232 = vst [vmem:[#allocation24_spill] sm:$0xff] %v16408_v13  ;;  %v12195_v38 = vld [vmem:[#allocation8 + $0x960] sm:$0xf0] }
 0x26c   :  { %v2547_v6 = vsel %vm2546_vm6, %v15726_v8, %v2543_v30  ;;  %17233 = vst [vmem:[#allocation25_spill] sm:$0xff] %v16410_v52  ;;  %v15181_v48 = vld [vmem:[#allocation8 + $0xb44] sm:$0xf] }
 0x26d   :  { %v2554_v40 = vmul.f32 %v2547_v6, %v2520_v19  ;;  %v2555_v25 = vmul.f32 %v2547_v6, %v2521_v12  ;;  %v2556_v35 = vmul.f32 %v2547_v6, %v2522_v27  ;;  %v2557_v37 = vmul.f32 %v2547_v6, %v2523_v59  ;;  %17234 = vst [vmem:[#allocation26_spill] sm:$0xff] %v16412_v23  ;;  %v14989_v12 = vld [vmem:[#allocation8 + $0x544] sm:$0xf] }
 0x26e   :  { %17235 = vst [vmem:[#allocation27_spill] sm:$0xff] %v16414_v53  ;;  %v2519_v19 = vsub.f32 %v16333_v10, %v16372_v36  ;;  %v2558_v24 = vmul.f32 %v2547_v6, %v2524_v58  ;;  %v2559_v30 = vmul.f32 %v2547_v6, %v2525_v33  ;;  %v15053_v59 = vld [vmem:[#allocation8 + $0x744] sm:$0xf] }
 0x26f   :  { %v2572_v29 = vmul.f32 %v2560_v51, %v2554_v40  ;;  %v2573_v31 = vmul.f32 %v2561_v3, %v2555_v25  ;;  %v2574_v22 = vmul.f32 %v2562_v45, %v2556_v35  ;;  %v2575_v39 = vmul.f32 %v2563_v32, %v2557_v37  ;;  %v15061_v32 = vld [vmem:[#allocation8 + $0x784] sm:$0xf]  ;;  %v15775_v37 = vld [vmem:[#allocation14 + $0x28] sm:$0xff] }
 0x270   :  { %v11750_v51 = vor.u32 %v15005_v49, %v11747_v60  ;;  %v12518_v45 = vor.u32 %v15197_v28, %v12515_v46  ;;  %v11974_v18 = vor.u32 %v15061_v32, %v11971_v2  ;;  %v11939_v10 = vld [vmem:[#allocation8 + $0x760] sm:$0xf0]  ;;  %v2553_v62 = vmul.f32 %v16383_v63, %v2519_v19 }
 0x271   :  { %v16416_v9 = vadd.f32 %v2578_v50, %v2572_v29  ;;  %v16418_v20 = vadd.f32 %v2579_v34, %v2573_v31  ;;  %v16420_v8 = vadd.f32 %v2580_v61, %v2574_v22  ;;  %v16422_v47 = vadd.f32 %v2581_v0, %v2575_v39  ;;  %v15189_v50 = vld [vmem:[#allocation8 + $0xb84] sm:$0xf] }
 0x272   :  { %v12483_v34 = vld [vmem:[#allocation8 + $0xba0] sm:$0xf0]  ;;  %v2564_v61 = vperm.slane %v16240_v42, 1  ;;  %v2518_v0 = vsub.f32 %v16311_v17, %v16372_v36  ;;  %v12230_v17 = vor.u32 %v15125_v11, %v12227_v21  ;;  %v2583_v49 = vperm.slane %v15775_v37, 2 }
 0x273   :  { %17236 = vst [vmem:[#allocation28_spill] sm:$0xff] %v16416_v9  ;;  %v16426_v3 = vpack.c.bf16 %v16416_v9, %v16408_v13  ;;  %v16430_v54 = vpack.c.bf16 %v16418_v20, %v16410_v52  ;;  %v16434_v14 = vpack.c.bf16 %v16420_v8, %v16412_v23  ;;  %v16438_v26 = vpack.c.bf16 %v16422_v47, %v16414_v53  ;;  %v11683_v42 = vld [vmem:[#allocation8 + $0x560] sm:$0xf0]  ;;  %v15132_v9 = vld [vmem:[#allocation8 + $0x9b4] sm:$0xf0] }
 0x274   :  { %17237 = vst [vmem:[#allocation29_spill] sm:$0xff] %v16418_v20  ;;  %v12486_v27 = vor.u32 %v15189_v50, %v12483_v34  ;;  %v15117_v36 = vld [vmem:[#allocation8 + $0x944] sm:$0xf]  ;;  %v2552_v41 = vmul.f32 %v16383_v63, %v2518_v0  ;;  %v11686_v35 = vor.u32 %v14989_v12, %v11683_v42  ;;  %v2576_v29 = vmul.f32 %v2564_v61, %v2558_v24  ;;  %v11483_v53 = vld [vmem:[#allocation8 + $0x3b8] sm:$0xf0] }
 0x275   :  { %17238 = vst [vmem:[#allocation30_spill] sm:$0xff] %v16420_v8  ;;  %4922 = vmatmul.bf16.vlgmr.msrb.gmra.mxu0 %v16426_v3  ;;  %4936 = vmatmul.bf16.vlgmr.msrb.gmra.mxu1 %v16430_v54  ;;  %v12451_v40 = vld [vmem:[#allocation8 + $0xb60] sm:$0xf0]  ;;  %v2577_v31 = vmul.f32 %v2565_v15, %v2559_v30  ;;  %v11942_v22 = vor.u32 %v15053_v59, %v11939_v10  ;;  %v11515_v8 = vld [vmem:[#allocation8 + $0x3f8] sm:$0xf0] }
 0x276   :  { %17239 = vst [vmem:[#allocation31_spill] sm:$0xff] %v16422_v47  ;;  %4950 = vmatmul.bf16.vlgmr.msrb.gmra.mxu2 %v16434_v14  ;;  %4964 = vmatmul.bf16.vlgmr.msrb.gmra.mxu3 %v16438_v26  ;;  %v15774_v6 = vld [vmem:[#allocation14 + $0x20] sm:$0xff]  ;;  %v12198_v1 = vor.u32 %v15117_v36, %v12195_v38  ;;  %v12454_v57 = vor.u32 %v15181_v48, %v12451_v40  ;;  %v14944_v47 = vld [vmem:[#allocation8 + $0x3dc] sm:$0xf]  ;;  %v15164_v23 = vld [vmem:[#allocation8 + $0xab4] sm:$0xf0] }
 0x277   :  { %17240 = vst [vmem:[#allocation32_spill] sm:$0xff] %v16434_v14  ;;  %5026 = vmatpush.bf16.msrb.mxu0 %v11750_v51  ;;  %5040 = vmatpush.bf16.msrb.mxu1 %v12006_v55  ;;  %v2582_v25 = vperm.slane %v15774_v6, 2  ;;  %v14981_v39 = vld [vmem:[#allocation8 + $0x504] sm:$0xf]  ;;  %v2570_v28 = vmul.f32 %v2564_v61, %v2552_v41  ;;  %v2571_v46 = vmul.f32 %v2565_v15, %v2553_v62  ;;  %v14840_v13 = vld [vmem:[#allocation8 + $0x9c] sm:$0xf] }
 0x278   :  { %17241 = vst [vmem:[#allocation33_spill] sm:$0xff] %v16438_v26  ;;  %5054 = vmatpush.bf16.msrb.mxu2 %v12262_v16  ;;  %5068 = vmatpush.bf16.msrb.mxu3 %v12518_v45  ;;  %v11651_v60 = vld [vmem:[#allocation8 + $0x520] sm:$0xf0]  ;;  %v16458_v45 = vadd.f32 %v2583_v49, %v2577_v31  ;;  %v14904_v52 = vld [vmem:[#allocation8 + $0x29c] sm:$0xf] }
 0x279   :  { %v15045_v63 = vld [vmem:[#allocation8 + $0x704] sm:$0xf]  ;;  %v11654_v7 = vor.u32 %v14981_v39, %v11651_v60  ;;  %v16456_v16 = vadd.f32 %v2582_v25, %v2576_v29  ;;  %v16460_v61 = vadd.f32 %v2582_v25, %v2570_v28  ;;  %v16462_v0 = vadd.f32 %v2583_v49, %v2571_v46 }
 0x27a   :  { %v11907_v44 = vld [vmem:[#allocation8 + $0x720] sm:$0xf0]  ;;  %17243 = vst [vmem:[#allocation35_spill] sm:$0xff] %v16458_v45 }
 0x27b   :  { %5027 = vmatpush.bf16.msrb.mxu0 %v11718_v4  ;;  %5041 = vmatpush.bf16.msrb.mxu1 %v11974_v18  ;;  %v15109_v56 = vld [vmem:[#allocation8 + $0x904] sm:$0xf]  ;;  %17242 = vst [vmem:[#allocation34_spill] sm:$0xff] %v16456_v16  ;;  %v11910_v32 = vor.u32 %v15045_v63, %v11907_v44  ;;  %v16466_v30 = vpack.c.bf16 %v16456_v16, %v16460_v61  ;;  %v12281_v16 = vld [vmem:[#allocation8 + $0x9d8] sm:$0xf] }
 0x27c   :  { %5055 = vmatpush.bf16.msrb.mxu2 %v12230_v17  ;;  %5069 = vmatpush.bf16.msrb.mxu3 %v12486_v27  ;;  %v12163_v51 = vld [vmem:[#allocation8 + $0x920] sm:$0xf0]  ;;  %17244 = vst [vmem:[#allocation36_spill] sm:$0xff] %v16460_v61  ;;  %v16470_v18 = vpack.c.bf16 %v16458_v45, %v16462_v0  ;;  %v15020_v45 = vld [vmem:[#allocation8 + $0x634] sm:$0xf0] }
 0x27d   :  { %v15173_v55 = vld [vmem:[#allocation8 + $0xb04] sm:$0xf]  ;;  %v12166_v58 = vor.u32 %v15109_v56, %v12163_v51  ;;  %17245 = vst [vmem:[#allocation37_spill] sm:$0xff] %v16462_v0  ;;  %v11259_v0 = vld [vmem:[#allocation8 + $0x1f8] sm:$0xf0] }
 0x27e   :  { %v12419_v5 = vld [vmem:[#allocation8 + $0xb20] sm:$0xf0] }
 0x27f   :  { %5028 = vmatpush.bf16.msrb.mxu0 %v11686_v35  ;;  %5042 = vmatpush.bf16.msrb.mxu1 %v11942_v22  ;;  %v14973_v2 = vld [vmem:[#allocation8 + $0x4c4] sm:$0xf]  ;;  %v12422_v33 = vor.u32 %v15173_v55, %v12419_v5 }
 0x280   :  { %v11619_v11 = vld [vmem:[#allocation8 + $0x4e0] sm:$0xf0]  ;;  %5056 = vmatpush.bf16.msrb.mxu2 %v12198_v1  ;;  %5070 = vmatpush.bf16.msrb.mxu3 %v12454_v57 }
 0x281   :  { %v15037_v21 = vld [vmem:[#allocation8 + $0x6c4] sm:$0xf]  ;;  %v11622_v24 = vor.u32 %v14973_v2, %v11619_v11  ;;  %v11241_v11 = vld [vmem:[#allocation8 + $0x1c8] sm:$0xf] }
 0x282   :  { %v11875_v50 = vld [vmem:[#allocation8 + $0x6e0] sm:$0xf0] }
 0x283   :  { %v15101_v34 = vld [vmem:[#allocation8 + $0x8c4] sm:$0xf]  ;;  %5029 = vmatpush.bf16.msrb.mxu0 %v11654_v7  ;;  %5043 = vmatpush.bf16.msrb.mxu1 %v11910_v32  ;;  %v11878_v12 = vor.u32 %v15037_v21, %v11875_v50  ;;  %v14946_v21 = vld [vmem:[#allocation8 + $0x3e4] sm:$0xf0] }
 0x284   :  { %v12131_v19 = vld [vmem:[#allocation8 + $0x8e0] sm:$0xf0]  ;;  %5057 = vmatpush.bf16.msrb.mxu2 %v12166_v58  ;;  %5071 = vmatpush.bf16.msrb.mxu3 %v12422_v33  ;;  %v14882_v58 = vld [vmem:[#allocation8 + $0x1e4] sm:$0xf0] }
 0x285   :  { %v15165_v4 = vld [vmem:[#allocation8 + $0xac4] sm:$0xf]  ;;  %v12134_v27 = vor.u32 %v15101_v34, %v12131_v19  ;;  %4978 = vmatmul.bf16.vlgmr.msra.gmra.mxu0 %v16466_v30  ;;  %4992 = vmatmul.bf16.vlgmr.msra.gmra.mxu1 %v16470_v18  ;;  %v11497_v33 = vld [vmem:[#allocation8 + $0x3c8] sm:$0xf] }
 0x286   :  { %v12387_v15 = vld [vmem:[#allocation8 + $0xae0] sm:$0xf0]  ;;  %5006 = vmatmul.bf16.vlgmr.msra.gmra.mxu2 %v16426_v3  ;;  %5020 = vmatmul.bf16.vlgmr.msra.gmra.mxu3 %v16430_v54  ;;  %v11753_v50 = vld [vmem:[#allocation8 + $0x5c8] sm:$0xf] }
 0x287   :  { %v14965_v42 = vld [vmem:[#allocation8 + $0x484] sm:$0xf]  ;;  %v12390_v59 = vor.u32 %v15165_v4, %v12387_v15  ;;  %5030 = vmatpush.bf16.msrb.mxu0 %v11622_v24  ;;  %5044 = vmatpush.bf16.msrb.mxu1 %v11878_v12  ;;  %v15010_v4 = vld [vmem:[#allocation8 + $0x5e4] sm:$0xf0] }
 0x288   :  { %v11587_v17 = vld [vmem:[#allocation8 + $0x4a0] sm:$0xf0]  ;;  %5058 = vmatpush.bf16.msrb.mxu2 %v12134_v27  ;;  %v12009_v15 = vld [vmem:[#allocation8 + $0x7c8] sm:$0xf]  ;;  %v11498_v27 = vor.u32 %v14946_v21, %v11497_v33 }
 0x289   :  { %v15029_v10 = vld [vmem:[#allocation8 + $0x684] sm:$0xf]  ;;  %v11590_v40 = vor.u32 %v14965_v42, %v11587_v17  ;;  %5072 = vmatpush.bf16.msrb.mxu3 %v12390_v59  ;;  %v15074_v24 = vld [vmem:[#allocation8 + $0x7e4] sm:$0xf0]  ;;  %v11242_v17 = vor.u32 %v14882_v58, %v11241_v11 }
 0x28a   :  { %v11843_v36 = vld [vmem:[#allocation8 + $0x6a0] sm:$0xf0]  ;;  %v11209_v59 = vld [vmem:[#allocation8 + $0x188] sm:$0xf] }
 0x28b   :  { %v15093_v41 = vld [vmem:[#allocation8 + $0x884] sm:$0xf]  ;;  %v11846_v6 = vor.u32 %v15029_v10, %v11843_v36  ;;  %5031 = vmatpush.bf16.msrb.mxu0 %v11590_v40  ;;  %v14874_v10 = vld [vmem:[#allocation8 + $0x1a4] sm:$0xf0]  ;;  %v11754_v36 = vor.u32 %v15010_v4, %v11753_v50 }
 0x28c   :  { %v12099_v62 = vld [vmem:[#allocation8 + $0x8a0] sm:$0xf0]  ;;  %v15002_v40 = vld [vmem:[#allocation8 + $0x5a4] sm:$0xf0] }
 0x28d   :  { %v15157_v38 = vld [vmem:[#allocation8 + $0xa84] sm:$0xf]  ;;  %v12102_v37 = vor.u32 %v15093_v41, %v12099_v62  ;;  %5045 = vmatpush.bf16.msrb.mxu1 %v11846_v6  ;;  %v12010_v41 = vor.u32 %v15074_v24, %v12009_v15  ;;  %v11465_v62 = vld [vmem:[#allocation8 + $0x388] sm:$0xf] }
 0x28e   :  { %v12355_v48 = vld [vmem:[#allocation8 + $0xaa0] sm:$0xf0]  ;;  %v11977_v6 = vld [vmem:[#allocation8 + $0x788] sm:$0xf] }
 0x28f   :  { %v14957_v25 = vld [vmem:[#allocation8 + $0x444] sm:$0xf]  ;;  %v12358_v49 = vor.u32 %v15157_v38, %v12355_v48  ;;  %5059 = vmatpush.bf16.msrb.mxu2 %v12102_v37  ;;  %v14938_v38 = vld [vmem:[#allocation8 + $0x3a4] sm:$0xf0] }
 0x290   :  { %v11555_v35 = vld [vmem:[#allocation8 + $0x460] sm:$0xf0]  ;;  %v11721_v48 = vld [vmem:[#allocation8 + $0x588] sm:$0xf]  ;;  %v11466_v37 = vor.u32 %v14938_v38, %v11465_v62 }
 0x291   :  { %v15021_v29 = vld [vmem:[#allocation8 + $0x644] sm:$0xf]  ;;  %v11558_v63 = vor.u32 %v14957_v25, %v11555_v35  ;;  %5073 = vmatpush.bf16.msrb.mxu3 %v12358_v49  ;;  %v15066_v25 = vld [vmem:[#allocation8 + $0x7a4] sm:$0xf0]  ;;  %v11210_v35 = vor.u32 %v14874_v10, %v11209_v59 }
 0x292   :  { %v11811_v31 = vld [vmem:[#allocation8 + $0x660] sm:$0xf0]  ;;  %v11177_v49 = vld [vmem:[#allocation8 + $0x148] sm:$0xf] }
 0x293   :  { %v15085_v22 = vld [vmem:[#allocation8 + $0x844] sm:$0xf]  ;;  %v11814_v44 = vor.u32 %v15021_v29, %v11811_v31  ;;  %5032 = vmatpush.bf16.msrb.mxu0 %v11558_v63  ;;  %v14866_v29 = vld [vmem:[#allocation8 + $0x164] sm:$0xf0]  ;;  %v11722_v31 = vor.u32 %v15002_v40, %v11721_v48 }
 0x294   :  { %v12067_v39 = vld [vmem:[#allocation8 + $0x860] sm:$0xf0]  ;;  %v11945_v63 = vld [vmem:[#allocation8 + $0x748] sm:$0xf] }
 0x295   :  { %v15149_v60 = vld [vmem:[#allocation8 + $0xa44] sm:$0xf]  ;;  %v12070_v51 = vor.u32 %v15085_v22, %v12067_v39  ;;  %5046 = vmatpush.bf16.msrb.mxu1 %v11814_v44  ;;  %v11978_v22 = vor.u32 %v15066_v25, %v11977_v6  ;;  %v11433_v39 = vld [vmem:[#allocation8 + $0x348] sm:$0xf] }
 0x296   :  { %v12323_v1 = vld [vmem:[#allocation8 + $0xa60] sm:$0xf0]  ;;  %v15058_v44 = vld [vmem:[#allocation8 + $0x764] sm:$0xf0] }
 0x297   :  { %v14949_v57 = vld [vmem:[#allocation8 + $0x404] sm:$0xf]  ;;  %v12326_v55 = vor.u32 %v15149_v60, %v12323_v1  ;;  %5060 = vmatpush.bf16.msrb.mxu2 %v12070_v51  ;;  %v14930_v60 = vld [vmem:[#allocation8 + $0x364] sm:$0xf0] }
 0x298   :  { %v11523_v56 = vld [vmem:[#allocation8 + $0x420] sm:$0xf0]  ;;  %v11689_v1 = vld [vmem:[#allocation8 + $0x548] sm:$0xf] }
 0x299   :  { %v15013_v28 = vld [vmem:[#allocation8 + $0x604] sm:$0xf]  ;;  %v11526_v34 = vor.u32 %v14949_v57, %v11523_v56  ;;  %5074 = vmatpush.bf16.msrb.mxu3 %v12326_v55  ;;  %v14994_v57 = vld [vmem:[#allocation8 + $0x564] sm:$0xf0]  ;;  %v11178_v56 = vor.u32 %v14866_v29, %v11177_v49 }
 0x29a   :  { %v11779_v46 = vld [vmem:[#allocation8 + $0x620] sm:$0xf0]  ;;  %v14858_v51 = vld [vmem:[#allocation8 + $0x124] sm:$0xf0]  ;;  %v11690_v55 = vor.u32 %v14994_v57, %v11689_v1 }
 0x29b   :  { %v15077_v5 = vld [vmem:[#allocation8 + $0x804] sm:$0xf]  ;;  %v11782_v19 = vor.u32 %v15013_v28, %v11779_v46  ;;  %5033 = vmatpush.bf16.msrb.mxu0 %v11526_v34  ;;  %v11434_v28 = vor.u32 %v14930_v60, %v11433_v39  ;;  %v11145_v46 = vld [vmem:[#allocation8 + $0x108] sm:$0xf] }
 0x29c   :  { %v12035_v7 = vld [vmem:[#allocation8 + $0x820] sm:$0xf0]  ;;  %v14986_v11 = vld [vmem:[#allocation8 + $0x524] sm:$0xf0]  ;;  %v11146_v21 = vor.u32 %v14858_v51, %v11145_v46 }
 0x29d   :  { %v15141_v32 = vld [vmem:[#allocation8 + $0xa04] sm:$0xf]  ;;  %v12038_v12 = vor.u32 %v15077_v5, %v12035_v7  ;;  %5047 = vmatpush.bf16.msrb.mxu1 %v11782_v19  ;;  %v11946_v5 = vor.u32 %v15058_v44, %v11945_v63  ;;  %v11401_v7 = vld [vmem:[#allocation8 + $0x308] sm:$0xf] }
 0x29e   :  { %v12291_v2 = vld [vmem:[#allocation8 + $0xa20] sm:$0xf0]  ;;  %5034 = vmatmul.bf16.vlgmr.msrb.gmra.mxu0 %v16434_v14  ;;  %v11913_v58 = vld [vmem:[#allocation8 + $0x708] sm:$0xf] }
 0x29f   :  { %v12294_v42 = vor.u32 %v15141_v32, %v12291_v2  ;;  %5061 = vmatpush.bf16.msrb.mxu2 %v12038_v12  ;;  %5082 = vmatpush.bf16.msra.mxu0 %v11242_v17  ;;  %v14922_v32 = vld [vmem:[#allocation8 + $0x324] sm:$0xf0] }
 0x2a0   :  { %5048 = vmatmul.bf16.vlgmr.msrb.gmra.mxu1 %v16438_v26  ;;  %v11657_v2 = vld [vmem:[#allocation8 + $0x508] sm:$0xf]  ;;  %v11402_v50 = vor.u32 %v14922_v32, %v11401_v7 }
 0x2a1   :  { %5075 = vmatpush.bf16.msrb.mxu3 %v12294_v42  ;;  %5096 = vmatpush.bf16.msra.mxu1 %v11498_v27  ;;  %v15050_v33 = vld [vmem:[#allocation8 + $0x724] sm:$0xf0]  ;;  %v11658_v4 = vor.u32 %v14986_v11, %v11657_v2 }
 0x2a2   :  { %5062 = vmatmul.bf16.vlgmr.msrb.gmra.mxu2 %v16466_v30  ;;  %v11113_v34 = vld [vmem:[#allocation8 + $0xc8] sm:$0xf]  ;;  %v11914_v15 = vor.u32 %v15050_v33, %v11913_v58 }
 0x2a3   :  { %5110 = vmatpush.bf16.msra.mxu2 %v11754_v36  ;;  %5083 = vmatpush.bf16.msra.mxu0 %v11210_v35  ;;  %v14850_v19 = vld [vmem:[#allocation8 + $0xe4] sm:$0xf0] }
 0x2a4   :  { %5076 = vmatmul.bf16.vlgmr.msrb.gmra.mxu3 %v16470_v18  ;;  %v11369_v24 = vld [vmem:[#allocation8 + $0x2c8] sm:$0xf]  ;;  %v11114_v10 = vor.u32 %v14850_v19, %v11113_v34 }
 0x2a5   :  { %5124 = vmatpush.bf16.msra.mxu3 %v12010_v41  ;;  %5097 = vmatpush.bf16.msra.mxu1 %v11466_v37  ;;  %v14914_v12 = vld [vmem:[#allocation8 + $0x2e4] sm:$0xf0] }
 0x2a6   :  { %v11625_v42 = vld [vmem:[#allocation8 + $0x4c8] sm:$0xf]  ;;  %v11370_v36 = vor.u32 %v14914_v12, %v11369_v24  ;;  %v14878_v12 = vld [vmem:[#allocation8 + $0x1cc] sm:$0xf] }
 0x2a7   :  { %5111 = vmatpush.bf16.msra.mxu2 %v11722_v31  ;;  %5084 = vmatpush.bf16.msra.mxu0 %v11178_v56  ;;  %v14978_v17 = vld [vmem:[#allocation8 + $0x4e4] sm:$0xf0] }
 0x2a8   :  { %v11881_v27 = vld [vmem:[#allocation8 + $0x6c8] sm:$0xf]  ;;  %v11626_v38 = vor.u32 %v14978_v17, %v11625_v42 }
 0x2a9   :  { %5125 = vmatpush.bf16.msra.mxu3 %v11978_v22  ;;  %5098 = vmatpush.bf16.msra.mxu1 %v11434_v28  ;;  %v15042_v59 = vld [vmem:[#allocation8 + $0x6e4] sm:$0xf0] }
 0x2aa   :  { %v11081_v41 = vld [vmem:[#allocation8 + $0x88] sm:$0xf]  ;;  %v11882_v48 = vor.u32 %v15042_v59, %v11881_v27  ;;  %v11243_v27 = vld [vmem:[#allocation8 + $0x1e8] sm:$0xf0] }
 0x2ab   :  { %5112 = vmatpush.bf16.msra.mxu2 %v11690_v55  ;;  %5085 = vmatpush.bf16.msra.mxu0 %v11146_v21  ;;  %v14842_v62 = vld [vmem:[#allocation8 + $0xa4] sm:$0xf0]  ;;  %v14942_v59 = vld [vmem:[#allocation8 + $0x3cc] sm:$0xf] }
 0x2ac   :  { %v11337_v40 = vld [vmem:[#allocation8 + $0x288] sm:$0xf]  ;;  %v11082_v29 = vor.u32 %v14842_v62, %v11081_v41 }
 0x2ad   :  { %5126 = vmatpush.bf16.msra.mxu3 %v11946_v5  ;;  %5099 = vmatpush.bf16.msra.mxu1 %v11402_v50  ;;  %v14906_v6 = vld [vmem:[#allocation8 + $0x2a4] sm:$0xf0] }
 0x2ae   :  { %v11593_v25 = vld [vmem:[#allocation8 + $0x488] sm:$0xf]  ;;  %v11338_v31 = vor.u32 %v14906_v6, %v11337_v40  ;;  %v11246_v6 = vor.u32 %v14878_v12, %v11243_v27 }
 0x2af   :  { %5113 = vmatpush.bf16.msra.mxu2 %v11658_v4  ;;  %v14970_v35 = vld [vmem:[#allocation8 + $0x4a4] sm:$0xf0]  ;;  %5086 = vmatpush.bf16.msra.mxu0 %v11114_v10  ;;  %v11499_v10 = vld [vmem:[#allocation8 + $0x3e8] sm:$0xf0] }
 0x2b0   :  { %v11849_v37 = vld [vmem:[#allocation8 + $0x688] sm:$0xf]  ;;  %v11594_v60 = vor.u32 %v14970_v35, %v11593_v25  ;;  %v11502_v25 = vor.u32 %v14942_v59, %v11499_v10 }
 0x2b1   :  { %5127 = vmatpush.bf16.msra.mxu3 %v11914_v15  ;;  %v15034_v49 = vld [vmem:[#allocation8 + $0x6a4] sm:$0xf0]  ;;  %5100 = vmatpush.bf16.msra.mxu1 %v11370_v36 }
 0x2b2   :  { %v11049_v22 = vld [vmem:[#allocation8 + $0x48] sm:$0xf]  ;;  %v11850_v1 = vor.u32 %v15034_v49, %v11849_v37  ;;  %v14870_v49 = vld [vmem:[#allocation8 + $0x18c] sm:$0xf] }
 0x2b3   :  { %v14834_v39 = vld [vmem:[#allocation8 + $0x64] sm:$0xf0]  ;;  %5114 = vmatpush.bf16.msra.mxu2 %v11626_v38  ;;  %5087 = vmatpush.bf16.msra.mxu0 %v11082_v29  ;;  %v11211_v29 = vld [vmem:[#allocation8 + $0x1a8] sm:$0xf0] }
 0x2b4   :  { %v11305_v57 = vld [vmem:[#allocation8 + $0x248] sm:$0xf]  ;;  %v11050_v55 = vor.u32 %v14834_v39, %v11049_v22  ;;  %v11467_v22 = vld [vmem:[#allocation8 + $0x3a8] sm:$0xf0] }
 0x2b5   :  { %5128 = vmatpush.bf16.msra.mxu3 %v11882_v48  ;;  %v14898_v63 = vld [vmem:[#allocation8 + $0x264] sm:$0xf0]  ;;  %5101 = vmatpush.bf16.msra.mxu1 %v11338_v31  ;;  %v14934_v31 = vld [vmem:[#allocation8 + $0x38c] sm:$0xf] }
 0x2b6   :  { %v11561_v44 = vld [vmem:[#allocation8 + $0x448] sm:$0xf]  ;;  %v11306_v5 = vor.u32 %v14898_v63, %v11305_v57  ;;  %v11214_v63 = vor.u32 %v14870_v49, %v11211_v29 }
 0x2b7   :  { %v14962_v56 = vld [vmem:[#allocation8 + $0x464] sm:$0xf0]  ;;  %5115 = vmatpush.bf16.msra.mxu2 %v11594_v60  ;;  %5088 = vmatpush.bf16.msra.mxu0 %v11050_v55  ;;  %v14926_v55 = vld [vmem:[#allocation8 + $0x34c] sm:$0xf] }
 0x2b8   :  { %v11817_v28 = vld [vmem:[#allocation8 + $0x648] sm:$0xf]  ;;  %v11562_v11 = vor.u32 %v14962_v56, %v11561_v44  ;;  %v11470_v44 = vor.u32 %v14934_v31, %v11467_v22  ;;  %v14838_v22 = vld [vmem:[#allocation8 + $0x8c] sm:$0xf] }
 0x2b9   :  { %v15026_v46 = vld [vmem:[#allocation8 + $0x664] sm:$0xf0]  ;;  %5129 = vmatpush.bf16.msra.mxu3 %v11850_v1  ;;  %5102 = vmatpush.bf16.msra.mxu1 %v11306_v5  ;;  %v11435_v5 = vld [vmem:[#allocation8 + $0x368] sm:$0xf0] }
 0x2ba   :  { %v11017_v51 = vld [vmem:[#allocation8 + $0x8] sm:$0xf]  ;;  %v11818_v58 = vor.u32 %v15026_v46, %v11817_v28  ;;  %v14862_v46 = vld [vmem:[#allocation8 + $0x14c] sm:$0xf] }
 0x2bb   :  { %v14826_v7 = vld [vmem:[#allocation8 + $0x24] sm:$0xf0]  ;;  %5116 = vmatpush.bf16.msra.mxu2 %v11562_v11 }
 0x2bc   :  { %v11273_v32 = vld [vmem:[#allocation8 + $0x208] sm:$0xf]  ;;  %v11018_v42 = vor.u32 %v14826_v7, %v11017_v51  ;;  %v11179_v51 = vld [vmem:[#allocation8 + $0x168] sm:$0xf0] }
 0x2bd   :  { %v14890_v2 = vld [vmem:[#allocation8 + $0x224] sm:$0xf0]  ;;  %5130 = vmatpush.bf16.msra.mxu3 %v11818_v58  ;;  %v11182_v58 = vor.u32 %v14862_v46, %v11179_v51 }
 0x2be   :  { %v11529_v33 = vld [vmem:[#allocation8 + $0x408] sm:$0xf]  ;;  %v11274_v17 = vor.u32 %v14890_v2, %v11273_v32  ;;  %5089 = vmatpush.bf16.msra.mxu0 %v11018_v42 }
 0x2bf   :  { %v14954_v21 = vld [vmem:[#allocation8 + $0x424] sm:$0xf0] }
 0x2c0   :  { %v11785_v50 = vld [vmem:[#allocation8 + $0x608] sm:$0xf]  ;;  %v11530_v36 = vor.u32 %v14954_v21, %v11529_v33  ;;  %5103 = vmatpush.bf16.msra.mxu1 %v11274_v17  ;;  %v11438_v33 = vor.u32 %v14926_v55, %v11435_v5  ;;  %v14830_v5 = vld [vmem:[#allocation8 + $0x4c] sm:$0xf] }
 0x2c1   :  { %v15018_v34 = vld [vmem:[#allocation8 + $0x624] sm:$0xf0]  ;;  %5090 = vmatmul.bf16.vlgmr.msra.gmra.mxu0 %v16426_v3 }
 0x2c2   :  { %v12265_v19 = vld [vmem:[#allocation8 + $0x9c8] sm:$0xf]  ;;  %v11786_v41 = vor.u32 %v15018_v34, %v11785_v50  ;;  %5117 = vmatpush.bf16.msra.mxu2 %v11530_v36  ;;  %v14854_v34 = vld [vmem:[#allocation8 + $0x10c] sm:$0xf] }
 0x2c3   :  { %v15138_v4 = vld [vmem:[#allocation8 + $0x9e4] sm:$0xf0]  ;;  %5104 = vmatmul.bf16.vlgmr.msra.gmra.mxu1 %v16430_v54 }
 0x2c4   :  { %v12521_v15 = vld [vmem:[#allocation8 + $0xbc8] sm:$0xf]  ;;  %v12266_v62 = vor.u32 %v15138_v4, %v12265_v19  ;;  %5131 = vmatpush.bf16.msra.mxu3 %v11786_v41  ;;  %v11147_v19 = vld [vmem:[#allocation8 + $0x128] sm:$0xf0] }
 0x2c5   :  { %v15202_v24 = vld [vmem:[#allocation8 + $0xbe4] sm:$0xf0]  ;;  %5118 = vmatmul.bf16.vlgmr.msra.gmra.mxu2 %v16434_v14  ;;  %v14918_v4 = vld [vmem:[#allocation8 + $0x30c] sm:$0xf]  ;;  %v11150_v27 = vor.u32 %v14854_v34, %v11147_v19 }
 0x2c6   :  { %v12522_v38 = vor.u32 %v15202_v24, %v12521_v15  ;;  %v12233_v48 = vld [vmem:[#allocation8 + $0x988] sm:$0xf]  ;;  %5138 = vmatpush.bf16.msrb.mxu0 %v12266_v62  ;;  %5166 = vmatpush.bf16.msrb.mxu2 %v11246_v6  ;;  %v11403_v15 = vld [vmem:[#allocation8 + $0x328] sm:$0xf0] }
 0x2c7   :  { %v15130_v40 = vld [vmem:[#allocation8 + $0x9a4] sm:$0xf0]  ;;  %5132 = vmatmul.bf16.vlgmr.msra.gmra.mxu3 %v16438_v26  ;;  %v11406_v59 = vor.u32 %v14918_v4, %v11403_v15  ;;  %v14846_v41 = vld [vmem:[#allocation8 + $0xcc] sm:$0xf] }
 0x2c8   :  { %v12489_v35 = vld [vmem:[#allocation8 + $0xb88] sm:$0xf]  ;;  %5152 = vmatpush.bf16.msrb.mxu1 %v12522_v38  ;;  %v12234_v39 = vor.u32 %v15130_v40, %v12233_v48  ;;  %5180 = vmatpush.bf16.msrb.mxu3 %v11502_v25  ;;  %v11115_v62 = vld [vmem:[#allocation8 + $0xe8] sm:$0xf0] }
 0x2c9   :  { %v15194_v37 = vld [vmem:[#allocation8 + $0xba4] sm:$0xf0]  ;;  %v14910_v38 = vld [vmem:[#allocation8 + $0x2cc] sm:$0xf] }
 0x2ca   :  { %v12490_v60 = vor.u32 %v15194_v37, %v12489_v35  ;;  %v12201_v1 = vld [vmem:[#allocation8 + $0x948] sm:$0xf]  ;;  %5139 = vmatpush.bf16.msrb.mxu0 %v12234_v39  ;;  %5167 = vmatpush.bf16.msrb.mxu2 %v11214_v63  ;;  %v11371_v48 = vld [vmem:[#allocation8 + $0x2e8] sm:$0xf0]  ;;  %v11118_v37 = vor.u32 %v14846_v41, %v11115_v62 }
 0x2cb   :  { %v15122_v57 = vld [vmem:[#allocation8 + $0x964] sm:$0xf0]  ;;  %v11374_v49 = vor.u32 %v14910_v38, %v11371_v48  ;;  %v11083_v39 = vld [vmem:[#allocation8 + $0xa8] sm:$0xf0] }
 0x2cc   :  { %v12457_v56 = vld [vmem:[#allocation8 + $0xb48] sm:$0xf]  ;;  %5153 = vmatpush.bf16.msrb.mxu1 %v12490_v60  ;;  %v12202_v7 = vor.u32 %v15122_v57, %v12201_v1  ;;  %5181 = vmatpush.bf16.msrb.mxu3 %v11470_v44  ;;  %v14902_v60 = vld [vmem:[#allocation8 + $0x28c] sm:$0xf] }
 0x2cd   :  { %v15186_v28 = vld [vmem:[#allocation8 + $0xb64] sm:$0xf0]  ;;  %v11339_v1 = vld [vmem:[#allocation8 + $0x2a8] sm:$0xf0] }
 0x2ce   :  { %v12458_v32 = vor.u32 %v15186_v28, %v12457_v56  ;;  %v12169_v2 = vld [vmem:[#allocation8 + $0x908] sm:$0xf]  ;;  %5140 = vmatpush.bf16.msrb.mxu0 %v12202_v7  ;;  %5168 = vmatpush.bf16.msrb.mxu2 %v11182_v58  ;;  %v11086_v28 = vor.u32 %v14838_v22, %v11083_v39  ;;  %v11342_v46 = vor.u32 %v14902_v60, %v11339_v1  ;;  %v11051_v7 = vld [vmem:[#allocation8 + $0x68] sm:$0xf0] }
 0x2cf   :  { %v15114_v11 = vld [vmem:[#allocation8 + $0x924] sm:$0xf0]  ;;  %v11054_v19 = vor.u32 %v14830_v5, %v11051_v7  ;;  %v14822_v15 = vld [vmem:[#allocation8 + $0xc] sm:$0xf] }
 0x2d0   :  { %v12425_v21 = vld [vmem:[#allocation8 + $0xb08] sm:$0xf]  ;;  %5154 = vmatpush.bf16.msrb.mxu1 %v12458_v32  ;;  %v12170_v24 = vor.u32 %v15114_v11, %v12169_v2  ;;  %5182 = vmatpush.bf16.msrb.mxu3 %v11438_v33  ;;  %v14894_v32 = vld [vmem:[#allocation8 + $0x24c] sm:$0xf] }
 0x2d1   :  { %v15178_v50 = vld [vmem:[#allocation8 + $0xb24] sm:$0xf0]  ;;  %v11307_v2 = vld [vmem:[#allocation8 + $0x268] sm:$0xf0] }
 0x2d2   :  { %v12426_v12 = vor.u32 %v15178_v50, %v12425_v21  ;;  %v12137_v42 = vld [vmem:[#allocation8 + $0x8c8] sm:$0xf]  ;;  %5141 = vmatpush.bf16.msrb.mxu0 %v12170_v24  ;;  %5169 = vmatpush.bf16.msrb.mxu2 %v11150_v27  ;;  %v11310_v4 = vor.u32 %v14894_v32, %v11307_v2  ;;  %v11019_v24 = vld [vmem:[#allocation8 + $0x28] sm:$0xf0] }
 0x2d3   :  { %v15106_v17 = vld [vmem:[#allocation8 + $0x8e4] sm:$0xf0]  ;;  %v11755_v27 = vld [vmem:[#allocation8 + $0x5e8] sm:$0xf0] }
 0x2d4   :  { %v12393_v10 = vld [vmem:[#allocation8 + $0xac8] sm:$0xf]  ;;  %5155 = vmatpush.bf16.msrb.mxu1 %v12426_v12  ;;  %v12138_v40 = vor.u32 %v15106_v17, %v12137_v42  ;;  %5183 = vmatpush.bf16.msrb.mxu3 %v11406_v59  ;;  %v14886_v12 = vld [vmem:[#allocation8 + $0x20c] sm:$0xf] }
 0x2d5   :  { %v15170_v36 = vld [vmem:[#allocation8 + $0xae4] sm:$0xf0]  ;;  %v11275_v42 = vld [vmem:[#allocation8 + $0x228] sm:$0xf0] }
 0x2d6   :  { %v12394_v6 = vor.u32 %v15170_v36, %v12393_v10  ;;  %v12105_v25 = vld [vmem:[#allocation8 + $0x888] sm:$0xf]  ;;  %5142 = vmatpush.bf16.msrb.mxu0 %v12138_v40  ;;  %5170 = vmatpush.bf16.msrb.mxu2 %v11118_v37  ;;  %v15006_v17 = vld [vmem:[#allocation8 + $0x5cc] sm:$0xf] }
 0x2d7   :  { %v15098_v35 = vld [vmem:[#allocation8 + $0x8a4] sm:$0xf0]  ;;  %v15070_v59 = vld [vmem:[#allocation8 + $0x7cc] sm:$0xf] }
 0x2d8   :  { %v12361_v29 = vld [vmem:[#allocation8 + $0xa88] sm:$0xf]  ;;  %5156 = vmatpush.bf16.msrb.mxu1 %v12394_v6  ;;  %v12106_v57 = vor.u32 %v15098_v35, %v12105_v25  ;;  %5184 = vmatpush.bf16.msrb.mxu3 %v11374_v49  ;;  %v12011_v10 = vld [vmem:[#allocation8 + $0x7e8] sm:$0xf0]  ;;  %v11022_v6 = vor.u32 %v14822_v15, %v11019_v24  ;;  %v11278_v25 = vor.u32 %v14886_v12, %v11275_v42 }
 0x2d9   :  { %v15162_v31 = vld [vmem:[#allocation8 + $0xaa4] sm:$0xf0]  ;;  %v15134_v36 = vld [vmem:[#allocation8 + $0x9cc] sm:$0xf]  ;;  %v11758_v35 = vor.u32 %v15006_v17, %v11755_v27  ;;  %v12014_v37 = vor.u32 %v15070_v59, %v12011_v10 }
 0x2da   :  { %v12362_v63 = vor.u32 %v15162_v31, %v12361_v29  ;;  %v12073_v44 = vld [vmem:[#allocation8 + $0x848] sm:$0xf]  ;;  %5143 = vmatpush.bf16.msrb.mxu0 %v12106_v57  ;;  %5171 = vmatpush.bf16.msrb.mxu2 %v11086_v28  ;;  %v12267_v38 = vld [vmem:[#allocation8 + $0x9e8] sm:$0xf0] }
 0x2db   :  { %v15090_v56 = vld [vmem:[#allocation8 + $0x864] sm:$0xf0]  ;;  %v15198_v48 = vld [vmem:[#allocation8 + $0xbcc] sm:$0xf]  ;;  %v12270_v31 = vor.u32 %v15134_v36, %v12267_v38 }
 0x2dc   :  { %v12329_v51 = vld [vmem:[#allocation8 + $0xa48] sm:$0xf]  ;;  %5157 = vmatpush.bf16.msrb.mxu1 %v12362_v63  ;;  %v12074_v58 = vor.u32 %v15090_v56, %v12073_v44  ;;  %5185 = vmatpush.bf16.msrb.mxu3 %v11342_v46  ;;  %v12523_v40 = vld [vmem:[#allocation8 + $0xbe8] sm:$0xf0] }
 0x2dd   :  { %v15154_v55 = vld [vmem:[#allocation8 + $0xa64] sm:$0xf0]  ;;  %v14998_v49 = vld [vmem:[#allocation8 + $0x58c] sm:$0xf]  ;;  %v12526_v22 = vor.u32 %v15198_v48, %v12523_v40 }
 0x2de   :  { %v12041_v11 = vld [vmem:[#allocation8 + $0x808] sm:$0xf]  ;;  %v12330_v33 = vor.u32 %v15154_v55, %v12329_v51  ;;  %5144 = vmatpush.bf16.msrb.mxu0 %v12074_v58  ;;  %5172 = vmatpush.bf16.msrb.mxu2 %v11054_v19  ;;  %v11723_v29 = vld [vmem:[#allocation8 + $0x5a8] sm:$0xf0] }
 0x2df   :  { %v15082_v21 = vld [vmem:[#allocation8 + $0x824] sm:$0xf0]  ;;  %v15062_v39 = vld [vmem:[#allocation8 + $0x78c] sm:$0xf]  ;;  %v11726_v56 = vor.u32 %v14998_v49, %v11723_v29 }
 0x2e0   :  { %v12297_v50 = vld [vmem:[#allocation8 + $0xa08] sm:$0xf]  ;;  %5158 = vmatpush.bf16.msrb.mxu1 %v12330_v33  ;;  %v12042_v41 = vor.u32 %v15082_v21, %v12041_v11  ;;  %5186 = vmatpush.bf16.msrb.mxu3 %v11310_v4  ;;  %v11979_v60 = vld [vmem:[#allocation8 + $0x7a8] sm:$0xf0] }
 0x2e1   :  { %v15146_v34 = vld [vmem:[#allocation8 + $0xa24] sm:$0xf0]  ;;  %v15126_v1 = vld [vmem:[#allocation8 + $0x98c] sm:$0xf]  ;;  %v11982_v28 = vor.u32 %v15062_v39, %v11979_v60 }
 0x2e2   :  { %v12298_v62 = vor.u32 %v15146_v34, %v12297_v50  ;;  %5145 = vmatpush.bf16.msrb.mxu0 %v12042_v41  ;;  %v12235_v57 = vld [vmem:[#allocation8 + $0x9a8] sm:$0xf0]  ;;  %5173 = vmatpush.bf16.msrb.mxu2 %v11022_v6 }
 0x2e3   :  { %v15190_v63 = vld [vmem:[#allocation8 + $0xb8c] sm:$0xf]  ;;  %v12238_v55 = vor.u32 %v15126_v1, %v12235_v57 }
 0x2e4   :  { %5159 = vmatpush.bf16.msrb.mxu1 %v12298_v62  ;;  %v12491_v44 = vld [vmem:[#allocation8 + $0xba8] sm:$0xf0]  ;;  %5187 = vmatpush.bf16.msrb.mxu3 %v11278_v25 }
 0x2e5   :  { %v14990_v46 = vld [vmem:[#allocation8 + $0x54c] sm:$0xf]  ;;  %v12494_v5 = vor.u32 %v15190_v63, %v12491_v44  ;;  %5146 = vmatmul.bf16.vlgmr.msrb.gmra.mxu0 %v16466_v30  ;;  %5174 = vmatmul.bf16.vlgmr.msrb.gmra.mxu2 %v16426_v3 }
 0x2e6   :  { %5194 = vmatpush.bf16.msra.mxu0 %v11758_v35  ;;  %v11691_v51 = vld [vmem:[#allocation8 + $0x568] sm:$0xf0]  ;;  %5222 = vmatpush.bf16.msra.mxu2 %v12270_v31 }
 0x2e7   :  { %v15054_v7 = vld [vmem:[#allocation8 + $0x74c] sm:$0xf]  ;;  %5160 = vmatmul.bf16.vlgmr.msrb.gmra.mxu1 %v16470_v18  ;;  %5188 = vmatmul.bf16.vlgmr.msrb.gmra.mxu3 %v16430_v54  ;;  %v11694_v21 = vor.u32 %v14990_v46, %v11691_v51 }
 0x2e8   :  { %5208 = vmatpush.bf16.msra.mxu1 %v12014_v37  ;;  %5236 = vmatpush.bf16.msra.mxu3 %v12526_v22  ;;  %v11947_v32 = vld [vmem:[#allocation8 + $0x768] sm:$0xf0] }
 0x2e9   :  { %v15118_v2 = vld [vmem:[#allocation8 + $0x94c] sm:$0xf]  ;;  %v11950_v50 = vor.u32 %v15054_v7, %v11947_v32 }
 0x2ea   :  { %v12203_v11 = vld [vmem:[#allocation8 + $0x968] sm:$0xf0]  ;;  %5195 = vmatpush.bf16.msra.mxu0 %v11726_v56  ;;  %5223 = vmatpush.bf16.msra.mxu2 %v12238_v55 }
 0x2eb   :  { %v15182_v58 = vld [vmem:[#allocation8 + $0xb4c] sm:$0xf]  ;;  %v12206_v4 = vor.u32 %v15118_v2, %v12203_v11 }
 0x2ec   :  { %v12459_v33 = vld [vmem:[#allocation8 + $0xb68] sm:$0xf0]  ;;  %5209 = vmatpush.bf16.msra.mxu1 %v11982_v28  ;;  %5237 = vmatpush.bf16.msra.mxu3 %v12494_v5 }
 0x2ed   :  { %v14982_v34 = vld [vmem:[#allocation8 + $0x50c] sm:$0xf]  ;;  %v12462_v15 = vor.u32 %v15182_v58, %v12459_v33 }
 0x2ee   :  { %v11659_v19 = vld [vmem:[#allocation8 + $0x528] sm:$0xf0]  ;;  %5196 = vmatpush.bf16.msra.mxu0 %v11694_v21  ;;  %5224 = vmatpush.bf16.msra.mxu2 %v12206_v4 }
 0x2ef   :  { %v15046_v24 = vld [vmem:[#allocation8 + $0x70c] sm:$0xf]  ;;  %v11662_v10 = vor.u32 %v14982_v34, %v11659_v19 }
 0x2f0   :  { %v11915_v12 = vld [vmem:[#allocation8 + $0x728] sm:$0xf0]  ;;  %5210 = vmatpush.bf16.msra.mxu1 %v11950_v50  ;;  %5238 = vmatpush.bf16.msra.mxu3 %v12462_v15 }
 0x2f1   :  { %v15110_v42 = vld [vmem:[#allocation8 + $0x90c] sm:$0xf]  ;;  %v11918_v36 = vor.u32 %v15046_v24, %v11915_v12 }
 0x2f2   :  { %v12171_v17 = vld [vmem:[#allocation8 + $0x928] sm:$0xf0]  ;;  %5197 = vmatpush.bf16.msra.mxu0 %v11662_v10 }
 0x2f3   :  { %v15174_v27 = vld [vmem:[#allocation8 + $0xb0c] sm:$0xf]  ;;  %v12174_v38 = vor.u32 %v15110_v42, %v12171_v17 }
 0x2f4   :  { %v12427_v59 = vld [vmem:[#allocation8 + $0xb28] sm:$0xf0]  ;;  %5211 = vmatpush.bf16.msra.mxu1 %v11918_v36 }
 0x2f5   :  { %v14974_v41 = vld [vmem:[#allocation8 + $0x4cc] sm:$0xf]  ;;  %v12430_v48 = vor.u32 %v15174_v27, %v12427_v59  ;;  %5225 = vmatpush.bf16.msra.mxu2 %v12174_v38  ;;  %v14883_v38 = vld [vmem:[#allocation8 + $0x1ec] sm:$0xf0] }
 0x2f6   :  { %v11627_v62 = vld [vmem:[#allocation8 + $0x4e8] sm:$0xf0] }
 0x2f7   :  { %v15038_v40 = vld [vmem:[#allocation8 + $0x6cc] sm:$0xf]  ;;  %v11630_v29 = vor.u32 %v14974_v41, %v11627_v62  ;;  %5239 = vmatpush.bf16.msra.mxu3 %v12430_v48  ;;  %v11249_v62 = vld [vmem:[#allocation8 + $0x1d0] sm:$0xf] }
 0x2f8   :  { %v11883_v6 = vld [vmem:[#allocation8 + $0x6e8] sm:$0xf0]  ;;  %v11505_v48 = vld [vmem:[#allocation8 + $0x3d0] sm:$0xf] }
 0x2f9   :  { %v15102_v25 = vld [vmem:[#allocation8 + $0x8cc] sm:$0xf]  ;;  %v11886_v31 = vor.u32 %v15038_v40, %v11883_v6  ;;  %5198 = vmatpush.bf16.msra.mxu0 %v11630_v29  ;;  %v14947_v40 = vld [vmem:[#allocation8 + $0x3ec] sm:$0xf0] }
 0x2fa   :  { %v12139_v35 = vld [vmem:[#allocation8 + $0x8e8] sm:$0xf0]  ;;  %v11761_v6 = vld [vmem:[#allocation8 + $0x5d0] sm:$0xf] }
 0x2fb   :  { %v15166_v37 = vld [vmem:[#allocation8 + $0xacc] sm:$0xf]  ;;  %v12142_v60 = vor.u32 %v15102_v25, %v12139_v35  ;;  %5212 = vmatpush.bf16.msra.mxu1 %v11886_v31  ;;  %v15075_v29 = vld [vmem:[#allocation8 + $0x7ec] sm:$0xf0] }
 0x2fc   :  { %v12395_v49 = vld [vmem:[#allocation8 + $0xae8] sm:$0xf0] }
 0x2fd   :  { %v14966_v22 = vld [vmem:[#allocation8 + $0x48c] sm:$0xf]  ;;  %v12398_v1 = vor.u32 %v15166_v37, %v12395_v49  ;;  %5226 = vmatpush.bf16.msra.mxu2 %v12142_v60  ;;  %v15011_v37 = vld [vmem:[#allocation8 + $0x5ec] sm:$0xf0]  ;;  %v11506_v60 = vor.u32 %v14947_v40, %v11505_v48 }
 0x2fe   :  { %v11595_v39 = vld [vmem:[#allocation8 + $0x4a8] sm:$0xf0]  ;;  %v12017_v49 = vld [vmem:[#allocation8 + $0x7d0] sm:$0xf] }
 0x2ff   :  { %v15030_v57 = vld [vmem:[#allocation8 + $0x68c] sm:$0xf]  ;;  %v11598_v51 = vor.u32 %v14966_v22, %v11595_v39  ;;  %5240 = vmatpush.bf16.msra.mxu3 %v12398_v1  ;;  %v11250_v39 = vor.u32 %v14883_v38, %v11249_v62  ;;  %v11217_v1 = vld [vmem:[#allocation8 + $0x190] sm:$0xf] }
 0x300   :  { %v11851_v63 = vld [vmem:[#allocation8 + $0x6a8] sm:$0xf0]  ;;  %v11409_v48 = vld [vmem:[#allocation8 + $0x310] sm:$0xf] }
 0x301   :  { %v15094_v44 = vld [vmem:[#allocation8 + $0x88c] sm:$0xf]  ;;  %v11854_v55 = vor.u32 %v15030_v57, %v11851_v63  ;;  %5199 = vmatpush.bf16.msra.mxu0 %v11598_v51  ;;  %v14875_v57 = vld [vmem:[#allocation8 + $0x1ac] sm:$0xf0]  ;;  %v11762_v63 = vor.u32 %v15011_v37, %v11761_v6 }
 0x302   :  { %v12107_v56 = vld [vmem:[#allocation8 + $0x8a8] sm:$0xf0]  ;;  %v15003_v51 = vld [vmem:[#allocation8 + $0x5ac] sm:$0xf0] }
 0x303   :  { %v15158_v28 = vld [vmem:[#allocation8 + $0xa8c] sm:$0xf]  ;;  %v12110_v32 = vor.u32 %v15094_v44, %v12107_v56  ;;  %5213 = vmatpush.bf16.msra.mxu1 %v11854_v55  ;;  %v12018_v44 = vor.u32 %v15075_v29, %v12017_v49  ;;  %v11473_v56 = vld [vmem:[#allocation8 + $0x390] sm:$0xf] }
 0x304   :  { %v12363_v46 = vld [vmem:[#allocation8 + $0xaa8] sm:$0xf0]  ;;  %v11985_v55 = vld [vmem:[#allocation8 + $0x790] sm:$0xf] }
 0x305   :  { %v14958_v5 = vld [vmem:[#allocation8 + $0x44c] sm:$0xf]  ;;  %v12366_v2 = vor.u32 %v15158_v28, %v12363_v46  ;;  %5227 = vmatpush.bf16.msra.mxu2 %v12110_v32  ;;  %v14939_v28 = vld [vmem:[#allocation8 + $0x3ac] sm:$0xf0] }
 0x306   :  { %v11563_v7 = vld [vmem:[#allocation8 + $0x468] sm:$0xf0]  ;;  %v11729_v46 = vld [vmem:[#allocation8 + $0x590] sm:$0xf]  ;;  %v11474_v32 = vor.u32 %v14939_v28, %v11473_v56  ;;  %v4951_v56 = vpop.f32.mrf.mxu2 }
 0x307   :  { %v15022_v11 = vld [vmem:[#allocation8 + $0x64c] sm:$0xf]  ;;  %v11566_v4 = vor.u32 %v14958_v5, %v11563_v7  ;;  %5241 = vmatpush.bf16.msra.mxu3 %v12366_v2  ;;  %v15067_v5 = vld [vmem:[#allocation8 + $0x7ac] sm:$0xf0]  ;;  %v11218_v7 = vor.u32 %v14875_v57, %v11217_v1 }
 0x308   :  { %v11819_v58 = vld [vmem:[#allocation8 + $0x668] sm:$0xf0]  ;;  %v11185_v2 = vld [vmem:[#allocation8 + $0x150] sm:$0xf] }
 0x309   :  { %v15086_v33 = vld [vmem:[#allocation8 + $0x84c] sm:$0xf]  ;;  %v11822_v15 = vor.u32 %v15022_v11, %v11819_v58  ;;  %5200 = vmatpush.bf16.msra.mxu0 %v11566_v4  ;;  %v14867_v11 = vld [vmem:[#allocation8 + $0x16c] sm:$0xf0]  ;;  %v16488_v58 = vld [vmem:[#allocation14] sm:$0xff] }
 0x30a   :  { %v12075_v21 = vld [vmem:[#allocation8 + $0x868] sm:$0xf0]  ;;  %v11697_v4 = vld [vmem:[#allocation8 + $0x550] sm:$0xf] }
 0x30b   :  { %v15150_v50 = vld [vmem:[#allocation8 + $0xa4c] sm:$0xf]  ;;  %v12078_v17 = vor.u32 %v15086_v33, %v12075_v21  ;;  %5214 = vmatpush.bf16.msra.mxu1 %v11822_v15  ;;  %v17214_v33 = vperm.slane %v16488_v58, 3  ;;  %v11730_v21 = vor.u32 %v15003_v51, %v11729_v46  ;;  %v14995_v15 = vld [vmem:[#allocation8 + $0x56c] sm:$0xf0] }
 0x30c   :  { %v12331_v34 = vld [vmem:[#allocation8 + $0xa68] sm:$0xf0]  ;;  %v11698_v62 = vor.u32 %v14995_v15, %v11697_v4  ;;  %v14923_v40 = vld [vmem:[#allocation8 + $0x32c] sm:$0xf0] }
 0x30d   :  { %v14950_v19 = vld [vmem:[#allocation8 + $0x40c] sm:$0xf]  ;;  %v12334_v27 = vor.u32 %v15150_v50, %v12331_v34  ;;  %5228 = vmatpush.bf16.msra.mxu2 %v12078_v17  ;;  %v11986_v50 = vor.u32 %v15067_v5, %v11985_v55  ;;  %v11441_v34 = vld [vmem:[#allocation8 + $0x350] sm:$0xf]  ;;  %v4937_v17 = vpop.f32.mrf.mxu1 }
 0x30e   :  { %v11531_v24 = vld [vmem:[#allocation8 + $0x428] sm:$0xf0]  ;;  %v11665_v6 = vld [vmem:[#allocation8 + $0x510] sm:$0xf] }
 0x30f   :  { %v15014_v12 = vld [vmem:[#allocation8 + $0x60c] sm:$0xf]  ;;  %v11534_v25 = vor.u32 %v14950_v19, %v11531_v24  ;;  %5242 = vmatpush.bf16.msra.mxu3 %v12334_v27  ;;  %v14931_v19 = vld [vmem:[#allocation8 + $0x36c] sm:$0xf0]  ;;  %v11186_v27 = vor.u32 %v14867_v11, %v11185_v2 }
 0x310   :  { %v11787_v42 = vld [vmem:[#allocation8 + $0x628] sm:$0xf0]  ;;  %v11953_v24 = vld [vmem:[#allocation8 + $0x750] sm:$0xf] }
 0x311   :  { %v15078_v59 = vld [vmem:[#allocation8 + $0x80c] sm:$0xf]  ;;  %v11790_v35 = vor.u32 %v15014_v12, %v11787_v42  ;;  %5201 = vmatpush.bf16.msra.mxu0 %v11534_v25  ;;  %v15059_v12 = vld [vmem:[#allocation8 + $0x76c] sm:$0xf0]  ;;  %v4923_v42 = vpop.f32.mrf.mxu0 }
 0x312   :  { %v12043_v10 = vld [vmem:[#allocation8 + $0x828] sm:$0xf0]  ;;  %v11954_v38 = vor.u32 %v15059_v12, %v11953_v24  ;;  %v11921_v37 = vld [vmem:[#allocation8 + $0x710] sm:$0xf] }
 0x313   :  { %v15142_v36 = vld [vmem:[#allocation8 + $0xa0c] sm:$0xf]  ;;  %v12046_v31 = vor.u32 %v15078_v59, %v12043_v10  ;;  %5215 = vmatpush.bf16.msra.mxu1 %v11790_v35  ;;  %v11442_v59 = vor.u32 %v14931_v19, %v11441_v34  ;;  %v4924_v10 = vadd.f32 %v4923_v42, %v17214_v33  ;;  %v14987_v35 = vld [vmem:[#allocation8 + $0x52c] sm:$0xf0] }
 0x314   :  { %v12299_v41 = vld [vmem:[#allocation8 + $0xa28] sm:$0xf0]  ;;  %5202 = vmatmul.bf16.vlgmr.msra.gmra.mxu0 %v16434_v14  ;;  %v15051_v49 = vld [vmem:[#allocation8 + $0x72c] sm:$0xf0] }
 0x315   :  { %v12302_v22 = vor.u32 %v15142_v36, %v12299_v41  ;;  %5229 = vmatpush.bf16.msra.mxu2 %v12046_v31  ;;  %5250 = vmatpush.bf16.msrb.mxu0 %v11250_v39  ;;  %v11153_v36 = vld [vmem:[#allocation8 + $0x110] sm:$0xf]  ;;  %v4938_v25 = vadd.f32 %v4937_v17, %v4924_v10  ;;  %v11410_v31 = vor.u32 %v14923_v40, %v11409_v48 }
 0x316   :  { %5216 = vmatmul.bf16.vlgmr.msra.gmra.mxu1 %v16438_v26  ;;  %v14859_v41 = vld [vmem:[#allocation8 + $0x12c] sm:$0xf0]  ;;  %v11922_v1 = vor.u32 %v15051_v49, %v11921_v37 }
 0x317   :  { %5243 = vmatpush.bf16.msra.mxu3 %v12302_v22  ;;  %5264 = vmatpush.bf16.msrb.mxu1 %v11506_v60  ;;  %v11154_v29 = vor.u32 %v14859_v41, %v11153_v36  ;;  %v11121_v22 = vld [vmem:[#allocation8 + $0xd0] sm:$0xf]  ;;  %v11666_v60 = vor.u32 %v14987_v35, %v11665_v6  ;;  %v4952_v55 = vadd.f32 %v4951_v56, %v4938_v25 }
 0x318   :  { %5230 = vmatmul.bf16.vlgmr.msra.gmra.mxu2 %v16466_v30  ;;  %v14851_v39 = vld [vmem:[#allocation8 + $0xec] sm:$0xf0] }
 0x319   :  { %5278 = vmatpush.bf16.msrb.mxu2 %v11762_v63  ;;  %5251 = vmatpush.bf16.msrb.mxu0 %v11218_v7  ;;  %v11377_v57 = vld [vmem:[#allocation8 + $0x2d0] sm:$0xf]  ;;  %v16497_v5 = vpop.f32.mrf.mxu0  ;;  %v16499_v7 = vpop.f32.mrf.mxu1  ;;  %v11122_v2 = vor.u32 %v14851_v39, %v11121_v22 }
 0x31a   :  { %5244 = vmatmul.bf16.vlgmr.msra.gmra.mxu3 %v16470_v18  ;;  %v14915_v63 = vld [vmem:[#allocation8 + $0x2ec] sm:$0xf0] }
 0x31b   :  { %5292 = vmatpush.bf16.msrb.mxu3 %v12018_v44  ;;  %5265 = vmatpush.bf16.msrb.mxu1 %v11474_v32  ;;  %v11633_v44 = vld [vmem:[#allocation8 + $0x4d0] sm:$0xf]  ;;  %v4965_v32 = vpop.f32.mrf.mxu3  ;;  %v11378_v11 = vor.u32 %v14915_v63, %v11377_v57 }
 0x31c   :  { %v14979_v28 = vld [vmem:[#allocation8 + $0x4ec] sm:$0xf0]  ;;  %v4966_v34 = vadd.f32 %v4965_v32, %v4952_v55 }
 0x31d   :  { %5279 = vmatpush.bf16.msrb.mxu2 %v11730_v21  ;;  %5252 = vmatpush.bf16.msrb.mxu0 %v11186_v27  ;;  %v11889_v46 = vld [vmem:[#allocation8 + $0x6d0] sm:$0xf]  ;;  %v11634_v19 = vor.u32 %v14979_v28, %v11633_v44 }
 0x31e   :  { %v15043_v51 = vld [vmem:[#allocation8 + $0x6ec] sm:$0xf0] }
 0x31f   :  { %5293 = vmatpush.bf16.msrb.mxu3 %v11986_v50  ;;  %5266 = vmatpush.bf16.msrb.mxu1 %v11442_v59  ;;  %v11089_v21 = vld [vmem:[#allocation8 + $0x90] sm:$0xf]  ;;  %v11890_v4 = vor.u32 %v15043_v51, %v11889_v46 }
 0x320   :  { %v14843_v50 = vld [vmem:[#allocation8 + $0xac] sm:$0xf0] }
 0x321   :  { %5280 = vmatpush.bf16.msrb.mxu2 %v11698_v62  ;;  %5253 = vmatpush.bf16.msrb.mxu0 %v11154_v29  ;;  %v11345_v15 = vld [vmem:[#allocation8 + $0x290] sm:$0xf]  ;;  %v11090_v59 = vor.u32 %v14843_v50, %v11089_v21  ;;  %v4979_v49 = vpop.f32.mrf.mxu0  ;;  %v4993_v56 = vpop.f32.mrf.mxu1 }
 0x322   :  { %v14907_v24 = vld [vmem:[#allocation8 + $0x2ac] sm:$0xf0]  ;;  %v4980_v39 = vadd.f32 %v4979_v49, %v4966_v34 }
 0x323   :  { %5294 = vmatpush.bf16.msrb.mxu3 %v11954_v38  ;;  %5267 = vmatpush.bf16.msrb.mxu1 %v11410_v31  ;;  %v11601_v12 = vld [vmem:[#allocation8 + $0x490] sm:$0xf]  ;;  %v11346_v10 = vor.u32 %v14907_v24, %v11345_v15  ;;  %v11251_v15 = vld [vmem:[#allocation8 + $0x1f0] sm:$0xf0] }
 0x324   :  { %v14971_v42 = vld [vmem:[#allocation8 + $0x4ac] sm:$0xf0]  ;;  %v16501_v55 = vadd.f32 %v4993_v56, %v4980_v39  ;;  %v14943_v24 = vld [vmem:[#allocation8 + $0x3d4] sm:$0xf] }
 0x325   :  { %5281 = vmatpush.bf16.msrb.mxu2 %v11666_v60  ;;  %v11857_v17 = vld [vmem:[#allocation8 + $0x690] sm:$0xf]  ;;  %5254 = vmatpush.bf16.msrb.mxu0 %v11122_v2  ;;  %v11602_v62 = vor.u32 %v14971_v42, %v11601_v12  ;;  %v11507_v12 = vld [vmem:[#allocation8 + $0x3f0] sm:$0xf0] }
 0x326   :  { %v15035_v27 = vld [vmem:[#allocation8 + $0x6ac] sm:$0xf0]  ;;  %v11443_v56 = vld [vmem:[#allocation8 + $0x370] sm:$0xf0] }
 0x327   :  { %5295 = vmatpush.bf16.msrb.mxu3 %v11922_v1  ;;  %5268 = vmatpush.bf16.msrb.mxu1 %v11378_v11  ;;  %v11057_v36 = vld [vmem:[#allocation8 + $0x50] sm:$0xf]  ;;  %v11858_v38 = vor.u32 %v15035_v27, %v11857_v17 }
 0x328   :  { %v14835_v41 = vld [vmem:[#allocation8 + $0x6c] sm:$0xf0] }
 0x329   :  { %5282 = vmatpush.bf16.msrb.mxu2 %v11634_v19  ;;  %v11313_v48 = vld [vmem:[#allocation8 + $0x250] sm:$0xf]  ;;  %5255 = vmatpush.bf16.msrb.mxu0 %v11090_v59  ;;  %v11058_v31 = vor.u32 %v14835_v41, %v11057_v36  ;;  %v14879_v19 = vld [vmem:[#allocation8 + $0x1d4] sm:$0xf] }
 0x32a   :  { %v14899_v40 = vld [vmem:[#allocation8 + $0x26c] sm:$0xf0]  ;;  %v11254_v41 = vor.u32 %v14879_v19, %v11251_v15  ;;  %v14855_v19 = vld [vmem:[#allocation8 + $0x114] sm:$0xf] }
 0x32b   :  { %5296 = vmatpush.bf16.msrb.mxu3 %v11890_v4  ;;  %v11569_v6 = vld [vmem:[#allocation8 + $0x450] sm:$0xf]  ;;  %5269 = vmatpush.bf16.msrb.mxu1 %v11346_v10  ;;  %v11314_v22 = vor.u32 %v14899_v40, %v11313_v48  ;;  %v14871_v40 = vld [vmem:[#allocation8 + $0x194] sm:$0xf] }
 0x32c   :  { %v14963_v25 = vld [vmem:[#allocation8 + $0x46c] sm:$0xf0]  ;;  %v11411_v15 = vld [vmem:[#allocation8 + $0x330] sm:$0xf0] }
 0x32d   :  { %v11825_v35 = vld [vmem:[#allocation8 + $0x650] sm:$0xf]  ;;  %5283 = vmatpush.bf16.msrb.mxu2 %v11602_v62  ;;  %v11570_v63 = vor.u32 %v14963_v25, %v11569_v6  ;;  %5256 = vmatpush.bf16.msrb.mxu0 %v11058_v31  ;;  %v11510_v62 = vor.u32 %v14943_v24, %v11507_v12  ;;  %v11219_v6 = vld [vmem:[#allocation8 + $0x1b0] sm:$0xf0] }
 0x32e   :  { %v15027_v37 = vld [vmem:[#allocation8 + $0x66c] sm:$0xf0]  ;;  %v14935_v25 = vld [vmem:[#allocation8 + $0x394] sm:$0xf] }
 0x32f   :  { %v11025_v29 = vld [vmem:[#allocation8 + $0x10] sm:$0xf]  ;;  %5297 = vmatpush.bf16.msrb.mxu3 %v11858_v38  ;;  %v11826_v44 = vor.u32 %v15027_v37, %v11825_v35  ;;  %5270 = vmatpush.bf16.msrb.mxu1 %v11314_v22  ;;  %v11475_v35 = vld [vmem:[#allocation8 + $0x3b0] sm:$0xf0]  ;;  %v11222_v22 = vor.u32 %v14871_v40, %v11219_v6 }
 0x330   :  { %v14827_v60 = vld [vmem:[#allocation8 + $0x2c] sm:$0xf0]  ;;  %v11478_v39 = vor.u32 %v14935_v25, %v11475_v35 }
 0x331   :  { %v11281_v1 = vld [vmem:[#allocation8 + $0x210] sm:$0xf]  ;;  %v11026_v34 = vor.u32 %v14827_v60, %v11025_v29  ;;  %5284 = vmatpush.bf16.msrb.mxu2 %v11570_v63  ;;  %v11187_v63 = vld [vmem:[#allocation8 + $0x170] sm:$0xf0] }
 0x332   :  { %v14891_v57 = vld [vmem:[#allocation8 + $0x22c] sm:$0xf0] }
 0x333   :  { %v11537_v28 = vld [vmem:[#allocation8 + $0x410] sm:$0xf]  ;;  %v11282_v4 = vor.u32 %v14891_v57, %v11281_v1  ;;  %5298 = vmatpush.bf16.msrb.mxu3 %v11826_v44  ;;  %5257 = vmatpush.bf16.msrb.mxu0 %v11026_v34  ;;  %v14863_v57 = vld [vmem:[#allocation8 + $0x154] sm:$0xf] }
 0x334   :  { %v14955_v46 = vld [vmem:[#allocation8 + $0x42c] sm:$0xf0]  ;;  %v14927_v44 = vld [vmem:[#allocation8 + $0x354] sm:$0xf] }
 0x335   :  { %v11793_v51 = vld [vmem:[#allocation8 + $0x610] sm:$0xf]  ;;  %v11538_v42 = vor.u32 %v14955_v46, %v11537_v28  ;;  %5271 = vmatpush.bf16.msrb.mxu1 %v11282_v4  ;;  %v11155_v34 = vld [vmem:[#allocation8 + $0x130] sm:$0xf0] }
 0x336   :  { %v15019_v32 = vld [vmem:[#allocation8 + $0x62c] sm:$0xf0]  ;;  %5258 = vmatmul.bf16.vlgmr.msrb.gmra.mxu0 %v16426_v3  ;;  %v14919_v4 = vld [vmem:[#allocation8 + $0x314] sm:$0xf] }
 0x337   :  { %v12273_v2 = vld [vmem:[#allocation8 + $0x9d0] sm:$0xf]  ;;  %v11794_v17 = vor.u32 %v15019_v32, %v11793_v51  ;;  %5285 = vmatpush.bf16.msrb.mxu2 %v11538_v42 }
 0x338   :  { %v15139_v11 = vld [vmem:[#allocation8 + $0x9ec] sm:$0xf0]  ;;  %5272 = vmatmul.bf16.vlgmr.msrb.gmra.mxu1 %v16430_v54 }
 0x339   :  { %v12529_v21 = vld [vmem:[#allocation8 + $0xbd0] sm:$0xf]  ;;  %v12274_v27 = vor.u32 %v15139_v11, %v12273_v2  ;;  %5299 = vmatpush.bf16.msrb.mxu3 %v11794_v17  ;;  %v11190_v2 = vor.u32 %v14863_v57, %v11187_v63  ;;  %v11446_v11 = vor.u32 %v14927_v44, %v11443_v56 }
 0x33a   :  { %v15203_v50 = vld [vmem:[#allocation8 + $0xbec] sm:$0xf0]  ;;  %5286 = vmatmul.bf16.vlgmr.msrb.gmra.mxu2 %v16434_v14 }
 0x33b   :  { %v12530_v59 = vor.u32 %v15203_v50, %v12529_v21  ;;  %v12241_v10 = vld [vmem:[#allocation8 + $0x990] sm:$0xf]  ;;  %5306 = vmatpush.bf16.msra.mxu0 %v12274_v27  ;;  %5334 = vmatpush.bf16.msra.mxu2 %v11254_v41  ;;  %v11158_v27 = vor.u32 %v14855_v19, %v11155_v34  ;;  %v14847_v41 = vld [vmem:[#allocation8 + $0xd4] sm:$0xf] }
 0x33c   :  { %v15131_v36 = vld [vmem:[#allocation8 + $0x9ac] sm:$0xf0]  ;;  %5300 = vmatmul.bf16.vlgmr.msrb.gmra.mxu3 %v16438_v26 }
 0x33d   :  { %v12497_v38 = vld [vmem:[#allocation8 + $0xb90] sm:$0xf]  ;;  %5320 = vmatpush.bf16.msra.mxu1 %v12530_v59  ;;  %v12242_v37 = vor.u32 %v15131_v36, %v12241_v10  ;;  %5348 = vmatpush.bf16.msra.mxu3 %v11510_v62  ;;  %v11414_v59 = vor.u32 %v14919_v4, %v11411_v15  ;;  %v11123_v62 = vld [vmem:[#allocation8 + $0xf0] sm:$0xf0] }
 0x33e   :  { %v15195_v48 = vld [vmem:[#allocation8 + $0xbac] sm:$0xf0] }
 0x33f   :  { %v12498_v49 = vor.u32 %v15195_v48, %v12497_v38  ;;  %v12209_v29 = vld [vmem:[#allocation8 + $0x950] sm:$0xf]  ;;  %5307 = vmatpush.bf16.msra.mxu0 %v12242_v37  ;;  %5335 = vmatpush.bf16.msra.mxu2 %v11222_v22  ;;  %v14911_v38 = vld [vmem:[#allocation8 + $0x2d4] sm:$0xf]  ;;  %v11126_v37 = vor.u32 %v14847_v41, %v11123_v62 }
 0x340   :  { %v15123_v31 = vld [vmem:[#allocation8 + $0x96c] sm:$0xf0]  ;;  %v11379_v48 = vld [vmem:[#allocation8 + $0x2f0] sm:$0xf0] }
 0x341   :  { %v12465_v60 = vld [vmem:[#allocation8 + $0xb50] sm:$0xf]  ;;  %5321 = vmatpush.bf16.msra.mxu1 %v12498_v49  ;;  %v12210_v28 = vor.u32 %v15123_v31, %v12209_v29  ;;  %5349 = vmatpush.bf16.msra.mxu3 %v11478_v39  ;;  %v11382_v49 = vor.u32 %v14911_v38, %v11379_v48  ;;  %v14839_v22 = vld [vmem:[#allocation8 + $0x94] sm:$0xf] }
 0x342   :  { %v15187_v1 = vld [vmem:[#allocation8 + $0xb6c] sm:$0xf0]  ;;  %v11091_v39 = vld [vmem:[#allocation8 + $0xb0] sm:$0xf0] }
 0x343   :  { %v12466_v46 = vor.u32 %v15187_v1, %v12465_v60  ;;  %v12177_v51 = vld [vmem:[#allocation8 + $0x910] sm:$0xf]  ;;  %5308 = vmatpush.bf16.msra.mxu0 %v12210_v28  ;;  %5336 = vmatpush.bf16.msra.mxu2 %v11190_v2  ;;  %v14903_v60 = vld [vmem:[#allocation8 + $0x294] sm:$0xf]  ;;  %v11094_v28 = vor.u32 %v14839_v22, %v11091_v39 }
 0x344   :  { %v15115_v32 = vld [vmem:[#allocation8 + $0x92c] sm:$0xf0]  ;;  %v11347_v1 = vld [vmem:[#allocation8 + $0x2b0] sm:$0xf0] }
 0x345   :  { %v12433_v21 = vld [vmem:[#allocation8 + $0xb10] sm:$0xf]  ;;  %5322 = vmatpush.bf16.msra.mxu1 %v12466_v46  ;;  %v12178_v24 = vor.u32 %v15115_v32, %v12177_v51  ;;  %5350 = vmatpush.bf16.msra.mxu3 %v11446_v11  ;;  %v11350_v46 = vor.u32 %v14903_v60, %v11347_v1  ;;  %v14831_v2 = vld [vmem:[#allocation8 + $0x54] sm:$0xf] }
 0x346   :  { %v15179_v50 = vld [vmem:[#allocation8 + $0xb2c] sm:$0xf0]  ;;  %v11059_v11 = vld [vmem:[#allocation8 + $0x70] sm:$0xf0] }
 0x347   :  { %v12434_v12 = vor.u32 %v15179_v50, %v12433_v21  ;;  %v12145_v42 = vld [vmem:[#allocation8 + $0x8d0] sm:$0xf]  ;;  %5309 = vmatpush.bf16.msra.mxu0 %v12178_v24  ;;  %5337 = vmatpush.bf16.msra.mxu2 %v11158_v27  ;;  %v14895_v21 = vld [vmem:[#allocation8 + $0x254] sm:$0xf] }
 0x348   :  { %v15107_v17 = vld [vmem:[#allocation8 + $0x8ec] sm:$0xf0]  ;;  %v11315_v50 = vld [vmem:[#allocation8 + $0x270] sm:$0xf0] }
 0x349   :  { %v12401_v10 = vld [vmem:[#allocation8 + $0xad0] sm:$0xf]  ;;  %5323 = vmatpush.bf16.msra.mxu1 %v12434_v12  ;;  %v12146_v40 = vor.u32 %v15107_v17, %v12145_v42  ;;  %5351 = vmatpush.bf16.msra.mxu3 %v11414_v59  ;;  %v11062_v42 = vor.u32 %v14831_v2, %v11059_v11  ;;  %v11318_v17 = vor.u32 %v14895_v21, %v11315_v50  ;;  %v14823_v27 = vld [vmem:[#allocation8 + $0x14] sm:$0xf] }
 0x34a   :  { %v15171_v36 = vld [vmem:[#allocation8 + $0xaec] sm:$0xf0]  ;;  %v11027_v59 = vld [vmem:[#allocation8 + $0x30] sm:$0xf0] }
 0x34b   :  { %v12402_v6 = vor.u32 %v15171_v36, %v12401_v10  ;;  %v12113_v25 = vld [vmem:[#allocation8 + $0x890] sm:$0xf]  ;;  %5310 = vmatpush.bf16.msra.mxu0 %v12146_v40  ;;  %5338 = vmatpush.bf16.msra.mxu2 %v11126_v37  ;;  %v14887_v10 = vld [vmem:[#allocation8 + $0x214] sm:$0xf] }
 0x34c   :  { %v15099_v35 = vld [vmem:[#allocation8 + $0x8ac] sm:$0xf0]  ;;  %v11283_v36 = vld [vmem:[#allocation8 + $0x230] sm:$0xf0] }
 0x34d   :  { %v12369_v29 = vld [vmem:[#allocation8 + $0xa90] sm:$0xf]  ;;  %5324 = vmatpush.bf16.msra.mxu1 %v12402_v6  ;;  %v12114_v57 = vor.u32 %v15099_v35, %v12113_v25  ;;  %5352 = vmatpush.bf16.msra.mxu3 %v11382_v49  ;;  %v15007_v41 = vld [vmem:[#allocation8 + $0x5d4] sm:$0xf] }
 0x34e   :  { %v15163_v31 = vld [vmem:[#allocation8 + $0xaac] sm:$0xf0]  ;;  %v11763_v62 = vld [vmem:[#allocation8 + $0x5f0] sm:$0xf0] }
 0x34f   :  { %v12370_v63 = vor.u32 %v15163_v31, %v12369_v29  ;;  %v12081_v44 = vld [vmem:[#allocation8 + $0x850] sm:$0xf]  ;;  %5311 = vmatpush.bf16.msra.mxu0 %v12114_v57  ;;  %5339 = vmatpush.bf16.msra.mxu2 %v11094_v28  ;;  %v15071_v38 = vld [vmem:[#allocation8 + $0x7d4] sm:$0xf]  ;;  %v11030_v29 = vor.u32 %v14823_v27, %v11027_v59  ;;  %v11286_v31 = vor.u32 %v14887_v10, %v11283_v36  ;;  %v16509_v27 = vpop.f32.mrf.mxu2 }
 0x350   :  { %v15091_v56 = vld [vmem:[#allocation8 + $0x86c] sm:$0xf0]  ;;  %v12019_v48 = vld [vmem:[#allocation8 + $0x7f0] sm:$0xf0]  ;;  %v11766_v22 = vor.u32 %v15007_v41, %v11763_v62 }
 0x351   :  { %v12337_v51 = vld [vmem:[#allocation8 + $0xa50] sm:$0xf]  ;;  %5325 = vmatpush.bf16.msra.mxu1 %v12370_v63  ;;  %v12082_v34 = vor.u32 %v15091_v56, %v12081_v44  ;;  %5353 = vmatpush.bf16.msra.mxu3 %v11350_v46  ;;  %v15135_v40 = vld [vmem:[#allocation8 + $0x9d4] sm:$0xf]  ;;  %v12022_v39 = vor.u32 %v15071_v38, %v12019_v48 }
 0x352   :  { %v15155_v32 = vld [vmem:[#allocation8 + $0xa6c] sm:$0xf0]  ;;  %v12275_v35 = vld [vmem:[#allocation8 + $0x9f0] sm:$0xf0] }
 0x353   :  { %v12049_v19 = vld [vmem:[#allocation8 + $0x810] sm:$0xf]  ;;  %v12338_v4 = vor.u32 %v15155_v32, %v12337_v51  ;;  %5312 = vmatpush.bf16.msra.mxu0 %v12082_v34  ;;  %v15199_v37 = vld [vmem:[#allocation8 + $0xbd4] sm:$0xf]  ;;  %5340 = vmatpush.bf16.msra.mxu2 %v11062_v42  ;;  %v12278_v57 = vor.u32 %v15135_v40, %v12275_v35 }
 0x354   :  { %v15083_v15 = vld [vmem:[#allocation8 + $0x82c] sm:$0xf0]  ;;  %v12531_v49 = vld [vmem:[#allocation8 + $0xbf0] sm:$0xf0] }
 0x355   :  { %v12305_v24 = vld [vmem:[#allocation8 + $0xa10] sm:$0xf]  ;;  %5326 = vmatpush.bf16.msra.mxu1 %v12338_v4  ;;  %v12050_v6 = vor.u32 %v15083_v15, %v12049_v19  ;;  %5354 = vmatpush.bf16.msra.mxu3 %v11318_v17  ;;  %v14999_v60 = vld [vmem:[#allocation8 + $0x594] sm:$0xf]  ;;  %v12534_v63 = vor.u32 %v15199_v37, %v12531_v49 }
 0x356   :  { %v15147_v12 = vld [vmem:[#allocation8 + $0xa2c] sm:$0xf0]  ;;  %v11731_v1 = vld [vmem:[#allocation8 + $0x5b0] sm:$0xf0] }
 0x357   :  { %v12306_v25 = vor.u32 %v15147_v12, %v12305_v24  ;;  %v15063_v44 = vld [vmem:[#allocation8 + $0x794] sm:$0xf]  ;;  %5313 = vmatpush.bf16.msra.mxu0 %v12050_v6  ;;  %5341 = vmatpush.bf16.msra.mxu2 %v11030_v29  ;;  %v11734_v2 = vor.u32 %v14999_v60, %v11731_v1 }
 0x358   :  { %v11987_v56 = vld [vmem:[#allocation8 + $0x7b0] sm:$0xf0] }
 0x359   :  { %v15127_v28 = vld [vmem:[#allocation8 + $0x994] sm:$0xf]  ;;  %5327 = vmatpush.bf16.msra.mxu1 %v12306_v25  ;;  %5355 = vmatpush.bf16.msra.mxu3 %v11286_v31  ;;  %v11990_v11 = vor.u32 %v15063_v44, %v11987_v56 }
 0x35a   :  { %v12243_v46 = vld [vmem:[#allocation8 + $0x9b0] sm:$0xf0]  ;;  %5314 = vmatmul.bf16.vlgmr.msra.gmra.mxu0 %v16466_v30  ;;  %5342 = vmatmul.bf16.vlgmr.msra.gmra.mxu2 %v16426_v3 }
 0x35b   :  { %v15191_v51 = vld [vmem:[#allocation8 + $0xb94] sm:$0xf]  ;;  %5362 = vmatpush.bf16.msrb.mxu0 %v11766_v22  ;;  %5390 = vmatpush.bf16.msrb.mxu2 %v12278_v57  ;;  %v12246_v19 = vor.u32 %v15127_v28, %v12243_v46 }
 0x35c   :  { %v12499_v32 = vld [vmem:[#allocation8 + $0xbb0] sm:$0xf0]  ;;  %5328 = vmatmul.bf16.vlgmr.msra.gmra.mxu1 %v16470_v18  ;;  %5356 = vmatmul.bf16.vlgmr.msra.gmra.mxu3 %v16430_v54 }
 0x35d   :  { %5376 = vmatpush.bf16.msrb.mxu1 %v12022_v39  ;;  %v14991_v21 = vld [vmem:[#allocation8 + $0x554] sm:$0xf]  ;;  %5404 = vmatpush.bf16.msrb.mxu3 %v12534_v63  ;;  %v12502_v34 = vor.u32 %v15191_v51, %v12499_v32  ;;  %v16513_v39 = vpop.f32.mrf.mxu3 }
 0x35e   :  { %v11699_v50 = vld [vmem:[#allocation8 + $0x570] sm:$0xf0] }
 0x35f   :  { %v15055_v4 = vld [vmem:[#allocation8 + $0x754] sm:$0xf]  ;;  %5363 = vmatpush.bf16.msrb.mxu0 %v11734_v2  ;;  %v11702_v59 = vor.u32 %v14991_v21, %v11699_v50  ;;  %5391 = vmatpush.bf16.msrb.mxu2 %v12246_v19  ;;  %v16515_v21 = vpop.f32.mrf.mxu2 }
 0x360   :  { %v11955_v15 = vld [vmem:[#allocation8 + $0x770] sm:$0xf0] }
 0x361   :  { %v15119_v24 = vld [vmem:[#allocation8 + $0x954] sm:$0xf]  ;;  %5377 = vmatpush.bf16.msrb.mxu1 %v11990_v11  ;;  %v11958_v10 = vor.u32 %v15055_v4, %v11955_v15  ;;  %5405 = vmatpush.bf16.msrb.mxu3 %v12502_v34 }
 0x362   :  { %v12211_v12 = vld [vmem:[#allocation8 + $0x970] sm:$0xf0] }
 0x363   :  { %v15183_v42 = vld [vmem:[#allocation8 + $0xb54] sm:$0xf]  ;;  %v12214_v62 = vor.u32 %v15119_v24, %v12211_v12  ;;  %5364 = vmatpush.bf16.msrb.mxu0 %v11702_v59 }
 0x364   :  { %v12467_v17 = vld [vmem:[#allocation8 + $0xb70] sm:$0xf0] }
 0x365   :  { %v14983_v36 = vld [vmem:[#allocation8 + $0x514] sm:$0xf]  ;;  %v12470_v38 = vor.u32 %v15183_v42, %v12467_v17  ;;  %5378 = vmatpush.bf16.msrb.mxu1 %v11958_v10  ;;  %5392 = vmatpush.bf16.msrb.mxu2 %v12214_v62 }
 0x366   :  { %v11667_v41 = vld [vmem:[#allocation8 + $0x530] sm:$0xf0] }
 0x367   :  { %v15047_v48 = vld [vmem:[#allocation8 + $0x714] sm:$0xf]  ;;  %v11670_v49 = vor.u32 %v14983_v36, %v11667_v41  ;;  %5406 = vmatpush.bf16.msrb.mxu3 %v12470_v38  ;;  %v16517_v41 = vpop.f32.mrf.mxu0 }
 0x368   :  { %v11923_v40 = vld [vmem:[#allocation8 + $0x730] sm:$0xf0] }
 0x369   :  { %v15111_v6 = vld [vmem:[#allocation8 + $0x914] sm:$0xf]  ;;  %v11926_v29 = vor.u32 %v15047_v48, %v11923_v40  ;;  %5365 = vmatpush.bf16.msrb.mxu0 %v11670_v49  ;;  %v16519_v49 = vpop.f32.mrf.mxu3 }
 0x36a   :  { %v12179_v25 = vld [vmem:[#allocation8 + $0x930] sm:$0xf0] }
 0x36b   :  { %v15175_v35 = vld [vmem:[#allocation8 + $0xb14] sm:$0xf]  ;;  %v12182_v60 = vor.u32 %v15111_v6, %v12179_v25  ;;  %5379 = vmatpush.bf16.msrb.mxu1 %v11926_v29 }
 0x36c   :  { %v12435_v37 = vld [vmem:[#allocation8 + $0xb30] sm:$0xf0] }
 0x36d   :  { %v14975_v31 = vld [vmem:[#allocation8 + $0x4d4] sm:$0xf]  ;;  %v12438_v1 = vor.u32 %v15175_v35, %v12435_v37  ;;  %5393 = vmatpush.bf16.msrb.mxu2 %v12182_v60 }
 0x36e   :  { %v11635_v22 = vld [vmem:[#allocation8 + $0x4f0] sm:$0xf0] }
 0x36f   :  { %v15039_v57 = vld [vmem:[#allocation8 + $0x6d4] sm:$0xf]  ;;  %v11638_v51 = vor.u32 %v14975_v31, %v11635_v22  ;;  %5407 = vmatpush.bf16.msrb.mxu3 %v12438_v1 }
 0x370   :  { %v11891_v63 = vld [vmem:[#allocation8 + $0x6f0] sm:$0xf0] }
 0x371   :  { %v15103_v44 = vld [vmem:[#allocation8 + $0x8d4] sm:$0xf]  ;;  %v11894_v32 = vor.u32 %v15039_v57, %v11891_v63  ;;  %5366 = vmatpush.bf16.msrb.mxu0 %v11638_v51 }
 0x372   :  { %v12147_v56 = vld [vmem:[#allocation8 + $0x8f0] sm:$0xf0] }
 0x373   :  { %v15167_v28 = vld [vmem:[#allocation8 + $0xad4] sm:$0xf]  ;;  %v12150_v50 = vor.u32 %v15103_v44, %v12147_v56  ;;  %5380 = vmatpush.bf16.msrb.mxu1 %v11894_v32  ;;  %v11257_v32 = vld [vmem:[#allocation8 + $0x1d8] sm:$0xf] }
 0x374   :  { %v12403_v46 = vld [vmem:[#allocation8 + $0xaf0] sm:$0xf0] }
 0x375   :  { %v14967_v2 = vld [vmem:[#allocation8 + $0x494] sm:$0xf]  ;;  %v12406_v19 = vor.u32 %v15167_v28, %v12403_v46  ;;  %5394 = vmatpush.bf16.msrb.mxu2 %v12150_v50  ;;  %v16523_v50 = vpop.f32.mrf.mxu2 }
 0x376   :  { %v11603_v11 = vld [vmem:[#allocation8 + $0x4b0] sm:$0xf0] }
 0x377   :  { %v15031_v34 = vld [vmem:[#allocation8 + $0x694] sm:$0xf]  ;;  %v11606_v17 = vor.u32 %v14967_v2, %v11603_v11  ;;  %5408 = vmatpush.bf16.msrb.mxu3 %v12406_v19  ;;  %v14884_v2 = vld [vmem:[#allocation8 + $0x1f4] sm:$0xf0]  ;;  %v16521_v11 = vpop.f32.mrf.mxu1 }
 0x378   :  { %v11859_v4 = vld [vmem:[#allocation8 + $0x6b0] sm:$0xf0]  ;;  %v11513_v19 = vld [vmem:[#allocation8 + $0x3d8] sm:$0xf] }
 0x379   :  { %v15095_v15 = vld [vmem:[#allocation8 + $0x894] sm:$0xf]  ;;  %v11862_v59 = vor.u32 %v15031_v34, %v11859_v4  ;;  %5367 = vmatpush.bf16.msrb.mxu0 %v11606_v17  ;;  %v14948_v34 = vld [vmem:[#allocation8 + $0x3f4] sm:$0xf0] }
 0x37a   :  { %v12115_v24 = vld [vmem:[#allocation8 + $0x8b0] sm:$0xf0]  ;;  %v11769_v4 = vld [vmem:[#allocation8 + $0x5d8] sm:$0xf] }
 0x37b   :  { %v15159_v12 = vld [vmem:[#allocation8 + $0xa94] sm:$0xf]  ;;  %v12118_v62 = vor.u32 %v15095_v15, %v12115_v24  ;;  %5381 = vmatpush.bf16.msrb.mxu1 %v11862_v59  ;;  %v15076_v17 = vld [vmem:[#allocation8 + $0x7f4] sm:$0xf0] }
 0x37c   :  { %v12371_v42 = vld [vmem:[#allocation8 + $0xab0] sm:$0xf0] }
 0x37d   :  { %v14959_v10 = vld [vmem:[#allocation8 + $0x454] sm:$0xf]  ;;  %v12374_v38 = vor.u32 %v15159_v12, %v12371_v42  ;;  %5395 = vmatpush.bf16.msrb.mxu2 %v12118_v62  ;;  %v15012_v12 = vld [vmem:[#allocation8 + $0x5f4] sm:$0xf0]  ;;  %v11514_v62 = vor.u32 %v14948_v34, %v11513_v19 }
 0x37e   :  { %v11571_v36 = vld [vmem:[#allocation8 + $0x470] sm:$0xf0]  ;;  %v12025_v42 = vld [vmem:[#allocation8 + $0x7d8] sm:$0xf] }
 0x37f   :  { %v15023_v48 = vld [vmem:[#allocation8 + $0x654] sm:$0xf]  ;;  %v11574_v31 = vor.u32 %v14959_v10, %v11571_v36  ;;  %5409 = vmatpush.bf16.msrb.mxu3 %v12374_v38  ;;  %v11258_v36 = vor.u32 %v14884_v2, %v11257_v32  ;;  %v11225_v38 = vld [vmem:[#allocation8 + $0x198] sm:$0xf] }
 0x380   :  { %v11827_v40 = vld [vmem:[#allocation8 + $0x670] sm:$0xf0]  ;;  %v14932_v32 = vld [vmem:[#allocation8 + $0x374] sm:$0xf0] }
 0x381   :  { %v15087_v6 = vld [vmem:[#allocation8 + $0x854] sm:$0xf]  ;;  %v11830_v22 = vor.u32 %v15023_v48, %v11827_v40  ;;  %5368 = vmatpush.bf16.msrb.mxu0 %v11574_v31  ;;  %v14876_v48 = vld [vmem:[#allocation8 + $0x1b4] sm:$0xf0]  ;;  %v16525_v40 = vpop.f32.mrf.mxu0 }
 0x382   :  { %v12083_v25 = vld [vmem:[#allocation8 + $0x870] sm:$0xf0]  ;;  %v11737_v31 = vld [vmem:[#allocation8 + $0x598] sm:$0xf] }
 0x383   :  { %v15151_v35 = vld [vmem:[#allocation8 + $0xa54] sm:$0xf]  ;;  %v12086_v63 = vor.u32 %v15087_v6, %v12083_v25  ;;  %5382 = vmatpush.bf16.msrb.mxu1 %v11830_v22  ;;  %v11770_v6 = vor.u32 %v15012_v12, %v11769_v4  ;;  %v12026_v25 = vor.u32 %v15076_v17, %v12025_v42  ;;  %v11993_v22 = vld [vmem:[#allocation8 + $0x798] sm:$0xf] }
 0x384   :  { %v12339_v37 = vld [vmem:[#allocation8 + $0xa70] sm:$0xf0]  ;;  %v11705_v2 = vld [vmem:[#allocation8 + $0x558] sm:$0xf] }
 0x385   :  { %v14951_v29 = vld [vmem:[#allocation8 + $0x414] sm:$0xf]  ;;  %v12342_v44 = vor.u32 %v15151_v35, %v12339_v37  ;;  %5396 = vmatpush.bf16.msrb.mxu2 %v12086_v63  ;;  %v11481_v35 = vld [vmem:[#allocation8 + $0x398] sm:$0xf] }
 0x386   :  { %v11539_v60 = vld [vmem:[#allocation8 + $0x430] sm:$0xf0]  ;;  %v14940_v37 = vld [vmem:[#allocation8 + $0x3b4] sm:$0xf0] }
 0x387   :  { %v15015_v1 = vld [vmem:[#allocation8 + $0x614] sm:$0xf]  ;;  %v11542_v15 = vor.u32 %v14951_v29, %v11539_v60  ;;  %5410 = vmatpush.bf16.msrb.mxu3 %v12342_v44  ;;  %v15004_v29 = vld [vmem:[#allocation8 + $0x5b4] sm:$0xf0]  ;;  %v11482_v63 = vor.u32 %v14940_v37, %v11481_v35 }
 0x388   :  { %v11795_v57 = vld [vmem:[#allocation8 + $0x630] sm:$0xf0]  ;;  %v15068_v60 = vld [vmem:[#allocation8 + $0x7b4] sm:$0xf0] }
 0x389   :  { %v15079_v56 = vld [vmem:[#allocation8 + $0x814] sm:$0xf]  ;;  %v11798_v24 = vor.u32 %v15015_v1, %v11795_v57  ;;  %5369 = vmatpush.bf16.msrb.mxu0 %v11542_v15  ;;  %v16527_v1 = vpop.f32.mrf.mxu3  ;;  %v11226_v57 = vor.u32 %v14876_v48, %v11225_v38  ;;  %v11193_v44 = vld [vmem:[#allocation8 + $0x158] sm:$0xf]  ;;  %v16531_v15 = vpop.f32.mrf.mxu1 }
 0x38a   :  { %v12051_v28 = vld [vmem:[#allocation8 + $0x830] sm:$0xf0]  ;;  %v14996_v19 = vld [vmem:[#allocation8 + $0x574] sm:$0xf0]  ;;  %v16537_v37 = vpop.f32.mrf.mxu0 }
 0x38b   :  { %v15143_v46 = vld [vmem:[#allocation8 + $0xa14] sm:$0xf]  ;;  %v12054_v59 = vor.u32 %v15079_v56, %v12051_v28  ;;  %5383 = vmatpush.bf16.msrb.mxu1 %v11798_v24  ;;  %v14868_v56 = vld [vmem:[#allocation8 + $0x174] sm:$0xf0]  ;;  %v11738_v28 = vor.u32 %v15004_v29, %v11737_v31  ;;  %v16533_v24 = vpop.f32.mrf.mxu2 }
 0x38c   :  { %v12307_v51 = vld [vmem:[#allocation8 + $0xa30] sm:$0xf0]  ;;  %5370 = vmatmul.bf16.vlgmr.msrb.gmra.mxu0 %v16434_v14  ;;  %v11961_v34 = vld [vmem:[#allocation8 + $0x758] sm:$0xf]  ;;  %v11194_v12 = vor.u32 %v14868_v56, %v11193_v44 }
 0x38d   :  { %v12310_v10 = vor.u32 %v15143_v46, %v12307_v51  ;;  %5397 = vmatpush.bf16.msrb.mxu2 %v12054_v59  ;;  %5418 = vmatpush.bf16.msra.mxu0 %v11258_v36  ;;  %v11994_v46 = vor.u32 %v15068_v60, %v11993_v22  ;;  %v11449_v51 = vld [vmem:[#allocation8 + $0x358] sm:$0xf] }
 0x38e   :  { %5384 = vmatmul.bf16.vlgmr.msrb.gmra.mxu1 %v16438_v26  ;;  %v15060_v4 = vld [vmem:[#allocation8 + $0x774] sm:$0xf0]  ;;  %v11450_v42 = vor.u32 %v14932_v32, %v11449_v51 }
 0x38f   :  { %5411 = vmatpush.bf16.msrb.mxu3 %v12310_v10  ;;  %5432 = vmatpush.bf16.msra.mxu1 %v11514_v62  ;;  %v11161_v17 = vld [vmem:[#allocation8 + $0x118] sm:$0xf]  ;;  %v11706_v10 = vor.u32 %v14996_v19, %v11705_v2  ;;  %v11962_v36 = vor.u32 %v15060_v4, %v11961_v34 }
 0x390   :  { %5398 = vmatmul.bf16.vlgmr.msrb.gmra.mxu2 %v16466_v30  ;;  %v14860_v59 = vld [vmem:[#allocation8 + $0x134] sm:$0xf0] }
 0x391   :  { %5446 = vmatpush.bf16.msra.mxu2 %v11770_v6  ;;  %5419 = vmatpush.bf16.msra.mxu0 %v11226_v57  ;;  %v11417_v62 = vld [vmem:[#allocation8 + $0x318] sm:$0xf]  ;;  %v11162_v31 = vor.u32 %v14860_v59, %v11161_v17  ;;  %v16539_v57 = vpop.f32.mrf.mxu3 }
 0x392   :  { %5412 = vmatmul.bf16.vlgmr.msrb.gmra.mxu3 %v16470_v18  ;;  %v14924_v38 = vld [vmem:[#allocation8 + $0x334] sm:$0xf0] }
 0x393   :  { %5460 = vmatpush.bf16.msra.mxu3 %v12026_v25  ;;  %5433 = vmatpush.bf16.msra.mxu1 %v11482_v63  ;;  %v11673_v48 = vld [vmem:[#allocation8 + $0x518] sm:$0xf]  ;;  %v11418_v29 = vor.u32 %v14924_v38, %v11417_v62  ;;  %v16543_v17 = vpop.f32.mrf.mxu2 }
 0x394   :  { %v14988_v6 = vld [vmem:[#allocation8 + $0x534] sm:$0xf0] }
 0x395   :  { %5447 = vmatpush.bf16.msra.mxu2 %v11738_v28  ;;  %v11929_v25 = vld [vmem:[#allocation8 + $0x718] sm:$0xf]  ;;  %5420 = vmatpush.bf16.msra.mxu0 %v11194_v12  ;;  %v11674_v63 = vor.u32 %v14988_v6, %v11673_v48 }
 0x396   :  { %v15052_v35 = vld [vmem:[#allocation8 + $0x734] sm:$0xf0] }
 0x397   :  { %5461 = vmatpush.bf16.msra.mxu3 %v11994_v46  ;;  %5434 = vmatpush.bf16.msra.mxu1 %v11450_v42  ;;  %v11129_v22 = vld [vmem:[#allocation8 + $0xd8] sm:$0xf]  ;;  %v11930_v44 = vor.u32 %v15052_v35, %v11929_v25  ;;  %v16541_v42 = vpop.f32.mrf.mxu1  ;;  %v16545_v35 = vpop.f32.mrf.mxu0 }
 0x398   :  { %v14852_v60 = vld [vmem:[#allocation8 + $0xf4] sm:$0xf0] }
 0x399   :  { %5448 = vmatpush.bf16.msra.mxu2 %v11706_v10  ;;  %v11385_v56 = vld [vmem:[#allocation8 + $0x2d8] sm:$0xf]  ;;  %5421 = vmatpush.bf16.msra.mxu0 %v11162_v31  ;;  %v11130_v19 = vor.u32 %v14852_v60, %v11129_v22  ;;  %v16547_v33 = vpop.f32.mrf.mxu3 }
 0x39a   :  { %v14916_v28 = vld [vmem:[#allocation8 + $0x2f4] sm:$0xf0] }
 0x39b   :  { %5462 = vmatpush.bf16.msra.mxu3 %v11962_v36  ;;  %v11641_v46 = vld [vmem:[#allocation8 + $0x4d8] sm:$0xf]  ;;  %5435 = vmatpush.bf16.msra.mxu1 %v11418_v29  ;;  %v11386_v34 = vor.u32 %v14916_v28, %v11385_v56 }
 0x39c   :  { %v14980_v51 = vld [vmem:[#allocation8 + $0x4f4] sm:$0xf0] }
 0x39d   :  { %v11897_v32 = vld [vmem:[#allocation8 + $0x6d8] sm:$0xf]  ;;  %5449 = vmatpush.bf16.msra.mxu2 %v11674_v63  ;;  %v11642_v59 = vor.u32 %v14980_v51, %v11641_v46  ;;  %5422 = vmatpush.bf16.msra.mxu0 %v11130_v19 }
 0x39e   :  { %v15044_v2 = vld [vmem:[#allocation8 + $0x6f4] sm:$0xf0] }
 0x39f   :  { %v11097_v4 = vld [vmem:[#allocation8 + $0x98] sm:$0xf]  ;;  %5463 = vmatpush.bf16.msra.mxu3 %v11930_v44  ;;  %v11898_v10 = vor.u32 %v15044_v2, %v11897_v32  ;;  %5436 = vmatpush.bf16.msra.mxu1 %v11386_v34 }
 0x3a0   :  { %v14844_v12 = vld [vmem:[#allocation8 + $0xb4] sm:$0xf0] }
 0x3a1   :  { %v11353_v36 = vld [vmem:[#allocation8 + $0x298] sm:$0xf]  ;;  %v11098_v31 = vor.u32 %v14844_v12, %v11097_v4  ;;  %5450 = vmatpush.bf16.msra.mxu2 %v11642_v59  ;;  %v16549_v59 = vpop.f32.mrf.mxu1  ;;  %v16555_v20 = vpop.f32.mrf.mxu3 }
 0x3a2   :  { %v14908_v62 = vld [vmem:[#allocation8 + $0x2b4] sm:$0xf0] }
 0x3a3   :  { %v11609_v38 = vld [vmem:[#allocation8 + $0x498] sm:$0xf]  ;;  %v11354_v29 = vor.u32 %v14908_v62, %v11353_v36  ;;  %5464 = vmatpush.bf16.msra.mxu3 %v11898_v10  ;;  %5423 = vmatpush.bf16.msra.mxu0 %v11098_v31  ;;  %v16551_v10 = vpop.f32.mrf.mxu2 }
 0x3a4   :  { %v14972_v48 = vld [vmem:[#allocation8 + $0x4b4] sm:$0xf0] }
 0x3a5   :  { %v11865_v6 = vld [vmem:[#allocation8 + $0x698] sm:$0xf]  ;;  %v11610_v63 = vor.u32 %v14972_v48, %v11609_v38  ;;  %5437 = vmatpush.bf16.msra.mxu1 %v11354_v29 }
 0x3a6   :  { %v15036_v25 = vld [vmem:[#allocation8 + $0x6b4] sm:$0xf0] }
 0x3a7   :  { %v11065_v22 = vld [vmem:[#allocation8 + $0x58] sm:$0xf]  ;;  %v11866_v44 = vor.u32 %v15036_v25, %v11865_v6  ;;  %5451 = vmatpush.bf16.msra.mxu2 %v11610_v63  ;;  %v16553_v63 = vpop.f32.mrf.mxu0 }
 0x3a8   :  { %v14836_v60 = vld [vmem:[#allocation8 + $0x74] sm:$0xf0] }
 0x3a9   :  { %v11321_v56 = vld [vmem:[#allocation8 + $0x258] sm:$0xf]  ;;  %v11066_v19 = vor.u32 %v14836_v60, %v11065_v22  ;;  %5465 = vmatpush.bf16.msra.mxu3 %v11866_v44  ;;  %v14880_v60 = vld [vmem:[#allocation8 + $0x1dc] sm:$0xf] }
 0x3aa   :  { %v14900_v28 = vld [vmem:[#allocation8 + $0x274] sm:$0xf0]  ;;  %v11262_v61 = vor.u32 %v14880_v60, %v11259_v0 }
 0x3ab   :  { %v11577_v46 = vld [vmem:[#allocation8 + $0x458] sm:$0xf]  ;;  %v11322_v34 = vor.u32 %v14900_v28, %v11321_v56  ;;  %5424 = vmatpush.bf16.msra.mxu0 %v11066_v19  ;;  %v11518_v19 = vor.u32 %v14944_v47, %v11515_v8  ;;  %v16559_v0 = vpop.f32.mrf.mxu2 }
 0x3ac   :  { %v14964_v51 = vld [vmem:[#allocation8 + $0x474] sm:$0xf0] }
 0x3ad   :  { %v11833_v32 = vld [vmem:[#allocation8 + $0x658] sm:$0xf]  ;;  %v11578_v62 = vor.u32 %v14964_v51, %v11577_v46  ;;  %5438 = vmatpush.bf16.msra.mxu1 %v11322_v34 }
 0x3ae   :  { %v15028_v2 = vld [vmem:[#allocation8 + $0x674] sm:$0xf0] }
 0x3af   :  { %v14828_v4 = vld [vmem:[#allocation8 + $0x34] sm:$0xf0]  ;;  %v11834_v38 = vor.u32 %v15028_v2, %v11833_v32  ;;  %5452 = vmatpush.bf16.msra.mxu2 %v11578_v62  ;;  %v16563_v60 = vpop.f32.mrf.mxu0 }
 0x3b0   :  { %v11289_v12 = vld [vmem:[#allocation8 + $0x218] sm:$0xf]  ;;  %v11034_v56 = vor.u32 %v14828_v4, %v11033_v43  ;;  %v14872_v4 = vld [vmem:[#allocation8 + $0x19c] sm:$0xf] }
 0x3b1   :  { %v14892_v36 = vld [vmem:[#allocation8 + $0x234] sm:$0xf0]  ;;  %5466 = vmatpush.bf16.msra.mxu3 %v11834_v38 }
 0x3b2   :  { %v11545_v48 = vld [vmem:[#allocation8 + $0x418] sm:$0xf]  ;;  %v11290_v28 = vor.u32 %v14892_v36, %v11289_v12  ;;  %5425 = vmatpush.bf16.msra.mxu0 %v11034_v56  ;;  %v11227_v12 = vld [vmem:[#allocation8 + $0x1b8] sm:$0xf0] }
 0x3b3   :  { %v14956_v6 = vld [vmem:[#allocation8 + $0x434] sm:$0xf0]  ;;  %v14936_v36 = vld [vmem:[#allocation8 + $0x39c] sm:$0xf]  ;;  %v11230_v8 = vor.u32 %v14872_v4, %v11227_v12  ;;  %v16567_v4 = vpop.f32.mrf.mxu3 }
 0x3b4   :  { %v11801_v25 = vld [vmem:[#allocation8 + $0x618] sm:$0xf]  ;;  %v11546_v44 = vor.u32 %v14956_v6, %v11545_v48  ;;  %5439 = vmatpush.bf16.msra.mxu1 %v11290_v28  ;;  %v16557_v48 = vpop.f32.mrf.mxu1  ;;  %v11486_v47 = vor.u32 %v14936_v36, %v11483_v53 }
 0x3b5   :  { %v15140_v31 = vld [vmem:[#allocation8 + $0x9f4] sm:$0xf0]  ;;  %v11802_v46 = vor.u32 %v15020_v45, %v11801_v25  ;;  %5426 = vmatmul.bf16.vlgmr.msra.gmra.mxu0 %v16426_v3 }
 0x3b6   :  { %v12537_v29 = vld [vmem:[#allocation8 + $0xbd8] sm:$0xf]  ;;  %v12282_v51 = vor.u32 %v15140_v31, %v12281_v16  ;;  %5453 = vmatpush.bf16.msra.mxu2 %v11546_v44  ;;  %v14864_v31 = vld [vmem:[#allocation8 + $0x15c] sm:$0xf] }
 0x3b7   :  { %v15204_v22 = vld [vmem:[#allocation8 + $0xbf4] sm:$0xf0]  ;;  %5467 = vmatpush.bf16.msra.mxu3 %v11802_v46  ;;  %5440 = vmatmul.bf16.vlgmr.msra.gmra.mxu1 %v16430_v54 }
 0x3b8   :  { %v12538_v32 = vor.u32 %v15204_v22, %v12537_v29  ;;  %v12249_v2 = vld [vmem:[#allocation8 + $0x998] sm:$0xf]  ;;  %5474 = vmatpush.bf16.msrb.mxu0 %v12282_v51  ;;  %v11195_v29 = vld [vmem:[#allocation8 + $0x178] sm:$0xf0] }
 0x3b9   :  { %v12505_v34 = vld [vmem:[#allocation8 + $0xb98] sm:$0xf]  ;;  %v12250_v16 = vor.u32 %v15132_v9, %v12249_v2  ;;  %v14928_v9 = vld [vmem:[#allocation8 + $0x35c] sm:$0xf]  ;;  %5454 = vmatmul.bf16.vlgmr.msra.gmra.mxu2 %v16434_v14  ;;  %v11198_v44 = vor.u32 %v14864_v31, %v11195_v29 }
 0x3ba   :  { %v15196_v43 = vld [vmem:[#allocation8 + $0xbb4] sm:$0xf0]  ;;  %5488 = vmatpush.bf16.msrb.mxu1 %v12538_v32  ;;  %5502 = vmatpush.bf16.msrb.mxu2 %v11262_v61  ;;  %v11451_v22 = vld [vmem:[#allocation8 + $0x378] sm:$0xf0] }
 0x3bb   :  { %v12506_v45 = vor.u32 %v15196_v43, %v12505_v34  ;;  %v12217_v62 = vld [vmem:[#allocation8 + $0x958] sm:$0xf]  ;;  %5516 = vmatpush.bf16.msrb.mxu3 %v11518_v19  ;;  %v11454_v46 = vor.u32 %v14928_v9, %v11451_v22  ;;  %v14856_v2 = vld [vmem:[#allocation8 + $0x11c] sm:$0xf] }
 0x3bc   :  { %v15124_v38 = vld [vmem:[#allocation8 + $0x974] sm:$0xf0]  ;;  %5468 = vmatmul.bf16.vlgmr.msra.gmra.mxu3 %v16438_v26  ;;  %5475 = vmatpush.bf16.msrb.mxu0 %v12250_v16  ;;  %v11163_v19 = vld [vmem:[#allocation8 + $0x138] sm:$0xf0] }
 0x3bd   :  { %v12473_v6 = vld [vmem:[#allocation8 + $0xb58] sm:$0xf]  ;;  %v12218_v61 = vor.u32 %v15124_v38, %v12217_v62  ;;  %v14920_v34 = vld [vmem:[#allocation8 + $0x31c] sm:$0xf]  ;;  %v16569_v62 = vpop.f32.mrf.mxu1  ;;  %v16571_v38 = vpop.f32.mrf.mxu2 }
 0x3be   :  { %v15188_v25 = vld [vmem:[#allocation8 + $0xb74] sm:$0xf0]  ;;  %5489 = vmatpush.bf16.msrb.mxu1 %v12506_v45  ;;  %5503 = vmatpush.bf16.msrb.mxu2 %v11230_v8  ;;  %v11419_v43 = vld [vmem:[#allocation8 + $0x338] sm:$0xf0]  ;;  %v11166_v8 = vor.u32 %v14856_v2, %v11163_v19  ;;  %v16576_v2 = vpop.f32.mrf.mxu0 }
 0x3bf   :  { %v12474_v53 = vor.u32 %v15188_v25, %v12473_v6  ;;  %v12185_v56 = vld [vmem:[#allocation8 + $0x918] sm:$0xf]  ;;  %5517 = vmatpush.bf16.msrb.mxu3 %v11486_v47  ;;  %v11422_v47 = vor.u32 %v14920_v34, %v11419_v43  ;;  %v14848_v31 = vld [vmem:[#allocation8 + $0xdc] sm:$0xf] }
 0x3c0   :  { %v15116_v28 = vld [vmem:[#allocation8 + $0x934] sm:$0xf0]  ;;  %5476 = vmatpush.bf16.msrb.mxu0 %v12218_v61  ;;  %v11131_v29 = vld [vmem:[#allocation8 + $0xf8] sm:$0xf0]  ;;  %v17246_v61 = vperm.slane %v16488_v58, 3 }
 0x3c1   :  { %v12441_v51 = vld [vmem:[#allocation8 + $0xb18] sm:$0xf]  ;;  %v12186_v12 = vor.u32 %v15116_v28, %v12185_v56  ;;  %v14912_v9 = vld [vmem:[#allocation8 + $0x2dc] sm:$0xf]  ;;  %v15777_v56 = vld [vmem:[#allocation14 + $0x8] sm:$0xff]  ;;  %v11134_v19 = vor.u32 %v14848_v31, %v11131_v29 }
 0x3c2   :  { %v15180_v32 = vld [vmem:[#allocation8 + $0xb34] sm:$0xf0]  ;;  %5490 = vmatpush.bf16.msrb.mxu1 %v12474_v53  ;;  %5504 = vmatpush.bf16.msrb.mxu2 %v11198_v44  ;;  %v11387_v22 = vld [vmem:[#allocation8 + $0x2f8] sm:$0xf0]  ;;  %v4926_v53 = vadd.f32 %v16497_v5, %v17246_v61  ;;  %v2987_v28 = vperm.slane %v15777_v56, 3 }
 0x3c3   :  { %v12442_v36 = vor.u32 %v15180_v32, %v12441_v51  ;;  %v12153_v16 = vld [vmem:[#allocation8 + $0x8d8] sm:$0xf]  ;;  %5518 = vmatpush.bf16.msrb.mxu3 %v11454_v46  ;;  %v11390_v34 = vor.u32 %v14912_v9, %v11387_v22  ;;  %v11099_v58 = vld [vmem:[#allocation8 + $0xb8] sm:$0xf0] }
 0x3c4   :  { %v15108_v45 = vld [vmem:[#allocation8 + $0x8f4] sm:$0xf0]  ;;  %5477 = vmatpush.bf16.msrb.mxu0 %v12186_v12  ;;  %v11355_v5 = vld [vmem:[#allocation8 + $0x2b8] sm:$0xf0]  ;;  %v4940_v61 = vadd.f32 %v16499_v7, %v4926_v53  ;;  %v5008_v12 = vadd.f32 %v16515_v21, %v2987_v28 }
 0x3c5   :  { %v12409_v6 = vld [vmem:[#allocation8 + $0xad8] sm:$0xf]  ;;  %v12154_v51 = vor.u32 %v15108_v45, %v12153_v16  ;;  %v11358_v31 = vor.u32 %v14904_v52, %v11355_v5  ;;  %v14832_v22 = vld [vmem:[#allocation8 + $0x5c] sm:$0xf] }
 0x3c6   :  { %v15172_v25 = vld [vmem:[#allocation8 + $0xaf4] sm:$0xf0]  ;;  %5491 = vmatpush.bf16.msrb.mxu1 %v12442_v36  ;;  %5505 = vmatpush.bf16.msrb.mxu2 %v11166_v8  ;;  %v16580_v36 = vpop.f32.mrf.mxu3  ;;  %v11067_v7 = vld [vmem:[#allocation8 + $0x78] sm:$0xf0]  ;;  %v5022_v56 = vadd.f32 %v16519_v49, %v5008_v12 }
 0x3c7   :  { %v12410_v32 = vor.u32 %v15172_v25, %v12409_v6  ;;  %v12121_v44 = vld [vmem:[#allocation8 + $0x898] sm:$0xf]  ;;  %5519 = vmatpush.bf16.msrb.mxu3 %v11422_v47  ;;  %v4954_v6 = vadd.f32 %v16509_v27, %v4940_v61  ;;  %v11102_v25 = vor.u32 %v14840_v13, %v11099_v58  ;;  %v14896_v53 = vld [vmem:[#allocation8 + $0x25c] sm:$0xf]  ;;  %v5177_v27 = vpop.f32.mrf.mxu2  ;;  %v5010_v13 = vadd.f32 %v16523_v50, %v2987_v28  ;;  %v16591_v61 = vpop.f32.mrf.mxu0 }
 0x3c8   :  { %v15100_v46 = vld [vmem:[#allocation8 + $0x8b4] sm:$0xf0]  ;;  %5478 = vmatpush.bf16.msrb.mxu0 %v12154_v51  ;;  %v11323_v21 = vld [vmem:[#allocation8 + $0x278] sm:$0xf0]  ;;  %v15778_v51 = vld [vmem:[#allocation14 + $0x10] sm:$0xff]  ;;  %v11070_v12 = vor.u32 %v14832_v22, %v11067_v7  ;;  %v5036_v50 = vadd.f32 %v16525_v40, %v5022_v56 }
 0x3c9   :  { %v12377_v43 = vld [vmem:[#allocation8 + $0xa98] sm:$0xf]  ;;  %v12122_v16 = vor.u32 %v15100_v46, %v12121_v44  ;;  %v16587_v46 = vpop.f32.mrf.mxu1  ;;  %v4968_v49 = vadd.f32 %v16513_v39, %v4954_v6  ;;  %v11035_v26 = vld [vmem:[#allocation8 + $0x38] sm:$0xf0] }
 0x3ca   :  { %5492 = vmatpush.bf16.msrb.mxu1 %v12410_v32  ;;  %v12378_v45 = vor.u32 %v15164_v23, %v12377_v43  ;;  %v12089_v8 = vld [vmem:[#allocation8 + $0x858] sm:$0xf]  ;;  %5506 = vmatpush.bf16.msrb.mxu2 %v11134_v19  ;;  %v2988_v32 = vperm.slane %v15778_v51, 3  ;;  %v11326_v51 = vor.u32 %v14896_v53, %v11323_v21  ;;  %v14888_v14 = vld [vmem:[#allocation8 + $0x21c] sm:$0xf] }
 0x3cb   :  { %v15092_v47 = vld [vmem:[#allocation8 + $0x874] sm:$0xf0]  ;;  %5520 = vmatpush.bf16.msrb.mxu3 %v11390_v34  ;;  %v11291_v28 = vld [vmem:[#allocation8 + $0x238] sm:$0xf0] }
 0x3cc   :  { %v12345_v29 = vld [vmem:[#allocation8 + $0xa58] sm:$0xf]  ;;  %5479 = vmatpush.bf16.msrb.mxu0 %v12122_v16  ;;  %v12090_v52 = vor.u32 %v15092_v47, %v12089_v8  ;;  %v15008_v16 = vld [vmem:[#allocation8 + $0x5dc] sm:$0xf]  ;;  %v4982_v8 = vadd.f32 %v16517_v41, %v4968_v49  ;;  %v5092_v47 = vadd.f32 %v16545_v35, %v2988_v32  ;;  %v5094_v39 = vadd.f32 %v16553_v63, %v2988_v32 }
 0x3cd   :  { %v15156_v9 = vld [vmem:[#allocation8 + $0xa74] sm:$0xf0]  ;;  %v15072_v6 = vld [vmem:[#allocation8 + $0x7dc] sm:$0xf]  ;;  %v11294_v35 = vor.u32 %v14888_v14, %v11291_v28  ;;  %v5050_v63 = vadd.f32 %v16531_v15, %v5036_v50 }
 0x3ce   :  { %v16584_v44 = vld [vmem:[#allocation14 + $0x18] sm:$0xff]  ;;  %5493 = vmatpush.bf16.msrb.mxu1 %v12378_v45  ;;  %v12346_v34 = vor.u32 %v15156_v9, %v12345_v29  ;;  %5507 = vmatpush.bf16.msrb.mxu2 %v11102_v25  ;;  %v5191_v56 = vpop.f32.mrf.mxu3  ;;  %v16606_v15 = vadd.f32 %v16521_v11, %v4982_v8 }
 0x3cf   :  { %v2989_v23 = vperm.slane %v16584_v44, 3  ;;  %v12057_v19 = vld [vmem:[#allocation8 + $0x818] sm:$0xf]  ;;  %5521 = vmatpush.bf16.msrb.mxu3 %v11358_v31  ;;  %v14824_v44 = vld [vmem:[#allocation8 + $0x1c] sm:$0xf]  ;;  %v5024_v31 = vadd.f32 %v16527_v1, %v5010_v13 }
 0x3d0   :  { %v15084_v43 = vld [vmem:[#allocation8 + $0x834] sm:$0xf0]  ;;  %v11771_v45 = vld [vmem:[#allocation8 + $0x5f8] sm:$0xf0]  ;;  %5480 = vmatpush.bf16.msrb.mxu0 %v12090_v52  ;;  %v11038_v41 = vor.u32 %v14824_v44, %v11035_v26 }
 0x3d1   :  { %v12313_v58 = vld [vmem:[#allocation8 + $0xa18] sm:$0xf]  ;;  %v12027_v29 = vld [vmem:[#allocation8 + $0x7f8] sm:$0xf0]  ;;  %v12058_v9 = vor.u32 %v15084_v43, %v12057_v19  ;;  %v5176_v21 = vadd.f32 %v16571_v38, %v2989_v23  ;;  %v5038_v32 = vadd.f32 %v16537_v37, %v5024_v31  ;;  %v11774_v49 = vor.u32 %v15008_v16, %v11771_v45  ;;  %v5217_v43 = vpop.f32.mrf.mxu1 }
 0x3d2   :  { %v15148_v5 = vld [vmem:[#allocation8 + $0xa34] sm:$0xf0]  ;;  %v15136_v25 = vld [vmem:[#allocation8 + $0x9dc] sm:$0xf]  ;;  %5494 = vmatpush.bf16.msrb.mxu1 %v12346_v34  ;;  %5508 = vmatpush.bf16.msrb.mxu2 %v11070_v12  ;;  %v12030_v1 = vor.u32 %v15072_v6, %v12027_v29  ;;  %v5106_v19 = vadd.f32 %v16549_v59, %v5092_v47  ;;  %v5108_v34 = vadd.f32 %v16557_v48, %v5094_v39  ;;  %v5602_v45 = vmul.f32 0.044715, %v16501_v55  ;;  %v5205_v39 = vpop.f32.mrf.mxu0 }
 0x3d3   :  { %v12314_v22 = vor.u32 %v15148_v5, %v12313_v58  ;;  %v12283_v7 = vld [vmem:[#allocation8 + $0x9f8] sm:$0xf0]  ;;  %5522 = vmatpush.bf16.msrb.mxu3 %v11326_v51  ;;  %v16603_v58 = vpop.f32.mrf.mxu2  ;;  %v5064_v37 = vadd.f32 %v16533_v24, %v5050_v63  ;;  %v5178_v51 = vadd.f32 %v5177_v27, %v2989_v23  ;;  %v5190_v16 = vadd.f32 %v16580_v36, %v5176_v21 }
 0x3d4   :  { %v15200_v40 = vld [vmem:[#allocation8 + $0xbdc] sm:$0xf]  ;;  %v12286_v38 = vor.u32 %v15136_v25, %v12283_v7  ;;  %5481 = vmatpush.bf16.msrb.mxu0 %v12058_v9  ;;  %v5120_v48 = vadd.f32 %v16551_v10, %v5106_v19  ;;  %v5122_v28 = vadd.f32 %v16559_v0, %v5108_v34  ;;  %v5052_v11 = vadd.f32 %v16541_v42, %v5038_v32 }
 0x3d5   :  { %v12539_v53 = vld [vmem:[#allocation8 + $0xbf8] sm:$0xf0]  ;;  %v5204_v47 = vadd.f32 %v16591_v61, %v5190_v16  ;;  %v16616_v25 = vadd.f32 %v16539_v57, %v5064_v37  ;;  %v5192_v42 = vadd.f32 %v5191_v56, %v5178_v51  ;;  %v5610_v57 = vmul.f32 0.044715, %v16606_v15 }
 0x3d6   :  { %v15000_v13 = vld [vmem:[#allocation8 + $0x59c] sm:$0xf]  ;;  %v12542_v5 = vor.u32 %v15200_v40, %v12539_v53  ;;  %5495 = vmatpush.bf16.msrb.mxu1 %v12314_v22  ;;  %5509 = vmatpush.bf16.msrb.mxu2 %v11038_v41  ;;  %v5066_v61 = vadd.f32 %v16543_v17, %v5052_v11  ;;  %v5134_v7 = vadd.f32 %v16555_v20, %v5120_v48  ;;  %v5245_v53 = vpop.f32.mrf.mxu3 }
 0x3d7   :  { %v11739_v52 = vld [vmem:[#allocation8 + $0x5b8] sm:$0xf0]  ;;  %5523 = vmatpush.bf16.msrb.mxu3 %v11294_v35  ;;  %5482 = vmatmul.bf16.vlgmr.msrb.gmra.mxu0 %v16466_v30  ;;  %v5136_v40 = vadd.f32 %v16567_v4, %v5122_v28  ;;  %v5206_v21 = vadd.f32 %v5205_v39, %v5192_v42  ;;  %v5218_v32 = vadd.f32 %v5217_v43, %v5204_v47 }
 0x3d8   :  { %v15064_v12 = vld [vmem:[#allocation8 + $0x79c] sm:$0xf]  ;;  %5530 = vmatpush.bf16.msra.mxu0 %v11774_v49  ;;  %v11742_v24 = vor.u32 %v15000_v13, %v11739_v52  ;;  %v16628_v19 = vadd.f32 %v16547_v33, %v5066_v61  ;;  %v5148_v34 = vadd.f32 %v16563_v60, %v5134_v7  ;;  %v5626_v28 = vmul.f32 %v5610_v57, %v16606_v15 }
 0x3d9   :  { %v11995_v26 = vld [vmem:[#allocation8 + $0x7b8] sm:$0xf0]  ;;  %5496 = vmatmul.bf16.vlgmr.msrb.gmra.mxu1 %v16470_v18  ;;  %5510 = vmatmul.bf16.vlgmr.msrb.gmra.mxu2 %v16426_v3  ;;  %v5618_v3 = vmul.f32 %v5602_v45, %v16501_v55  ;;  %v5232_v43 = vadd.f32 %v16603_v58, %v5218_v32 }
 0x3da   :  { %v15128_v14 = vld [vmem:[#allocation8 + $0x99c] sm:$0xf]  ;;  %5544 = vmatpush.bf16.msra.mxu1 %v12030_v1  ;;  %v11998_v23 = vor.u32 %v15064_v12, %v11995_v26  ;;  %5558 = vmatpush.bf16.msra.mxu2 %v12286_v38  ;;  %v5150_v38 = vadd.f32 %v16576_v2, %v5136_v40  ;;  %v5603_v26 = vmul.f32 0.044715, %v16616_v25 }
 0x3db   :  { %v12251_v44 = vld [vmem:[#allocation8 + $0x9b8] sm:$0xf0]  ;;  %5572 = vmatpush.bf16.msra.mxu3 %v12542_v5  ;;  %v5219_v5 = vpop.f32.mrf.mxu1  ;;  %v5233_v12 = vpop.f32.mrf.mxu2  ;;  %v5634_v58 = vmul.f32 %v5618_v3, %v16501_v55  ;;  %v16643_v47 = vadd.f32 %v5245_v53, %v5232_v43 }
 0x3dc   :  { %v15192_v59 = vld [vmem:[#allocation8 + $0xb9c] sm:$0xf]  ;;  %v12254_v10 = vor.u32 %v15128_v14, %v12251_v44  ;;  %5524 = vmatmul.bf16.vlgmr.msrb.gmra.mxu3 %v16430_v54  ;;  %5531 = vmatpush.bf16.msra.mxu0 %v11742_v24  ;;  %v5220_v14 = vadd.f32 %v5219_v5, %v5206_v21  ;;  %v5619_v61 = vmul.f32 %v5603_v26, %v16616_v25 }
 0x3dd   :  { %v12507_v50 = vld [vmem:[#allocation8 + $0xbb8] sm:$0xf0] }
 0x3de   :  { %v14992_v27 = vld [vmem:[#allocation8 + $0x55c] sm:$0xf]  ;;  %v12510_v0 = vor.u32 %v15192_v59, %v12507_v50  ;;  %5545 = vmatpush.bf16.msra.mxu1 %v11998_v23  ;;  %5559 = vmatpush.bf16.msra.mxu2 %v12254_v10  ;;  %v5234_v16 = vadd.f32 %v5233_v12, %v5220_v14  ;;  %v5611_v23 = vmul.f32 0.044715, %v16628_v19 }
 0x3df   :  { %v11707_v8 = vld [vmem:[#allocation8 + $0x578] sm:$0xf0] }
 0x3e0   :  { %v15056_v36 = vld [vmem:[#allocation8 + $0x75c] sm:$0xf]  ;;  %v11710_v56 = vor.u32 %v14992_v27, %v11707_v8  ;;  %5573 = vmatpush.bf16.msra.mxu3 %v12510_v0  ;;  %v16638_v27 = vadd.f32 %v16569_v62, %v5148_v34  ;;  %v16641_v8 = vadd.f32 %v16587_v46, %v5150_v38  ;;  %v5642_v46 = vmul.f32 %v5626_v28, %v16606_v15 }
 0x3e1   :  { %v11963_v6 = vld [vmem:[#allocation8 + $0x778] sm:$0xf0]  ;;  %v5627_v21 = vmul.f32 %v5611_v23, %v16628_v19 }
 0x3e2   :  { %v15120_v29 = vld [vmem:[#allocation8 + $0x95c] sm:$0xf]  ;;  %v11966_v41 = vor.u32 %v15056_v36, %v11963_v6  ;;  %5532 = vmatpush.bf16.msra.mxu0 %v11710_v56  ;;  %v5247_v6 = vpop.f32.mrf.mxu3  ;;  %v5604_v56 = vmul.f32 0.044715, %v16638_v27  ;;  %v5658_v12 = vadd.f32 %v5642_v46, %v16606_v15 }
 0x3e3   :  { %v12219_v31 = vld [vmem:[#allocation8 + $0x978] sm:$0xf0]  ;;  %v16648_v7 = vadd.f32 %v5247_v6, %v5234_v16  ;;  %v5643_v26 = vmul.f32 %v5627_v21, %v16628_v19 }
 0x3e4   :  { %v15184_v9 = vld [vmem:[#allocation8 + $0xb5c] sm:$0xf]  ;;  %v12222_v20 = vor.u32 %v15120_v29, %v12219_v31  ;;  %5546 = vmatpush.bf16.msra.mxu1 %v11966_v41  ;;  %v5612_v41 = vmul.f32 0.044715, %v16641_v8  ;;  %v5620_v14 = vmul.f32 %v5604_v56, %v16638_v27 }
 0x3e5   :  { %v12475_v22 = vld [vmem:[#allocation8 + $0xb78] sm:$0xf0]  ;;  %v5613_v34 = vmul.f32 0.044715, %v16648_v7  ;;  %v5659_v6 = vadd.f32 %v5643_v26, %v16628_v19 }
 0x3e6   :  { %v14984_v35 = vld [vmem:[#allocation8 + $0x51c] sm:$0xf]  ;;  %v12478_v17 = vor.u32 %v15184_v9, %v12475_v22  ;;  %5560 = vmatpush.bf16.msra.mxu2 %v12222_v20  ;;  %v5650_v22 = vadd.f32 %v5634_v58, %v16501_v55 }
 0x3e7   :  { %v11675_v63 = vld [vmem:[#allocation8 + $0x538] sm:$0xf0] }
 0x3e8   :  { %v15048_v4 = vld [vmem:[#allocation8 + $0x71c] sm:$0xf]  ;;  %v11678_v37 = vor.u32 %v14984_v35, %v11675_v63  ;;  %5574 = vmatpush.bf16.msra.mxu3 %v12478_v17  ;;  %v5605_v35 = vmul.f32 0.044715, %v16643_v47  ;;  %v5666_v5 = vmul.f32 0.7978846, %v5650_v22 }
 0x3e9   :  { %v11931_v49 = vld [vmem:[#allocation8 + $0x738] sm:$0xf0] }
 0x3ea   :  { %v15112_v1 = vld [vmem:[#allocation8 + $0x91c] sm:$0xf]  ;;  %v11934_v51 = vor.u32 %v15048_v4, %v11931_v49  ;;  %5533 = vmatpush.bf16.msra.mxu0 %v11678_v37  ;;  %v16659_v37 = vpop.f32.mrf.mxu0  ;;  %v5621_v58 = vmul.f32 %v5605_v35, %v16643_v47  ;;  %15727 = vtanh.f32 %v5666_v5  ;;  %v15780_v5 = vld [vmem:[#allocation14 + $0x20] sm:$0xff] }
 0x3eb   :  { %v12187_v54 = vld [vmem:[#allocation8 + $0x938] sm:$0xf0] }
 0x3ec   :  { %v15176_v13 = vld [vmem:[#allocation8 + $0xb1c] sm:$0xf]  ;;  %v12190_v33 = vor.u32 %v15112_v1, %v12187_v54  ;;  %5547 = vmatpush.bf16.msra.mxu1 %v11934_v51  ;;  %v16661_v51 = vpop.f32.mrf.mxu1  ;;  %v5637_v21 = vmul.f32 %v5621_v58, %v16643_v47  ;;  %v12665_v58 = vld [vmem:[#allocation10 + $0xf0] sm:$0xf] }
 0x3ed   :  { %v12443_v52 = vld [vmem:[#allocation8 + $0xb38] sm:$0xf0] }
 0x3ee   :  { %v14976_v44 = vld [vmem:[#allocation8 + $0x4dc] sm:$0xf]  ;;  %v12446_v50 = vor.u32 %v15176_v13, %v12443_v52  ;;  %5561 = vmatpush.bf16.msra.mxu2 %v12190_v33  ;;  %v5635_v52 = vmul.f32 %v5619_v61, %v16616_v25  ;;  %v15346_v61 = vld [vmem:[#allocation10 + $0x464] sm:$0xf0] }
 0x3ef   :  { %v11643_v59 = vld [vmem:[#allocation8 + $0x4f8] sm:$0xf0] }
 0x3f0   :  { %v15040_v60 = vld [vmem:[#allocation8 + $0x6dc] sm:$0xf]  ;;  %v11646_v39 = vor.u32 %v14976_v44, %v11643_v59  ;;  %5575 = vmatpush.bf16.msra.mxu3 %v12446_v50  ;;  %v5628_v59 = vmul.f32 %v5612_v41, %v16641_v8  ;;  %v5651_v23 = vadd.f32 %v5635_v52, %v16616_v25  ;;  %v13073_v52 = vld [vmem:[#allocation10 + $0x420] sm:$0xf] }
 0x3f1   :  { %v11899_v48 = vld [vmem:[#allocation8 + $0x6f8] sm:$0xf0] }
 0x3f2   :  { %v15104_v2 = vld [vmem:[#allocation8 + $0x8dc] sm:$0xf]  ;;  %v11902_v10 = vor.u32 %v15040_v60, %v11899_v48  ;;  %5534 = vmatpush.bf16.msra.mxu0 %v11646_v39  ;;  %v5629_v39 = vmul.f32 %v5613_v34, %v16648_v7  ;;  %v5667_v35 = vmul.f32 0.7978846, %v5651_v23  ;;  %v15340_v34 = vld [vmem:[#allocation10 + $0x434] sm:$0xf0] }
 0x3f3   :  { %v12155_v45 = vld [vmem:[#allocation8 + $0x8f8] sm:$0xf0]  ;;  %v13049_v23 = vld [vmem:[#allocation10 + $0x3f0] sm:$0xf] }
 0x3f4   :  { %v15168_v11 = vld [vmem:[#allocation8 + $0xadc] sm:$0xf]  ;;  %v12158_v29 = vor.u32 %v15104_v2, %v12155_v45  ;;  %5548 = vmatpush.bf16.msra.mxu1 %v11902_v10 }
 0x3f5   :  { %v12411_v24 = vld [vmem:[#allocation8 + $0xaf8] sm:$0xf0] }
 0x3f6   :  { %v14968_v0 = vld [vmem:[#allocation8 + $0x49c] sm:$0xf]  ;;  %v12414_v42 = vor.u32 %v15168_v11, %v12411_v24  ;;  %5562 = vmatpush.bf16.msra.mxu2 %v12158_v29  ;;  %v5636_v29 = vmul.f32 %v5620_v14, %v16638_v27 }
 0x3f7   :  { %v11611_v36 = vld [vmem:[#allocation8 + $0x4b8] sm:$0xf0] }
 0x3f8   :  { %v15032_v31 = vld [vmem:[#allocation8 + $0x69c] sm:$0xf]  ;;  %v11614_v63 = vor.u32 %v14968_v0, %v11611_v36  ;;  %5576 = vmatpush.bf16.msra.mxu3 %v12414_v42  ;;  %v12713_v0 = vld [vmem:[#allocation10 + $0x150] sm:$0xf]  ;;  %v15250_v36 = vld [vmem:[#allocation10 + $0x164] sm:$0xf0]  ;;  %v5652_v26 = vadd.f32 %v5636_v29, %v16638_v27 }
 0x3f9   :  { %v11867_v9 = vld [vmem:[#allocation8 + $0x6b8] sm:$0xf0]  ;;  %v12905_v42 = vld [vmem:[#allocation10 + $0x2d0] sm:$0xf] }
 0x3fa   :  { %v15096_v62 = vld [vmem:[#allocation8 + $0x89c] sm:$0xf]  ;;  %v11870_v32 = vor.u32 %v15032_v31, %v11867_v9  ;;  %5535 = vmatpush.bf16.msra.mxu0 %v11614_v63  ;;  %v15298_v31 = vld [vmem:[#allocation10 + $0x2e4] sm:$0xf0]  ;;  %v13097_v9 = vld [vmem:[#allocation10 + $0x450] sm:$0xf]  ;;  %v5645_v63 = vmul.f32 %v5629_v39, %v16648_v7 }
 0x3fb   :  { %v12123_v40 = vld [vmem:[#allocation8 + $0x8b8] sm:$0xf0]  ;;  %v5668_v29 = vmul.f32 0.7978846, %v5652_v26 }
 0x3fc   :  { %v15160_v53 = vld [vmem:[#allocation8 + $0xa9c] sm:$0xf]  ;;  %v12126_v49 = vor.u32 %v15096_v62, %v12123_v40  ;;  %5549 = vmatpush.bf16.msra.mxu1 %v11870_v32  ;;  %v5644_v62 = vmul.f32 %v5628_v59, %v16641_v8  ;;  %v13289_v40 = vld [vmem:[#allocation10 + $0x5d0] sm:$0xf]  ;;  %v16672_v32 = vpop.f32.mrf.mxu2  ;;  %v5261_v59 = vpop.f32.mrf.mxu0 }
 0x3fd   :  { %v12379_v57 = vld [vmem:[#allocation8 + $0xab8] sm:$0xf0] }
 0x3fe   :  { %v14960_v20 = vld [vmem:[#allocation8 + $0x45c] sm:$0xf]  ;;  %v12382_v1 = vor.u32 %v15160_v53, %v12379_v57  ;;  %5563 = vmatpush.bf16.msra.mxu2 %v12126_v49  ;;  %v15394_v53 = vld [vmem:[#allocation10 + $0x5e4] sm:$0xf0]  ;;  %v5674_v57 = vmul.f32 0.7978846, %v5658_v12  ;;  %v5660_v14 = vadd.f32 %v5644_v62, %v16641_v8 }
 0x3ff   :  { %v11579_v17 = vld [vmem:[#allocation8 + $0x478] sm:$0xf0]  ;;  %v15244_v49 = vld [vmem:[#allocation10 + $0x134] sm:$0xf0]  ;;  %v5675_v12 = vmul.f32 0.7978846, %v5659_v6 }
 0x400   :  { %v15024_v4 = vld [vmem:[#allocation8 + $0x65c] sm:$0xf]  ;;  %v11582_v33 = vor.u32 %v14960_v20, %v11579_v17  ;;  %5577 = vmatpush.bf16.msra.mxu3 %v12382_v1  ;;  %v12714_v20 = vor.u32 %v15250_v36, %v12713_v0  ;;  %v12906_v17 = vor.u32 %v15298_v31, %v12905_v42  ;;  %v13098_v1 = vor.u32 %v15346_v61, %v13097_v9  ;;  %v15334_v0 = vld [vmem:[#allocation10 + $0x404] sm:$0xf0]  ;;  %v13241_v36 = vld [vmem:[#allocation10 + $0x570] sm:$0xf]  ;;  %v16682_v9 = vpop.f32.mrf.mxu3 }
 0x401   :  { %v11835_v3 = vld [vmem:[#allocation8 + $0x678] sm:$0xf0]  ;;  %15729 = vtanh.f32 %v5674_v57  ;;  %v15382_v6 = vld [vmem:[#allocation10 + $0x584] sm:$0xf0]  ;;  %v5676_v42 = vmul.f32 0.7978846, %v5660_v14 }
 0x402   :  { %v15088_v54 = vld [vmem:[#allocation8 + $0x85c] sm:$0xf]  ;;  %v11838_v50 = vor.u32 %v15024_v4, %v11835_v3  ;;  %5536 = vmatpush.bf16.msra.mxu0 %v11582_v33  ;;  %v12689_v4 = vld [vmem:[#allocation10 + $0x120] sm:$0xf]  ;;  %v13290_v3 = vor.u32 %v15394_v53, %v13289_v40  ;;  %v16677_v33 = vpop.f32.mrf.mxu1  ;;  %15731 = vtanh.f32 %v5667_v35  ;;  %v12809_v14 = vld [vmem:[#allocation10 + $0x210] sm:$0xf] }
 0x403   :  { %v12091_v13 = vld [vmem:[#allocation8 + $0x878] sm:$0xf0]  ;;  %v12641_v57 = vld [vmem:[#allocation10 + $0xc0] sm:$0xf]  ;;  %15733 = vtanh.f32 %v5675_v12  ;;  %v15226_v12 = vld [vmem:[#allocation10 + $0xa4] sm:$0xf0] }
 0x404   :  { %v15152_v38 = vld [vmem:[#allocation8 + $0xa5c] sm:$0xf]  ;;  %v12094_v28 = vor.u32 %v15088_v54, %v12091_v13  ;;  %5550 = vmatpush.bf16.msra.mxu1 %v11838_v50  ;;  %v12881_v54 = vld [vmem:[#allocation10 + $0x2a0] sm:$0xf]  ;;  %v15292_v13 = vld [vmem:[#allocation10 + $0x2b4] sm:$0xf0]  ;;  %v5661_v50 = vadd.f32 %v5645_v63, %v16648_v7  ;;  %15735 = vtanh.f32 %v5668_v29 }
 0x405   :  { %v12347_v43 = vld [vmem:[#allocation8 + $0xa78] sm:$0xf0]  ;;  %v12833_v35 = vld [vmem:[#allocation10 + $0x240] sm:$0xf]  ;;  %v15280_v63 = vld [vmem:[#allocation10 + $0x254] sm:$0xf0]  ;;  %15737 = vtanh.f32 %v5676_v42 }
 0x406   :  { %v14952_v44 = vld [vmem:[#allocation8 + $0x41c] sm:$0xf]  ;;  %v12350_v16 = vor.u32 %v15152_v38, %v12347_v43  ;;  %5564 = vmatpush.bf16.msra.mxu2 %v12094_v28  ;;  %v13265_v38 = vld [vmem:[#allocation10 + $0x5a0] sm:$0xf]  ;;  %v15388_v43 = vld [vmem:[#allocation10 + $0x5b4] sm:$0xf0] }
 0x407   :  { %v11547_v60 = vld [vmem:[#allocation8 + $0x438] sm:$0xf0]  ;;  %v15238_v28 = vld [vmem:[#allocation10 + $0x104] sm:$0xf0]  ;;  %v12977_v29 = vld [vmem:[#allocation10 + $0x360] sm:$0xf] }
 0x408   :  { %v15016_v48 = vld [vmem:[#allocation8 + $0x61c] sm:$0xf]  ;;  %v11550_v22 = vor.u32 %v14952_v44, %v11547_v60  ;;  %5578 = vmatpush.bf16.msra.mxu3 %v12350_v16  ;;  %v5653_v44 = vadd.f32 %v5637_v21, %v16643_v47  ;;  %v2990_v60 = vperm.slane %v15780_v5, 3  ;;  %v13074_v16 = vor.u32 %v15340_v34, %v13073_v52  ;;  %v15232_v21 = vld [vmem:[#allocation10 + $0xd4] sm:$0xf0] }
 0x409   :  { %v11803_v2 = vld [vmem:[#allocation8 + $0x638] sm:$0xf0]  ;;  %v12666_v62 = vor.u32 %v15238_v28, %v12665_v58  ;;  %v16703_v28 = vmul.f32 0.5, %v16616_v25  ;;  %v12785_v25 = vld [vmem:[#allocation10 + $0x1e0] sm:$0xf] }
 0x40a   :  { %v15080_v45 = vld [vmem:[#allocation8 + $0x81c] sm:$0xf]  ;;  %v11806_v46 = vor.u32 %v15016_v48, %v11803_v2  ;;  %5537 = vmatpush.bf16.msra.mxu0 %v11550_v22  ;;  %v12690_v48 = vor.u32 %v15244_v49, %v12689_v4  ;;  %v12882_v2 = vor.u32 %v15292_v13, %v12881_v54  ;;  %v5669_v31 = vmul.f32 0.7978846, %v5653_v44  ;;  %v15728_v22 = vpop.eup %15727  ;;  %v15376_v4 = vld [vmem:[#allocation10 + $0x554] sm:$0xf0] }
 0x40b   :  { %v12059_v11 = vld [vmem:[#allocation8 + $0x838] sm:$0xf0]  ;;  %v5260_v61 = vadd.f32 %v16659_v37, %v2990_v60  ;;  %v5262_v40 = vadd.f32 %v5261_v59, %v2990_v60  ;;  %v15730_v49 = vpop.eup %15729  ;;  %v16688_v37 = vmul.f32 0.5, %v16501_v55  ;;  %v12642_v54 = vor.u32 %v15232_v21, %v12641_v57  ;;  %v15274_v44 = vld [vmem:[#allocation10 + $0x224] sm:$0xf0] }
 0x40c   :  { %v15144_v24 = vld [vmem:[#allocation8 + $0xa1c] sm:$0xf]  ;;  %v12062_v56 = vor.u32 %v15080_v45, %v12059_v11  ;;  %5551 = vmatpush.bf16.msra.mxu1 %v11806_v46  ;;  %v13266_v45 = vor.u32 %v15388_v43, %v13265_v38  ;;  %v12857_v11 = vld [vmem:[#allocation10 + $0x270] sm:$0xf]  ;;  %v5677_v46 = vmul.f32 0.7978846, %v5661_v50  ;;  %v15732_v13 = vpop.eup %15731  ;;  %v12834_v38 = vor.u32 %v15280_v63, %v12833_v35 }
 0x40d   :  { %v12315_v10 = vld [vmem:[#allocation8 + $0xa38] sm:$0xf0]  ;;  %v5274_v52 = vadd.f32 %v16661_v51, %v5260_v61  ;;  %v5276_v34 = vadd.f32 %v16677_v33, %v5262_v40  ;;  %v12617_v43 = vld [vmem:[#allocation10 + $0x90] sm:$0xf]  ;;  %15739 = vtanh.f32 %v5669_v31  ;;  %v15322_v51 = vld [vmem:[#allocation10 + $0x3a4] sm:$0xf0] }
 0x40e   :  { %v12318_v41 = vor.u32 %v15144_v24, %v12315_v10  ;;  %5565 = vmatpush.bf16.msra.mxu2 %v12062_v56  ;;  %8048 = vmatpush.bf16.msrb.mxu0 %v12714_v20  ;;  %v15286_v24 = vld [vmem:[#allocation10 + $0x284] sm:$0xf0]  ;;  %v17247_v39 = vld [vmem:[#allocation32_spill] sm:$0xff]  ;;  %v17248_v10 = vld [vmem:[#allocation33_spill] sm:$0xff]  ;;  %v13050_v56 = vor.u32 %v15334_v0, %v13049_v23  ;;  %15741 = vtanh.f32 %v5677_v46  ;;  %v16700_v58 = vadd.f32 1.0, %v15730_v49 }
 0x40f   :  { %5538 = vmatmul.bf16.vlgmr.msra.gmra.mxu0 %v17247_v39  ;;  %5552 = vmatmul.bf16.vlgmr.msra.gmra.mxu1 %v17248_v10  ;;  %v12858_v53 = vor.u32 %v15286_v24, %v12857_v11  ;;  %v15328_v20 = vld [vmem:[#allocation10 + $0x3d4] sm:$0xf0]  ;;  %v13001_v59 = vld [vmem:[#allocation10 + $0x390] sm:$0xf]  ;;  %v5288_v50 = vadd.f32 %v16672_v32, %v5274_v52  ;;  %v15370_v33 = vld [vmem:[#allocation10 + $0x524] sm:$0xf0]  ;;  %v12618_v32 = vor.u32 %v15226_v12, %v12617_v43 }
 0x410   :  { %5579 = vmatpush.bf16.msra.mxu3 %v12318_v41  ;;  %8062 = vmatpush.bf16.msrb.mxu1 %v12906_v17  ;;  %v13242_v41 = vor.u32 %v15382_v6, %v13241_v36  ;;  %v13217_v17 = vld [vmem:[#allocation10 + $0x540] sm:$0xf]  ;;  %v13193_v60 = vld [vmem:[#allocation10 + $0x510] sm:$0xf]  ;;  %v16708_v11 = vmul.f32 0.5, %v16628_v19  ;;  %v12810_v24 = vor.u32 %v15274_v44, %v12809_v14  ;;  %v13002_v0 = vor.u32 %v15322_v51, %v13001_v59 }
 0x411   :  { %5566 = vmatmul.bf16.vlgmr.msra.gmra.mxu2 %v16466_v30  ;;  %v13025_v30 = vld [vmem:[#allocation10 + $0x3c0] sm:$0xf]  ;;  %v13218_v26 = vor.u32 %v15376_v4, %v13217_v17  ;;  %v15220_v39 = vld [vmem:[#allocation10 + $0x74] sm:$0xf0]  ;;  %v13194_v36 = vor.u32 %v15370_v33, %v13193_v60  ;;  %v5302_v31 = vadd.f32 %v16682_v9, %v5288_v50  ;;  %v5596_v57 = vmul.f32 0.5, %v16641_v8 }
 0x412   :  { %8076 = vmatpush.bf16.msrb.mxu2 %v13098_v1  ;;  %8049 = vmatpush.bf16.msrb.mxu0 %v12690_v48  ;;  %v5315_v1 = vpop.f32.mrf.mxu0  ;;  %v13026_v55 = vor.u32 %v15328_v20, %v13025_v30  ;;  %v16695_v48 = vadd.f32 1.0, %v15728_v22  ;;  %v12593_v23 = vld [vmem:[#allocation10 + $0x60] sm:$0xf]  ;;  %v15268_v6 = vld [vmem:[#allocation10 + $0x1f4] sm:$0xf0]  ;;  %v5597_v12 = vmul.f32 0.5, %v16648_v7 }
 0x413   :  { %5580 = vmatmul.bf16.vlgmr.msra.gmra.mxu3 %v16470_v18  ;;  %v5289_v18 = vpop.f32.mrf.mxu2  ;;  %v13169_v22 = vld [vmem:[#allocation10 + $0x4e0] sm:$0xf]  ;;  %v15364_v46 = vld [vmem:[#allocation10 + $0x4f4] sm:$0xf0]  ;;  %v5316_v63 = vadd.f32 %v5315_v1, %v5302_v31  ;;  %v12786_v30 = vor.u32 %v15268_v6, %v12785_v25  ;;  %v15214_v20 = vld [vmem:[#allocation10 + $0x44] sm:$0xf0] }
 0x414   :  { %8090 = vmatpush.bf16.msrb.mxu3 %v13290_v3  ;;  %8063 = vmatpush.bf16.msrb.mxu1 %v12882_v2  ;;  %v16690_v3 = vpop.f32.mrf.mxu1  ;;  %v5290_v5 = vadd.f32 %v5289_v18, %v5276_v34  ;;  %v16698_v2 = vmul.f32 0.5, %v16606_v15  ;;  %v5303_v15 = vpop.f32.mrf.mxu3  ;;  %v12569_v18 = vld [vmem:[#allocation10 + $0x30] sm:$0xf]  ;;  %v15310_v52 = vld [vmem:[#allocation10 + $0x344] sm:$0xf0]  ;;  %v5589_v31 = vmul.f32 0.5, %v16643_v47 }
 0x415   :  { %v12761_v49 = vld [vmem:[#allocation10 + $0x1b0] sm:$0xf]  ;;  %v16721_v14 = vadd.f32 %v16690_v3, %v5316_v63  ;;  %v12570_v44 = vor.u32 %v15214_v20, %v12569_v18  ;;  %v15208_v50 = vld [vmem:[#allocation10 + $0x14] sm:$0xf0]  ;;  %v13649_v63 = vld [vmem:[#allocation10 + $0x8a0] sm:$0xf] }
 0x416   :  { %8077 = vmatpush.bf16.msrb.mxu2 %v13074_v16  ;;  %8050 = vmatpush.bf16.msrb.mxu0 %v12666_v62  ;;  %v15734_v16 = vpop.eup %15733  ;;  %v5304_v19 = vadd.f32 %v5303_v15, %v5290_v5  ;;  %v15316_v62 = vld [vmem:[#allocation10 + $0x374] sm:$0xf0]  ;;  %v12953_v8 = vld [vmem:[#allocation10 + $0x330] sm:$0xf]  ;;  %v12737_v5 = vld [vmem:[#allocation10 + $0x180] sm:$0xf]  ;;  %v5722_v3 = vmul.f32 %v16700_v58, %v16698_v2  ;;  %v5714_v2 = vmul.f32 %v16695_v48, %v16688_v37 }
 0x417   :  { %v15736_v10 = vpop.eup %15735  ;;  %v5707_v40 = vadd.f32 1.0, %v15734_v16  ;;  %v12978_v4 = vor.u32 %v15316_v62, %v12977_v29  ;;  %v13145_v34 = vld [vmem:[#allocation10 + $0x4b0] sm:$0xf]  ;;  %v15256_v51 = vld [vmem:[#allocation10 + $0x194] sm:$0xf0]  ;;  %v12954_v60 = vor.u32 %v15310_v52, %v12953_v8  ;;  %v15781_v48 = vld [vmem:[#allocation14 + $0x28] sm:$0xff] }
 0x418   :  { %8091 = vmatpush.bf16.msrb.mxu3 %v13266_v45  ;;  %8064 = vmatpush.bf16.msrb.mxu1 %v12858_v53  ;;  %v16705_v45 = vadd.f32 1.0, %v15732_v13  ;;  %v15738_v42 = vpop.eup %15737  ;;  %v16712_v53 = vmul.f32 0.5, %v16638_v27  ;;  %v16715_v35 = vadd.f32 1.0, %v15736_v10  ;;  %v13170_v27 = vor.u32 %v15364_v46, %v13169_v22  ;;  %v12929_v16 = vld [vmem:[#allocation10 + $0x300] sm:$0xf] }
 0x419   :  { %v15740_v61 = vpop.eup %15739  ;;  %v5708_v1 = vadd.f32 1.0, %v15738_v42  ;;  %v5723_v10 = vmul.f32 %v5707_v40, %v16708_v11  ;;  %v15442_v15 = vld [vmem:[#allocation10 + $0x764] sm:$0xf0]  ;;  %v5606_v6 = vmul.f32 0.044715, %v16721_v14  ;;  %v12738_v42 = vor.u32 %v15256_v51, %v12737_v5 }
 0x41a   :  { %8078 = vmatpush.bf16.msrb.mxu2 %v13050_v56  ;;  %8051 = vmatpush.bf16.msrb.mxu0 %v12642_v54  ;;  %v5317_v21 = vpop.f32.mrf.mxu0  ;;  %v12594_v56 = vor.u32 %v15220_v39, %v12593_v23  ;;  %v15262_v54 = vld [vmem:[#allocation10 + $0x1c4] sm:$0xf0]  ;;  %v5701_v43 = vadd.f32 1.0, %v15740_v61  ;;  %v15352_v23 = vld [vmem:[#allocation10 + $0x494] sm:$0xf0]  ;;  %v5716_v47 = vmul.f32 %v16715_v35, %v16712_v53  ;;  %v16737_v37 = vpack.c.bf16 %v5722_v3, %v5714_v2 }
 0x41b   :  { %v5318_v9 = vadd.f32 %v5317_v21, %v5304_v19  ;;  %v12762_v59 = vor.u32 %v15262_v54, %v12761_v49  ;;  %v13481_v39 = vld [vmem:[#allocation10 + $0x750] sm:$0xf]  ;;  %v5724_v25 = vmul.f32 %v5708_v1, %v5596_v57  ;;  %v5343_v58 = vpop.f32.mrf.mxu2  ;;  %v13457_v57 = vld [vmem:[#allocation10 + $0x720] sm:$0xf]  ;;  %v5715_v21 = vmul.f32 %v16705_v45, %v16703_v28  ;;  %v15478_v54 = vld [vmem:[#allocation10 + $0x884] sm:$0xf0] }
 0x41c   :  { %8092 = vmatpush.bf16.msrb.mxu3 %v13242_v41  ;;  %8065 = vmatpush.bf16.msrb.mxu1 %v12834_v38  ;;  %v15742_v41 = vpop.eup %15741  ;;  %v5331_v17 = vpop.f32.mrf.mxu1  ;;  %v15358_v38 = vld [vmem:[#allocation10 + $0x4c4] sm:$0xf0]  ;;  %v13482_v61 = vor.u32 %v15442_v15, %v13481_v39  ;;  %v2991_v18 = vperm.slane %v15781_v48, 3  ;;  %v13625_v49 = vld [vmem:[#allocation10 + $0x870] sm:$0xf] }
 0x41d   :  { %v16717_v13 = vadd.f32 %v5331_v17, %v5318_v9  ;;  %v13146_v33 = vor.u32 %v15358_v38, %v13145_v34  ;;  %v5357_v11 = vpop.f32.mrf.mxu3  ;;  %v15484_v9 = vld [vmem:[#allocation10 + $0x8b4] sm:$0xf0]  ;;  %v16739_v20 = vpack.c.bf16 %v5723_v10, %v5715_v21  ;;  %v16741_v28 = vpack.c.bf16 %v5724_v25, %v5716_v47  ;;  %v15466_v39 = vld [vmem:[#allocation10 + $0x824] sm:$0xf0]  ;;  %v13361_v25 = vld [vmem:[#allocation10 + $0x660] sm:$0xf] }
 0x41e   :  { %8079 = vmatpush.bf16.msrb.mxu2 %v13026_v55  ;;  %8052 = vmatpush.bf16.msrb.mxu0 %v12618_v32  ;;  %v5709_v55 = vadd.f32 1.0, %v15742_v41  ;;  %v15304_v32 = vld [vmem:[#allocation10 + $0x314] sm:$0xf0]  ;;  %v13650_v17 = vor.u32 %v15484_v9, %v13649_v63  ;;  %v5344_v52 = vadd.f32 %v5343_v58, %v2991_v18  ;;  %v13626_v1 = vor.u32 %v15478_v54, %v13625_v49  ;;  %v13337_v21 = vld [vmem:[#allocation10 + $0x630] sm:$0xf] }
 0x41f   :  { %v5614_v7 = vmul.f32 0.044715, %v16717_v13  ;;  %v12930_v62 = vor.u32 %v15304_v32, %v12929_v16  ;;  %v15436_v41 = vld [vmem:[#allocation10 + $0x734] sm:$0xf0]  ;;  %v13385_v32 = vld [vmem:[#allocation10 + $0x690] sm:$0xf] }
 0x420   :  { %8093 = vmatpush.bf16.msrb.mxu3 %v13218_v26  ;;  %8066 = vmatpush.bf16.msrb.mxu1 %v12810_v24  ;;  %v12545_v26 = vld [vmem:[#allocation10] sm:$0xf]  ;;  %v5725_v19 = vmul.f32 %v5709_v55, %v5597_v12  ;;  %v13458_v35 = vor.u32 %v15436_v41, %v13457_v57  ;;  %v15424_v12 = vld [vmem:[#allocation10 + $0x6d4] sm:$0xf0]  ;;  %v5358_v5 = vadd.f32 %v5357_v11, %v5344_v52  ;;  %v15406_v9 = vld [vmem:[#allocation10 + $0x644] sm:$0xf0] }
 0x421   :  { %v13121_v24 = vld [vmem:[#allocation10 + $0x480] sm:$0xf]  ;;  %v12546_v29 = vor.u32 %v15208_v50, %v12545_v26  ;;  %v5630_v46 = vmul.f32 %v5614_v7, %v16717_v13  ;;  %v15472_v26 = vld [vmem:[#allocation10 + $0x854] sm:$0xf0]  ;;  %v15418_v7 = vld [vmem:[#allocation10 + $0x6a4] sm:$0xf0] }
 0x422   :  { %8080 = vmatpush.bf16.msrb.mxu2 %v13002_v0  ;;  %8053 = vmatpush.bf16.msrb.mxu0 %v12594_v56  ;;  %v13673_v0 = vld [vmem:[#allocation10 + $0x8d0] sm:$0xf]  ;;  %v13122_v22 = vor.u32 %v15352_v23, %v13121_v24  ;;  %v5717_v56 = vmul.f32 %v5701_v43, %v5589_v31  ;;  %v13409_v43 = vld [vmem:[#allocation10 + $0x6c0] sm:$0xf]  ;;  %v5371_v51 = vpop.f32.mrf.mxu0  ;;  %v15412_v31 = vld [vmem:[#allocation10 + $0x674] sm:$0xf0] }
 0x423   :  { %v5646_v53 = vmul.f32 %v5630_v46, %v16717_v13  ;;  %v13601_v55 = vld [vmem:[#allocation10 + $0x840] sm:$0xf]  ;;  %v5372_v24 = vadd.f32 %v5371_v51, %v5358_v5  ;;  %v13577_v23 = vld [vmem:[#allocation10 + $0x810] sm:$0xf]  ;;  %v15454_v48 = vld [vmem:[#allocation10 + $0x7c4] sm:$0xf0] }
 0x424   :  { %8094 = vmatpush.bf16.msrb.mxu3 %v13194_v36  ;;  %8067 = vmatpush.bf16.msrb.mxu1 %v12786_v30  ;;  %v15490_v36 = vld [vmem:[#allocation10 + $0x8e4] sm:$0xf0]  ;;  %v5622_v30 = vmul.f32 %v5606_v6, %v16721_v14  ;;  %v16743_v45 = vpack.c.bf16 %v5725_v19, %v5717_v56  ;;  %v13602_v16 = vor.u32 %v15472_v26, %v13601_v55  ;;  %v5385_v10 = vpop.f32.mrf.mxu1  ;;  %v13865_v6 = vld [vmem:[#allocation10 + $0xa50] sm:$0xf]  ;;  %v13553_v19 = vld [vmem:[#allocation10 + $0x7e0] sm:$0xf] }
 0x425   :  { %v13674_v40 = vor.u32 %v15490_v36, %v13673_v0  ;;  %v5662_v34 = vadd.f32 %v5646_v53, %v16717_v13  ;;  %v5359_v50 = vpop.f32.mrf.mxu3  ;;  %v13386_v0 = vor.u32 %v15418_v7, %v13385_v32  ;;  %v13578_v36 = vor.u32 %v15466_v39, %v13577_v23  ;;  %v13841_v47 = vld [vmem:[#allocation10 + $0xa20] sm:$0xf]  ;;  %v15532_v56 = vld [vmem:[#allocation10 + $0xa34] sm:$0xf0]  ;;  %v15247_v26 = vld [vmem:[#allocation10 + $0x154] sm:$0xf] }
 0x426   :  { %8081 = vmatpush.bf16.msrb.mxu2 %v12978_v4  ;;  %8054 = vmatpush.bf16.msrb.mxu0 %v12570_v44  ;;  %v13433_v4 = vld [vmem:[#allocation10 + $0x6f0] sm:$0xf]  ;;  %v5638_v8 = vmul.f32 %v5622_v30, %v16721_v14  ;;  %v15295_v5 = vld [vmem:[#allocation10 + $0x2d4] sm:$0xf]  ;;  %v12907_v51 = vld [vmem:[#allocation10 + $0x2e8] sm:$0xf0] }
 0x427   :  { %v13529_v30 = vld [vmem:[#allocation10 + $0x7b0] sm:$0xf] }
 0x428   :  { %8095 = vmatpush.bf16.msrb.mxu3 %v13170_v27  ;;  %8068 = vmatpush.bf16.msrb.mxu1 %v12762_v59  ;;  %v15430_v27 = vld [vmem:[#allocation10 + $0x704] sm:$0xf0]  ;;  %v5654_v44 = vadd.f32 %v5638_v8, %v16721_v14  ;;  %v5345_v59 = vpop.f32.mrf.mxu2  ;;  %v13338_v8 = vor.u32 %v15406_v9, %v13337_v21  ;;  %v13530_v52 = vor.u32 %v15454_v48, %v13529_v30  ;;  %v12667_v21 = vld [vmem:[#allocation10 + $0x108] sm:$0xf0]  ;;  %v13745_v30 = vld [vmem:[#allocation10 + $0x960] sm:$0xf] }
 0x429   :  { %v13434_v38 = vor.u32 %v15430_v27, %v13433_v4  ;;  %v5346_v15 = vadd.f32 %v5345_v59, %v2991_v18  ;;  %v13842_v18 = vor.u32 %v15532_v56, %v13841_v47  ;;  %v15400_v4 = vld [vmem:[#allocation10 + $0x614] sm:$0xf0]  ;;  %v13505_v27 = vld [vmem:[#allocation10 + $0x780] sm:$0xf]  ;;  %v15283_v47 = vld [vmem:[#allocation10 + $0x274] sm:$0xf] }
 0x42a   :  { %8082 = vmatpush.bf16.msrb.mxu2 %v12954_v60  ;;  %8055 = vmatpush.bf16.msrb.mxu0 %v12546_v29  ;;  %v5678_v60 = vmul.f32 0.7978846, %v5662_v34  ;;  %v5670_v3 = vmul.f32 0.7978846, %v5654_v44  ;;  %v15538_v29 = vld [vmem:[#allocation10 + $0xa64] sm:$0xf0] }
 0x42b   :  { %v5360_v11 = vadd.f32 %v5359_v50, %v5346_v15  ;;  %v15448_v34 = vld [vmem:[#allocation10 + $0x794] sm:$0xf0]  ;;  %v12715_v44 = vld [vmem:[#allocation10 + $0x168] sm:$0xf0] }
 0x42c   :  { %8096 = vmatpush.bf16.msrb.mxu3 %v13146_v33  ;;  %8069 = vmatpush.bf16.msrb.mxu1 %v12738_v42  ;;  %v13410_v33 = vor.u32 %v15424_v12, %v13409_v43  ;;  %15743 = vtanh.f32 %v5678_v60  ;;  %v5386_v42 = vadd.f32 %v5385_v10, %v5372_v24  ;;  %v5387_v54 = vpop.f32.mrf.mxu1  ;;  %v5590_v24 = vmul.f32 0.5, %v16721_v14  ;;  %v13793_v10 = vld [vmem:[#allocation10 + $0x9c0] sm:$0xf]  ;;  %v12859_v56 = vld [vmem:[#allocation10 + $0x288] sm:$0xf0] }
 0x42d   :  { %8056 = vmatmul.bf16.vlgmr.msrb.gmra.mxu0 %v16737_v37  ;;  %15745 = vtanh.f32 %v5670_v3  ;;  %v5413_v58 = vpop.f32.mrf.mxu3  ;;  %v13506_v39 = vor.u32 %v15448_v34, %v13505_v27  ;;  %v12718_v3 = vor.u32 %v15247_v26, %v12715_v44  ;;  %v15508_v48 = vld [vmem:[#allocation10 + $0x974] sm:$0xf0]  ;;  %v15277_v27 = vld [vmem:[#allocation10 + $0x244] sm:$0xf]  ;;  %v12811_v26 = vld [vmem:[#allocation10 + $0x228] sm:$0xf0] }
 0x42e   :  { %8083 = vmatpush.bf16.msrb.mxu2 %v12930_v62  ;;  %8104 = vmatpush.bf16.msra.mxu0 %v13482_v61  ;;  %v15460_v62 = vld [vmem:[#allocation10 + $0x7f4] sm:$0xf0]  ;;  %v5373_v61 = vpop.f32.mrf.mxu0 }
 0x42f   :  { %8070 = vmatmul.bf16.vlgmr.msrb.gmra.mxu1 %v16739_v20  ;;  %v13554_v57 = vor.u32 %v15460_v62, %v13553_v19  ;;  %v5374_v63 = vadd.f32 %v5373_v61, %v5360_v11 }
 0x430   :  { %8097 = vmatpush.bf16.msrb.mxu3 %v13122_v22  ;;  %8118 = vmatpush.bf16.msra.mxu1 %v13674_v40  ;;  %v13866_v22 = vor.u32 %v15538_v29, %v13865_v6  ;;  %v5399_v2 = vpop.f32.mrf.mxu2  ;;  %v13362_v40 = vor.u32 %v15412_v31, %v13361_v25  ;;  %v12910_v25 = vor.u32 %v15295_v5, %v12907_v51  ;;  %v12691_v6 = vld [vmem:[#allocation10 + $0x138] sm:$0xf0]  ;;  %v15520_v29 = vld [vmem:[#allocation10 + $0x9d4] sm:$0xf0]  ;;  %v13697_v5 = vld [vmem:[#allocation10 + $0x900] sm:$0xf] }
 0x431   :  { %8084 = vmatmul.bf16.vlgmr.msrb.gmra.mxu2 %v16741_v28  ;;  %v5400_v46 = vadd.f32 %v5399_v2, %v5386_v42  ;;  %v5388_v55 = vadd.f32 %v5387_v54, %v5374_v63  ;;  %v15289_v42 = vld [vmem:[#allocation10 + $0x2a4] sm:$0xf]  ;;  %v12883_v31 = vld [vmem:[#allocation10 + $0x2b8] sm:$0xf0]  ;;  %v13794_v19 = vor.u32 %v15520_v29, %v13793_v10  ;;  %v15235_v2 = vld [vmem:[#allocation10 + $0xf4] sm:$0xf]  ;;  %v13746_v54 = vor.u32 %v15508_v48, %v13745_v30 }
 0x432   :  { %8105 = vmatpush.bf16.msra.mxu0 %v13458_v35  ;;  %8132 = vmatpush.bf16.msra.mxu2 %v13866_v22  ;;  %v15744_v53 = vpop.eup %15743  ;;  %v12886_v61 = vor.u32 %v15289_v42, %v12883_v31  ;;  %v15496_v51 = vld [vmem:[#allocation10 + $0x914] sm:$0xf0]  ;;  %v15211_v42 = vld [vmem:[#allocation10 + $0x34] sm:$0xf]  ;;  %v15337_v31 = vld [vmem:[#allocation10 + $0x424] sm:$0xf] }
 0x433   :  { %8098 = vmatmul.bf16.vlgmr.msrb.gmra.mxu3 %v16743_v45  ;;  %v16753_v41 = vadd.f32 %v5413_v58, %v5400_v46  ;;  %v15746_v49 = vpop.eup %15745  ;;  %v5710_v43 = vadd.f32 1.0, %v15744_v53  ;;  %v12670_v53 = vor.u32 %v15235_v2, %v12667_v21  ;;  %v15259_v2 = vld [vmem:[#allocation10 + $0x1b4] sm:$0xf]  ;;  %v12547_v21 = vld [vmem:[#allocation10 + $0x18] sm:$0xf0] }
 0x434   :  { %8119 = vmatpush.bf16.msra.mxu1 %v13650_v17  ;;  %v13313_v17 = vld [vmem:[#allocation10 + $0x600] sm:$0xf]  ;;  %v5702_v60 = vadd.f32 1.0, %v15746_v49  ;;  %v12835_v49 = vld [vmem:[#allocation10 + $0x258] sm:$0xf0] }
 0x435   :  { %v5607_v35 = vmul.f32 0.044715, %v16753_v41  ;;  %v5415_v7 = vpop.f32.mrf.mxu3  ;;  %v13314_v23 = vor.u32 %v15400_v4, %v13313_v17  ;;  %v15229_v17 = vld [vmem:[#allocation10 + $0xc4] sm:$0xf]  ;;  %v12643_v4 = vld [vmem:[#allocation10 + $0xd8] sm:$0xf0]  ;;  %v12838_v34 = vor.u32 %v15277_v27, %v12835_v49 }
 0x436   :  { %8106 = vmatpush.bf16.msra.mxu0 %v13434_v38  ;;  %8133 = vmatpush.bf16.msra.mxu2 %v13842_v18  ;;  %v13817_v38 = vld [vmem:[#allocation10 + $0x9f0] sm:$0xf]  ;;  %v5718_v14 = vmul.f32 %v5702_v60, %v5590_v24  ;;  %v13099_v24 = vld [vmem:[#allocation10 + $0x468] sm:$0xf0]  ;;  %v15487_v27 = vld [vmem:[#allocation10 + $0x8d4] sm:$0xf] }
 0x437   :  { %v5623_v12 = vmul.f32 %v5607_v35, %v16753_v41  ;;  %v12862_v35 = vor.u32 %v15283_v47, %v12859_v56  ;;  %v15253_v47 = vld [vmem:[#allocation10 + $0x184] sm:$0xf]  ;;  %v13675_v49 = vld [vmem:[#allocation10 + $0x8e8] sm:$0xf0] }
 0x438   :  { %8120 = vmatpush.bf16.msra.mxu1 %v13626_v1  ;;  %v15526_v1 = vld [vmem:[#allocation10 + $0xa04] sm:$0xf0]  ;;  %v5401_v50 = vpop.f32.mrf.mxu2 }
 0x439   :  { %v13818_v59 = vor.u32 %v15526_v1, %v13817_v38  ;;  %v5402_v32 = vadd.f32 %v5401_v50, %v5388_v55  ;;  %v15223_v38 = vld [vmem:[#allocation10 + $0x94] sm:$0xf]  ;;  %v13721_v1 = vld [vmem:[#allocation10 + $0x930] sm:$0xf]  ;;  %v15217_v50 = vld [vmem:[#allocation10 + $0x64] sm:$0xf] }
 0x43a   :  { %8107 = vmatpush.bf16.msra.mxu0 %v13410_v33  ;;  %v5598_v33 = vmul.f32 0.5, %v16717_v13  ;;  %v15241_v13 = vld [vmem:[#allocation10 + $0x124] sm:$0xf]  ;;  %v15271_v55 = vld [vmem:[#allocation10 + $0x214] sm:$0xf] }
 0x43b   :  { %8134 = vmatpush.bf16.msra.mxu2 %v13818_v59  ;;  %v12694_v22 = vor.u32 %v15241_v13, %v12691_v6 }
 0x43c   :  { %8121 = vmatpush.bf16.msra.mxu1 %v13602_v16  ;;  %v5639_v16 = vmul.f32 %v5623_v12, %v16753_v41  ;;  %v5726_v15 = vmul.f32 %v5710_v43, %v5598_v33  ;;  %v15502_v43 = vld [vmem:[#allocation10 + $0x944] sm:$0xf0]  ;;  %v12619_v12 = vld [vmem:[#allocation10 + $0xa8] sm:$0xf0]  ;;  %v12814_v33 = vor.u32 %v15271_v55, %v12811_v26  ;;  %v13459_v55 = vld [vmem:[#allocation10 + $0x738] sm:$0xf0] }
 0x43d   :  { %v13722_v44 = vor.u32 %v15502_v43, %v13721_v1  ;;  %v12622_v60 = vor.u32 %v15223_v38, %v12619_v12  ;;  %v15433_v12 = vld [vmem:[#allocation10 + $0x724] sm:$0xf] }
 0x43e   :  { %8108 = vmatpush.bf16.msra.mxu0 %v13386_v0  ;;  %v5655_v0 = vadd.f32 %v5639_v16, %v16753_v41  ;;  %v16765_v46 = vpack.c.bf16 %v5726_v15, %v5718_v14  ;;  %v12595_v16 = vld [vmem:[#allocation10 + $0x78] sm:$0xf0] }
 0x43f   :  { %8135 = vmatpush.bf16.msra.mxu2 %v13794_v19  ;;  %v12598_v6 = vor.u32 %v15217_v50, %v12595_v16  ;;  %v13075_v19 = vld [vmem:[#allocation10 + $0x438] sm:$0xf0]  ;;  %v15325_v50 = vld [vmem:[#allocation10 + $0x3c4] sm:$0xf]  ;;  %v15574_v16 = vld [vmem:[#allocation10 + $0xb84] sm:$0xf0] }
 0x440   :  { %8122 = vmatpush.bf16.msra.mxu1 %v13578_v36  ;;  %v16761_v36 = vadd.f32 %v5415_v7, %v5402_v32  ;;  %v5671_v58 = vmul.f32 0.7978846, %v5655_v0  ;;  %v15343_v32 = vld [vmem:[#allocation10 + $0x454] sm:$0xf]  ;;  %v5591_v0 = vmul.f32 0.5, %v16753_v41  ;;  %v13078_v41 = vor.u32 %v15337_v31, %v13075_v19 }
 0x441   :  { %v13102_v15 = vor.u32 %v15343_v32, %v13099_v24  ;;  %v5455_v24 = vpop.f32.mrf.mxu2  ;;  %v13985_v31 = vld [vmem:[#allocation10 + $0xb40] sm:$0xf]  ;;  %v15568_v19 = vld [vmem:[#allocation10 + $0xb54] sm:$0xf0] }
 0x442   :  { %8109 = vmatpush.bf16.msra.mxu0 %v13362_v40  ;;  %v5615_v62 = vmul.f32 0.044715, %v16761_v36  ;;  %v13769_v40 = vld [vmem:[#allocation10 + $0x990] sm:$0xf]  ;;  %15747 = vtanh.f32 %v5671_v58  ;;  %v12763_v58 = vld [vmem:[#allocation10 + $0x1c8] sm:$0xf0] }
 0x443   :  { %v12766_v48 = vor.u32 %v15259_v2, %v12763_v58  ;;  %v12979_v2 = vld [vmem:[#allocation10 + $0x378] sm:$0xf0] }
 0x444   :  { %8123 = vmatpush.bf16.msra.mxu1 %v13554_v57  ;;  %v5631_v11 = vmul.f32 %v5615_v62, %v16761_v36  ;;  %v15514_v57 = vld [vmem:[#allocation10 + $0x9a4] sm:$0xf0] }
 0x445   :  { %v13770_v63 = vor.u32 %v15514_v57, %v13769_v40  ;;  %v15205_v57 = vld [vmem:[#allocation10 + $0x4] sm:$0xf] }
 0x446   :  { %8110 = vmatpush.bf16.msra.mxu0 %v13338_v8  ;;  %v5647_v9 = vmul.f32 %v5631_v11, %v16761_v36  ;;  %v16772_v11 = vld [vmem:[#allocation14 + $0x30] sm:$0xff]  ;;  %v12550_v1 = vor.u32 %v15205_v57, %v12547_v21  ;;  %v15469_v57 = vld [vmem:[#allocation10 + $0x844] sm:$0xf]  ;;  %v5469_v21 = vpop.f32.mrf.mxu3 }
 0x447   :  { %8136 = vmatpush.bf16.msra.mxu2 %v13770_v63  ;;  %v5427_v63 = vpop.f32.mrf.mxu0 }
 0x448   :  { %8124 = vmatpush.bf16.msra.mxu1 %v13530_v52  ;;  %v5663_v18 = vadd.f32 %v5647_v9, %v16761_v36  ;;  %v12646_v52 = vor.u32 %v15229_v17, %v12643_v4  ;;  %v15748_v59 = vpop.eup %15747  ;;  %v5441_v9 = vpop.f32.mrf.mxu1  ;;  %v15439_v17 = vld [vmem:[#allocation10 + $0x754] sm:$0xf]  ;;  %v13483_v4 = vld [vmem:[#allocation10 + $0x768] sm:$0xf0] }
 0x449   :  { %v5703_v7 = vadd.f32 1.0, %v15748_v59  ;;  %v13486_v26 = vor.u32 %v15439_v17, %v13483_v4  ;;  %v15481_v59 = vld [vmem:[#allocation10 + $0x8a4] sm:$0xf]  ;;  %v5457_v17 = vpop.f32.mrf.mxu2 }
 0x44a   :  { %8111 = vmatpush.bf16.msra.mxu0 %v13314_v23  ;;  %v5679_v8 = vmul.f32 0.7978846, %v5663_v18  ;;  %v15265_v23 = vld [vmem:[#allocation10 + $0x1e4] sm:$0xf]  ;;  %v12739_v18 = vld [vmem:[#allocation10 + $0x198] sm:$0xf0] }
 0x44b   :  { %8137 = vmatpush.bf16.msra.mxu2 %v13746_v54  ;;  %v5719_v14 = vmul.f32 %v5703_v7, %v5591_v0  ;;  %v12742_v43 = vor.u32 %v15253_v47, %v12739_v18  ;;  %v13435_v0 = vld [vmem:[#allocation10 + $0x708] sm:$0xf0]  ;;  %v13603_v47 = vld [vmem:[#allocation10 + $0x858] sm:$0xf0]  ;;  %v15307_v18 = vld [vmem:[#allocation10 + $0x334] sm:$0xf] }
 0x44c   :  { %8125 = vmatpush.bf16.msra.mxu1 %v13506_v39  ;;  %15749 = vtanh.f32 %v5679_v8  ;;  %v12787_v39 = vld [vmem:[#allocation10 + $0x1f8] sm:$0xf0]  ;;  %v14033_v8 = vld [vmem:[#allocation10 + $0xba0] sm:$0xf] }
 0x44d   :  { %8112 = vmatmul.bf16.vlgmr.msra.gmra.mxu0 %v16765_v46  ;;  %v12790_v29 = vor.u32 %v15265_v23, %v12787_v39  ;;  %v15319_v23 = vld [vmem:[#allocation10 + $0x394] sm:$0xf]  ;;  %v13003_v39 = vld [vmem:[#allocation10 + $0x3a8] sm:$0xf0] }
 0x44e   :  { %8160 = vmatpush.bf16.msrb.mxu0 %v12718_v3  ;;  %v13698_v3 = vor.u32 %v15496_v51, %v13697_v5  ;;  %v13027_v5 = vld [vmem:[#allocation10 + $0x3d8] sm:$0xf0] }
 0x44f   :  { %8138 = vmatpush.bf16.msra.mxu2 %v13722_v44  ;;  %v13678_v44 = vor.u32 %v15487_v27, %v13675_v49  ;;  %v13651_v51 = vld [vmem:[#allocation10 + $0x8b8] sm:$0xf0]  ;;  %v13606_v27 = vor.u32 %v15469_v57, %v13603_v47  ;;  %v15415_v49 = vld [vmem:[#allocation10 + $0x694] sm:$0xf] }
 0x450   :  { %8174 = vmatpush.bf16.msrb.mxu1 %v12910_v25  ;;  %v5599_v25 = vmul.f32 0.5, %v16761_v36  ;;  %v15586_v36 = vld [vmem:[#allocation10 + $0xbe4] sm:$0xf0] }
 0x452   :  { %8161 = vmatpush.bf16.msrb.mxu0 %v12694_v22  ;;  %v15750_v10 = vpop.eup %15749  ;;  %v12571_v22 = vld [vmem:[#allocation10 + $0x48] sm:$0xf0] }
 0x453   :  { %v5711_v13 = vadd.f32 1.0, %v15750_v10  ;;  %8139 = vmatpush.bf16.msra.mxu2 %v13698_v3  ;;  %v12574_v30 = vor.u32 %v15211_v42, %v12571_v22  ;;  %v13462_v3 = vor.u32 %v15433_v12, %v13459_v55  ;;  %v13654_v10 = vor.u32 %v15481_v59, %v13651_v51  ;;  %v15313_v22 = vld [vmem:[#allocation10 + $0x364] sm:$0xf]  ;;  %v15556_v12 = vld [vmem:[#allocation10 + $0xaf4] sm:$0xf0] }
 0x454   :  { %8175 = vmatpush.bf16.msrb.mxu1 %v12886_v61  ;;  %v14057_v61 = vld [vmem:[#allocation10 + $0xbd0] sm:$0xf]  ;;  %v13006_v42 = vor.u32 %v15319_v23, %v13003_v39 }
 0x455   :  { %v5727_v62 = vmul.f32 %v5711_v13, %v5599_v25  ;;  %v14058_v56 = vor.u32 %v15586_v36, %v14057_v61  ;;  %v15475_v25 = vld [vmem:[#allocation10 + $0x874] sm:$0xf]  ;;  %v5429_v13 = vpop.f32.mrf.mxu0  ;;  %v15421_v61 = vld [vmem:[#allocation10 + $0x6c4] sm:$0xf]  ;;  %v13411_v36 = vld [vmem:[#allocation10 + $0x6d8] sm:$0xf0] }
 0x456   :  { %8162 = vmatpush.bf16.msrb.mxu0 %v12670_v53  ;;  %v15331_v53 = vld [vmem:[#allocation10 + $0x3f4] sm:$0xf]  ;;  %v13414_v4 = vor.u32 %v15421_v61, %v13411_v36  ;;  %v13913_v39 = vld [vmem:[#allocation10 + $0xab0] sm:$0xf]  ;;  %v13291_v36 = vld [vmem:[#allocation10 + $0x5e8] sm:$0xf0] }
 0x457   :  { %8188 = vmatpush.bf16.msrb.mxu2 %v13102_v15  ;;  %v16774_v40 = vpack.c.bf16 %v5727_v62, %v5719_v14  ;;  %8146 = vmatpush.bf16.msra.mxu3 %v14058_v56  ;;  %v15427_v15 = vld [vmem:[#allocation10 + $0x6f4] sm:$0xf]  ;;  %v13986_v62 = vor.u32 %v15568_v19, %v13985_v31  ;;  %v12982_v56 = vor.u32 %v15313_v22, %v12979_v2  ;;  %v13339_v31 = vld [vmem:[#allocation10 + $0x648] sm:$0xf0]  ;;  %v13889_v22 = vld [vmem:[#allocation10 + $0xa80] sm:$0xf] }
 0x458   :  { %8176 = vmatpush.bf16.msrb.mxu1 %v12862_v35  ;;  %v13051_v35 = vld [vmem:[#allocation10 + $0x408] sm:$0xf0]  ;;  %v15451_v19 = vld [vmem:[#allocation10 + $0x7b4] sm:$0xf]  ;;  %v15544_v2 = vld [vmem:[#allocation10 + $0xa94] sm:$0xf0] }
 0x459   :  { %8126 = vmatmul.bf16.vlgmr.msra.gmra.mxu1 %v16774_v40  ;;  %v13054_v54 = vor.u32 %v15331_v53, %v13051_v35  ;;  %v12955_v53 = vld [vmem:[#allocation10 + $0x348] sm:$0xf0]  ;;  %v15391_v61 = vld [vmem:[#allocation10 + $0x5d4] sm:$0xf] }
 0x45a   :  { %8163 = vmatpush.bf16.msrb.mxu0 %v12646_v52  ;;  %v15580_v52 = vld [vmem:[#allocation10 + $0xbb4] sm:$0xf0]  ;;  %v13294_v47 = vor.u32 %v15391_v61, %v13291_v36  ;;  %v15367_v61 = vld [vmem:[#allocation10 + $0x514] sm:$0xf]  ;;  %v13195_v36 = vld [vmem:[#allocation10 + $0x528] sm:$0xf0] }
 0x45b   :  { %8189 = vmatpush.bf16.msrb.mxu2 %v13078_v41  ;;  %v14034_v38 = vor.u32 %v15580_v52, %v14033_v8  ;;  %v15463_v8 = vld [vmem:[#allocation10 + $0x814] sm:$0xf] }
 0x45c   :  { %8177 = vmatpush.bf16.msrb.mxu1 %v12838_v34  ;;  %v2992_v34 = vperm.slane %v16772_v11, 3  ;;  %v13438_v11 = vor.u32 %v15427_v15, %v13435_v0  ;;  %v5471_v0 = vpop.f32.mrf.mxu3 }
 0x45d   :  { %8147 = vmatpush.bf16.msra.mxu3 %v14034_v38  ;;  %v5483_v52 = vpop.f32.mrf.mxu0 }
 0x45e   :  { %8164 = vmatpush.bf16.msrb.mxu0 %v12622_v60  ;;  %v13030_v60 = vor.u32 %v15325_v50, %v13027_v5  ;;  %v5428_v32 = vadd.f32 %v5427_v63, %v2992_v34  ;;  %v13961_v63 = vld [vmem:[#allocation10 + $0xb10] sm:$0xf]  ;;  %v15301_v50 = vld [vmem:[#allocation10 + $0x304] sm:$0xf]  ;;  %v12931_v5 = vld [vmem:[#allocation10 + $0x318] sm:$0xf0] }
 0x45f   :  { %8190 = vmatpush.bf16.msrb.mxu2 %v13054_v54  ;;  %v13387_v54 = vld [vmem:[#allocation10 + $0x6a8] sm:$0xf0]  ;;  %v12934_v23 = vor.u32 %v15301_v50, %v12931_v5  ;;  %v12889_v50 = vld [vmem:[#allocation10 + $0x2a8] sm:$0xf]  ;;  %v15293_v5 = vld [vmem:[#allocation10 + $0x2bc] sm:$0xf0] }
 0x460   :  { %8178 = vmatpush.bf16.msrb.mxu1 %v12814_v33  ;;  %v14009_v33 = vld [vmem:[#allocation10 + $0xb70] sm:$0xf]  ;;  %v5442_v14 = vadd.f32 %v5441_v9, %v5428_v32  ;;  %v15562_v9 = vld [vmem:[#allocation10 + $0xb24] sm:$0xf0]  ;;  %v13390_v59 = vor.u32 %v15415_v49, %v13387_v54  ;;  %v13363_v32 = vld [vmem:[#allocation10 + $0x678] sm:$0xf0] }
 0x461   :  { %v14010_v7 = vor.u32 %v15574_v16, %v14009_v33  ;;  %v15409_v16 = vld [vmem:[#allocation10 + $0x664] sm:$0xf]  ;;  %v15299_v49 = vld [vmem:[#allocation10 + $0x2ec] sm:$0xf0] }
 0x462   :  { %8165 = vmatpush.bf16.msrb.mxu0 %v12598_v6  ;;  %v5443_v6 = vpop.f32.mrf.mxu1  ;;  %v5456_v58 = vadd.f32 %v5455_v24, %v5442_v14  ;;  %v15457_v24 = vld [vmem:[#allocation10 + $0x7e4] sm:$0xf] }
 0x463   :  { %8191 = vmatpush.bf16.msrb.mxu2 %v13030_v60  ;;  %8148 = vmatpush.bf16.msra.mxu3 %v14010_v7  ;;  %v13555_v7 = vld [vmem:[#allocation10 + $0x7f8] sm:$0xf0] }
 0x464   :  { %8179 = vmatpush.bf16.msrb.mxu1 %v12790_v29  ;;  %v13627_v29 = vld [vmem:[#allocation10 + $0x888] sm:$0xf0]  ;;  %v5470_v35 = vadd.f32 %v5469_v21, %v5456_v58 }
 0x465   :  { %v13630_v41 = vor.u32 %v15475_v25, %v13627_v29  ;;  %v13366_v25 = vor.u32 %v15409_v16, %v13363_v32  ;;  %v13558_v29 = vor.u32 %v15457_v24, %v13555_v7  ;;  %v5485_v14 = vpop.f32.mrf.mxu0  ;;  %v16791_v16 = vld [vmem:[#allocation14 + $0x38] sm:$0xff]  ;;  %v5511_v32 = vpop.f32.mrf.mxu2 }
 0x466   :  { %8166 = vmatpush.bf16.msrb.mxu0 %v12574_v30  ;;  %v5430_v30 = vadd.f32 %v5429_v13, %v2992_v34  ;;  %v13937_v34 = vld [vmem:[#allocation10 + $0xae0] sm:$0xf]  ;;  %v5525_v24 = vpop.f32.mrf.mxu3 }
 0x467   :  { %8192 = vmatpush.bf16.msrb.mxu2 %v13006_v42  ;;  %8149 = vmatpush.bf16.msra.mxu3 %v13986_v62  ;;  %v15403_v42 = vld [vmem:[#allocation10 + $0x634] sm:$0xf]  ;;  %v13531_v62 = vld [vmem:[#allocation10 + $0x7c8] sm:$0xf0] }
 0x468   :  { %8180 = vmatpush.bf16.msrb.mxu1 %v12766_v48  ;;  %v13962_v48 = vor.u32 %v15562_v9, %v13961_v63  ;;  %v5444_v55 = vadd.f32 %v5443_v6, %v5430_v30  ;;  %v13342_v21 = vor.u32 %v15403_v42, %v13339_v31  ;;  %v13534_v9 = vor.u32 %v15451_v19, %v13531_v62  ;;  %v15397_v30 = vld [vmem:[#allocation10 + $0x604] sm:$0xf]  ;;  %v13219_v42 = vld [vmem:[#allocation10 + $0x558] sm:$0xf0]  ;;  %v12649_v62 = vld [vmem:[#allocation10 + $0xc8] sm:$0xf] }
 0x46a   :  { %8167 = vmatpush.bf16.msrb.mxu0 %v12550_v1  ;;  %v5497_v38 = vpop.f32.mrf.mxu1  ;;  %v13579_v1 = vld [vmem:[#allocation10 + $0x828] sm:$0xf0]  ;;  %v5458_v51 = vadd.f32 %v5457_v17, %v5444_v55  ;;  %v15251_v17 = vld [vmem:[#allocation10 + $0x16c] sm:$0xf0] }
 0x46b   :  { %8193 = vmatpush.bf16.msrb.mxu2 %v12982_v56  ;;  %8150 = vmatpush.bf16.msra.mxu3 %v13962_v48  ;;  %v13582_v33 = vor.u32 %v15463_v8, %v13579_v1  ;;  %v13315_v48 = vld [vmem:[#allocation10 + $0x618] sm:$0xf0]  ;;  %v15385_v8 = vld [vmem:[#allocation10 + $0x5a4] sm:$0xf] }
 0x46c   :  { %8181 = vmatpush.bf16.msrb.mxu1 %v12742_v43  ;;  %v12958_v43 = vor.u32 %v15307_v18, %v12955_v53  ;;  %v5472_v13 = vadd.f32 %v5471_v0, %v5458_v51  ;;  %v15445_v18 = vld [vmem:[#allocation10 + $0x784] sm:$0xf]  ;;  %v13507_v53 = vld [vmem:[#allocation10 + $0x798] sm:$0xf0]  ;;  %v13318_v54 = vor.u32 %v15397_v30, %v13315_v48  ;;  %v15379_v51 = vld [vmem:[#allocation10 + $0x574] sm:$0xf] }
 0x46d   :  { %8168 = vmatmul.bf16.vlgmr.msrb.gmra.mxu0 %v16737_v37  ;;  %v12817_v48 = vld [vmem:[#allocation10 + $0x218] sm:$0xf] }
 0x46e   :  { %8216 = vmatpush.bf16.msra.mxu0 %v13486_v26  ;;  %v5484_v26 = vadd.f32 %v5483_v52, %v5470_v35  ;;  %v12721_v35 = vld [vmem:[#allocation10 + $0x158] sm:$0xf]  ;;  %v13267_v52 = vld [vmem:[#allocation10 + $0x5b8] sm:$0xf0] }
 0x46f   :  { %8182 = vmatmul.bf16.vlgmr.msrb.gmra.mxu1 %v16739_v20  ;;  %8194 = vmatpush.bf16.msrb.mxu2 %v12958_v43  ;;  %v13510_v43 = vor.u32 %v15445_v18, %v13507_v53  ;;  %v15275_v18 = vld [vmem:[#allocation10 + $0x22c] sm:$0xf0] }
 0x470   :  { %8230 = vmatpush.bf16.msra.mxu1 %v13678_v44  ;;  %v13938_v44 = vor.u32 %v15556_v12, %v13937_v34  ;;  %v16780_v60 = vadd.f32 %v5497_v38, %v5484_v26  ;;  %v13270_v34 = vor.u32 %v15385_v8, %v13267_v52  ;;  %v12722_v12 = vor.u32 %v15251_v17, %v12721_v35  ;;  %v12697_v26 = vld [vmem:[#allocation10 + $0x128] sm:$0xf]  ;;  %v5513_v17 = vpop.f32.mrf.mxu2  ;;  %v15361_v52 = vld [vmem:[#allocation10 + $0x4e4] sm:$0xf] }
 0x472   :  { %8217 = vmatpush.bf16.msra.mxu0 %v13462_v3  ;;  %v15550_v3 = vld [vmem:[#allocation10 + $0xac4] sm:$0xf0]  ;;  %8151 = vmatpush.bf16.msra.mxu3 %v13938_v44  ;;  %v5499_v57 = vpop.f32.mrf.mxu1  ;;  %v5592_v35 = vmul.f32 0.5, %v16780_v60 }
 0x473   :  { %v13914_v15 = vor.u32 %v15550_v3, %v13913_v39  ;;  %8195 = vmatpush.bf16.msrb.mxu2 %v12934_v23  ;;  %v12890_v3 = vor.u32 %v15293_v5, %v12889_v50  ;;  %v15221_v5 = vld [vmem:[#allocation10 + $0x7c] sm:$0xf0] }
 0x474   :  { %8231 = vmatpush.bf16.msra.mxu1 %v13654_v10  ;;  %v5608_v10 = vmul.f32 0.044715, %v16780_v60 }
 0x476   :  { %8218 = vmatpush.bf16.msra.mxu0 %v13438_v11  ;;  %v5624_v6 = vmul.f32 %v5608_v10, %v16780_v60  ;;  %v5486_v11 = vadd.f32 %v5485_v14, %v5472_v13  ;;  %8152 = vmatpush.bf16.msra.mxu3 %v13914_v15  ;;  %v12673_v10 = vld [vmem:[#allocation10 + $0xf8] sm:$0xf]  ;;  %v15239_v15 = vld [vmem:[#allocation10 + $0x10c] sm:$0xf0] }
 0x477   :  { %v15287_v13 = vld [vmem:[#allocation10 + $0x28c] sm:$0xf0]  ;;  %v12674_v19 = vor.u32 %v15239_v15, %v12673_v10 }
 0x478   :  { %8232 = vmatpush.bf16.msra.mxu1 %v13630_v41  ;;  %v5640_v58 = vmul.f32 %v5624_v6, %v16780_v60  ;;  %v13890_v41 = vor.u32 %v15544_v2, %v13889_v22  ;;  %v16786_v63 = vadd.f32 %v5499_v57, %v5486_v11  ;;  %v2993_v6 = vperm.slane %v16791_v16, 3  ;;  %v15233_v2 = vld [vmem:[#allocation10 + $0xdc] sm:$0xf0]  ;;  %v12625_v57 = vld [vmem:[#allocation10 + $0x98] sm:$0xf] }
 0x479   :  { %v15281_v11 = vld [vmem:[#allocation10 + $0x25c] sm:$0xf0] }
 0x47a   :  { %8219 = vmatpush.bf16.msra.mxu0 %v13414_v4  ;;  %v5656_v56 = vadd.f32 %v5640_v58, %v16780_v60  ;;  %v5616_v4 = vmul.f32 0.044715, %v16786_v63  ;;  %8153 = vmatpush.bf16.msra.mxu3 %v13890_v41  ;;  %v12841_v58 = vld [vmem:[#allocation10 + $0x248] sm:$0xf]  ;;  %v5512_v41 = vadd.f32 %v5511_v32, %v2993_v6 }
 0x47b   :  { %v12842_v30 = vor.u32 %v15281_v11, %v12841_v58  ;;  %v12601_v60 = vld [vmem:[#allocation10 + $0x68] sm:$0xf]  ;;  %v13123_v58 = vld [vmem:[#allocation10 + $0x498] sm:$0xf0] }
 0x47c   :  { %8233 = vmatpush.bf16.msra.mxu1 %v13606_v27  ;;  %v12913_v27 = vld [vmem:[#allocation10 + $0x2d8] sm:$0xf]  ;;  %v5672_v38 = vmul.f32 0.7978846, %v5656_v56  ;;  %v5632_v1 = vmul.f32 %v5616_v4, %v16786_v63  ;;  %v5527_v4 = vpop.f32.mrf.mxu3  ;;  %v12602_v15 = vor.u32 %v15221_v5, %v12601_v60  ;;  %v13657_v5 = vld [vmem:[#allocation10 + $0x8a8] sm:$0xf] }
 0x47d   :  { %v12914_v55 = vor.u32 %v15299_v49, %v12913_v27  ;;  %v5526_v27 = vadd.f32 %v5525_v24, %v5512_v41  ;;  %v5600_v49 = vmul.f32 0.5, %v16786_v63  ;;  %v15355_v24 = vld [vmem:[#allocation10 + $0x4b4] sm:$0xf] }
 0x47e   :  { %8220 = vmatpush.bf16.msra.mxu0 %v13390_v59  ;;  %8202 = vmatpush.bf16.msrb.mxu3 %v13294_v47  ;;  %v5648_v44 = vmul.f32 %v5632_v1, %v16786_v63  ;;  %v15245_v59 = vld [vmem:[#allocation10 + $0x13c] sm:$0xf0]  ;;  %15751 = vtanh.f32 %v5672_v38  ;;  %v13198_v47 = vor.u32 %v15367_v61, %v13195_v36  ;;  %v13171_v38 = vld [vmem:[#allocation10 + $0x4f8] sm:$0xf0]  ;;  %v15523_v41 = vld [vmem:[#allocation10 + $0x9f4] sm:$0xf] }
 0x47f   :  { %v12698_v39 = vor.u32 %v15245_v59, %v12697_v26  ;;  %v13819_v61 = vld [vmem:[#allocation10 + $0xa08] sm:$0xf0] }
 0x480   :  { %8234 = vmatpush.bf16.msra.mxu1 %v13582_v33  ;;  %v13243_v33 = vld [vmem:[#allocation10 + $0x588] sm:$0xf0]  ;;  %v5664_v7 = vadd.f32 %v5648_v44, %v16786_v63  ;;  %v15269_v63 = vld [vmem:[#allocation10 + $0x1fc] sm:$0xf0] }
 0x481   :  { %v13246_v23 = vor.u32 %v15379_v51, %v13243_v33  ;;  %v12793_v51 = vld [vmem:[#allocation10 + $0x1e8] sm:$0xf]  ;;  %v5514_v33 = vadd.f32 %v5513_v17, %v2993_v6  ;;  %v12769_v6 = vld [vmem:[#allocation10 + $0x1b8] sm:$0xf]  ;;  %v13822_v17 = vor.u32 %v15523_v41, %v13819_v61 }
 0x482   :  { %8221 = vmatpush.bf16.msra.mxu0 %v13366_v25  ;;  %8203 = vmatpush.bf16.msrb.mxu3 %v13270_v34  ;;  %v5680_v0 = vmul.f32 0.7978846, %v5664_v7  ;;  %v12865_v25 = vld [vmem:[#allocation10 + $0x278] sm:$0xf]  ;;  %v15535_v34 = vld [vmem:[#allocation10 + $0xa54] sm:$0xf] }
 0x483   :  { %v12866_v14 = vor.u32 %v15287_v13, %v12865_v25  ;;  %v13147_v7 = vld [vmem:[#allocation10 + $0x4c8] sm:$0xf0]  ;;  %v12577_v25 = vld [vmem:[#allocation10 + $0x38] sm:$0xf]  ;;  %v15215_v13 = vld [vmem:[#allocation10 + $0x4c] sm:$0xf0] }
 0x484   :  { %8235 = vmatpush.bf16.msra.mxu1 %v13558_v29  ;;  %v15373_v29 = vld [vmem:[#allocation10 + $0x544] sm:$0xf]  ;;  %15753 = vtanh.f32 %v5680_v0  ;;  %v15752_v22 = vpop.eup %15751  ;;  %v12794_v0 = vor.u32 %v15269_v63, %v12793_v51  ;;  %v12578_v11 = vor.u32 %v15215_v13, %v12577_v25  ;;  %v15485_v51 = vld [vmem:[#allocation10 + $0x8bc] sm:$0xf0]  ;;  %v15479_v25 = vld [vmem:[#allocation10 + $0x88c] sm:$0xf0] }
 0x485   :  { %v13222_v31 = vor.u32 %v15373_v29, %v13219_v42  ;;  %v5704_v56 = vadd.f32 1.0, %v15752_v22 }
 0x486   :  { %8222 = vmatpush.bf16.msra.mxu0 %v13342_v21  ;;  %8204 = vmatpush.bf16.msrb.mxu3 %v13246_v23  ;;  %v15227_v21 = vld [vmem:[#allocation10 + $0xac] sm:$0xf0]  ;;  %v15529_v23 = vld [vmem:[#allocation10 + $0xa24] sm:$0xf] }
 0x487   :  { %v12626_v1 = vor.u32 %v15227_v21, %v12625_v57  ;;  %v5720_v26 = vmul.f32 %v5704_v56, %v5592_v35  ;;  %v12553_v56 = vld [vmem:[#allocation10 + $0x8] sm:$0xf] }
 0x488   :  { %8236 = vmatpush.bf16.msra.mxu1 %v13534_v9  ;;  %v12650_v9 = vor.u32 %v15233_v2, %v12649_v62  ;;  %v15349_v2 = vld [vmem:[#allocation10 + $0x484] sm:$0xf] }
 0x489   :  { %v13126_v36 = vor.u32 %v15349_v2, %v13123_v58  ;;  %v15425_v2 = vld [vmem:[#allocation10 + $0x6dc] sm:$0xf0]  ;;  %v13609_v58 = vld [vmem:[#allocation10 + $0x848] sm:$0xf] }
 0x48a   :  { %8223 = vmatpush.bf16.msra.mxu0 %v13318_v54  ;;  %8205 = vmatpush.bf16.msrb.mxu3 %v13222_v31  ;;  %v15754_v53 = vpop.eup %15753  ;;  %v15263_v31 = vld [vmem:[#allocation10 + $0x1cc] sm:$0xf0] }
 0x48b   :  { %v5712_v54 = vadd.f32 1.0, %v15754_v53  ;;  %v15443_v53 = vld [vmem:[#allocation10 + $0x76c] sm:$0xf0] }
 0x48c   :  { %8237 = vmatpush.bf16.msra.mxu1 %v13510_v43  ;;  %v5539_v8 = vpop.f32.mrf.mxu0  ;;  %v12818_v43 = vor.u32 %v15275_v18, %v12817_v48  ;;  %v5553_v50 = vpop.f32.mrf.mxu1  ;;  %v15257_v48 = vld [vmem:[#allocation10 + $0x19c] sm:$0xf0]  ;;  %v13489_v18 = vld [vmem:[#allocation10 + $0x758] sm:$0xf] }
 0x48d   :  { %8224 = vmatmul.bf16.vlgmr.msra.gmra.mxu0 %v16765_v46  ;;  %v5728_v44 = vmul.f32 %v5712_v54, %v5600_v49  ;;  %v5540_v59 = vadd.f32 %v5539_v8, %v5526_v27  ;;  %v15491_v27 = vld [vmem:[#allocation10 + $0x8ec] sm:$0xf0]  ;;  %v15517_v8 = vld [vmem:[#allocation10 + $0x9c4] sm:$0xf] }
 0x48e   :  { %8272 = vmatpush.bf16.msrb.mxu0 %v12722_v12  ;;  %v13867_v12 = vld [vmem:[#allocation10 + $0xa68] sm:$0xf0]  ;;  %8206 = vmatpush.bf16.msrb.mxu3 %v13198_v47  ;;  %v12770_v47 = vor.u32 %v15263_v31, %v12769_v6  ;;  %v15505_v6 = vld [vmem:[#allocation10 + $0x964] sm:$0xf]  ;;  %v13747_v31 = vld [vmem:[#allocation10 + $0x978] sm:$0xf0] }
 0x48f   :  { %8238 = vmatmul.bf16.vlgmr.msra.gmra.mxu1 %v16774_v40  ;;  %v16799_v16 = vpack.c.bf16 %v5728_v44, %v5720_v26  ;;  %v13870_v32 = vor.u32 %v15535_v34, %v13867_v12  ;;  %v5554_v10 = vadd.f32 %v5553_v50, %v5540_v59  ;;  %v13490_v12 = vor.u32 %v15443_v53, %v13489_v18  ;;  %v13465_v26 = vld [vmem:[#allocation10 + $0x728] sm:$0xf]  ;;  %v15437_v50 = vld [vmem:[#allocation10 + $0x73c] sm:$0xf0]  ;;  %v15419_v18 = vld [vmem:[#allocation10 + $0x6ac] sm:$0xf0] }
 0x490   :  { %8286 = vmatpush.bf16.msrb.mxu1 %v12914_v55  ;;  %v13174_v55 = vor.u32 %v15361_v52, %v13171_v38  ;;  %v13795_v52 = vld [vmem:[#allocation10 + $0x9d8] sm:$0xf0]  ;;  %v13750_v41 = vor.u32 %v15505_v6, %v13747_v31  ;;  %v15455_v31 = vld [vmem:[#allocation10 + $0x7cc] sm:$0xf0] }
 0x491   :  { %8140 = vmatmul.bf16.vlgmr.msra.gmra.mxu2 %v16799_v16  ;;  %v13798_v60 = vor.u32 %v15517_v8, %v13795_v52  ;;  %v13699_v8 = vld [vmem:[#allocation10 + $0x918] sm:$0xf0] }
 0x492   :  { %8273 = vmatpush.bf16.msrb.mxu0 %v12698_v39  ;;  %v13843_v39 = vld [vmem:[#allocation10 + $0xa38] sm:$0xf0]  ;;  %8207 = vmatpush.bf16.msrb.mxu3 %v13174_v55 }
 0x493   :  { %8244 = vmatpush.bf16.msra.mxu2 %v13870_v32  ;;  %v13846_v22 = vor.u32 %v15529_v23, %v13843_v39  ;;  %v13466_v23 = vor.u32 %v15437_v50, %v13465_v26  ;;  %v13658_v39 = vor.u32 %v15485_v51, %v13657_v5  ;;  %v13081_v51 = vld [vmem:[#allocation10 + $0x428] sm:$0xf] }
 0x494   :  { %8287 = vmatpush.bf16.msrb.mxu1 %v12890_v3  ;;  %v13150_v3 = vor.u32 %v15355_v24, %v13147_v7  ;;  %v5567_v29 = vpop.f32.mrf.mxu2  ;;  %v5541_v62 = vpop.f32.mrf.mxu0  ;;  %v15511_v24 = vld [vmem:[#allocation10 + $0x994] sm:$0xf]  ;;  %v13771_v7 = vld [vmem:[#allocation10 + $0x9a8] sm:$0xf0] }
 0x495   :  { %v5555_v49 = vpop.f32.mrf.mxu1  ;;  %v13774_v13 = vor.u32 %v15511_v24, %v13771_v7 }
 0x496   :  { %8274 = vmatpush.bf16.msrb.mxu0 %v12674_v19  ;;  %v5581_v42 = vpop.f32.mrf.mxu3  ;;  %v5528_v19 = vadd.f32 %v5527_v4, %v5514_v33  ;;  %8208 = vmatpush.bf16.msrb.mxu3 %v13150_v3  ;;  %v13681_v4 = vld [vmem:[#allocation10 + $0x8d8] sm:$0xf] }
 0x497   :  { %8245 = vmatpush.bf16.msra.mxu2 %v13846_v22  ;;  %v13682_v55 = vor.u32 %v15491_v27, %v13681_v4  ;;  %v13441_v3 = vld [vmem:[#allocation10 + $0x6f8] sm:$0xf] }
 0x498   :  { %8288 = vmatpush.bf16.msrb.mxu1 %v12866_v14  ;;  %v5568_v14 = vadd.f32 %v5567_v29, %v5554_v10  ;;  %v5542_v21 = vadd.f32 %v5541_v62, %v5528_v19  ;;  %v15431_v10 = vld [vmem:[#allocation10 + $0x70c] sm:$0xf0]  ;;  %v13417_v62 = vld [vmem:[#allocation10 + $0x6c8] sm:$0xf] }
 0x499   :  { %v13442_v19 = vor.u32 %v15431_v10, %v13441_v3 }
 0x49a   :  { %8275 = vmatpush.bf16.msrb.mxu0 %v12650_v9  ;;  %v16802_v57 = vadd.f32 %v5581_v42, %v5568_v14  ;;  %v15209_v9 = vld [vmem:[#allocation10 + $0x1c] sm:$0xf0]  ;;  %8209 = vmatpush.bf16.msrb.mxu3 %v13126_v36 }
 0x49b   :  { %v12554_v54 = vor.u32 %v15209_v9, %v12553_v56  ;;  %8246 = vmatpush.bf16.msra.mxu2 %v13822_v17  ;;  %v16817_v36 = vld [vmem:[#allocation14] sm:$0xff]  ;;  %v13723_v56 = vld [vmem:[#allocation10 + $0x948] sm:$0xf0]  ;;  %v13418_v9 = vor.u32 %v15425_v2, %v13417_v62  ;;  %v15467_v17 = vld [vmem:[#allocation10 + $0x82c] sm:$0xf0] }
 0x49c   :  { %8289 = vmatpush.bf16.msrb.mxu1 %v12842_v30  ;;  %v12745_v30 = vld [vmem:[#allocation10 + $0x188] sm:$0xf]  ;;  %v5609_v35 = vmul.f32 0.044715, %v16802_v57  ;;  %v5569_v34 = vpop.f32.mrf.mxu2 }
 0x49e   :  { %8276 = vmatpush.bf16.msrb.mxu0 %v12626_v1  ;;  %v5625_v38 = vmul.f32 %v5609_v35, %v16802_v57  ;;  %v5556_v1 = vadd.f32 %v5555_v49, %v5542_v21  ;;  %v5583_v63 = vpop.f32.mrf.mxu3  ;;  %v6122_v21 = vperm.slane %v16817_v36, 4  ;;  %v13585_v35 = vld [vmem:[#allocation10 + $0x818] sm:$0xf] }
 0x49f   :  { %8247 = vmatpush.bf16.msra.mxu2 %v13798_v60  ;;  %v15461_v60 = vld [vmem:[#allocation10 + $0x7fc] sm:$0xf0] }
 0x4a0   :  { %8290 = vmatpush.bf16.msrb.mxu1 %v12818_v43  ;;  %v12746_v43 = vor.u32 %v15257_v48, %v12745_v30  ;;  %v5641_v44 = vmul.f32 %v5625_v38, %v16802_v57  ;;  %v5570_v59 = vadd.f32 %v5569_v34, %v5556_v1  ;;  %v13393_v48 = vld [vmem:[#allocation10 + $0x698] sm:$0xf]  ;;  %v13586_v1 = vor.u32 %v15467_v17, %v13585_v35  ;;  %v15347_v34 = vld [vmem:[#allocation10 + $0x46c] sm:$0xf0]  ;;  %v12723_v17 = vld [vmem:[#allocation10 + $0x170] sm:$0xf0] }
 0x4a1   :  { %8196 = vmatmul.bf16.vlgmr.msrb.gmra.mxu2 %v16741_v28  ;;  %v13394_v38 = vor.u32 %v15419_v18, %v13393_v48  ;;  %v13513_v48 = vld [vmem:[#allocation10 + $0x788] sm:$0xf]  ;;  %v15449_v18 = vld [vmem:[#allocation10 + $0x79c] sm:$0xf0] }
 0x4a2   :  { %8277 = vmatpush.bf16.msrb.mxu0 %v12602_v15  ;;  %v5657_v33 = vadd.f32 %v5641_v44, %v16802_v57  ;;  %v16808_v32 = vadd.f32 %v5583_v63, %v5570_v59  ;;  %v15413_v44 = vld [vmem:[#allocation10 + $0x67c] sm:$0xf0]  ;;  %v13561_v59 = vld [vmem:[#allocation10 + $0x7e8] sm:$0xf] }
 0x4a3   :  { %8248 = vmatpush.bf16.msra.mxu2 %v13774_v13  ;;  %v15341_v63 = vld [vmem:[#allocation10 + $0x43c] sm:$0xf0]  ;;  %v13562_v7 = vor.u32 %v15461_v60, %v13561_v59  ;;  %v5593_v13 = vmul.f32 0.5, %v16802_v57  ;;  %v15290_v59 = vld [vmem:[#allocation10 + $0x2ac] sm:$0xf] }
 0x4a4   :  { %8291 = vmatpush.bf16.msrb.mxu1 %v12794_v0  ;;  %v5617_v15 = vmul.f32 0.044715, %v16808_v32  ;;  %v13633_v0 = vld [vmem:[#allocation10 + $0x878] sm:$0xf]  ;;  %v5673_v29 = vmul.f32 0.7978846, %v5657_v33 }
 0x4a5   :  { %v13634_v14 = vor.u32 %v15479_v25, %v13633_v0  ;;  %v14059_v0 = vld [vmem:[#allocation10 + $0xbe8] sm:$0xf0]  ;;  %v13537_v25 = vld [vmem:[#allocation10 + $0x7b8] sm:$0xf]  ;;  %v12891_v60 = vld [vmem:[#allocation10 + $0x2c0] sm:$0xf0] }
 0x4a6   :  { %8278 = vmatpush.bf16.msrb.mxu0 %v12578_v11  ;;  %v5633_v42 = vmul.f32 %v5617_v15, %v16808_v32  ;;  %v15473_v11 = vld [vmem:[#allocation10 + $0x85c] sm:$0xf0]  ;;  %15755 = vtanh.f32 %v5673_v29  ;;  %v15583_v15 = vld [vmem:[#allocation10 + $0xbd4] sm:$0xf]  ;;  %v5601_v29 = vmul.f32 0.5, %v16808_v32 }
 0x4a7   :  { %v13610_v30 = vor.u32 %v15473_v11, %v13609_v58  ;;  %8249 = vmatpush.bf16.msra.mxu2 %v13750_v41  ;;  %v13057_v11 = vld [vmem:[#allocation10 + $0x3f8] sm:$0xf]  ;;  %v15335_v41 = vld [vmem:[#allocation10 + $0x40c] sm:$0xf0]  ;;  %v14062_v57 = vor.u32 %v15583_v15, %v14059_v0  ;;  %v12867_v15 = vld [vmem:[#allocation10 + $0x290] sm:$0xf0] }
 0x4a8   :  { %8292 = vmatpush.bf16.msrb.mxu1 %v12770_v47  ;;  %v5649_v22 = vmul.f32 %v5633_v42, %v16808_v32  ;;  %v15499_v47 = vld [vmem:[#allocation10 + $0x934] sm:$0xf]  ;;  %v13058_v35 = vor.u32 %v15335_v41, %v13057_v11  ;;  %v12843_v11 = vld [vmem:[#allocation10 + $0x260] sm:$0xf0]  ;;  %v12961_v41 = vld [vmem:[#allocation10 + $0x338] sm:$0xf] }
 0x4a9   :  { %v13726_v27 = vor.u32 %v15499_v47, %v13723_v56  ;;  %v14035_v47 = vld [vmem:[#allocation10 + $0xbb8] sm:$0xf0]  ;;  %v13321_v56 = vld [vmem:[#allocation10 + $0x608] sm:$0xf] }
 0x4aa   :  { %8279 = vmatpush.bf16.msrb.mxu0 %v12554_v54  ;;  %v5665_v61 = vadd.f32 %v5649_v22, %v16808_v32  ;;  %v8057_v4 = vpop.f32.mrf.mxu0  ;;  %v15493_v54 = vld [vmem:[#allocation10 + $0x904] sm:$0xf]  ;;  %v13538_v32 = vor.u32 %v15455_v31, %v13537_v25  ;;  %v12985_v25 = vld [vmem:[#allocation10 + $0x368] sm:$0xf]  ;;  %v15559_v31 = vld [vmem:[#allocation10 + $0xb14] sm:$0xf] }
 0x4ab   :  { %v8058_v49 = vadd.f32 %v8057_v4, %v6122_v21  ;;  %8250 = vmatpush.bf16.msra.mxu2 %v13726_v27  ;;  %v13702_v50 = vor.u32 %v15493_v54, %v13699_v8  ;;  %v15296_v4 = vld [vmem:[#allocation10 + $0x2dc] sm:$0xf]  ;;  %v12915_v27 = vld [vmem:[#allocation10 + $0x2f0] sm:$0xf0]  ;;  %v13033_v54 = vld [vmem:[#allocation10 + $0x3c8] sm:$0xf] }
 0x4ac   :  { %8293 = vmatpush.bf16.msrb.mxu1 %v12746_v43  ;;  %v5681_v53 = vmul.f32 0.7978846, %v5665_v61  ;;  %v8071_v52 = vpop.f32.mrf.mxu1  ;;  %v13105_v43 = vld [vmem:[#allocation10 + $0x458] sm:$0xf]  ;;  %v15577_v61 = vld [vmem:[#allocation10 + $0xba4] sm:$0xf] }
 0x4ad   :  { %8280 = vmatmul.bf16.vlgmr.msrb.gmra.mxu0 %v16737_v37  ;;  %v8072_v26 = vadd.f32 %v8071_v52, %v8058_v49  ;;  %v13106_v5 = vor.u32 %v15347_v34, %v13105_v43  ;;  %v15329_v8 = vld [vmem:[#allocation10 + $0x3dc] sm:$0xf0]  ;;  %v14038_v52 = vor.u32 %v15577_v61, %v14035_v47  ;;  %v12918_v43 = vor.u32 %v15296_v4, %v12915_v27  ;;  %v15571_v34 = vld [vmem:[#allocation10 + $0xb74] sm:$0xf]  ;;  %v15311_v61 = vld [vmem:[#allocation10 + $0x34c] sm:$0xf0] }
 0x4ae   :  { %8328 = vmatpush.bf16.msra.mxu0 %v13490_v12  ;;  %15757 = vtanh.f32 %v5681_v53  ;;  %v13369_v12 = vld [vmem:[#allocation10 + $0x668] sm:$0xf]  ;;  %v15248_v53 = vld [vmem:[#allocation10 + $0x15c] sm:$0xf] }
 0x4af   :  { %8294 = vmatmul.bf16.vlgmr.msrb.gmra.mxu1 %v16739_v20  ;;  %v13370_v24 = vor.u32 %v15413_v44, %v13369_v12  ;;  %8251 = vmatpush.bf16.msra.mxu2 %v13702_v50  ;;  %v14011_v12 = vld [vmem:[#allocation10 + $0xb88] sm:$0xf0]  ;;  %v12699_v44 = vld [vmem:[#allocation10 + $0x140] sm:$0xf0]  ;;  %v13009_v50 = vld [vmem:[#allocation10 + $0x398] sm:$0xf] }
 0x4b0   :  { %8342 = vmatpush.bf16.msra.mxu1 %v13682_v55  ;;  %v15756_v55 = vpop.eup %15755  ;;  %v12937_v27 = vld [vmem:[#allocation10 + $0x308] sm:$0xf] }
 0x4b1   :  { %v5705_v33 = vadd.f32 1.0, %v15756_v55  ;;  %v15242_v55 = vld [vmem:[#allocation10 + $0x12c] sm:$0xf] }
 0x4b2   :  { %8329 = vmatpush.bf16.msra.mxu0 %v13466_v23  ;;  %v13345_v23 = vld [vmem:[#allocation10 + $0x638] sm:$0xf]  ;;  %8252 = vmatmul.bf16.vlgmr.msra.gmra.mxu2 %v16799_v16  ;;  %v16831_v0 = vpop.f32.mrf.mxu0 }
 0x4b3   :  { %8300 = vmatpush.bf16.msrb.mxu2 %v13106_v5  ;;  %v5721_v22 = vmul.f32 %v5705_v33, %v5593_v13  ;;  %v15323_v5 = vld [vmem:[#allocation10 + $0x3ac] sm:$0xf0]  ;;  %v12894_v33 = vor.u32 %v15290_v59, %v12891_v60  ;;  %v15317_v13 = vld [vmem:[#allocation10 + $0x37c] sm:$0xf0]  ;;  %v15266_v60 = vld [vmem:[#allocation10 + $0x1ec] sm:$0xf] }
 0x4b4   :  { %8343 = vmatpush.bf16.msra.mxu1 %v13658_v39  ;;  %v15407_v39 = vld [vmem:[#allocation10 + $0x64c] sm:$0xf0]  ;;  %v15758_v3 = vpop.eup %15757  ;;  %v8085_v10 = vpop.f32.mrf.mxu2 }
 0x4b5   :  { %v5713_v42 = vadd.f32 1.0, %v15758_v3  ;;  %v8086_v6 = vadd.f32 %v8085_v10, %v8072_v26  ;;  %v13346_v62 = vor.u32 %v15407_v39, %v13345_v23  ;;  %v13034_v26 = vor.u32 %v15329_v8, %v13033_v54  ;;  %v15236_v23 = vld [vmem:[#allocation10 + $0xfc] sm:$0xf]  ;;  %v12675_v3 = vld [vmem:[#allocation10 + $0x110] sm:$0xf0] }
 0x4b6   :  { %8330 = vmatpush.bf16.msra.mxu0 %v13442_v19  ;;  %v8099_v19 = vpop.f32.mrf.mxu3  ;;  %v13010_v39 = vor.u32 %v15323_v5, %v13009_v50  ;;  %v15284_v10 = vld [vmem:[#allocation10 + $0x27c] sm:$0xf]  ;;  %v12795_v50 = vld [vmem:[#allocation10 + $0x200] sm:$0xf0]  ;;  %v13849_v5 = vld [vmem:[#allocation10 + $0xa28] sm:$0xf] }
 0x4b7   :  { %v5729_v2 = vmul.f32 %v5713_v42, %v5601_v29  ;;  %v16824_v58 = vadd.f32 %v8099_v19, %v8086_v6  ;;  %v12678_v42 = vor.u32 %v15236_v23, %v12675_v3  ;;  %v12870_v6 = vor.u32 %v15284_v10, %v12867_v15  ;;  %v13963_v19 = vld [vmem:[#allocation10 + $0xb28] sm:$0xf0]  ;;  %v15212_v3 = vld [vmem:[#allocation10 + $0x3c] sm:$0xf]  ;;  %v12579_v10 = vld [vmem:[#allocation10 + $0x50] sm:$0xf0] }
 0x4b8   :  { %8344 = vmatpush.bf16.msra.mxu1 %v13634_v14  ;;  %v13082_v14 = vor.u32 %v15341_v63, %v13081_v51  ;;  %v14014_v51 = vor.u32 %v15571_v34, %v14011_v12  ;;  %v12702_v63 = vor.u32 %v15242_v55, %v12699_v44  ;;  %v15547_v34 = vld [vmem:[#allocation10 + $0xab4] sm:$0xf]  ;;  %v13915_v12 = vld [vmem:[#allocation10 + $0xac8] sm:$0xf0]  ;;  %v12603_v44 = vld [vmem:[#allocation10 + $0x80] sm:$0xf0]  ;;  %v12798_v23 = vor.u32 %v15266_v60, %v12795_v50 }
 0x4b9   :  { %v13225_v50 = vld [vmem:[#allocation10 + $0x548] sm:$0xf] }
 0x4ba   :  { %8331 = vmatpush.bf16.msra.mxu0 %v13418_v9  ;;  %v15401_v9 = vld [vmem:[#allocation10 + $0x61c] sm:$0xf0]  ;;  %8301 = vmatpush.bf16.msrb.mxu2 %v13082_v14  ;;  %v15230_v14 = vld [vmem:[#allocation10 + $0xcc] sm:$0xf] }
 0x4bb   :  { %v13322_v49 = vor.u32 %v15401_v9, %v13321_v56  ;;  %v15553_v56 = vld [vmem:[#allocation10 + $0xae4] sm:$0xf]  ;;  %v13939_v9 = vld [vmem:[#allocation10 + $0xaf8] sm:$0xf0] }
 0x4bc   :  { %8345 = vmatpush.bf16.msra.mxu1 %v13610_v30  ;;  %v16827_v30 = vpack.c.bf16 %v5729_v2, %v5721_v22  ;;  %v12651_v22 = vld [vmem:[#allocation10 + $0xe0] sm:$0xf0]  ;;  %v15278_v2 = vld [vmem:[#allocation10 + $0x24c] sm:$0xf]  ;;  %v13942_v8 = vor.u32 %v15553_v56, %v13939_v9  ;;  %v13491_v56 = vld [vmem:[#allocation10 + $0x770] sm:$0xf0] }
 0x4bd   :  { %v12846_v47 = vor.u32 %v15278_v2, %v12843_v11  ;;  %v16839_v2 = vpop.f32.mrf.mxu1  ;;  %v15488_v9 = vld [vmem:[#allocation10 + $0x8dc] sm:$0xf] }
 0x4be   :  { %8332 = vmatpush.bf16.msra.mxu0 %v13394_v38  ;;  %8154 = vmatmul.bf16.vlgmr.msra.gmra.mxu3 %v16827_v30  ;;  %v13514_v38 = vor.u32 %v15449_v18, %v13513_v48  ;;  %v15224_v48 = vld [vmem:[#allocation10 + $0x9c] sm:$0xf]  ;;  %v12962_v18 = vor.u32 %v15311_v61, %v12961_v41  ;;  %v12555_v41 = vld [vmem:[#allocation10 + $0x20] sm:$0xf0]  ;;  %v15254_v61 = vld [vmem:[#allocation10 + $0x18c] sm:$0xf] }
 0x4bf   :  { %8258 = vmatpush.bf16.msra.mxu3 %v14062_v57  ;;  %8302 = vmatpush.bf16.msrb.mxu2 %v13058_v35  ;;  %v13966_v57 = vor.u32 %v15559_v31, %v13963_v19  ;;  %v15272_v35 = vld [vmem:[#allocation10 + $0x21c] sm:$0xf]  ;;  %v12582_v19 = vor.u32 %v15212_v3, %v12579_v10  ;;  %v15509_v3 = vld [vmem:[#allocation10 + $0x97c] sm:$0xf0] }
 0x4c0   :  { %8346 = vmatpush.bf16.msra.mxu1 %v13586_v1  ;;  %v12726_v1 = vor.u32 %v15248_v53, %v12723_v17  ;;  %v12627_v53 = vld [vmem:[#allocation10 + $0xb0] sm:$0xf0] }
 0x4c1   :  { %v12819_v17 = vld [vmem:[#allocation10 + $0x230] sm:$0xf0] }
 0x4c2   :  { %8333 = vmatpush.bf16.msra.mxu0 %v13370_v24  ;;  %v15565_v24 = vld [vmem:[#allocation10 + $0xb44] sm:$0xf] }
 0x4c3   :  { %8259 = vmatpush.bf16.msra.mxu3 %v14038_v52  ;;  %8303 = vmatpush.bf16.msrb.mxu2 %v13034_v26  ;;  %v13873_v52 = vld [vmem:[#allocation10 + $0xa58] sm:$0xf]  ;;  %v15218_v26 = vld [vmem:[#allocation10 + $0x6c] sm:$0xf] }
 0x4c4   :  { %8347 = vmatpush.bf16.msra.mxu1 %v13562_v7  ;;  %v13987_v7 = vld [vmem:[#allocation10 + $0xb58] sm:$0xf0] }
 0x4c5   :  { %v13990_v29 = vor.u32 %v15565_v24, %v13987_v7  ;;  %v13891_v24 = vld [vmem:[#allocation10 + $0xa98] sm:$0xf0]  ;;  %v13297_v7 = vld [vmem:[#allocation10 + $0x5d8] sm:$0xf] }
 0x4c6   :  { %8334 = vmatpush.bf16.msra.mxu0 %v13346_v62  ;;  %v12986_v62 = vor.u32 %v15317_v13, %v12985_v25  ;;  %v15260_v25 = vld [vmem:[#allocation10 + $0x1bc] sm:$0xf]  ;;  %v12771_v13 = vld [vmem:[#allocation10 + $0x1d0] sm:$0xf0] }
 0x4c7   :  { %8260 = vmatpush.bf16.msra.mxu3 %v14014_v51  ;;  %8304 = vmatpush.bf16.msrb.mxu2 %v13010_v39  ;;  %v15533_v51 = vld [vmem:[#allocation10 + $0xa3c] sm:$0xf0]  ;;  %v15395_v39 = vld [vmem:[#allocation10 + $0x5ec] sm:$0xf0]  ;;  %v12774_v11 = vor.u32 %v15260_v25, %v12771_v13  ;;  %v13201_v25 = vld [vmem:[#allocation10 + $0x518] sm:$0xf] }
 0x4c8   :  { %8348 = vmatpush.bf16.msra.mxu1 %v13538_v32  ;;  %v12654_v32 = vor.u32 %v15230_v14, %v12651_v22  ;;  %v13850_v15 = vor.u32 %v15533_v51, %v13849_v5  ;;  %v13298_v31 = vor.u32 %v15395_v39, %v13297_v7  ;;  %v13273_v14 = vld [vmem:[#allocation10 + $0x5a8] sm:$0xf]  ;;  %v15206_v22 = vld [vmem:[#allocation10 + $0xc] sm:$0xf]  ;;  %v15476_v7 = vld [vmem:[#allocation10 + $0x87c] sm:$0xf] }
 0x4c9   :  { %v13753_v39 = vld [vmem:[#allocation10 + $0x968] sm:$0xf]  ;;  %v15371_v13 = vld [vmem:[#allocation10 + $0x52c] sm:$0xf0] }
 0x4ca   :  { %8335 = vmatpush.bf16.msra.mxu0 %v13322_v49  ;;  %v8113_v4 = vpop.f32.mrf.mxu0  ;;  %v15305_v49 = vld [vmem:[#allocation10 + $0x31c] sm:$0xf0] }
 0x4cb   :  { %8261 = vmatpush.bf16.msra.mxu3 %v13990_v29  ;;  %8305 = vmatpush.bf16.msrb.mxu2 %v12986_v62  ;;  %v16836_v54 = vadd.f32 %v8113_v4, %v16824_v58  ;;  %v12938_v55 = vor.u32 %v15305_v49, %v12937_v27  ;;  %v13918_v58 = vor.u32 %v15547_v34, %v13915_v12  ;;  %v15389_v62 = vld [vmem:[#allocation10 + $0x5bc] sm:$0xf0]  ;;  %v13249_v49 = vld [vmem:[#allocation10 + $0x578] sm:$0xf]  ;;  %v15482_v34 = vld [vmem:[#allocation10 + $0x8ac] sm:$0xf] }
 0x4cc   :  { %8349 = vmatpush.bf16.msra.mxu1 %v13514_v38  ;;  %v15539_v38 = vld [vmem:[#allocation10 + $0xa6c] sm:$0xf0]  ;;  %v13659_v12 = vld [vmem:[#allocation10 + $0x8c0] sm:$0xf0] }
 0x4cd   :  { %8336 = vmatmul.bf16.vlgmr.msra.gmra.mxu0 %v16765_v46  ;;  %v13874_v59 = vor.u32 %v15539_v38, %v13873_v52  ;;  %v13662_v51 = vor.u32 %v15482_v34, %v13659_v12 }
 0x4ce   :  { %8384 = vmatpush.bf16.msrb.mxu0 %v12726_v1  ;;  %8210 = vmatmul.bf16.vlgmr.msrb.gmra.mxu3 %v16743_v45  ;;  %v12630_v1 = vor.u32 %v15224_v48, %v12627_v53  ;;  %v13683_v48 = vld [vmem:[#allocation10 + $0x8f0] sm:$0xf0]  ;;  %v15521_v53 = vld [vmem:[#allocation10 + $0x9dc] sm:$0xf0] }
 0x4cf   :  { %8350 = vmatmul.bf16.vlgmr.msra.gmra.mxu1 %v16774_v40  ;;  %8262 = vmatpush.bf16.msra.mxu3 %v13966_v57  ;;  %v12747_v57 = vld [vmem:[#allocation10 + $0x1a0] sm:$0xf0]  ;;  %v13686_v52 = vor.u32 %v15488_v9, %v13683_v48  ;;  %v15416_v9 = vld [vmem:[#allocation10 + $0x69c] sm:$0xf]  ;;  %v13395_v48 = vld [vmem:[#allocation10 + $0x6b0] sm:$0xf0] }
 0x4d0   :  { %8398 = vmatpush.bf16.msrb.mxu1 %v12918_v43  ;;  %v12822_v43 = vor.u32 %v15272_v35, %v12819_v17  ;;  %8306 = vmatpush.bf16.msrb.mxu2 %v12962_v18  ;;  %v13801_v18 = vld [vmem:[#allocation10 + $0x9c8] sm:$0xf]  ;;  %v13274_v35 = vor.u32 %v15389_v62, %v13273_v14  ;;  %v12558_v17 = vor.u32 %v15206_v22, %v12555_v41  ;;  %v13611_v14 = vld [vmem:[#allocation10 + $0x860] sm:$0xf0]  ;;  %v13729_v62 = vld [vmem:[#allocation10 + $0x938] sm:$0xf] }
 0x4d1   :  { %v12750_v4 = vor.u32 %v15254_v61, %v12747_v57  ;;  %v13802_v38 = vor.u32 %v15521_v53, %v13801_v18  ;;  %v15503_v22 = vld [vmem:[#allocation10 + $0x94c] sm:$0xf0]  ;;  %v13177_v57 = vld [vmem:[#allocation10 + $0x4e8] sm:$0xf]  ;;  %v15464_v18 = vld [vmem:[#allocation10 + $0x81c] sm:$0xf] }
 0x4d2   :  { %8385 = vmatpush.bf16.msrb.mxu0 %v12702_v63  ;;  %v12606_v63 = vor.u32 %v15218_v26, %v12603_v44  ;;  %v15515_v26 = vld [vmem:[#allocation10 + $0x9ac] sm:$0xf0]  ;;  %v13587_v53 = vld [vmem:[#allocation10 + $0x830] sm:$0xf0] }
 0x4d3   :  { %8263 = vmatpush.bf16.msra.mxu3 %v13942_v8  ;;  %v15383_v8 = vld [vmem:[#allocation10 + $0x58c] sm:$0xf0]  ;;  %v13590_v12 = vor.u32 %v15464_v18, %v13587_v53  ;;  %v12729_v53 = vld [vmem:[#allocation10 + $0x160] sm:$0xf] }
 0x4d4   :  { %8399 = vmatpush.bf16.msrb.mxu1 %v12894_v33  ;;  %v15541_v33 = vld [vmem:[#allocation10 + $0xa84] sm:$0xf]  ;;  %8307 = vmatpush.bf16.msrb.mxu2 %v12938_v55  ;;  %v13777_v55 = vld [vmem:[#allocation10 + $0x998] sm:$0xf]  ;;  %v13250_v44 = vor.u32 %v15383_v8, %v13249_v49  ;;  %v13107_v49 = vld [vmem:[#allocation10 + $0x470] sm:$0xf0] }
 0x4d5   :  { %v13894_v29 = vor.u32 %v15541_v33, %v13891_v24  ;;  %v15428_v33 = vld [vmem:[#allocation10 + $0x6fc] sm:$0xf]  ;;  %v13443_v24 = vld [vmem:[#allocation10 + $0x710] sm:$0xf0]  ;;  %v16851_v8 = vld [vmem:[#allocation14 + $0x8] sm:$0xff] }
 0x4d6   :  { %8386 = vmatpush.bf16.msrb.mxu0 %v12678_v42  ;;  %v13825_v42 = vld [vmem:[#allocation10 + $0x9f8] sm:$0xf] }
 0x4d7   :  { %8264 = vmatpush.bf16.msra.mxu3 %v13918_v58  ;;  %8308 = vmatmul.bf16.vlgmr.msrb.gmra.mxu2 %v16741_v28  ;;  %v15377_v58 = vld [vmem:[#allocation10 + $0x55c] sm:$0xf0] }
 0x4d8   :  { %8400 = vmatpush.bf16.msrb.mxu1 %v12870_v6  ;;  %8356 = vmatpush.bf16.msra.mxu2 %v13874_v59  ;;  %v15527_v6 = vld [vmem:[#allocation10 + $0xa0c] sm:$0xf0]  ;;  %v8127_v59 = vpop.f32.mrf.mxu1  ;;  %v13226_v10 = vor.u32 %v15377_v58, %v13225_v50  ;;  %v13563_v50 = vld [vmem:[#allocation10 + $0x800] sm:$0xf0] }
 0x4d9   :  { %v16843_v5 = vadd.f32 %v8127_v59, %v16836_v54  ;;  %v16847_v54 = vpop.f32.mrf.mxu0 }
 0x4da   :  { %8387 = vmatpush.bf16.msrb.mxu0 %v12654_v32  ;;  %v13826_v32 = vor.u32 %v15527_v6, %v13825_v42  ;;  %v13754_v42 = vor.u32 %v15509_v3, %v13753_v39  ;;  %v15422_v6 = vld [vmem:[#allocation10 + $0x6cc] sm:$0xf]  ;;  %v14065_v39 = vld [vmem:[#allocation10 + $0xbd8] sm:$0xf] }
 0x4db   :  { %8265 = vmatpush.bf16.msra.mxu3 %v13894_v29 }
 0x4dc   :  { %8401 = vmatpush.bf16.msrb.mxu1 %v12846_v47  ;;  %8357 = vmatpush.bf16.msra.mxu2 %v13850_v15  ;;  %v15440_v47 = vld [vmem:[#allocation10 + $0x75c] sm:$0xf]  ;;  %v13446_v15 = vor.u32 %v15428_v33, %v13443_v24 }
 0x4dd   :  { %v13494_v27 = vor.u32 %v15440_v47, %v13491_v56  ;;  %v13730_v56 = vor.u32 %v15503_v22, %v13729_v62  ;;  %v13059_v62 = vld [vmem:[#allocation10 + $0x410] sm:$0xf0] }
 0x4de   :  { %8388 = vmatpush.bf16.msrb.mxu0 %v12630_v1  ;;  %8266 = vmatmul.bf16.vlgmr.msra.gmra.mxu3 %v16827_v30  ;;  %v15434_v1 = vld [vmem:[#allocation10 + $0x72c] sm:$0xf] }
 0x4df   :  { %8314 = vmatpush.bf16.msrb.mxu3 %v13298_v31  ;;  %v13419_v31 = vld [vmem:[#allocation10 + $0x6e0] sm:$0xf0] }
 0x4e0   :  { %8402 = vmatpush.bf16.msrb.mxu1 %v12822_v43  ;;  %8358 = vmatpush.bf16.msra.mxu2 %v13826_v32  ;;  %v13467_v43 = vld [vmem:[#allocation10 + $0x740] sm:$0xf0]  ;;  %v16849_v41 = vpop.f32.mrf.mxu1  ;;  %v13422_v61 = vor.u32 %v15422_v6, %v13419_v31  ;;  %v15365_v32 = vld [vmem:[#allocation10 + $0x4fc] sm:$0xf0]  ;;  %v15452_v6 = vld [vmem:[#allocation10 + $0x7bc] sm:$0xf] }
 0x4e1   :  { %v13470_v60 = vor.u32 %v15434_v1, %v13467_v43  ;;  %v13153_v1 = vld [vmem:[#allocation10 + $0x4b8] sm:$0xf]  ;;  %v15359_v43 = vld [vmem:[#allocation10 + $0x4cc] sm:$0xf0]  ;;  %v13539_v31 = vld [vmem:[#allocation10 + $0x7d0] sm:$0xf0] }
 0x4e2   :  { %8389 = vmatpush.bf16.msrb.mxu0 %v12606_v63  ;;  %v13778_v63 = vor.u32 %v15515_v26, %v13777_v55  ;;  %v15410_v26 = vld [vmem:[#allocation10 + $0x66c] sm:$0xf]  ;;  %v13154_v58 = vor.u32 %v15359_v43, %v13153_v1 }
 0x4e3   :  { %8315 = vmatpush.bf16.msrb.mxu3 %v13274_v35  ;;  %v13705_v35 = vld [vmem:[#allocation10 + $0x908] sm:$0xf] }
 0x4e4   :  { %8403 = vmatpush.bf16.msrb.mxu1 %v12798_v23  ;;  %8359 = vmatpush.bf16.msra.mxu2 %v13802_v38  ;;  %v13635_v23 = vld [vmem:[#allocation10 + $0x890] sm:$0xf0]  ;;  %v13398_v38 = vor.u32 %v15416_v9, %v13395_v48  ;;  %v15446_v9 = vld [vmem:[#allocation10 + $0x78c] sm:$0xf]  ;;  %v13515_v48 = vld [vmem:[#allocation10 + $0x7a0] sm:$0xf0] }
 0x4e5   :  { %v13638_v29 = vor.u32 %v15476_v7, %v13635_v23  ;;  %v13129_v7 = vld [vmem:[#allocation10 + $0x488] sm:$0xf]  ;;  %v15353_v23 = vld [vmem:[#allocation10 + $0x49c] sm:$0xf0]  ;;  %v13518_v43 = vor.u32 %v15446_v9, %v13515_v48  ;;  %v12963_v9 = vld [vmem:[#allocation10 + $0x350] sm:$0xf0] }
 0x4e6   :  { %8390 = vmatpush.bf16.msrb.mxu0 %v12582_v19  ;;  %v15470_v19 = vld [vmem:[#allocation10 + $0x84c] sm:$0xf] }
 0x4e7   :  { %8316 = vmatpush.bf16.msrb.mxu3 %v13250_v44  ;;  %v13614_v47 = vor.u32 %v15470_v19, %v13611_v14  ;;  %v13371_v44 = vld [vmem:[#allocation10 + $0x680] sm:$0xf0]  ;;  %v13130_v19 = vor.u32 %v15353_v23, %v13129_v7  ;;  %v15332_v14 = vld [vmem:[#allocation10 + $0x3fc] sm:$0xf]  ;;  %v13993_v7 = vld [vmem:[#allocation10 + $0xb48] sm:$0xf] }
 0x4e8   :  { %8404 = vmatpush.bf16.msrb.mxu1 %v12774_v11  ;;  %8360 = vmatpush.bf16.msra.mxu2 %v13778_v63  ;;  %v13202_v11 = vor.u32 %v15371_v13, %v13201_v25  ;;  %v13083_v63 = vld [vmem:[#allocation10 + $0x440] sm:$0xf0]  ;;  %v13374_v24 = vor.u32 %v15410_v26, %v13371_v44  ;;  %v15404_v25 = vld [vmem:[#allocation10 + $0x63c] sm:$0xf]  ;;  %v13347_v13 = vld [vmem:[#allocation10 + $0x650] sm:$0xf0]  ;;  %v13062_v18 = vor.u32 %v15332_v14, %v13059_v62 }
 0x4e9   :  { %v15569_v23 = vld [vmem:[#allocation10 + $0xb5c] sm:$0xf0]  ;;  %v13969_v14 = vld [vmem:[#allocation10 + $0xb18] sm:$0xf]  ;;  %v15563_v62 = vld [vmem:[#allocation10 + $0xb2c] sm:$0xf0] }
 0x4ea   :  { %8391 = vmatpush.bf16.msrb.mxu0 %v12558_v17  ;;  %v15497_v17 = vld [vmem:[#allocation10 + $0x91c] sm:$0xf0]  ;;  %v8169_v34 = vpop.f32.mrf.mxu0  ;;  %v13970_v48 = vor.u32 %v15563_v62, %v13969_v14  ;;  %v15216_v62 = vld [vmem:[#allocation10 + $0x54] sm:$0xf0] }
 0x4eb   :  { %8317 = vmatpush.bf16.msrb.mxu3 %v13226_v10  ;;  %v13706_v55 = vor.u32 %v15497_v17, %v13705_v35  ;;  %v15252_v35 = vld [vmem:[#allocation10 + $0x174] sm:$0xf0]  ;;  %v12921_v17 = vld [vmem:[#allocation10 + $0x2e0] sm:$0xf] }
 0x4ec   :  { %8405 = vmatpush.bf16.msrb.mxu1 %v12750_v4  ;;  %8361 = vmatpush.bf16.msra.mxu2 %v13754_v42  ;;  %v13178_v4 = vor.u32 %v15365_v32, %v13177_v57  ;;  %v8183_v3 = vpop.f32.mrf.mxu1  ;;  %v15581_v57 = vld [vmem:[#allocation10 + $0xbbc] sm:$0xf0]  ;;  %v15398_v32 = vld [vmem:[#allocation10 + $0x60c] sm:$0xf] }
 0x4ed   :  { %8392 = vmatmul.bf16.vlgmr.msrb.gmra.mxu0 %v16737_v37  ;;  %v12585_v14 = vld [vmem:[#allocation10 + $0x40] sm:$0xf] }
 0x4ee   :  { %8440 = vmatpush.bf16.msra.mxu0 %v13494_v27  ;;  %v15344_v27 = vld [vmem:[#allocation10 + $0x45c] sm:$0xf] }
 0x4ef   :  { %8406 = vmatmul.bf16.vlgmr.msrb.gmra.mxu1 %v16739_v20  ;;  %8318 = vmatpush.bf16.msrb.mxu3 %v13202_v11  ;;  %v13110_v59 = vor.u32 %v15344_v27, %v13107_v49  ;;  %v13350_v11 = vor.u32 %v15404_v25, %v13347_v13  ;;  %v15326_v27 = vld [vmem:[#allocation10 + $0x3cc] sm:$0xf]  ;;  %v13035_v49 = vld [vmem:[#allocation10 + $0x3e0] sm:$0xf0]  ;;  %v12873_v25 = vld [vmem:[#allocation10 + $0x280] sm:$0xf] }
 0x4f0   :  { %8454 = vmatpush.bf16.msra.mxu1 %v13686_v52  ;;  %v6123_v52 = vperm.slane %v16851_v8, 4  ;;  %8362 = vmatpush.bf16.msra.mxu2 %v13730_v56  ;;  %v13323_v56 = vld [vmem:[#allocation10 + $0x620] sm:$0xf0]  ;;  %v13038_v44 = vor.u32 %v15326_v27, %v13035_v49  ;;  %v15288_v13 = vld [vmem:[#allocation10 + $0x294] sm:$0xf0] }
 0x4f1   :  { %v13326_v1 = vor.u32 %v15398_v32, %v13323_v56  ;;  %v12849_v32 = vld [vmem:[#allocation10 + $0x250] sm:$0xf]  ;;  %v15308_v56 = vld [vmem:[#allocation10 + $0x33c] sm:$0xf]  ;;  %v12633_v27 = vld [vmem:[#allocation10 + $0xa0] sm:$0xf] }
 0x4f2   :  { %8441 = vmatpush.bf16.msra.mxu0 %v13470_v60  ;;  %v15458_v60 = vld [vmem:[#allocation10 + $0x7ec] sm:$0xf]  ;;  %v8170_v33 = vadd.f32 %v8169_v34, %v6123_v52  ;;  %v12730_v34 = vor.u32 %v15252_v35, %v12729_v53  ;;  %v13945_v53 = vld [vmem:[#allocation10 + $0xae8] sm:$0xf]  ;;  %v15557_v35 = vld [vmem:[#allocation10 + $0xafc] sm:$0xf0] }
 0x4f3   :  { %8319 = vmatpush.bf16.msrb.mxu3 %v13178_v4  ;;  %v13566_v10 = vor.u32 %v15458_v60, %v13563_v50  ;;  %v15300_v4 = vld [vmem:[#allocation10 + $0x2f4] sm:$0xf0]  ;;  %v15246_v60 = vld [vmem:[#allocation10 + $0x144] sm:$0xf0]  ;;  %v12897_v50 = vld [vmem:[#allocation10 + $0x2b0] sm:$0xf] }
 0x4f4   :  { %8455 = vmatpush.bf16.msra.mxu1 %v13662_v51  ;;  %v15338_v51 = vld [vmem:[#allocation10 + $0x42c] sm:$0xf]  ;;  %8363 = vmatpush.bf16.msra.mxu2 %v13706_v55  ;;  %v15575_v55 = vld [vmem:[#allocation10 + $0xb8c] sm:$0xf0]  ;;  %v12922_v26 = vor.u32 %v15300_v4, %v12921_v17  ;;  %v12966_v4 = vor.u32 %v15308_v56, %v12963_v9  ;;  %v15228_v49 = vld [vmem:[#allocation10 + $0xb4] sm:$0xf0] }
 0x4f5   :  { %v13086_v42 = vor.u32 %v15338_v51, %v13083_v63  ;;  %v15320_v51 = vld [vmem:[#allocation10 + $0x39c] sm:$0xf]  ;;  %v13011_v63 = vld [vmem:[#allocation10 + $0x3b0] sm:$0xf0]  ;;  %v13761_v8 = vld [vmem:[#allocation10 + $0x970] sm:$0xf] }
 0x4f6   :  { %8442 = vmatpush.bf16.msra.mxu0 %v13446_v15  ;;  %v15587_v15 = vld [vmem:[#allocation10 + $0xbec] sm:$0xf0] }
 0x4f7   :  { %8320 = vmatpush.bf16.msrb.mxu3 %v13154_v58  ;;  %8364 = vmatmul.bf16.vlgmr.msra.gmra.mxu2 %v16799_v16  ;;  %v14066_v22 = vor.u32 %v15587_v15, %v14065_v39  ;;  %v15294_v58 = vld [vmem:[#allocation10 + $0x2c4] sm:$0xf0]  ;;  %v15240_v15 = vld [vmem:[#allocation10 + $0x114] sm:$0xf0] }
 0x4f8   :  { %8456 = vmatpush.bf16.msra.mxu1 %v13638_v29  ;;  %8412 = vmatpush.bf16.msrb.mxu2 %v13110_v59  ;;  %v16856_v29 = vadd.f32 %v8183_v3, %v8170_v33  ;;  %v12705_v59 = vld [vmem:[#allocation10 + $0x130] sm:$0xf]  ;;  %v12898_v39 = vor.u32 %v15294_v58, %v12897_v50  ;;  %v13014_v3 = vor.u32 %v15320_v51, %v13011_v63  ;;  %v16864_v58 = vpop.f32.mrf.mxu1 }
 0x4f9   :  { %v15551_v50 = vld [vmem:[#allocation10 + $0xacc] sm:$0xf0] }
 0x4fa   :  { %8443 = vmatpush.bf16.msra.mxu0 %v13422_v61  ;;  %v14041_v61 = vld [vmem:[#allocation10 + $0xba8] sm:$0xf] }
 0x4fb   :  { %8321 = vmatpush.bf16.msrb.mxu3 %v13130_v19 }
 0x4fc   :  { %8457 = vmatpush.bf16.msra.mxu1 %v13614_v47  ;;  %v13542_v47 = vor.u32 %v15452_v6, %v13539_v31  ;;  %8413 = vmatpush.bf16.msrb.mxu2 %v13086_v42  ;;  %v15314_v42 = vld [vmem:[#allocation10 + $0x36c] sm:$0xf]  ;;  %v12987_v6 = vld [vmem:[#allocation10 + $0x380] sm:$0xf0]  ;;  %v13994_v31 = vor.u32 %v15569_v23, %v13993_v7  ;;  %v12801_v23 = vld [vmem:[#allocation10 + $0x1f0] sm:$0xf] }
 0x4fe   :  { %8444 = vmatpush.bf16.msra.mxu0 %v13398_v38  ;;  %v14042_v38 = vor.u32 %v15581_v57, %v14041_v61  ;;  %8322 = vmatmul.bf16.vlgmr.msrb.gmra.mxu3 %v16743_v45  ;;  %v12657_v61 = vld [vmem:[#allocation10 + $0xd0] sm:$0xf]  ;;  %v15234_v57 = vld [vmem:[#allocation10 + $0xe4] sm:$0xf0] }
 0x4ff   :  { %8370 = vmatpush.bf16.msra.mxu3 %v14066_v22  ;;  %v12874_v22 = vor.u32 %v15288_v13, %v12873_v25  ;;  %v13897_v13 = vld [vmem:[#allocation10 + $0xa88] sm:$0xf] }
 0x500   :  { %8458 = vmatpush.bf16.msra.mxu1 %v13590_v12  ;;  %v14017_v12 = vld [vmem:[#allocation10 + $0xb78] sm:$0xf]  ;;  %8414 = vmatpush.bf16.msrb.mxu2 %v13062_v18  ;;  %v12658_v18 = vor.u32 %v15234_v57, %v12657_v61 }
 0x501   :  { %v14018_v33 = vor.u32 %v15575_v55, %v14017_v12  ;;  %v13946_v12 = vor.u32 %v15557_v35, %v13945_v53  ;;  %v15536_v55 = vld [vmem:[#allocation10 + $0xa5c] sm:$0xf]  ;;  %v15264_v61 = vld [vmem:[#allocation10 + $0x1d4] sm:$0xf0]  ;;  %v13275_v53 = vld [vmem:[#allocation10 + $0x5c0] sm:$0xf0] }
 0x502   :  { %8445 = vmatpush.bf16.msra.mxu0 %v13374_v24  ;;  %v12706_v24 = vor.u32 %v15246_v60, %v12705_v59  ;;  %v12634_v59 = vor.u32 %v15228_v49, %v12633_v27  ;;  %v13921_v60 = vld [vmem:[#allocation10 + $0xab8] sm:$0xf]  ;;  %v12561_v35 = vld [vmem:[#allocation10 + $0x10] sm:$0xf]  ;;  %v15210_v27 = vld [vmem:[#allocation10 + $0x24] sm:$0xf0] }
 0x503   :  { %8371 = vmatpush.bf16.msra.mxu3 %v14042_v38  ;;  %v12825_v38 = vld [vmem:[#allocation10 + $0x220] sm:$0xf]  ;;  %v12753_v49 = vld [vmem:[#allocation10 + $0x190] sm:$0xf] }
 0x504   :  { %8459 = vmatpush.bf16.msra.mxu1 %v13566_v10  ;;  %8415 = vmatpush.bf16.msrb.mxu2 %v13038_v44  ;;  %v12681_v10 = vld [vmem:[#allocation10 + $0x100] sm:$0xf]  ;;  %v16862_v44 = vpop.f32.mrf.mxu0 }
 0x505   :  { %v12682_v19 = vor.u32 %v15240_v15, %v12681_v10  ;;  %v15530_v10 = vld [vmem:[#allocation10 + $0xa2c] sm:$0xf]  ;;  %v13851_v15 = vld [vmem:[#allocation10 + $0xa40] sm:$0xf0] }
 0x506   :  { %8446 = vmatpush.bf16.msra.mxu0 %v13350_v11  ;;  %v12990_v11 = vor.u32 %v15314_v42, %v12987_v6  ;;  %v15545_v42 = vld [vmem:[#allocation10 + $0xa9c] sm:$0xf0]  ;;  %v15392_v6 = vld [vmem:[#allocation10 + $0x5dc] sm:$0xf] }
 0x507   :  { %8372 = vmatpush.bf16.msra.mxu3 %v14018_v33  ;;  %v12609_v33 = vld [vmem:[#allocation10 + $0x70] sm:$0xf]  ;;  %v13898_v57 = vor.u32 %v15545_v42, %v13897_v13  ;;  %v15512_v13 = vld [vmem:[#allocation10 + $0x99c] sm:$0xf]  ;;  %v13779_v42 = vld [vmem:[#allocation10 + $0x9b0] sm:$0xf0] }
 0x508   :  { %8460 = vmatpush.bf16.msra.mxu1 %v13542_v47  ;;  %8416 = vmatpush.bf16.msrb.mxu2 %v13014_v3  ;;  %v15282_v47 = vld [vmem:[#allocation10 + $0x264] sm:$0xf0]  ;;  %v13922_v3 = vor.u32 %v15551_v50, %v13921_v60  ;;  %v13803_v60 = vld [vmem:[#allocation10 + $0x9e0] sm:$0xf0] }
 0x509   :  { %v12850_v17 = vor.u32 %v15282_v47, %v12849_v32  ;;  %v15524_v32 = vld [vmem:[#allocation10 + $0x9fc] sm:$0xf]  ;;  %v13827_v47 = vld [vmem:[#allocation10 + $0xa10] sm:$0xf0] }
 0x50a   :  { %8447 = vmatpush.bf16.msra.mxu0 %v13326_v1  ;;  %v15276_v1 = vld [vmem:[#allocation10 + $0x234] sm:$0xf0] }
 0x50b   :  { %8373 = vmatpush.bf16.msra.mxu3 %v13994_v31  ;;  %v12826_v51 = vor.u32 %v15276_v1, %v12825_v38  ;;  %v15258_v38 = vld [vmem:[#allocation10 + $0x1a4] sm:$0xf0]  ;;  %v13830_v1 = vor.u32 %v15524_v32, %v13827_v47  ;;  %v13641_v32 = vld [vmem:[#allocation10 + $0x880] sm:$0xf] }
 0x50c   :  { %8461 = vmatpush.bf16.msra.mxu1 %v13518_v43  ;;  %8417 = vmatpush.bf16.msrb.mxu2 %v12990_v11  ;;  %v15302_v43 = vld [vmem:[#allocation10 + $0x30c] sm:$0xf]  ;;  %v12777_v11 = vld [vmem:[#allocation10 + $0x1c0] sm:$0xf]  ;;  %v16866_v56 = vpop.f32.mrf.mxu0 }
 0x50d   :  { %8448 = vmatmul.bf16.vlgmr.msra.gmra.mxu0 %v16765_v46 }
 0x50e   :  { %8496 = vmatpush.bf16.msrb.mxu0 %v12730_v34  ;;  %v12939_v34 = vld [vmem:[#allocation10 + $0x320] sm:$0xf0] }
 0x50f   :  { %8462 = vmatmul.bf16.vlgmr.msra.gmra.mxu1 %v16774_v40  ;;  %8374 = vmatpush.bf16.msra.mxu3 %v13970_v48  ;;  %v12942_v63 = vor.u32 %v15302_v43, %v12939_v34  ;;  %v12586_v48 = vor.u32 %v15216_v62, %v12585_v14  ;;  %v13497_v43 = vld [vmem:[#allocation10 + $0x760] sm:$0xf]  ;;  %v15444_v34 = vld [vmem:[#allocation10 + $0x774] sm:$0xf0]  ;;  %v13227_v14 = vld [vmem:[#allocation10 + $0x560] sm:$0xf0] }
 0x510   :  { %8510 = vmatpush.bf16.msrb.mxu1 %v12922_v26  ;;  %v13875_v26 = vld [vmem:[#allocation10 + $0xa70] sm:$0xf0]  ;;  %8418 = vmatpush.bf16.msrb.mxu2 %v12966_v4  ;;  %v12778_v4 = vor.u32 %v15264_v61, %v12777_v11  ;;  %v13782_v11 = vor.u32 %v15512_v13, %v13779_v42  ;;  %v13449_v61 = vld [vmem:[#allocation10 + $0x700] sm:$0xf]  ;;  %v15468_v42 = vld [vmem:[#allocation10 + $0x834] sm:$0xf0] }
 0x511   :  { %v13878_v7 = vor.u32 %v15536_v55, %v13875_v26  ;;  %v16871_v55 = vpop.f32.mrf.mxu2  ;;  %v15492_v26 = vld [vmem:[#allocation10 + $0x8f4] sm:$0xf0] }
 0x512   :  { %8497 = vmatpush.bf16.msrb.mxu0 %v12706_v24  ;;  %v15222_v24 = vld [vmem:[#allocation10 + $0x84] sm:$0xf0] }
 0x513   :  { %8375 = vmatpush.bf16.msra.mxu3 %v13946_v12  ;;  %v12610_v25 = vor.u32 %v15222_v24, %v12609_v33  ;;  %v13689_v12 = vld [vmem:[#allocation10 + $0x8e0] sm:$0xf]  ;;  %v13498_v33 = vor.u32 %v15444_v34, %v13497_v43  ;;  %v15380_v24 = vld [vmem:[#allocation10 + $0x57c] sm:$0xf]  ;;  %v13425_v34 = vld [vmem:[#allocation10 + $0x6d0] sm:$0xf] }
 0x514   :  { %8511 = vmatpush.bf16.msrb.mxu1 %v12898_v39  ;;  %v15270_v39 = vld [vmem:[#allocation10 + $0x204] sm:$0xf0]  ;;  %8419 = vmatpush.bf16.msrb.mxu2 %v12942_v63  ;;  %v12754_v63 = vor.u32 %v15258_v38, %v12753_v49  ;;  %v16874_v62 = vpop.f32.mrf.mxu0  ;;  %v15368_v49 = vld [vmem:[#allocation10 + $0x51c] sm:$0xf]  ;;  %v13203_v38 = vld [vmem:[#allocation10 + $0x530] sm:$0xf0] }
 0x515   :  { %v12802_v31 = vor.u32 %v15270_v39, %v12801_v23  ;;  %v13690_v23 = vor.u32 %v15492_v26, %v13689_v12  ;;  %v15426_v12 = vld [vmem:[#allocation10 + $0x6e4] sm:$0xf0]  ;;  %v13617_v26 = vld [vmem:[#allocation10 + $0x850] sm:$0xf] }
 0x516   :  { %8498 = vmatpush.bf16.msrb.mxu0 %v12682_v19  ;;  %v13299_v19 = vld [vmem:[#allocation10 + $0x5f0] sm:$0xf0] }
 0x517   :  { %8376 = vmatpush.bf16.msra.mxu3 %v13922_v3  ;;  %8420 = vmatmul.bf16.vlgmr.msrb.gmra.mxu2 %v16741_v28  ;;  %v13302_v9 = vor.u32 %v15392_v6, %v13299_v19  ;;  %v13473_v3 = vld [vmem:[#allocation10 + $0x730] sm:$0xf]  ;;  %v15374_v19 = vld [vmem:[#allocation10 + $0x54c] sm:$0xf] }
 0x518   :  { %8512 = vmatpush.bf16.msrb.mxu1 %v12874_v22  ;;  %8468 = vmatpush.bf16.msra.mxu2 %v13878_v7  ;;  %v13854_v22 = vor.u32 %v15530_v10, %v13851_v15  ;;  %v13251_v7 = vld [vmem:[#allocation10 + $0x590] sm:$0xf0]  ;;  %v15438_v10 = vld [vmem:[#allocation10 + $0x744] sm:$0xf0]  ;;  %v13665_v15 = vld [vmem:[#allocation10 + $0x8b0] sm:$0xf] }
 0x519   :  { %v13254_v6 = vor.u32 %v15380_v24, %v13251_v7  ;;  %v15362_v24 = vld [vmem:[#allocation10 + $0x4ec] sm:$0xf]  ;;  %v13179_v7 = vld [vmem:[#allocation10 + $0x500] sm:$0xf0] }
 0x51a   :  { %8499 = vmatpush.bf16.msrb.mxu0 %v12658_v18  ;;  %v15386_v18 = vld [vmem:[#allocation10 + $0x5ac] sm:$0xf] }
 0x51b   :  { %8377 = vmatpush.bf16.msra.mxu3 %v13898_v57  ;;  %v13278_v50 = vor.u32 %v15386_v18, %v13275_v53  ;;  %v15432_v57 = vld [vmem:[#allocation10 + $0x714] sm:$0xf0]  ;;  %v15506_v18 = vld [vmem:[#allocation10 + $0x96c] sm:$0xf]  ;;  %v13755_v53 = vld [vmem:[#allocation10 + $0x980] sm:$0xf0] }
 0x51c   :  { %8513 = vmatpush.bf16.msrb.mxu1 %v12850_v17  ;;  %v16869_v17 = vpop.f32.mrf.mxu1  ;;  %8469 = vmatpush.bf16.msra.mxu2 %v13854_v22  ;;  %v13758_v43 = vor.u32 %v15506_v18, %v13755_v53 }
 0x51e   :  { %8500 = vmatpush.bf16.msrb.mxu0 %v12634_v59  ;;  %v15518_v59 = vld [vmem:[#allocation10 + $0x9cc] sm:$0xf]  ;;  %8378 = vmatmul.bf16.vlgmr.msra.gmra.mxu3 %v16827_v30 }
 0x51f   :  { %8426 = vmatpush.bf16.msrb.mxu3 %v13302_v9  ;;  %v13806_v39 = vor.u32 %v15518_v59, %v13803_v60  ;;  %v8141_v9 = vpop.f32.mrf.mxu2  ;;  %v15474_v59 = vld [vmem:[#allocation10 + $0x864] sm:$0xf0]  ;;  %v15500_v60 = vld [vmem:[#allocation10 + $0x93c] sm:$0xf] }
 0x520   :  { %8514 = vmatpush.bf16.msrb.mxu1 %v12826_v51  ;;  %v12562_v51 = vor.u32 %v15210_v27, %v12561_v35  ;;  %8470 = vmatpush.bf16.msra.mxu2 %v13830_v1  ;;  %v16881_v35 = vadd.f32 %v8141_v9, %v16843_v5  ;;  %v13450_v27 = vor.u32 %v15432_v57, %v13449_v61  ;;  %v15348_v61 = vld [vmem:[#allocation10 + $0x474] sm:$0xf0]  ;;  %v13155_v9 = vld [vmem:[#allocation10 + $0x4d0] sm:$0xf0] }
 0x521   :  { %v13206_v5 = vor.u32 %v15368_v49, %v13203_v38  ;;  %v13569_v38 = vld [vmem:[#allocation10 + $0x7f0] sm:$0xf] }
 0x522   :  { %8501 = vmatpush.bf16.msrb.mxu0 %v12610_v25  ;;  %v15486_v25 = vld [vmem:[#allocation10 + $0x8c4] sm:$0xf0] }
 0x523   :  { %8427 = vmatpush.bf16.msrb.mxu3 %v13278_v50  ;;  %v13666_v22 = vor.u32 %v15486_v25, %v13665_v15  ;;  %v13731_v50 = vld [vmem:[#allocation10 + $0x950] sm:$0xf0]  ;;  %v13593_v15 = vld [vmem:[#allocation10 + $0x820] sm:$0xf] }
 0x524   :  { %8515 = vmatpush.bf16.msrb.mxu1 %v12802_v31  ;;  %v13474_v31 = vor.u32 %v15438_v10, %v13473_v3  ;;  %8471 = vmatpush.bf16.msra.mxu2 %v13806_v39  ;;  %v16876_v47 = vpop.f32.mrf.mxu1  ;;  %v13734_v39 = vor.u32 %v15500_v60, %v13731_v50  ;;  %v13401_v3 = vld [vmem:[#allocation10 + $0x6a0] sm:$0xf]  ;;  %v15420_v10 = vld [vmem:[#allocation10 + $0x6b4] sm:$0xf0]  ;;  %v13594_v18 = vor.u32 %v15468_v42, %v13593_v15  ;;  %v13131_v60 = vld [vmem:[#allocation10 + $0x4a0] sm:$0xf0] }
 0x525   :  { %v13402_v57 = vor.u32 %v15420_v10, %v13401_v3  ;;  %v15584_v50 = vld [vmem:[#allocation10 + $0xbdc] sm:$0xf]  ;;  %v15456_v3 = vld [vmem:[#allocation10 + $0x7d4] sm:$0xf0] }
 0x526   :  { %8502 = vmatpush.bf16.msrb.mxu0 %v12586_v48  ;;  %v15480_v48 = vld [vmem:[#allocation10 + $0x894] sm:$0xf0] }
 0x527   :  { %8428 = vmatpush.bf16.msrb.mxu3 %v13254_v6  ;;  %v13642_v1 = vor.u32 %v15480_v48, %v13641_v32  ;;  %v15494_v6 = vld [vmem:[#allocation10 + $0x90c] sm:$0xf]  ;;  %v15356_v32 = vld [vmem:[#allocation10 + $0x4bc] sm:$0xf]  ;;  %v15336_v42 = vld [vmem:[#allocation10 + $0x414] sm:$0xf0] }
 0x528   :  { %8516 = vmatpush.bf16.msrb.mxu1 %v12778_v4  ;;  %v13230_v4 = vor.u32 %v15374_v19, %v13227_v14  ;;  %8472 = vmatpush.bf16.msra.mxu2 %v13782_v11  ;;  %v16883_v14 = vpop.f32.mrf.mxu2  ;;  %v13113_v11 = vld [vmem:[#allocation10 + $0x460] sm:$0xf] }
 0x529   :  { %v13114_v49 = vor.u32 %v15348_v61, %v13113_v11  ;;  %v15578_v11 = vld [vmem:[#allocation10 + $0xbac] sm:$0xf]  ;;  %v14043_v61 = vld [vmem:[#allocation10 + $0xbc0] sm:$0xf0] }
 0x52a   :  { %8503 = vmatpush.bf16.msrb.mxu0 %v12562_v51  ;;  %v15784_v51 = vld [vmem:[#allocation14 + $0x10] sm:$0xff]  ;;  %v8281_v25 = vpop.f32.mrf.mxu0 }
 0x52b   :  { %8429 = vmatpush.bf16.msrb.mxu3 %v13230_v4  ;;  %v13377_v4 = vld [vmem:[#allocation10 + $0x670] sm:$0xf] }
 0x52c   :  { %8517 = vmatpush.bf16.msrb.mxu1 %v12754_v63  ;;  %v6124_v63 = vperm.slane %v15784_v51, 4  ;;  %8473 = vmatpush.bf16.msra.mxu2 %v13758_v43  ;;  %v8295_v13 = vpop.f32.mrf.mxu1  ;;  %v13158_v43 = vor.u32 %v15356_v32, %v13155_v9  ;;  %v15402_v9 = vld [vmem:[#allocation10 + $0x624] sm:$0xf0] }
 0x52d   :  { %8504 = vmatmul.bf16.vlgmr.msrb.gmra.mxu0 %v16737_v37 }
 0x52e   :  { %8552 = vmatpush.bf16.msra.mxu0 %v13498_v33  ;;  %v13426_v33 = vor.u32 %v15426_v12, %v13425_v34  ;;  %v8282_v19 = vadd.f32 %v8281_v25, %v6124_v63  ;;  %v13089_v34 = vld [vmem:[#allocation10 + $0x430] sm:$0xf]  ;;  %v15342_v12 = vld [vmem:[#allocation10 + $0x444] sm:$0xf0] }
 0x52f   :  { %8518 = vmatmul.bf16.vlgmr.msrb.gmra.mxu1 %v16739_v20  ;;  %8430 = vmatpush.bf16.msrb.mxu3 %v13206_v5  ;;  %v14067_v5 = vld [vmem:[#allocation10 + $0xbf0] sm:$0xf0] }
 0x530   :  { %8566 = vmatpush.bf16.msra.mxu1 %v13690_v23  ;;  %v13618_v23 = vor.u32 %v15474_v59, %v13617_v26  ;;  %v16885_v48 = vadd.f32 %v8295_v13, %v8282_v19  ;;  %8474 = vmatpush.bf16.msra.mxu2 %v13734_v39  ;;  %v15350_v59 = vld [vmem:[#allocation10 + $0x48c] sm:$0xf]  ;;  %v13545_v39 = vld [vmem:[#allocation10 + $0x7c0] sm:$0xf]  ;;  %v8197_v15 = vpop.f32.mrf.mxu2  ;;  %v14070_v19 = vor.u32 %v15584_v50, %v14067_v5  ;;  %v14019_v50 = vld [vmem:[#allocation10 + $0xb90] sm:$0xf0] }
 0x531   :  { %v13134_v25 = vor.u32 %v15350_v59, %v13131_v60  ;;  %v13065_v13 = vld [vmem:[#allocation10 + $0x400] sm:$0xf]  ;;  %v15572_v60 = vld [vmem:[#allocation10 + $0xb7c] sm:$0xf] }
 0x532   :  { %8553 = vmatpush.bf16.msra.mxu0 %v13474_v31  ;;  %v13707_v31 = vld [vmem:[#allocation10 + $0x920] sm:$0xf0] }
 0x533   :  { %v13710_v53 = vor.u32 %v15494_v6, %v13707_v31  ;;  %v16888_v31 = vadd.f32 %v8197_v15, %v16856_v29  ;;  %v12731_v29 = vld [vmem:[#allocation10 + $0x178] sm:$0xf0] }
 0x534   :  { %8567 = vmatpush.bf16.msra.mxu1 %v13666_v22  ;;  %v13182_v22 = vor.u32 %v15362_v24, %v13179_v7  ;;  %v15408_v24 = vld [vmem:[#allocation10 + $0x654] sm:$0xf0]  ;;  %v8283_v7 = vpop.f32.mrf.mxu0  ;;  %v8297_v6 = vpop.f32.mrf.mxu1 }
 0x535   :  { %8475 = vmatpush.bf16.msra.mxu2 %v13710_v53  ;;  %v8284_v10 = vadd.f32 %v8283_v7, %v6124_v63  ;;  %v13546_v63 = vor.u32 %v15456_v3, %v13545_v39  ;;  %v15450_v53 = vld [vmem:[#allocation10 + $0x7a4] sm:$0xf0]  ;;  %v15291_v7 = vld [vmem:[#allocation10 + $0x2b4] sm:$0xf]  ;;  %v13017_v39 = vld [vmem:[#allocation10 + $0x3a0] sm:$0xf] }
 0x536   :  { %8554 = vmatpush.bf16.msra.mxu0 %v13450_v27  ;;  %v15414_v27 = vld [vmem:[#allocation10 + $0x684] sm:$0xf0]  ;;  %8431 = vmatpush.bf16.msrb.mxu3 %v13182_v22  ;;  %v15324_v3 = vld [vmem:[#allocation10 + $0x3b4] sm:$0xf0] }
 0x537   :  { %v13378_v26 = vor.u32 %v15414_v27, %v13377_v4  ;;  %v16891_v32 = vadd.f32 %v8297_v6, %v8284_v10  ;;  %v13066_v4 = vor.u32 %v15336_v42, %v13065_v13  ;;  %v15249_v27 = vld [vmem:[#allocation10 + $0x164] sm:$0xf]  ;;  %v14022_v10 = vor.u32 %v15572_v60, %v14019_v50  ;;  %v16894_v42 = vpop.f32.mrf.mxu3 }
 0x538   :  { %8568 = vmatpush.bf16.msra.mxu1 %v13642_v1  ;;  %v15462_v1 = vld [vmem:[#allocation10 + $0x804] sm:$0xf0]  ;;  %8476 = vmatmul.bf16.vlgmr.msra.gmra.mxu2 %v16799_v16  ;;  %v12734_v59 = vor.u32 %v15249_v27, %v12731_v29  ;;  %v13995_v13 = vld [vmem:[#allocation10 + $0xb60] sm:$0xf0]  ;;  %v13971_v27 = vld [vmem:[#allocation10 + $0xb30] sm:$0xf0] }
 0x539   :  { %v13570_v51 = vor.u32 %v15462_v1, %v13569_v38  ;;  %8524 = vmatpush.bf16.msrb.mxu2 %v13114_v49  ;;  %v15297_v49 = vld [vmem:[#allocation10 + $0x2e4] sm:$0xf]  ;;  %v12923_v38 = vld [vmem:[#allocation10 + $0x2f8] sm:$0xf0]  ;;  %v13041_v1 = vld [vmem:[#allocation10 + $0x3d0] sm:$0xf] }
 0x53a   :  { %8555 = vmatpush.bf16.msra.mxu0 %v13426_v33  ;;  %v13353_v33 = vld [vmem:[#allocation10 + $0x640] sm:$0xf]  ;;  %8432 = vmatpush.bf16.msrb.mxu3 %v13158_v43  ;;  %v15330_v43 = vld [vmem:[#allocation10 + $0x3e4] sm:$0xf0] }
 0x53b   :  { %v13354_v22 = vor.u32 %v15408_v24, %v13353_v33  ;;  %v13042_v5 = vor.u32 %v15330_v43, %v13041_v1  ;;  %v15243_v33 = vld [vmem:[#allocation10 + $0x134] sm:$0xf]  ;;  %v12707_v24 = vld [vmem:[#allocation10 + $0x148] sm:$0xf0] }
 0x53c   :  { %8569 = vmatpush.bf16.msra.mxu1 %v13618_v23  ;;  %v13090_v23 = vor.u32 %v15342_v12, %v13089_v34  ;;  %v14046_v34 = vor.u32 %v15578_v11, %v14043_v61  ;;  %v12710_v15 = vor.u32 %v15243_v33, %v12707_v24  ;;  %v12683_v11 = vld [vmem:[#allocation10 + $0x118] sm:$0xf0]  ;;  %v15285_v61 = vld [vmem:[#allocation10 + $0x284] sm:$0xf]  ;;  %v12659_v1 = vld [vmem:[#allocation10 + $0xe8] sm:$0xf0] }
 0x53d   :  { %v15279_v43 = vld [vmem:[#allocation10 + $0x254] sm:$0xf] }
 0x53e   :  { %8556 = vmatpush.bf16.msra.mxu0 %v13402_v57  ;;  %v13329_v57 = vld [vmem:[#allocation10 + $0x610] sm:$0xf]  ;;  %8525 = vmatpush.bf16.msrb.mxu2 %v13090_v23  ;;  %v12899_v23 = vld [vmem:[#allocation10 + $0x2c8] sm:$0xf0] }
 0x53f   :  { %8433 = vmatpush.bf16.msrb.mxu3 %v13134_v25  ;;  %v13330_v12 = vor.u32 %v15402_v9, %v13329_v57  ;;  %v15566_v25 = vld [vmem:[#allocation10 + $0xb4c] sm:$0xf]  ;;  %v12902_v6 = vor.u32 %v15291_v7, %v12899_v23  ;;  %v12875_v57 = vld [vmem:[#allocation10 + $0x298] sm:$0xf0]  ;;  %v15318_v9 = vld [vmem:[#allocation10 + $0x384] sm:$0xf0] }
 0x540   :  { %8570 = vmatpush.bf16.msra.mxu1 %v13594_v18  ;;  %v13521_v18 = vld [vmem:[#allocation10 + $0x790] sm:$0xf]  ;;  %v12878_v29 = vor.u32 %v15285_v61, %v12875_v57  ;;  %v15225_v23 = vld [vmem:[#allocation10 + $0xa4] sm:$0xf]  ;;  %v15548_v61 = vld [vmem:[#allocation10 + $0xabc] sm:$0xf] }
 0x541   :  { %v8155_v33 = vpop.f32.mrf.mxu3  ;;  %v13923_v57 = vld [vmem:[#allocation10 + $0xad0] sm:$0xf0] }
 0x542   :  { %8557 = vmatpush.bf16.msra.mxu0 %v13378_v26  ;;  %v13522_v26 = vor.u32 %v15450_v53, %v13521_v18  ;;  %8434 = vmatmul.bf16.vlgmr.msrb.gmra.mxu3 %v16743_v45  ;;  %v13998_v18 = vor.u32 %v15566_v25, %v13995_v13  ;;  %v12945_v25 = vld [vmem:[#allocation10 + $0x310] sm:$0xf]  ;;  %v15306_v13 = vld [vmem:[#allocation10 + $0x324] sm:$0xf0] }
 0x543   :  { %8482 = vmatpush.bf16.msra.mxu3 %v14070_v19  ;;  %8526 = vmatpush.bf16.msrb.mxu2 %v13066_v4  ;;  %v13018_v19 = vor.u32 %v15324_v3, %v13017_v39  ;;  %v15560_v4 = vld [vmem:[#allocation10 + $0xb1c] sm:$0xf]  ;;  %v15273_v3 = vld [vmem:[#allocation10 + $0x224] sm:$0xf] }
 0x544   :  { %8571 = vmatpush.bf16.msra.mxu1 %v13570_v51  ;;  %v12926_v51 = vor.u32 %v15297_v49, %v12923_v38  ;;  %v15231_v38 = vld [vmem:[#allocation10 + $0xd4] sm:$0xf]  ;;  %v13974_v60 = vor.u32 %v15560_v4, %v13971_v27  ;;  %v12635_v39 = vld [vmem:[#allocation10 + $0xb8] sm:$0xf0]  ;;  %v12803_v27 = vld [vmem:[#allocation10 + $0x208] sm:$0xf0] }
 0x545   :  { %v12662_v50 = vor.u32 %v15231_v38, %v12659_v1  ;;  %v15534_v38 = vld [vmem:[#allocation10 + $0xa44] sm:$0xf0] }
 0x546   :  { %8558 = vmatpush.bf16.msra.mxu0 %v13354_v22  ;;  %v15237_v22 = vld [vmem:[#allocation10 + $0x104] sm:$0xf] }
 0x547   :  { %8483 = vmatpush.bf16.msra.mxu3 %v14046_v34  ;;  %8527 = vmatpush.bf16.msrb.mxu2 %v13042_v5  ;;  %v12686_v53 = vor.u32 %v15237_v22, %v12683_v11  ;;  %v12851_v34 = vld [vmem:[#allocation10 + $0x268] sm:$0xf0]  ;;  %v13947_v5 = vld [vmem:[#allocation10 + $0xb00] sm:$0xf0]  ;;  %v15540_v22 = vld [vmem:[#allocation10 + $0xa74] sm:$0xf0]  ;;  %v12638_v11 = vor.u32 %v15225_v23, %v12635_v39 }
 0x548   :  { %8572 = vmatpush.bf16.msra.mxu1 %v13546_v63  ;;  %v12993_v63 = vld [vmem:[#allocation10 + $0x370] sm:$0xf]  ;;  %v12854_v24 = vor.u32 %v15279_v43, %v12851_v34  ;;  %v15542_v43 = vld [vmem:[#allocation10 + $0xa8c] sm:$0xf]  ;;  %v13899_v34 = vld [vmem:[#allocation10 + $0xaa0] sm:$0xf0] }
 0x549   :  { %v12994_v49 = vor.u32 %v15318_v9, %v12993_v63  ;;  %v12946_v9 = vor.u32 %v15306_v13, %v12945_v25  ;;  %v12779_v23 = vld [vmem:[#allocation10 + $0x1d8] sm:$0xf0]  ;;  %v13902_v39 = vor.u32 %v15542_v43, %v13899_v34 }
 0x54a   :  { %8559 = vmatpush.bf16.msra.mxu0 %v13330_v12  ;;  %v12969_v12 = vld [vmem:[#allocation10 + $0x340] sm:$0xf] }
 0x54b   :  { %8484 = vmatpush.bf16.msra.mxu3 %v14022_v10  ;;  %8528 = vmatpush.bf16.msrb.mxu2 %v13018_v19  ;;  %v16901_v10 = vadd.f32 %v8155_v33, %v16881_v35  ;;  %v13881_v19 = vld [vmem:[#allocation10 + $0xa60] sm:$0xf]  ;;  %v15267_v35 = vld [vmem:[#allocation10 + $0x1f4] sm:$0xf]  ;;  %v12587_v33 = vld [vmem:[#allocation10 + $0x58] sm:$0xf0] }
 0x54c   :  { %8573 = vmatpush.bf16.msra.mxu1 %v13522_v26  ;;  %v15312_v26 = vld [vmem:[#allocation10 + $0x354] sm:$0xf0]  ;;  %v13882_v4 = vor.u32 %v15540_v22, %v13881_v19  ;;  %v15390_v19 = vld [vmem:[#allocation10 + $0x5c4] sm:$0xf0]  ;;  %v15207_v22 = vld [vmem:[#allocation10 + $0x14] sm:$0xf] }
 0x54d   :  { %8560 = vmatmul.bf16.vlgmr.msra.gmra.mxu0 %v16765_v46  ;;  %v12970_v7 = vor.u32 %v15312_v26, %v12969_v12  ;;  %v13305_v12 = vld [vmem:[#allocation10 + $0x5e0] sm:$0xf] }
 0x54e   :  { %8608 = vmatpush.bf16.msrb.mxu0 %v12734_v59  ;;  %v16898_v59 = vpop.f32.mrf.mxu2 }
 0x54f   :  { %8574 = vmatmul.bf16.vlgmr.msra.gmra.mxu1 %v16774_v40  ;;  %8485 = vmatpush.bf16.msra.mxu3 %v13998_v18  ;;  %v15219_v18 = vld [vmem:[#allocation10 + $0x74] sm:$0xf] }
 0x550   :  { %8622 = vmatpush.bf16.msrb.mxu1 %v12926_v51  ;;  %v15554_v51 = vld [vmem:[#allocation10 + $0xaec] sm:$0xf]  ;;  %8529 = vmatpush.bf16.msrb.mxu2 %v12994_v49  ;;  %v13857_v49 = vld [vmem:[#allocation10 + $0xa30] sm:$0xf] }
 0x552   :  { %8609 = vmatpush.bf16.msrb.mxu0 %v12710_v15  ;;  %v12827_v15 = vld [vmem:[#allocation10 + $0x238] sm:$0xf0] }
 0x553   :  { %8486 = vmatpush.bf16.msra.mxu3 %v13974_v60  ;;  %v12830_v63 = vor.u32 %v15273_v3, %v12827_v15  ;;  %v16905_v60 = vpop.f32.mrf.mxu3  ;;  %v13833_v3 = vld [vmem:[#allocation10 + $0xa00] sm:$0xf]  ;;  %v15528_v15 = vld [vmem:[#allocation10 + $0xa14] sm:$0xf0] }
 0x554   :  { %8623 = vmatpush.bf16.msrb.mxu1 %v12902_v6  ;;  %v13950_v6 = vor.u32 %v15554_v51, %v13947_v5  ;;  %8530 = vmatpush.bf16.msrb.mxu2 %v12970_v7  ;;  %v15396_v51 = vld [vmem:[#allocation10 + $0x5f4] sm:$0xf0]  ;;  %v15213_v5 = vld [vmem:[#allocation10 + $0x44] sm:$0xf] }
 0x555   :  { %v15261_v7 = vld [vmem:[#allocation10 + $0x1c4] sm:$0xf]  ;;  %v13306_v25 = vor.u32 %v15396_v51, %v13305_v12  ;;  %v12590_v13 = vor.u32 %v15213_v5, %v12587_v33  ;;  %v13257_v51 = vld [vmem:[#allocation10 + $0x580] sm:$0xf]  ;;  %v15384_v5 = vld [vmem:[#allocation10 + $0x594] sm:$0xf0] }
 0x556   :  { %8610 = vmatpush.bf16.msrb.mxu0 %v12686_v53  ;;  %v12611_v53 = vld [vmem:[#allocation10 + $0x88] sm:$0xf0]  ;;  %v16903_v26 = vpop.f32.mrf.mxu2 }
 0x557   :  { %8487 = vmatpush.bf16.msra.mxu3 %v13950_v6  ;;  %v12614_v1 = vor.u32 %v15219_v18, %v12611_v53  ;;  %v13281_v6 = vld [vmem:[#allocation10 + $0x5b0] sm:$0xf]  ;;  %v13834_v18 = vor.u32 %v15528_v15, %v13833_v3  ;;  %v15441_v53 = vld [vmem:[#allocation10 + $0x764] sm:$0xf]  ;;  %v15483_v3 = vld [vmem:[#allocation10 + $0x8b4] sm:$0xf] }
 0x558   :  { %8624 = vmatpush.bf16.msrb.mxu1 %v12878_v29  ;;  %v13926_v29 = vor.u32 %v15548_v61, %v13923_v57  ;;  %8531 = vmatpush.bf16.msrb.mxu2 %v12946_v9  ;;  %v12563_v61 = vld [vmem:[#allocation10 + $0x28] sm:$0xf0]  ;;  %v15255_v57 = vld [vmem:[#allocation10 + $0x194] sm:$0xf]  ;;  %v16908_v9 = vpop.f32.mrf.mxu0 }
 0x559   :  { %v12566_v43 = vor.u32 %v15207_v22, %v12563_v61  ;;  %v13258_v22 = vor.u32 %v15384_v5, %v13257_v51  ;;  %v13233_v61 = vld [vmem:[#allocation10 + $0x550] sm:$0xf]  ;;  %v15423_v5 = vld [vmem:[#allocation10 + $0x6d4] sm:$0xf] }
 0x55a   :  { %8611 = vmatpush.bf16.msrb.mxu0 %v12662_v50  ;;  %v12806_v50 = vor.u32 %v15267_v35, %v12803_v27  ;;  %v15489_v35 = vld [vmem:[#allocation10 + $0x8e4] sm:$0xf]  ;;  %v16910_v27 = vpop.f32.mrf.mxu1 }
 0x55b   :  { %8488 = vmatpush.bf16.msra.mxu3 %v13926_v29  ;;  %8532 = vmatmul.bf16.vlgmr.msrb.gmra.mxu2 %v16741_v28  ;;  %v13691_v29 = vld [vmem:[#allocation10 + $0x8f8] sm:$0xf0]  ;;  %v8211_v34 = vpop.f32.mrf.mxu3 }
 0x55c   :  { %8625 = vmatpush.bf16.msrb.mxu1 %v12854_v24  ;;  %8580 = vmatpush.bf16.msra.mxu2 %v13882_v4  ;;  %v13858_v24 = vor.u32 %v15534_v38, %v13857_v49  ;;  %v13499_v4 = vld [vmem:[#allocation10 + $0x778] sm:$0xf0]  ;;  %v13809_v49 = vld [vmem:[#allocation10 + $0x9d0] sm:$0xf]  ;;  %v15522_v38 = vld [vmem:[#allocation10 + $0x9e4] sm:$0xf0]  ;;  %v8212_v33 = vadd.f32 %v8211_v34, %v16888_v31  ;;  %v8172_v31 = vadd.f32 %v16862_v44, %v6123_v52 }
 0x55e   :  { %8612 = vmatpush.bf16.msrb.mxu0 %v12638_v11  ;;  %v12782_v11 = vor.u32 %v15261_v7, %v12779_v23  ;;  %v13810_v7 = vor.u32 %v15522_v38, %v13809_v49  ;;  %v15435_v23 = vld [vmem:[#allocation10 + $0x734] sm:$0xf]  ;;  %v16914_v15 = vpop.f32.mrf.mxu2  ;;  %v15510_v49 = vld [vmem:[#allocation10 + $0x984] sm:$0xf0]  ;;  %v8186_v52 = vadd.f32 %v16864_v58, %v8172_v31 }
 0x55f   :  { %8489 = vmatpush.bf16.msra.mxu3 %v13902_v39  ;;  %v13475_v39 = vld [vmem:[#allocation10 + $0x748] sm:$0xf0]  ;;  %v13762_v51 = vor.u32 %v15510_v49, %v13761_v8  ;;  %v13115_v8 = vld [vmem:[#allocation10 + $0x478] sm:$0xf0] }
 0x560   :  { %8626 = vmatpush.bf16.msrb.mxu1 %v12830_v63  ;;  %v12755_v63 = vld [vmem:[#allocation10 + $0x1a8] sm:$0xf0]  ;;  %8581 = vmatpush.bf16.msra.mxu2 %v13858_v24  ;;  %v13694_v24 = vor.u32 %v15489_v35, %v13691_v29  ;;  %v15477_v35 = vld [vmem:[#allocation10 + $0x884] sm:$0xf]  ;;  %v13643_v29 = vld [vmem:[#allocation10 + $0x898] sm:$0xf0]  ;;  %v16923_v44 = vpop.f32.mrf.mxu0 }
 0x561   :  { %v12758_v12 = vor.u32 %v15255_v57, %v12755_v63  ;;  %v15378_v57 = vld [vmem:[#allocation10 + $0x564] sm:$0xf0]  ;;  %v13646_v58 = vor.u32 %v15477_v35, %v13643_v29  ;;  %v15345_v29 = vld [vmem:[#allocation10 + $0x464] sm:$0xf] }
 0x562   :  { %8613 = vmatpush.bf16.msrb.mxu0 %v12614_v1  ;;  %v13282_v1 = vor.u32 %v15390_v19, %v13281_v6  ;;  %8490 = vmatmul.bf16.vlgmr.msra.gmra.mxu3 %v16827_v30  ;;  %v15516_v6 = vld [vmem:[#allocation10 + $0x9b4] sm:$0xf0]  ;;  %v8226_v19 = vadd.f32 %v16866_v56, %v8212_v33  ;;  %v13234_v38 = vor.u32 %v15378_v57, %v13233_v61  ;;  %v13427_v33 = vld [vmem:[#allocation10 + $0x6e8] sm:$0xf0]  ;;  %v15417_v61 = vld [vmem:[#allocation10 + $0x6a4] sm:$0xf] }
 0x563   :  { %8538 = vmatpush.bf16.msrb.mxu3 %v13306_v25  ;;  %v13667_v25 = vld [vmem:[#allocation10 + $0x8c8] sm:$0xf0]  ;;  %v8213_v34 = vpop.f32.mrf.mxu3  ;;  %v13403_v57 = vld [vmem:[#allocation10 + $0x6b8] sm:$0xf0] }
 0x564   :  { %8627 = vmatpush.bf16.msrb.mxu1 %v12806_v50  ;;  %v13502_v50 = vor.u32 %v15441_v53, %v13499_v4  ;;  %8582 = vmatpush.bf16.msra.mxu2 %v13834_v18  ;;  %v13670_v63 = vor.u32 %v15483_v3, %v13667_v25  ;;  %v15429_v53 = vld [vmem:[#allocation10 + $0x704] sm:$0xf]  ;;  %v13451_v4 = vld [vmem:[#allocation10 + $0x718] sm:$0xf0]  ;;  %v8240_v56 = vadd.f32 %v16869_v17, %v8226_v19  ;;  %v13185_v19 = vld [vmem:[#allocation10 + $0x4f0] sm:$0xf] }
 0x565   :  { %v13454_v17 = vor.u32 %v15429_v53, %v13451_v4  ;;  %v15498_v53 = vld [vmem:[#allocation10 + $0x924] sm:$0xf0] }
 0x566   :  { %8614 = vmatpush.bf16.msrb.mxu0 %v12590_v13  ;;  %v13785_v13 = vld [vmem:[#allocation10 + $0x9a0] sm:$0xf] }
 0x567   :  { %8539 = vmatpush.bf16.msrb.mxu3 %v13282_v1  ;;  %v13786_v18 = vor.u32 %v15516_v6, %v13785_v13  ;;  %v8254_v1 = vadd.f32 %v16903_v26, %v8240_v56  ;;  %v15504_v26 = vld [vmem:[#allocation10 + $0x954] sm:$0xf0]  ;;  %v13430_v6 = vor.u32 %v15423_v5, %v13427_v33 }
 0x568   :  { %8628 = vmatpush.bf16.msrb.mxu1 %v12782_v11  ;;  %v13478_v11 = vor.u32 %v15435_v23, %v13475_v39  ;;  %8583 = vmatpush.bf16.msra.mxu2 %v13810_v7  ;;  %v13619_v7 = vld [vmem:[#allocation10 + $0x868] sm:$0xf0]  ;;  %v13737_v23 = vld [vmem:[#allocation10 + $0x940] sm:$0xf]  ;;  %v16933_v13 = vld [vmem:[#allocation14 + $0x18] sm:$0xff] }
 0x56a   :  { %8615 = vmatpush.bf16.msrb.mxu0 %v12566_v43  ;;  %v16927_v43 = vpop.f32.mrf.mxu1  ;;  %v8393_v35 = vpop.f32.mrf.mxu0 }
 0x56b   :  { %8540 = vmatpush.bf16.msrb.mxu3 %v13258_v22  ;;  %v15366_v22 = vld [vmem:[#allocation10 + $0x504] sm:$0xf0] }
 0x56c   :  { %8629 = vmatpush.bf16.msrb.mxu1 %v12758_v12  ;;  %v13209_v12 = vld [vmem:[#allocation10 + $0x520] sm:$0xf]  ;;  %8584 = vmatpush.bf16.msra.mxu2 %v13786_v18  ;;  %v13595_v18 = vld [vmem:[#allocation10 + $0x838] sm:$0xf0]  ;;  %v13186_v56 = vor.u32 %v15366_v22, %v13185_v19  ;;  %v13137_v19 = vld [vmem:[#allocation10 + $0x490] sm:$0xf] }
 0x56d   :  { %8616 = vmatmul.bf16.vlgmr.msrb.gmra.mxu0 %v16737_v37  ;;  %v15372_v37 = vld [vmem:[#allocation10 + $0x534] sm:$0xf0]  ;;  %v15354_v22 = vld [vmem:[#allocation10 + $0x4a4] sm:$0xf0] }
 0x56e   :  { %8664 = vmatpush.bf16.msra.mxu0 %v13502_v50  ;;  %v8200_v50 = vadd.f32 %v16898_v59, %v8186_v52  ;;  %v13210_v25 = vor.u32 %v15372_v37, %v13209_v12  ;;  %v6125_v59 = vperm.slane %v16933_v13, 4  ;;  %v15360_v12 = vld [vmem:[#allocation10 + $0x4d4] sm:$0xf0] }
 0x56f   :  { %8630 = vmatmul.bf16.vlgmr.msrb.gmra.mxu1 %v16739_v20  ;;  %v15471_v20 = vld [vmem:[#allocation10 + $0x854] sm:$0xf]  ;;  %8541 = vmatpush.bf16.msrb.mxu3 %v13234_v38  ;;  %v8267_v38 = vpop.f32.mrf.mxu3 }
 0x570   :  { %8678 = vmatpush.bf16.msra.mxu1 %v13694_v24  ;;  %v8309_v24 = vpop.f32.mrf.mxu2  ;;  %v8214_v39 = vadd.f32 %v8213_v34, %v8200_v50  ;;  %8585 = vmatpush.bf16.msra.mxu2 %v13762_v51  ;;  %v13622_v31 = vor.u32 %v15471_v20, %v13619_v7  ;;  %v8394_v49 = vadd.f32 %v8393_v35, %v6125_v59  ;;  %v13379_v51 = vld [vmem:[#allocation10 + $0x688] sm:$0xf0]  ;;  %v15333_v35 = vld [vmem:[#allocation10 + $0x404] sm:$0xf] }
 0x571   :  { %v16931_v3 = vadd.f32 %v8309_v24, %v16885_v48  ;;  %v13713_v48 = vld [vmem:[#allocation10 + $0x910] sm:$0xf]  ;;  %v13406_v34 = vor.u32 %v15417_v61, %v13403_v57  ;;  %v16939_v37 = vadd.f32 %v8267_v38, %v8254_v1  ;;  %v13118_v20 = vor.u32 %v15345_v29, %v13115_v8  ;;  %v15459_v24 = vld [vmem:[#allocation10 + $0x7f4] sm:$0xf]  ;;  %v13571_v7 = vld [vmem:[#allocation10 + $0x808] sm:$0xf0] }
 0x572   :  { %8665 = vmatpush.bf16.msra.mxu0 %v13478_v11  ;;  %v13738_v11 = vor.u32 %v15504_v26, %v13737_v23  ;;  %v8228_v4 = vadd.f32 %v16874_v62, %v8214_v39  ;;  %v8407_v52 = vpop.f32.mrf.mxu1  ;;  %v13714_v62 = vor.u32 %v15498_v53, %v13713_v48  ;;  %v15339_v1 = vld [vmem:[#allocation10 + $0x434] sm:$0xf]  ;;  %v15588_v61 = vld [vmem:[#allocation10 + $0xbf4] sm:$0xf0]  ;;  %v15405_v57 = vld [vmem:[#allocation10 + $0x644] sm:$0xf]  ;;  %v8395_v53 = vpop.f32.mrf.mxu0 }
 0x573   :  { %8542 = vmatpush.bf16.msrb.mxu3 %v13210_v25  ;;  %v16941_v5 = vadd.f32 %v8407_v52, %v8394_v49  ;;  %v13091_v25 = vld [vmem:[#allocation10 + $0x448] sm:$0xf0]  ;;  %v13547_v48 = vld [vmem:[#allocation10 + $0x7d8] sm:$0xf0]  ;;  %v8396_v29 = vadd.f32 %v8395_v53, %v6125_v59  ;;  %v14049_v38 = vld [vmem:[#allocation10 + $0xbb0] sm:$0xf] }
 0x574   :  { %8679 = vmatpush.bf16.msra.mxu1 %v13670_v63  ;;  %v15465_v63 = vld [vmem:[#allocation10 + $0x824] sm:$0xf]  ;;  %8586 = vmatpush.bf16.msra.mxu2 %v13738_v11  ;;  %v8242_v39 = vadd.f32 %v16876_v47, %v8228_v4  ;;  %v13574_v11 = vor.u32 %v15459_v24, %v13571_v7  ;;  %v13138_v4 = vor.u32 %v15354_v22, %v13137_v19  ;;  %v15447_v59 = vld [vmem:[#allocation10 + $0x794] sm:$0xf]  ;;  %v13019_v19 = vld [vmem:[#allocation10 + $0x3b8] sm:$0xf0] }
 0x575   :  { %v13598_v50 = vor.u32 %v15465_v63, %v13595_v18  ;;  %v13355_v63 = vld [vmem:[#allocation10 + $0x658] sm:$0xf0]  ;;  %v15453_v18 = vld [vmem:[#allocation10 + $0x7c4] sm:$0xf] }
 0x576   :  { %8666 = vmatpush.bf16.msra.mxu0 %v13454_v17  ;;  %v13161_v17 = vld [vmem:[#allocation10 + $0x4c0] sm:$0xf]  ;;  %v8256_v47 = vadd.f32 %v16914_v15, %v8242_v39  ;;  %v13358_v52 = vor.u32 %v15405_v57, %v13355_v63  ;;  %v15399_v15 = vld [vmem:[#allocation10 + $0x614] sm:$0xf]  ;;  %v12995_v63 = vld [vmem:[#allocation10 + $0x388] sm:$0xf0] }
 0x577   :  { %8543 = vmatpush.bf16.msrb.mxu3 %v13186_v56  ;;  %v13162_v26 = vor.u32 %v15360_v12, %v13161_v17  ;;  %v13067_v56 = vld [vmem:[#allocation10 + $0x418] sm:$0xf0]  ;;  %v8269_v8 = vpop.f32.mrf.mxu3  ;;  %v13550_v12 = vor.u32 %v15453_v18, %v13547_v48  ;;  %v14025_v39 = vld [vmem:[#allocation10 + $0xb80] sm:$0xf]  ;;  %v15315_v57 = vld [vmem:[#allocation10 + $0x374] sm:$0xf] }
 0x578   :  { %8680 = vmatpush.bf16.msra.mxu1 %v13646_v58  ;;  %v15411_v58 = vld [vmem:[#allocation10 + $0x674] sm:$0xf]  ;;  %v8311_v33 = vpop.f32.mrf.mxu2  ;;  %8587 = vmatpush.bf16.msra.mxu2 %v13714_v62  ;;  %v16951_v17 = vadd.f32 %v8269_v8, %v8256_v47  ;;  %v13331_v62 = vld [vmem:[#allocation10 + $0x628] sm:$0xf0]  ;;  %v13070_v13 = vor.u32 %v15333_v35, %v13067_v56  ;;  %v13977_v18 = vld [vmem:[#allocation10 + $0xb20] sm:$0xf]  ;;  %v12998_v53 = vor.u32 %v15315_v57, %v12995_v63 }
 0x579   :  { %v16944_v23 = vadd.f32 %v8311_v33, %v16891_v32  ;;  %v13094_v32 = vor.u32 %v15339_v1, %v13091_v25  ;;  %v15327_v33 = vld [vmem:[#allocation10 + $0x3d4] sm:$0xf]  ;;  %v13334_v7 = vor.u32 %v15399_v15, %v13331_v62  ;;  %v15576_v1 = vld [vmem:[#allocation10 + $0xb94] sm:$0xf0]  ;;  %v15309_v47 = vld [vmem:[#allocation10 + $0x344] sm:$0xf] }
 0x57a   :  { %8667 = vmatpush.bf16.msra.mxu0 %v13430_v6  ;;  %v13382_v6 = vor.u32 %v15411_v58, %v13379_v51  ;;  %v13523_v51 = vld [vmem:[#allocation10 + $0x7a8] sm:$0xf0]  ;;  %v14026_v22 = vor.u32 %v15576_v1, %v14025_v39  ;;  %v15564_v48 = vld [vmem:[#allocation10 + $0xb34] sm:$0xf0]  ;;  %v13953_v56 = vld [vmem:[#allocation10 + $0xaf0] sm:$0xf] }
 0x57b   :  { %8544 = vmatpush.bf16.msrb.mxu3 %v13162_v26  ;;  %8588 = vmatmul.bf16.vlgmr.msra.gmra.mxu2 %v16799_v16  ;;  %v13526_v26 = vor.u32 %v15447_v59, %v13523_v51  ;;  %v13978_v35 = vor.u32 %v15564_v48, %v13977_v18  ;;  %v15393_v39 = vld [vmem:[#allocation10 + $0x5e4] sm:$0xf]  ;;  %v13307_v1 = vld [vmem:[#allocation10 + $0x5f8] sm:$0xf0]  ;;  %v15387_v57 = vld [vmem:[#allocation10 + $0x5b4] sm:$0xf] }
 0x57c   :  { %8681 = vmatpush.bf16.msra.mxu1 %v13622_v31  ;;  %v14073_v31 = vld [vmem:[#allocation10 + $0xbe0] sm:$0xf]  ;;  %8636 = vmatpush.bf16.msrb.mxu2 %v13118_v20  ;;  %v13043_v20 = vld [vmem:[#allocation10 + $0x3e8] sm:$0xf0] }
 0x57d   :  { %v14074_v49 = vor.u32 %v15588_v61, %v14073_v31  ;;  %v13046_v25 = vor.u32 %v15327_v33, %v13043_v20  ;;  %v14001_v31 = vld [vmem:[#allocation10 + $0xb50] sm:$0xf]  ;;  %v15531_v33 = vld [vmem:[#allocation10 + $0xa34] sm:$0xf]  ;;  %v13859_v20 = vld [vmem:[#allocation10 + $0xa48] sm:$0xf0] }
 0x57e   :  { %8668 = vmatpush.bf16.msra.mxu0 %v13406_v34  ;;  %v8409_v34 = vpop.f32.mrf.mxu1  ;;  %v13283_v63 = vld [vmem:[#allocation10 + $0x5c8] sm:$0xf0] }
 0x57f   :  { %v16953_v58 = vadd.f32 %v8409_v34, %v8396_v29  ;;  %8545 = vmatpush.bf16.msrb.mxu3 %v13138_v4  ;;  %v12971_v4 = vld [vmem:[#allocation10 + $0x358] sm:$0xf0]  ;;  %v15558_v29 = vld [vmem:[#allocation10 + $0xb04] sm:$0xf0]  ;;  %v13811_v48 = vld [vmem:[#allocation10 + $0x9e8] sm:$0xf0] }
 0x580   :  { %8682 = vmatpush.bf16.msra.mxu1 %v13598_v50  ;;  %v15582_v50 = vld [vmem:[#allocation10 + $0xbc4] sm:$0xf0]  ;;  %8637 = vmatpush.bf16.msrb.mxu2 %v13094_v32  ;;  %v12974_v8 = vor.u32 %v15309_v47, %v12971_v4  ;;  %v15381_v47 = vld [vmem:[#allocation10 + $0x584] sm:$0xf]  ;;  %v13259_v4 = vld [vmem:[#allocation10 + $0x598] sm:$0xf0] }
 0x581   :  { %v14050_v24 = vor.u32 %v15582_v50, %v14049_v38  ;;  %v15537_v38 = vld [vmem:[#allocation10 + $0xa64] sm:$0xf]  ;;  %v8323_v34 = vpop.f32.mrf.mxu3  ;;  %v15552_v50 = vld [vmem:[#allocation10 + $0xad4] sm:$0xf0] }
 0x582   :  { %8669 = vmatpush.bf16.msra.mxu0 %v13382_v6  ;;  %8546 = vmatmul.bf16.vlgmr.msrb.gmra.mxu3 %v16743_v45  ;;  %v15321_v6 = vld [vmem:[#allocation10 + $0x3a4] sm:$0xf]  ;;  %v8324_v15 = vadd.f32 %v8323_v34, %v16931_v3 }
 0x583   :  { %8594 = vmatpush.bf16.msra.mxu3 %v14074_v49  ;;  %v13022_v61 = vor.u32 %v15321_v6, %v13019_v19  ;;  %v15303_v49 = vld [vmem:[#allocation10 + $0x314] sm:$0xf]  ;;  %v13862_v6 = vor.u32 %v15531_v33, %v13859_v20  ;;  %v15525_v19 = vld [vmem:[#allocation10 + $0xa04] sm:$0xf]  ;;  %v13187_v20 = vld [vmem:[#allocation10 + $0x508] sm:$0xf0] }
 0x584   :  { %8683 = vmatpush.bf16.msra.mxu1 %v13574_v11  ;;  %8638 = vmatpush.bf16.msrb.mxu2 %v13070_v13  ;;  %v15570_v11 = vld [vmem:[#allocation10 + $0xb64] sm:$0xf0]  ;;  %v8338_v59 = vadd.f32 %v16908_v9, %v8324_v15  ;;  %v15363_v33 = vld [vmem:[#allocation10 + $0x4f4] sm:$0xf] }
 0x585   :  { %v14002_v32 = vor.u32 %v15570_v11, %v14001_v31  ;;  %v13310_v11 = vor.u32 %v15393_v39, %v13307_v1  ;;  %v13190_v39 = vor.u32 %v15363_v33, %v13187_v20 }
 0x586   :  { %8670 = vmatpush.bf16.msra.mxu0 %v13358_v52  ;;  %v13954_v52 = vor.u32 %v15558_v29, %v13953_v56  ;;  %v13787_v29 = vld [vmem:[#allocation10 + $0x9b8] sm:$0xf0] }
 0x587   :  { %8595 = vmatpush.bf16.msra.mxu3 %v14050_v24  ;;  %v8365_v24 = vpop.f32.mrf.mxu2 }
 0x588   :  { %8684 = vmatpush.bf16.msra.mxu1 %v13550_v12  ;;  %8639 = vmatpush.bf16.msrb.mxu2 %v13046_v25  ;;  %v13929_v12 = vld [vmem:[#allocation10 + $0xac0] sm:$0xf]  ;;  %v8352_v25 = vadd.f32 %v16910_v27, %v8338_v59  ;;  %v15519_v27 = vld [vmem:[#allocation10 + $0x9d4] sm:$0xf] }
 0x589   :  { %v13930_v51 = vor.u32 %v15552_v50, %v13929_v12  ;;  %v8325_v9 = vpop.f32.mrf.mxu3  ;;  %v15369_v12 = vld [vmem:[#allocation10 + $0x524] sm:$0xf] }
 0x58a   :  { %8671 = vmatpush.bf16.msra.mxu0 %v13334_v7  ;;  %v13905_v7 = vld [vmem:[#allocation10 + $0xa90] sm:$0xf]  ;;  %v8366_v31 = vadd.f32 %v8365_v24, %v8352_v25  ;;  %v15357_v25 = vld [vmem:[#allocation10 + $0x4c4] sm:$0xf] }
 0x58b   :  { %8596 = vmatpush.bf16.msra.mxu3 %v14026_v22  ;;  %v13835_v22 = vld [vmem:[#allocation10 + $0xa18] sm:$0xf0] }
 0x58c   :  { %8685 = vmatpush.bf16.msra.mxu1 %v13526_v26  ;;  %8640 = vmatpush.bf16.msrb.mxu2 %v13022_v61  ;;  %v15546_v26 = vld [vmem:[#allocation10 + $0xaa4] sm:$0xf0]  ;;  %v8326_v61 = vadd.f32 %v8325_v9, %v16944_v23  ;;  %v15513_v23 = vld [vmem:[#allocation10 + $0x9a4] sm:$0xf] }
 0x58d   :  { %8672 = vmatmul.bf16.vlgmr.msra.gmra.mxu0 %v16765_v46  ;;  %v12947_v46 = vld [vmem:[#allocation10 + $0x328] sm:$0xf0]  ;;  %v13906_v3 = vor.u32 %v15546_v26, %v13905_v7  ;;  %v15495_v7 = vld [vmem:[#allocation10 + $0x914] sm:$0xf] }
 0x58e   :  { %v12950_v62 = vor.u32 %v15303_v49, %v12947_v46  ;;  %v8340_v18 = vadd.f32 %v16923_v44, %v8326_v61  ;;  %v13262_v49 = vor.u32 %v15381_v47, %v13259_v4  ;;  %v15375_v44 = vld [vmem:[#allocation10 + $0x554] sm:$0xf]  ;;  %v13235_v46 = vld [vmem:[#allocation10 + $0x568] sm:$0xf0]  ;;  %v15573_v47 = vld [vmem:[#allocation10 + $0xb84] sm:$0xf] }
 0x58f   :  { %8686 = vmatmul.bf16.vlgmr.msra.gmra.mxu1 %v16774_v40  ;;  %8597 = vmatpush.bf16.msra.mxu3 %v14002_v32  ;;  %v13883_v40 = vld [vmem:[#allocation10 + $0xa78] sm:$0xf0]  ;;  %v13838_v32 = vor.u32 %v15525_v19, %v13835_v22  ;;  %v8367_v56 = vpop.f32.mrf.mxu2  ;;  %v13238_v34 = vor.u32 %v15375_v44, %v13235_v46  ;;  %v13715_v26 = vld [vmem:[#allocation10 + $0x928] sm:$0xf0] }
 0x590   :  { %8641 = vmatpush.bf16.msrb.mxu2 %v12998_v53  ;;  %v13886_v13 = vor.u32 %v15537_v38, %v13883_v40  ;;  %v13286_v53 = vor.u32 %v15387_v57, %v13283_v63  ;;  %v15507_v38 = vld [vmem:[#allocation10 + $0x974] sm:$0xf]  ;;  %v13763_v40 = vld [vmem:[#allocation10 + $0x988] sm:$0xf0]  ;;  %v13718_v19 = vor.u32 %v15495_v7, %v13715_v26  ;;  %v15585_v57 = vld [vmem:[#allocation10 + $0xbe4] sm:$0xf] }
 0x591   :  { %v13766_v50 = vor.u32 %v15507_v38, %v13763_v40  ;;  %v13139_v61 = vld [vmem:[#allocation10 + $0x4a8] sm:$0xf0]  ;;  %v14075_v63 = vld [vmem:[#allocation10 + $0xbf8] sm:$0xf0]  ;;  %v15549_v38 = vld [vmem:[#allocation10 + $0xac4] sm:$0xf] }
 0x592   :  { %v14027_v4 = vld [vmem:[#allocation10 + $0xb98] sm:$0xf0]  ;;  %v13955_v44 = vld [vmem:[#allocation10 + $0xb08] sm:$0xf0] }
 0x593   :  { %8598 = vmatpush.bf16.msra.mxu3 %v13978_v35  ;;  %v8354_v35 = vadd.f32 %v16927_v43, %v8340_v18  ;;  %v13211_v43 = vld [vmem:[#allocation10 + $0x538] sm:$0xf0] }
 0x594   :  { %8642 = vmatpush.bf16.msrb.mxu2 %v12974_v8  ;;  %v13931_v40 = vld [vmem:[#allocation10 + $0xad8] sm:$0xf0] }
 0x595   :  { %v8368_v8 = vadd.f32 %v8367_v56, %v8354_v35  ;;  %v14030_v35 = vor.u32 %v15573_v47, %v14027_v4  ;;  %v15567_v56 = vld [vmem:[#allocation10 + $0xb54] sm:$0xf]  ;;  %v8060_v47 = vadd.f32 %v16831_v0, %v6122_v21 }
 0x597   :  { %8599 = vmatpush.bf16.msra.mxu3 %v13954_v52  ;;  %v13790_v52 = vor.u32 %v15513_v23, %v13787_v29  ;;  %v15561_v29 = vld [vmem:[#allocation10 + $0xb24] sm:$0xf] }
 0x598   :  { %8643 = vmatpush.bf16.msrb.mxu2 %v12950_v62  ;;  %v15501_v62 = vld [vmem:[#allocation10 + $0x944] sm:$0xf] }
 0x59a   :  { %v8421_v15 = vpop.f32.mrf.mxu2 }
 0x59b   :  { %8600 = vmatpush.bf16.msra.mxu3 %v13930_v51  ;;  %8644 = vmatmul.bf16.vlgmr.msrb.gmra.mxu2 %v16741_v28  ;;  %v13814_v28 = vor.u32 %v15519_v27, %v13811_v48  ;;  %v8422_v59 = vadd.f32 %v8421_v15, %v16941_v5  ;;  %v13214_v51 = vor.u32 %v15369_v12, %v13211_v43  ;;  %v15579_v48 = vld [vmem:[#allocation10 + $0xbb4] sm:$0xf]  ;;  %v13907_v43 = vld [vmem:[#allocation10 + $0xaa8] sm:$0xf0] }
 0x59c   :  { %8692 = vmatpush.bf16.msra.mxu2 %v13886_v13  ;;  %v13739_v13 = vld [vmem:[#allocation10 + $0x958] sm:$0xf0]  ;;  %v14078_v27 = vor.u32 %v15585_v57, %v14075_v63  ;;  %v15543_v12 = vld [vmem:[#allocation10 + $0xa94] sm:$0xf] }
 0x59d   :  { %v13742_v24 = vor.u32 %v15501_v62, %v13739_v13  ;;  %v8449_v13 = vpop.f32.mrf.mxu0 }
 0x59f   :  { %8601 = vmatpush.bf16.msra.mxu3 %v13906_v3 }
 0x5a0   :  { %8693 = vmatpush.bf16.msra.mxu2 %v13862_v6  ;;  %v13163_v6 = vld [vmem:[#allocation10 + $0x4d8] sm:$0xf0] }
 0x5a1   :  { %v8379_v1 = vpop.f32.mrf.mxu3  ;;  %v13166_v9 = vor.u32 %v15357_v25, %v13163_v6 }
 0x5a2   :  { %8602 = vmatmul.bf16.vlgmr.msra.gmra.mxu3 %v16827_v30  ;;  %v16967_v3 = vadd.f32 %v8379_v1, %v8366_v31  ;;  %v8423_v22 = vpop.f32.mrf.mxu2 }
 0x5a3   :  { %8650 = vmatpush.bf16.msrb.mxu3 %v13310_v11  ;;  %v8424_v5 = vadd.f32 %v8423_v22, %v16953_v58  ;;  %v15351_v11 = vld [vmem:[#allocation10 + $0x494] sm:$0xf] }
 0x5a4   :  { %8694 = vmatpush.bf16.msra.mxu2 %v13838_v32  ;;  %v13142_v32 = vor.u32 %v15351_v11, %v13139_v61 }
 0x5a5   :  { %v16979_v20 = vpop.f32.mrf.mxu0 }
 0x5a7   :  { %8651 = vmatpush.bf16.msrb.mxu3 %v13286_v53  ;;  %v14051_v53 = vld [vmem:[#allocation10 + $0xbc8] sm:$0xf0] }
 0x5a8   :  { %8695 = vmatpush.bf16.msra.mxu2 %v13814_v28  ;;  %v14054_v58 = vor.u32 %v15579_v48, %v14051_v53  ;;  %v14003_v28 = vld [vmem:[#allocation10 + $0xb68] sm:$0xf0] }
 0x5a9   :  { %v8381_v18 = vpop.f32.mrf.mxu3  ;;  %v14006_v23 = vor.u32 %v15567_v56, %v14003_v28  ;;  %v8074_v28 = vadd.f32 %v16839_v2, %v8060_v47 }
 0x5aa   :  { %v16971_v31 = vadd.f32 %v8381_v18, %v8368_v8 }
 0x5ab   :  { %8652 = vmatpush.bf16.msrb.mxu3 %v13262_v49  ;;  %v15555_v49 = vld [vmem:[#allocation10 + $0xaf4] sm:$0xf] }
 0x5ac   :  { %8696 = vmatpush.bf16.msra.mxu2 %v13790_v52  ;;  %v13958_v46 = vor.u32 %v15555_v49, %v13955_v44 }
 0x5ad   :  { %v8505_v7 = vpop.f32.mrf.mxu0 }
 0x5af   :  { %8653 = vmatpush.bf16.msrb.mxu3 %v13238_v34 }
 0x5b0   :  { %8697 = vmatpush.bf16.msra.mxu2 %v13766_v50  ;;  %v13910_v50 = vor.u32 %v15543_v12, %v13907_v43 }
 0x5b3   :  { %8654 = vmatpush.bf16.msrb.mxu3 %v13214_v51  ;;  %v8463_v51 = vpop.f32.mrf.mxu1 }
 0x5b4   :  { %8698 = vmatpush.bf16.msra.mxu2 %v13742_v24 }
 0x5b5   :  { %v8507_v6 = vpop.f32.mrf.mxu0 }
 0x5b7   :  { %8655 = vmatpush.bf16.msrb.mxu3 %v13190_v39 }
 0x5b8   :  { %8699 = vmatpush.bf16.msra.mxu2 %v13718_v19 }
 0x5bb   :  { %8656 = vmatpush.bf16.msrb.mxu3 %v13166_v9  ;;  %8700 = vmatmul.bf16.vlgmr.msra.gmra.mxu2 %v16799_v16  ;;  %v13979_v16 = vld [vmem:[#allocation10 + $0xb38] sm:$0xf0]  ;;  %v16977_v33 = vpop.f32.mrf.mxu2 }
 0x5bc   :  { %v13982_v8 = vor.u32 %v15561_v29, %v13979_v16 }
 0x5bf   :  { %8657 = vmatpush.bf16.msrb.mxu3 %v13142_v32  ;;  %v16995_v32 = vld [vmem:[#allocation14 + $0x20] sm:$0xff] }
 0x5c0   :  { %v6126_v18 = vperm.slane %v16995_v32, 4 }
 0x5c2   :  { %8658 = vmatmul.bf16.vlgmr.msrb.gmra.mxu3 %v16743_v45  ;;  %v13934_v45 = vor.u32 %v15549_v38, %v13931_v40  ;;  %v8506_v48 = vadd.f32 %v8505_v7, %v6126_v18 }
 0x5c3   :  { %8706 = vmatpush.bf16.msra.mxu3 %v14078_v27  ;;  %v16985_v26 = vpop.f32.mrf.mxu2 }
 0x5c5   :  { %v8435_v52 = vpop.f32.mrf.mxu3 }
 0x5c6   :  { %v8436_v34 = vadd.f32 %v8435_v52, %v8422_v59  ;;  %v16983_v59 = vpop.f32.mrf.mxu1 }
 0x5c7   :  { %8707 = vmatpush.bf16.msra.mxu3 %v14054_v58 }
 0x5c8   :  { %v8450_v36 = vadd.f32 %v8449_v13, %v8436_v34 }
 0x5ca   :  { %v8561_v22 = vpop.f32.mrf.mxu0  ;;  %v8464_v43 = vadd.f32 %v8463_v51, %v8450_v36  ;;  %v14257_v36 = vld [vmem:[#allocation11 + $0x160] sm:$0xf] }
 0x5cb   :  { %8708 = vmatpush.bf16.msra.mxu3 %v14030_v35 }
 0x5cd   :  { %v8437_v15 = vpop.f32.mrf.mxu3 }
 0x5ce   :  { %v16974_v62 = vadd.f32 %v8437_v15, %v8424_v5  ;;  %v8519_v39 = vpop.f32.mrf.mxu1 }
 0x5cf   :  { %8709 = vmatpush.bf16.msra.mxu3 %v14006_v23  ;;  %v8520_v4 = vadd.f32 %v8519_v39, %v8506_v48  ;;  %v17008_v23 = vld [vmem:[#allocation14 + $0x28] sm:$0xff]  ;;  %v14137_v39 = vld [vmem:[#allocation11 + $0x70] sm:$0xf] }
 0x5d0   :  { %v6127_v29 = vperm.slane %v17008_v23, 4 }
 0x5d2   :  { %v16991_v57 = vpop.f32.mrf.mxu0 }
 0x5d3   :  { %8710 = vmatpush.bf16.msra.mxu3 %v13982_v8  ;;  %v8088_v8 = vadd.f32 %v16871_v55, %v8074_v28  ;;  %v8452_v28 = vadd.f32 %v16979_v20, %v16974_v62  ;;  %v14321_v62 = vld [vmem:[#allocation11 + $0x1e0] sm:$0xf] }
 0x5d5   :  { %v8102_v21 = vadd.f32 %v16894_v42, %v8088_v8  ;;  %v15602_v8 = vld [vmem:[#allocation11 + $0x64] sm:$0xf0] }
 0x5d7   :  { %8711 = vmatpush.bf16.msra.mxu3 %v13958_v46  ;;  %v8508_v46 = vadd.f32 %v8507_v6, %v6126_v18  ;;  %v14201_v6 = vld [vmem:[#allocation11 + $0xf0] sm:$0xf]  ;;  %v15620_v18 = vld [vmem:[#allocation11 + $0xf4] sm:$0xf0] }
 0x5db   :  { %8712 = vmatpush.bf16.msra.mxu3 %v13934_v45  ;;  %v8116_v45 = vadd.f32 %v16847_v54, %v8102_v21  ;;  %v14265_v54 = vld [vmem:[#allocation11 + $0x170] sm:$0xf] }
 0x5dd   :  { %v8130_v15 = vadd.f32 %v16849_v41, %v8116_v45  ;;  %v14329_v41 = vld [vmem:[#allocation11 + $0x1f0] sm:$0xf] }
 0x5de   :  { %v8533_v25 = vpop.f32.mrf.mxu2  ;;  %v14121_v45 = vld [vmem:[#allocation11 + $0x50] sm:$0xf] }
 0x5df   :  { %8713 = vmatpush.bf16.msra.mxu3 %v13910_v50  ;;  %v8534_v16 = vadd.f32 %v8533_v25, %v8520_v4  ;;  %v15604_v25 = vld [vmem:[#allocation11 + $0x74] sm:$0xf0]  ;;  %v14129_v4 = vld [vmem:[#allocation11 + $0x60] sm:$0xf] }
 0x5e2   :  { %8714 = vmatmul.bf16.vlgmr.msra.gmra.mxu3 %v16827_v30  ;;  %v8521_v30 = vpop.f32.mrf.mxu1 }
 0x5e3   :  { %v8522_v2 = vadd.f32 %v8521_v30, %v8508_v46  ;;  %v15636_v30 = vld [vmem:[#allocation11 + $0x174] sm:$0xf0] }
 0x5e4   :  { %v14266_v47 = vor.u32 %v15636_v30, %v14265_v54 }
 0x5e5   :  { %v16981_v24 = vpop.f32.mrf.mxu3 }
 0x5e6   :  { %v8535_v5 = vpop.f32.mrf.mxu2  ;;  %9474 = vmatpush.bf16.msrb.mxu2 %v14266_v47 }
 0x5e7   :  { %v8536_v7 = vadd.f32 %v8535_v5, %v8522_v2  ;;  %v15652_v5 = vld [vmem:[#allocation11 + $0x1f4] sm:$0xf0] }
 0x5ea   :  { %v8575_v9 = vpop.f32.mrf.mxu1  ;;  %v8617_v53 = vpop.f32.mrf.mxu0 }
 0x5eb   :  { %v8618_v52 = vadd.f32 %v8617_v53, %v6127_v29  ;;  %v14202_v53 = vor.u32 %v15620_v18, %v14201_v6 }
 0x5ed   :  { %v16987_v1 = vpop.f32.mrf.mxu3  ;;  %9460 = vmatpush.bf16.msrb.mxu1 %v14202_v53 }
 0x5f2   :  { %v16998_v27 = vpop.f32.mrf.mxu1  ;;  %v8619_v38 = vpop.f32.mrf.mxu0 }
 0x5f3   :  { %v8620_v42 = vadd.f32 %v8619_v38, %v6127_v29  ;;  %v15634_v38 = vld [vmem:[#allocation11 + $0x164] sm:$0xf0] }
 0x5fa   :  { %v8631_v35 = vpop.f32.mrf.mxu1 }
 0x5fb   :  { %v8632_v12 = vadd.f32 %v8631_v35, %v8618_v52  ;;  %v8144_v35 = vadd.f32 %v16883_v14, %v8130_v15  ;;  %v14130_v52 = vor.u32 %v15602_v8, %v14129_v4  ;;  %v14241_v4 = vld [vmem:[#allocation11 + $0x140] sm:$0xf] }
 0x5fc   :  { %v14305_v8 = vld [vmem:[#allocation11 + $0x1c0] sm:$0xf] }
 0x5fd   :  { %v8158_v53 = vadd.f32 %v16905_v60, %v8144_v35 }
 0x5fe   :  { %v16989_v61 = vpop.f32.mrf.mxu2 }
 0x602   :  { %v8633_v50 = vpop.f32.mrf.mxu1 }
 0x603   :  { %v8634_v2 = vadd.f32 %v8633_v50, %v8620_v42  ;;  %v15632_v50 = vld [vmem:[#allocation11 + $0x154] sm:$0xf0]  ;;  %v14313_v42 = vld [vmem:[#allocation11 + $0x1d0] sm:$0xf] }
 0x605   :  { %v8547_v19 = vpop.f32.mrf.mxu3 }
 0x606   :  { %v17000_v58 = vpop.f32.mrf.mxu2  ;;  %v8548_v49 = vadd.f32 %v8547_v19, %v8534_v16  ;;  %v17249_v19 = vld [vmem:[#allocation25_spill] sm:$0xff]  ;;  %v14330_v16 = vor.u32 %v15652_v5, %v14329_v41  ;;  %v15614_v5 = vld [vmem:[#allocation11 + $0xc4] sm:$0xf0] }
 0x607   :  { %v17017_v34 = vadd.f32 %v16939_v37, %v17249_v19  ;;  %v8478_v37 = vadd.f32 %v16977_v33, %v8464_v43 }
 0x608   :  { %v8562_v0 = vadd.f32 %v8561_v22, %v8548_v49  ;;  %v14138_v22 = vor.u32 %v15604_v25, %v14137_v39  ;;  %v14193_v49 = vld [vmem:[#allocation11 + $0xe0] sm:$0xf]  ;;  %9488 = vmatpush.bf16.msrb.mxu3 %v14330_v16  ;;  %v14249_v39 = vld [vmem:[#allocation11 + $0x150] sm:$0xf]  ;;  %v17251_v25 = vld [vmem:[#allocation26_spill] sm:$0xff] }
 0x609   :  { %v8749_v33 = vmul.f32 %v17017_v34, %v17017_v34  ;;  %v8492_v20 = vadd.f32 %v16981_v24, %v8478_v37  ;;  %v17034_v6 = vadd.f32 %v16967_v3, %v17251_v25  ;;  %v8466_v24 = vadd.f32 %v16983_v59, %v8452_v28  ;;  %v14177_v3 = vld [vmem:[#allocation11 + $0xc0] sm:$0xf]  ;;  %v15630_v28 = vld [vmem:[#allocation11 + $0x144] sm:$0xf0] }
 0x60a   :  { %v8576_v13 = vadd.f32 %v8575_v9, %v8562_v0  ;;  %v8673_v29 = vpop.f32.mrf.mxu0  ;;  %9446 = vmatpush.bf16.msrb.mxu0 %v14138_v22  ;;  %v14258_v0 = vor.u32 %v15634_v38, %v14257_v36  ;;  %v14250_v30 = vor.u32 %v15632_v50, %v14249_v39  ;;  %v14178_v38 = vor.u32 %v15614_v5, %v14177_v3 }
 0x60b   :  { %v8750_v60 = vmul.f32 %v17034_v6, %v17034_v6  ;;  %v8480_v35 = vadd.f32 %v16985_v26, %v8466_v24 }
 0x60c   :  { %v8590_v21 = vadd.f32 %v16989_v61, %v8576_v13  ;;  %v8687_v61 = vpop.f32.mrf.mxu1  ;;  %9475 = vmatpush.bf16.msrb.mxu2 %v14258_v0 }
 0x60d   :  { %v8549_v11 = vpop.f32.mrf.mxu3 }
 0x60e   :  { %v8550_v48 = vadd.f32 %v8549_v11, %v8536_v7  ;;  %v15618_v11 = vld [vmem:[#allocation11 + $0xe4] sm:$0xf0]  ;;  %v14185_v7 = vld [vmem:[#allocation11 + $0xd0] sm:$0xf]  ;;  %9447 = vmatpush.bf16.msrb.mxu0 %v14130_v52 }
 0x60f   :  { %v14194_v14 = vor.u32 %v15618_v11, %v14193_v49  ;;  %v15646_v49 = vld [vmem:[#allocation11 + $0x1c4] sm:$0xf0] }
 0x610   :  { %9476 = vmatpush.bf16.msrb.mxu2 %v14250_v30  ;;  %v14306_v0 = vor.u32 %v15646_v49, %v14305_v8  ;;  %v17259_v30 = vld [vmem:[#allocation34_spill] sm:$0xff]  ;;  %v17260_v49 = vld [vmem:[#allocation35_spill] sm:$0xff] }
 0x611   :  { %9461 = vmatpush.bf16.msrb.mxu1 %v14194_v14  ;;  %v17253_v14 = vld [vmem:[#allocation36_spill] sm:$0xff] }
 0x61e   :  { %v8645_v44 = vpop.f32.mrf.mxu2 }
 0x61f   :  { %v8646_v55 = vadd.f32 %v8645_v44, %v8632_v12  ;;  %v17250_v44 = vld [vmem:[#allocation24_spill] sm:$0xff]  ;;  %v8564_v12 = vadd.f32 %v16991_v57, %v8550_v48  ;;  %v14113_v48 = vld [vmem:[#allocation11 + $0x40] sm:$0xf] }
 0x620   :  { %v17025_v46 = vadd.f32 %v16901_v10, %v17250_v44  ;;  %v15600_v10 = vld [vmem:[#allocation11 + $0x54] sm:$0xf0] }
 0x621   :  { %v14122_v22 = vor.u32 %v15600_v10, %v14121_v45  ;;  %v15648_v57 = vld [vmem:[#allocation11 + $0x1d4] sm:$0xf0] }
 0x622   :  { %v8748_v59 = vmul.f32 %v17025_v46, %v17025_v46  ;;  %v14314_v41 = vor.u32 %v15648_v57, %v14313_v42  ;;  %v8732_v37 = vadd.f32 %v17017_v34, %v17025_v46 }
 0x623   :  { %9448 = vmatpush.bf16.msrb.mxu0 %v14122_v22  ;;  %v17258_v22 = vld [vmem:[#allocation37_spill] sm:$0xff] }
 0x624   :  { %v8760_v11 = vadd.f32 %v8749_v33, %v8748_v59  ;;  %v8733_v26 = vadd.f32 %v8732_v37, %v17034_v6 }
 0x625   :  { %v16993_v63 = vpop.f32.mrf.mxu3 }
 0x626   :  { %v8647_v9 = vpop.f32.mrf.mxu2  ;;  %v8604_v19 = vadd.f32 %v16993_v63, %v8590_v21  ;;  %v17252_v63 = vld [vmem:[#allocation27_spill] sm:$0xff]  ;;  %v8675_v21 = vpop.f32.mrf.mxu0  ;;  %v8761_v39 = vadd.f32 %v8760_v11, %v8750_v60 }
 0x627   :  { %v8648_v18 = vadd.f32 %v8647_v9, %v8634_v2  ;;  %v17042_v47 = vadd.f32 %v8492_v20, %v17252_v63 }
 0x628   :  { %v17051_v36 = vadd.f32 %v8604_v19, %v17253_v14 }
 0x629   :  { %v8751_v33 = vmul.f32 %v17042_v47, %v17042_v47 }
 0x62b   :  { %v8762_v19 = vadd.f32 %v8761_v39, %v8751_v33  ;;  %v14169_v33 = vld [vmem:[#allocation11 + $0xb0] sm:$0xf]  ;;  %v14161_v39 = vld [vmem:[#allocation11 + $0xa0] sm:$0xf] }
 0x62d   :  { %v17005_v56 = vpop.f32.mrf.mxu3 }
 0x63e   :  { %v8701_v44 = vpop.f32.mrf.mxu2 }
 0x645   :  { %v8659_v40 = vpop.f32.mrf.mxu3 }
 0x646   :  { %v8660_v51 = vadd.f32 %v8659_v40, %v8646_v55  ;;  %v15650_v40 = vld [vmem:[#allocation11 + $0x1e4] sm:$0xf0]  ;;  %v15616_v55 = vld [vmem:[#allocation11 + $0xd4] sm:$0xf0]  ;;  %v8703_v63 = vpop.f32.mrf.mxu2 }
 0x647   :  { %v14322_v15 = vor.u32 %v15650_v40, %v14321_v62  ;;  %v14186_v54 = vor.u32 %v15616_v55, %v14185_v7  ;;  %v17254_v62 = vld [vmem:[#allocation29_spill] sm:$0xff]  ;;  %v8494_v40 = vadd.f32 %v16987_v1, %v8480_v35  ;;  %v8734_v55 = vadd.f32 %v8733_v26, %v17042_v47  ;;  %v15612_v26 = vld [vmem:[#allocation11 + $0xb4] sm:$0xf0] }
 0x648   :  { %v8674_v43 = vadd.f32 %v8673_v29, %v8660_v51  ;;  %v15598_v51 = vld [vmem:[#allocation11 + $0x44] sm:$0xf0]  ;;  %v8578_v29 = vadd.f32 %v16998_v27, %v8564_v12  ;;  %v14242_v27 = vor.u32 %v15630_v28, %v14241_v4  ;;  %v17055_v20 = vadd.f32 %v16951_v17, %v17254_v62  ;;  %v17255_v12 = vld [vmem:[#allocation28_spill] sm:$0xff] }
 0x649   :  { %9489 = vmatpush.bf16.msrb.mxu3 %v14322_v15  ;;  %v14114_v52 = vor.u32 %v15598_v51, %v14113_v48  ;;  %9462 = vmatpush.bf16.msrb.mxu1 %v14186_v54  ;;  %v17256_v15 = vld [vmem:[#allocation30_spill] sm:$0xff]  ;;  %v8752_v1 = vmul.f32 %v17051_v36, %v17051_v36  ;;  %v15596_v62 = vld [vmem:[#allocation11 + $0x34] sm:$0xf0] }
 0x64a   :  { %v8688_v16 = vadd.f32 %v8687_v61, %v8674_v43  ;;  %v8592_v45 = vadd.f32 %v17000_v58, %v8578_v29  ;;  %v17063_v43 = vadd.f32 %v8158_v53, %v17255_v12  ;;  %v17067_v17 = vadd.f32 %v16971_v31, %v17256_v15  ;;  %9477 = vmatpush.bf16.msrb.mxu2 %v14242_v27  ;;  %v8689_v61 = vpop.f32.mrf.mxu1  ;;  %v17257_v31 = vld [vmem:[#allocation31_spill] sm:$0xff]  ;;  %v15644_v12 = vld [vmem:[#allocation11 + $0x1b4] sm:$0xf0] }
 0x64b   :  { %9449 = vmatpush.bf16.msrb.mxu0 %v14114_v52  ;;  %v8755_v58 = vmul.f32 %v17055_v20, %v17055_v20  ;;  %v8763_v59 = vadd.f32 %v8762_v19, %v8752_v1  ;;  %v14105_v27 = vld [vmem:[#allocation11 + $0x30] sm:$0xf]  ;;  %v14225_v1 = vld [vmem:[#allocation11 + $0x120] sm:$0xf] }
 0x64c   :  { %v8702_v2 = vadd.f32 %v8701_v44, %v8688_v16  ;;  %v8606_v25 = vadd.f32 %v17005_v56, %v8592_v45  ;;  %v8735_v56 = vadd.f32 %v8734_v55, %v17051_v36  ;;  %v8754_v57 = vmul.f32 %v17063_v43, %v17063_v43  ;;  %v15594_v55 = vld [vmem:[#allocation11 + $0x24] sm:$0xf0] }
 0x64d   :  { %v8661_v13 = vpop.f32.mrf.mxu3  ;;  %9490 = vmatpush.bf16.msrb.mxu3 %v14314_v41  ;;  %9463 = vmatpush.bf16.msrb.mxu1 %v14178_v38  ;;  %v8756_v54 = vmul.f32 %v17067_v17, %v17067_v17  ;;  %v14170_v45 = vor.u32 %v15612_v26, %v14169_v33  ;;  %v15603_v26 = vld [vmem:[#allocation11 + $0x74] sm:$0xf] }
 0x64e   :  { %v8662_v9 = vadd.f32 %v8661_v13, %v8648_v18  ;;  %v17076_v13 = vadd.f32 %v8494_v40, %v17257_v31  ;;  %v8739_v18 = vadd.f32 %v17055_v20, %v17063_v43  ;;  %v17089_v48 = vadd.f32 %v8606_v25, %v17259_v30  ;;  %v15628_v40 = vld [vmem:[#allocation11 + $0x134] sm:$0xf0]  ;;  %v14289_v31 = vld [vmem:[#allocation11 + $0x1a0] sm:$0xf] }
 0x64f   :  { %v8767_v53 = vadd.f32 %v8755_v58, %v8754_v57  ;;  %v15626_v58 = vld [vmem:[#allocation11 + $0x124] sm:$0xf0]  ;;  %v15592_v57 = vld [vmem:[#allocation11 + $0x14] sm:$0xf0] }
 0x650   :  { %v8676_v10 = vadd.f32 %v8675_v21, %v8662_v9  ;;  %v8740_v41 = vadd.f32 %v8739_v18, %v17067_v17  ;;  %v8757_v5 = vmul.f32 %v17076_v13, %v17076_v13  ;;  %v8758_v16 = vmul.f32 %v17089_v48, %v17089_v48  ;;  %v14153_v18 = vld [vmem:[#allocation11 + $0x90] sm:$0xf]  ;;  %v15608_v30 = vld [vmem:[#allocation11 + $0x94] sm:$0xf0] }
 0x651   :  { %9491 = vmatpush.bf16.msrb.mxu3 %v14306_v0  ;;  %v8768_v8 = vadd.f32 %v8767_v53, %v8756_v54  ;;  %v14106_v21 = vor.u32 %v15596_v62, %v14105_v27  ;;  %v14233_v0 = vld [vmem:[#allocation11 + $0x130] sm:$0xf]  ;;  %9464 = vmatpush.bf16.msrb.mxu1 %v14170_v45  ;;  %v14226_v19 = vor.u32 %v15626_v58, %v14225_v1  ;;  %v15684_v62 = vld [vmem:[#allocation11 + $0x2f4] sm:$0xf0]  ;;  %v14131_v1 = vld [vmem:[#allocation11 + $0x68] sm:$0xf0] }
 0x652   :  { %v8690_v42 = vadd.f32 %v8689_v61, %v8676_v10  ;;  %v8741_v9 = vadd.f32 %v8740_v41, %v17076_v13  ;;  %v14234_v10 = vor.u32 %v15628_v40, %v14233_v0  ;;  %v15640_v41 = vld [vmem:[#allocation11 + $0x194] sm:$0xf0]  ;;  %v14457_v27 = vld [vmem:[#allocation11 + $0x2f0] sm:$0xf]  ;;  %v14139_v0 = vld [vmem:[#allocation11 + $0x78] sm:$0xf0] }
 0x653   :  { %v8769_v35 = vadd.f32 %v8768_v8, %v8757_v5  ;;  %9450 = vmatpush.bf16.msrb.mxu0 %v14106_v21  ;;  %v15622_v8 = vld [vmem:[#allocation11 + $0x104] sm:$0xf0]  ;;  %v14458_v21 = vor.u32 %v15684_v62, %v14457_v27  ;;  %v15619_v40 = vld [vmem:[#allocation11 + $0xf4] sm:$0xf]  ;;  %v14142_v45 = vor.u32 %v15603_v26, %v14139_v0  ;;  %v15617_v58 = vld [vmem:[#allocation11 + $0xe4] sm:$0xf] }
 0x654   :  { %v8704_v4 = vadd.f32 %v8703_v63, %v8690_v42  ;;  %v8742_v60 = vadd.f32 %v8741_v9, %v17089_v48  ;;  %9478 = vmatpush.bf16.msrb.mxu2 %v14234_v10  ;;  %v14089_v42 = vld [vmem:[#allocation11 + $0x10] sm:$0xf]  ;;  %v15606_v9 = vld [vmem:[#allocation11 + $0x84] sm:$0xf0]  ;;  %v14203_v10 = vld [vmem:[#allocation11 + $0xf8] sm:$0xf0] }
 0x655   :  { %v8770_v14 = vadd.f32 %v8769_v35, %v8758_v16  ;;  %v14090_v54 = vor.u32 %v15592_v57, %v14089_v42  ;;  %v14281_v63 = vld [vmem:[#allocation11 + $0x190] sm:$0xf]  ;;  %v14209_v16 = vld [vmem:[#allocation11 + $0x100] sm:$0xf]  ;;  %v15676_v27 = vld [vmem:[#allocation11 + $0x2b4] sm:$0xf0] }
 0x656   :  { %v14282_v5 = vor.u32 %v15640_v41, %v14281_v63  ;;  %v14273_v35 = vld [vmem:[#allocation11 + $0x180] sm:$0xf]  ;;  %v14441_v42 = vld [vmem:[#allocation11 + $0x2d0] sm:$0xf]  ;;  %v15595_v62 = vld [vmem:[#allocation11 + $0x34] sm:$0xf] }
 0x657   :  { %v14369_v41 = vld [vmem:[#allocation11 + $0x240] sm:$0xf]  ;;  %v15611_v0 = vld [vmem:[#allocation11 + $0xb4] sm:$0xf] }
 0x658   :  { %9479 = vmatpush.bf16.msrb.mxu2 %v14226_v19 }
 0x665   :  { %v8715_v7 = vpop.f32.mrf.mxu3 }
 0x666   :  { %v8716_v24 = vadd.f32 %v8715_v7, %v8702_v2  ;;  %v14297_v2 = vld [vmem:[#allocation11 + $0x1b0] sm:$0xf]  ;;  %v14097_v7 = vld [vmem:[#allocation11 + $0x20] sm:$0xf] }
 0x667   :  { %v14298_v15 = vor.u32 %v15644_v12, %v14297_v2  ;;  %v14098_v25 = vor.u32 %v15594_v55, %v14097_v7  ;;  %v14385_v2 = vld [vmem:[#allocation11 + $0x260] sm:$0xf]  ;;  %v15666_v12 = vld [vmem:[#allocation11 + $0x264] sm:$0xf0] }
 0x668   :  { %v17079_v50 = vadd.f32 %v8716_v24, %v17258_v22  ;;  %v15610_v24 = vld [vmem:[#allocation11 + $0xa4] sm:$0xf0]  ;;  %v14386_v7 = vor.u32 %v15666_v12, %v14385_v2  ;;  %v14449_v55 = vld [vmem:[#allocation11 + $0x2e0] sm:$0xf]  ;;  %v17261_v2 = vld [vmem:[#allocation23_spill] sm:$0xff] }
 0x669   :  { %9492 = vmatpush.bf16.msrb.mxu3 %v14298_v15  ;;  %v14162_v61 = vor.u32 %v15610_v24, %v14161_v39  ;;  %v15642_v22 = vld [vmem:[#allocation11 + $0x1a4] sm:$0xf0]  ;;  %9451 = vmatpush.bf16.msrb.mxu0 %v14098_v25  ;;  %v14206_v15 = vor.u32 %v15619_v40, %v14203_v10  ;;  %v15601_v25 = vld [vmem:[#allocation11 + $0x64] sm:$0xf]  ;;  %v14171_v40 = vld [vmem:[#allocation11 + $0xb8] sm:$0xf0] }
 0x66a   :  { %v8736_v51 = vadd.f32 %v8735_v56, %v17079_v50  ;;  %v8753_v3 = vmul.f32 %v17079_v50, %v17079_v50  ;;  %v14290_v56 = vor.u32 %v15642_v22, %v14289_v31  ;;  %v15682_v39 = vld [vmem:[#allocation11 + $0x2e4] sm:$0xf0]  ;;  %v14134_v19 = vor.u32 %v15601_v25, %v14131_v1  ;;  %v14377_v22 = vld [vmem:[#allocation11 + $0x250] sm:$0xf]  ;;  %v15593_v1 = vld [vmem:[#allocation11 + $0x24] sm:$0xf] }
 0x66b   :  { %9465 = vmatpush.bf16.msrb.mxu1 %v14162_v61  ;;  %v14450_v24 = vor.u32 %v15682_v39, %v14449_v55  ;;  %v14195_v61 = vld [vmem:[#allocation11 + $0xe8] sm:$0xf0]  ;;  %v14174_v10 = vor.u32 %v15611_v0, %v14171_v40  ;;  %v14417_v55 = vld [vmem:[#allocation11 + $0x2a0] sm:$0xf] }
 0x66c   :  { %8737 = vadd.xlane.f32.xlu2 %v8736_v51  ;;  %v8764_v28 = vadd.f32 %v8763_v59, %v8753_v3  ;;  %v14217_v51 = vld [vmem:[#allocation11 + $0x110] sm:$0xf]  ;;  %v15624_v3 = vld [vmem:[#allocation11 + $0x114] sm:$0xf0]  ;;  %v14154_v59 = vor.u32 %v15608_v30, %v14153_v18  ;;  %v14198_v31 = vor.u32 %v15617_v58, %v14195_v61  ;;  %v14123_v30 = vld [vmem:[#allocation11 + $0x58] sm:$0xf0] }
 0x66d   :  { %v8717_v37 = vpop.f32.mrf.mxu3  ;;  %9493 = vmatpush.bf16.msrb.mxu3 %v14290_v56  ;;  %v14218_v53 = vor.u32 %v15624_v3, %v14217_v51  ;;  %9452 = vmatpush.bf16.msrb.mxu0 %v14090_v54  ;;  %v15664_v56 = vld [vmem:[#allocation11 + $0x254] sm:$0xf0]  ;;  %v15599_v54 = vld [vmem:[#allocation11 + $0x54] sm:$0xf]  ;;  %v14099_v58 = vld [vmem:[#allocation11 + $0x28] sm:$0xf0] }
 0x66e   :  { %v8718_v29 = vadd.f32 %v8717_v37, %v8704_v4  ;;  %8765 = vadd.xlane.f32.xlu0 %v8764_v28  ;;  %v14081_v4 = vld [vmem:[#allocation11] sm:$0xf]  ;;  %v15590_v28 = vld [vmem:[#allocation11 + $0x4] sm:$0xf0]  ;;  %v14378_v57 = vor.u32 %v15664_v56, %v14377_v22  ;;  %v15680_v18 = vld [vmem:[#allocation11 + $0x2d4] sm:$0xf0]  ;;  %v14126_v3 = vor.u32 %v15599_v54, %v14123_v30  ;;  %v14102_v22 = vor.u32 %v15593_v1, %v14099_v58 }
 0x66f   :  { %9466 = vmatpush.bf16.msrb.mxu1 %v14154_v59  ;;  %9480 = vmatpush.bf16.msrb.mxu2 %v14218_v53  ;;  %v14145_v37 = vld [vmem:[#allocation11 + $0x80] sm:$0xf]  ;;  %v14442_v51 = vor.u32 %v15680_v18, %v14441_v42  ;;  %v15615_v59 = vld [vmem:[#allocation11 + $0xd4] sm:$0xf]  ;;  %v14187_v53 = vld [vmem:[#allocation11 + $0xd8] sm:$0xf0] }
 0x670   :  { %v17101_v11 = vadd.f32 %v8718_v29, %v17260_v49  ;;  %v14082_v29 = vor.u32 %v15590_v28, %v14081_v4  ;;  %v14146_v49 = vor.u32 %v15606_v9, %v14145_v37  ;;  %v14190_v63 = vor.u32 %v15615_v59, %v14187_v53  ;;  %v14433_v4 = vld [vmem:[#allocation11 + $0x2c0] sm:$0xf]  ;;  %v15678_v37 = vld [vmem:[#allocation11 + $0x2c4] sm:$0xf0]  ;;  %v14115_v9 = vld [vmem:[#allocation11 + $0x48] sm:$0xf0] }
 0x671   :  { %9494 = vmatpush.bf16.msrb.mxu3 %v14282_v5  ;;  %v15662_v5 = vld [vmem:[#allocation11 + $0x244] sm:$0xf0]  ;;  %v15609_v56 = vld [vmem:[#allocation11 + $0xa4] sm:$0xf]  ;;  %v14163_v42 = vld [vmem:[#allocation11 + $0xa8] sm:$0xf0] }
 0x672   :  { %v8743_v44 = vadd.f32 %v8742_v60, %v17101_v11  ;;  %v8759_v52 = vmul.f32 %v17101_v11, %v17101_v11  ;;  %v14210_v60 = vor.u32 %v15622_v8, %v14209_v16  ;;  %9453 = vmatpush.bf16.msrb.mxu0 %v14082_v29  ;;  %v14370_v28 = vor.u32 %v15662_v5, %v14369_v41  ;;  %v15597_v29 = vld [vmem:[#allocation11 + $0x44] sm:$0xf]  ;;  %v15656_v54 = vld [vmem:[#allocation11 + $0x214] sm:$0xf0]  ;;  %v14409_v30 = vld [vmem:[#allocation11 + $0x290] sm:$0xf] }
 0x673   :  { %9467 = vmatpush.bf16.msrb.mxu1 %v14146_v49  ;;  %v14434_v16 = vor.u32 %v15678_v37, %v14433_v4  ;;  %v14118_v8 = vor.u32 %v15597_v29, %v14115_v9  ;;  %v15613_v49 = vld [vmem:[#allocation11 + $0xc4] sm:$0xf]  ;;  %v14166_v18 = vor.u32 %v15609_v56, %v14163_v42  ;;  %v15591_v59 = vld [vmem:[#allocation11 + $0x14] sm:$0xf]  ;;  %v14091_v53 = vld [vmem:[#allocation11 + $0x18] sm:$0xf0] }
 0x674   :  { %8744 = vadd.xlane.f32.xlu2 %v8743_v44  ;;  %v8771_v38 = vadd.f32 %v8770_v14, %v8759_v52  ;;  %v15638_v44 = vld [vmem:[#allocation11 + $0x184] sm:$0xf0]  ;;  %v14393_v52 = vld [vmem:[#allocation11 + $0x270] sm:$0xf]  ;;  %9481 = vmatpush.bf16.msrb.mxu2 %v14210_v60  ;;  %v14179_v60 = vld [vmem:[#allocation11 + $0xc8] sm:$0xf0]  ;;  %v14094_v37 = vor.u32 %v15591_v59, %v14091_v53 }
 0x675   :  { %v14274_v14 = vor.u32 %v15638_v44, %v14273_v35  ;;  %v14182_v35 = vor.u32 %v15613_v49, %v14179_v60  ;;  %v14361_v44 = vld [vmem:[#allocation11 + $0x230] sm:$0xf]  ;;  %v14155_v4 = vld [vmem:[#allocation11 + $0x98] sm:$0xf0]  ;;  %v14337_v49 = vld [vmem:[#allocation11 + $0x200] sm:$0xf] }
 0x676   :  { %8772 = vadd.xlane.f32.xlu1 %v8771_v38  ;;  %v15668_v38 = vld [vmem:[#allocation11 + $0x274] sm:$0xf0]  ;;  %v15654_v60 = vld [vmem:[#allocation11 + $0x204] sm:$0xf0] }
 0x677   :  { %v14394_v33 = vor.u32 %v15668_v38, %v14393_v52  ;;  %9495 = vmatpush.bf16.msrb.mxu3 %v14274_v14  ;;  %9516 = vmatpush.bf16.msra.mxu1 %v14458_v21  ;;  %v15660_v52 = vld [vmem:[#allocation11 + $0x234] sm:$0xf0]  ;;  %v14425_v14 = vld [vmem:[#allocation11 + $0x2b0] sm:$0xf]  ;;  %v17126_v56 = vld [vmem:[#allocation14 + $0x8] sm:$0xff] }
 0x678   :  { %9530 = vmatpush.bf16.msra.mxu2 %v14142_v45  ;;  %v14362_v38 = vor.u32 %v15660_v52, %v14361_v44  ;;  %v14426_v21 = vor.u32 %v15676_v27, %v14425_v14  ;;  %v15670_v14 = vld [vmem:[#allocation11 + $0x284] sm:$0xf0]  ;;  %v14083_v27 = vld [vmem:[#allocation11 + $0x8] sm:$0xf0]  ;;  %v8827_v42 = vperm.slane %v17126_v56, 5  ;;  %v15791_v59 = vld [vmem:[#allocation14 + $0x18] sm:$0xff] }
 0x679   :  { %9502 = vmatpush.bf16.msra.mxu0 %v14394_v33  ;;  %v14107_v33 = vld [vmem:[#allocation11 + $0x38] sm:$0xf0]  ;;  %v8829_v53 = vperm.slane %v15791_v59, 5 }
 0x67a   :  { %v14110_v26 = vor.u32 %v15595_v62, %v14107_v33  ;;  %v14338_v62 = vor.u32 %v15654_v60, %v14337_v49 }
 0x67b   :  { %9544 = vmatpush.bf16.msra.mxu3 %v14206_v15  ;;  %9517 = vmatpush.bf16.msra.mxu1 %v14450_v24  ;;  %v14353_v15 = vld [vmem:[#allocation11 + $0x220] sm:$0xf]  ;;  %v15674_v24 = vld [vmem:[#allocation11 + $0x2a4] sm:$0xf0] }
 0x67c   :  { %9531 = vmatpush.bf16.msra.mxu2 %v14134_v19 }
 0x67d   :  { %9503 = vmatpush.bf16.msra.mxu0 %v14386_v7  ;;  %v15658_v7 = vld [vmem:[#allocation11 + $0x224] sm:$0xf0] }
 0x67e   :  { %v14354_v25 = vor.u32 %v15658_v7, %v14353_v15 }
 0x67f   :  { %9545 = vmatpush.bf16.msra.mxu3 %v14198_v31  ;;  %9518 = vmatpush.bf16.msra.mxu1 %v14442_v51  ;;  %v14418_v31 = vor.u32 %v15674_v24, %v14417_v55  ;;  %v15672_v51 = vld [vmem:[#allocation11 + $0x294] sm:$0xf0] }
 0x680   :  { %9532 = vmatpush.bf16.msra.mxu2 %v14126_v3  ;;  %v14410_v5 = vor.u32 %v15672_v51, %v14409_v30  ;;  %v17136_v51 = vld [vmem:[#allocation14 + $0x10] sm:$0xff] }
 0x681   :  { %9504 = vmatpush.bf16.msra.mxu0 %v14378_v57  ;;  %v14345_v57 = vld [vmem:[#allocation11 + $0x210] sm:$0xf] }
 0x682   :  { %v14346_v41 = vor.u32 %v15656_v54, %v14345_v57 }
 0x683   :  { %9546 = vmatpush.bf16.msra.mxu3 %v14190_v63  ;;  %9519 = vmatpush.bf16.msra.mxu1 %v14434_v16  ;;  %v15607_v63 = vld [vmem:[#allocation11 + $0x94] sm:$0xf] }
 0x684   :  { %9533 = vmatpush.bf16.msra.mxu2 %v14118_v8  ;;  %v14158_v9 = vor.u32 %v15607_v63, %v14155_v4  ;;  %v8846_v4 = vperm.slane %v17136_v51, 6 }
 0x685   :  { %9505 = vmatpush.bf16.msra.mxu0 %v14370_v28 }
 0x687   :  { %9547 = vmatpush.bf16.msra.mxu3 %v14182_v35  ;;  %9520 = vmatpush.bf16.msra.mxu1 %v14426_v21  ;;  %v14401_v35 = vld [vmem:[#allocation11 + $0x280] sm:$0xf]  ;;  %v15605_v21 = vld [vmem:[#allocation11 + $0x84] sm:$0xf] }
 0x688   :  { %9534 = vmatpush.bf16.msra.mxu2 %v14110_v26  ;;  %v14402_v33 = vor.u32 %v15670_v14, %v14401_v35  ;;  %v14147_v26 = vld [vmem:[#allocation11 + $0x88] sm:$0xf0] }
 0x689   :  { %9506 = vmatpush.bf16.msra.mxu0 %v14362_v38  ;;  %v15589_v38 = vld [vmem:[#allocation11 + $0x4] sm:$0xf] }
 0x68a   :  { %v14086_v40 = vor.u32 %v15589_v38, %v14083_v27 }
 0x68b   :  { %9548 = vmatpush.bf16.msra.mxu3 %v14174_v10  ;;  %9521 = vmatpush.bf16.msra.mxu1 %v14418_v31  ;;  %v17123_v31 = vld [vmem:[#allocation14] sm:$0xff] }
 0x68c   :  { %9535 = vmatpush.bf16.msra.mxu2 %v14102_v22  ;;  %v8826_v22 = vperm.slane %v17123_v31, 5 }
 0x68d   :  { %9507 = vmatpush.bf16.msra.mxu0 %v14354_v25 }
 0x68f   :  { %9549 = vmatpush.bf16.msra.mxu3 %v14166_v18  ;;  %9522 = vmatpush.bf16.msra.mxu1 %v14410_v5 }
 0x690   :  { %9536 = vmatpush.bf16.msra.mxu2 %v14094_v37 }
 0x691   :  { %9508 = vmatpush.bf16.msra.mxu0 %v14346_v41 }
 0x693   :  { %9550 = vmatpush.bf16.msra.mxu3 %v14158_v9  ;;  %9523 = vmatpush.bf16.msra.mxu1 %v14402_v33  ;;  %v15635_v33 = vld [vmem:[#allocation11 + $0x174] sm:$0xf] }
 0x694   :  { %9537 = vmatpush.bf16.msra.mxu2 %v14086_v40 }
 0x695   :  { %9509 = vmatpush.bf16.msra.mxu0 %v14338_v62 }
 0x6df   :  { %v8738_v45 = vpop.xlane.xlu2 %8737 }
 0x6e0   :  { %v17108_v12 = vmul.f32 %v8738_v45, %v17261_v2  ;;  %v14150_v45 = vor.u32 %v15605_v21, %v14147_v26 }
 0x6e1   :  { %v8766_v39 = vpop.xlane.xlu0 %8765 }
 0x6e2   :  { %v8774_v61 = vmul.f32 %v8766_v39, %v17261_v2  ;;  %v8776_v19 = vmul.f32 %v17108_v12, %v17108_v12  ;;  %9551 = vmatpush.bf16.msra.mxu3 %v14150_v45  ;;  %v8781_v18 = vsub.f32 %v17017_v34, %v17108_v12  ;;  %v8782_v54 = vsub.f32 %v17034_v6, %v17108_v12  ;;  %v15651_v45 = vld [vmem:[#allocation11 + $0x1f4] sm:$0xf] }
 0x6e3   :  { %v8783_v30 = vsub.f32 %v17042_v47, %v17108_v12  ;;  %v8844_v6 = vperm.slane %v17123_v31, 6  ;;  %v8845_v47 = vperm.slane %v17126_v56, 6 }
 0x6e4   :  { %v8778_v3 = vsub.f32 %v8774_v61, %v8776_v19  ;;  %v8780_v19 = vsub.f32 %v17025_v46, %v17108_v12 }
 0x6e6   :  { %v8792_v28 = vadd.f32 1e-12, %v8778_v3  ;;  %v8828_v3 = vperm.slane %v17136_v51, 5 }
 0x6e7   :  { %v8745_v29 = vpop.xlane.xlu2 %8744 }
 0x6e8   :  { %15759 = vrsqrt.f32 %v8792_v28  ;;  %v17114_v16 = vmul.f32 %v8745_v29, %v17261_v2  ;;  %vm8800_vm8 = vweird.f32 %v8792_v28  ;;  %v8847_v29 = vperm.slane %v15791_v59, 6 }
 0x6e9   :  { %v8773_v8 = vpop.xlane.xlu1 %8772 }
 0x6ea   :  { %v8775_v44 = vmul.f32 %v8773_v8, %v17261_v2  ;;  %v8777_v52 = vmul.f32 %v17114_v16, %v17114_v16  ;;  %v8786_v37 = vsub.f32 %v17063_v43, %v17114_v16  ;;  %v8787_v8 = vsub.f32 %v17055_v20, %v17114_v16  ;;  %v14267_v20 = vld [vmem:[#allocation11 + $0x178] sm:$0xf0] }
 0x6eb   :  { %v8788_v49 = vsub.f32 %v17067_v17, %v17114_v16  ;;  %v8789_v60 = vsub.f32 %v17076_v13, %v17114_v16 }
 0x6ec   :  { %v8779_v0 = vsub.f32 %v8775_v44, %v8777_v52 }
 0x6ee   :  { %v15760_v10 = vpop.eup %15759  ;;  %v8793_v15 = vadd.f32 1e-12, %v8779_v0 }
 0x6ef   :  { %v8795_v2 = vmul.f32 %v15760_v10, %v8792_v28  ;;  %vm8801_vm7 = vweird.f32 %v15760_v10 }
 0x6f0   :  { %15761 = vrsqrt.f32 %v8793_v15  ;;  %vm8802_vm9 = vmor %vm8800_vm8, %vm8801_vm7  ;;  %vm8810_vm11 = vweird.f32 %v8793_v15 }
 0x6f1   :  { %v8796_v7 = vmul.f32 %v15760_v10, %v8795_v2 }
 0x6f3   :  { %v8797_v55 = vmul.f32 0.5, %v8796_v7  ;;  %v15667_v7 = vld [vmem:[#allocation11 + $0x274] sm:$0xf] }
 0x6f5   :  { %v8798_v39 = vsub.f32 1.5, %v8797_v55 }
 0x6f6   :  { %v15762_v25 = vpop.eup %15761 }
 0x6f7   :  { %v8799_v24 = vmul.f32 %v15760_v10, %v8798_v39  ;;  %v8805_v1 = vmul.f32 %v15762_v25, %v8793_v15  ;;  %vm8811_vm10 = vweird.f32 %v15762_v25 }
 0x6f8   :  { %vm8812_vm12 = vmor %vm8810_vm11, %vm8811_vm10 }
 0x6f9   :  { %v17119_v58 = vsel %vm8802_vm9, %v15760_v10, %v8799_v24  ;;  %v8806_v61 = vmul.f32 %v15762_v25, %v8805_v1  ;;  %v14331_v10 = vld [vmem:[#allocation11 + $0x1f8] sm:$0xf0] }
 0x6fa   :  { %v8814_v46 = vmul.f32 %v17119_v58, %v8780_v19  ;;  %v8815_v41 = vmul.f32 %v17119_v58, %v8781_v18  ;;  %v8816_v34 = vmul.f32 %v17119_v58, %v8782_v54  ;;  %v8817_v5 = vmul.f32 %v17119_v58, %v8783_v30  ;;  %v14395_v1 = vld [vmem:[#allocation11 + $0x278] sm:$0xf0] }
 0x6fb   :  { %v8807_v57 = vmul.f32 0.5, %v8806_v61  ;;  %v15683_v61 = vld [vmem:[#allocation11 + $0x2f4] sm:$0xf]  ;;  %v14459_v19 = vld [vmem:[#allocation11 + $0x2f8] sm:$0xf0]  ;;  %v14398_v59 = vor.u32 %v15667_v7, %v14395_v1 }
 0x6fc   :  { %v8832_v9 = vmul.f32 %v8826_v22, %v8814_v46  ;;  %v8833_v44 = vmul.f32 %v8827_v42, %v8815_v41  ;;  %v8834_v52 = vmul.f32 %v8828_v3, %v8816_v34  ;;  %v8835_v14 = vmul.f32 %v8829_v53, %v8817_v5  ;;  %v15633_v46 = vld [vmem:[#allocation11 + $0x164] sm:$0xf]  ;;  %v14323_v41 = vld [vmem:[#allocation11 + $0x1e8] sm:$0xf0] }
 0x6fd   :  { %v8808_v63 = vsub.f32 1.5, %v8807_v57  ;;  %v14270_v57 = vor.u32 %v15635_v33, %v14267_v20  ;;  %v15665_v34 = vld [vmem:[#allocation11 + $0x264] sm:$0xf]  ;;  %v14387_v5 = vld [vmem:[#allocation11 + $0x268] sm:$0xf0] }
 0x6fe   :  { %v8850_v17 = vadd.f32 %v8844_v6, %v8832_v9  ;;  %v8851_v15 = vadd.f32 %v8845_v47, %v8833_v44  ;;  %v8852_v2 = vadd.f32 %v8846_v4, %v8834_v52  ;;  %v8853_v13 = vadd.f32 %v8847_v29, %v8835_v14  ;;  %v14443_v33 = vld [vmem:[#allocation11 + $0x2d8] sm:$0xf0]  ;;  %v15661_v7 = vld [vmem:[#allocation11 + $0x244] sm:$0xf] }
 0x6ff   :  { %v8809_v28 = vmul.f32 %v15762_v25, %v8808_v63  ;;  %v15649_v63 = vld [vmem:[#allocation11 + $0x1e4] sm:$0xf]  ;;  %v8830_v9 = vperm.slane %v16995_v32, 5  ;;  %v14390_v52 = vor.u32 %v15665_v34, %v14387_v5  ;;  %v14363_v34 = vld [vmem:[#allocation11 + $0x238] sm:$0xf0] }
 0x700   :  { %v15675_v5 = vld [vmem:[#allocation11 + $0x2b4] sm:$0xf] }
 0x701   :  { %v8813_v35 = vsel %vm8812_vm12, %v15762_v25, %v8809_v28  ;;  %v8791_v28 = vsub.f32 %v17101_v11, %v17114_v16 }
 0x702   :  { %v8820_v38 = vmul.f32 %v8813_v35, %v8786_v37  ;;  %v8821_v27 = vmul.f32 %v8813_v35, %v8787_v8  ;;  %v8822_v43 = vmul.f32 %v8813_v35, %v8788_v49  ;;  %v8823_v62 = vmul.f32 %v8813_v35, %v8789_v60  ;;  %v14251_v60 = vld [vmem:[#allocation11 + $0x158] sm:$0xf0] }
 0x703   :  { %v8785_v8 = vsub.f32 %v17079_v50, %v17108_v12  ;;  %v14326_v49 = vor.u32 %v15649_v63, %v14323_v41  ;;  %v8825_v11 = vmul.f32 %v8813_v35, %v8791_v28 }
 0x704   :  { %v8838_v21 = vmul.f32 %v8826_v22, %v8820_v38  ;;  %v8839_v26 = vmul.f32 %v8827_v42, %v8821_v27  ;;  %v8840_v0 = vmul.f32 %v8828_v3, %v8822_v43  ;;  %v8841_v40 = vmul.f32 %v8829_v53, %v8823_v62  ;;  %v14259_v3 = vld [vmem:[#allocation11 + $0x168] sm:$0xf0]  ;;  %v15647_v38 = vld [vmem:[#allocation11 + $0x1d4] sm:$0xf]  ;;  %v14379_v43 = vld [vmem:[#allocation11 + $0x258] sm:$0xf0] }
 0x705   :  { %v14334_v22 = vor.u32 %v15651_v45, %v14331_v10  ;;  %v14462_v53 = vor.u32 %v15683_v61, %v14459_v19  ;;  %v14262_v37 = vor.u32 %v15633_v46, %v14259_v3  ;;  %v15663_v27 = vld [vmem:[#allocation11 + $0x254] sm:$0xf]  ;;  %v8849_v10 = vperm.slane %v17008_v23, 6 }
 0x706   :  { %v8856_v55 = vadd.f32 %v8844_v6, %v8838_v21  ;;  %v8857_v39 = vadd.f32 %v8845_v47, %v8839_v26  ;;  %v8858_v25 = vadd.f32 %v8846_v4, %v8840_v0  ;;  %v8859_v24 = vadd.f32 %v8847_v29, %v8841_v40  ;;  %v15681_v6 = vld [vmem:[#allocation11 + $0x2e4] sm:$0xf]  ;;  %v14451_v47 = vld [vmem:[#allocation11 + $0x2e8] sm:$0xf0]  ;;  %v15679_v62 = vld [vmem:[#allocation11 + $0x2d4] sm:$0xf] }
 0x707   :  { %v8790_v4 = vsub.f32 %v17089_v48, %v17114_v16  ;;  %v8784_v29 = vsub.f32 %v17051_v36, %v17108_v12  ;;  %v15631_v48 = vld [vmem:[#allocation11 + $0x154] sm:$0xf]  ;;  %v8831_v16 = vperm.slane %v17008_v23, 5  ;;  %v14454_v14 = vor.u32 %v15681_v6, %v14451_v47  ;;  %v14315_v36 = vld [vmem:[#allocation11 + $0x1d8] sm:$0xf0] }
 0x708   :  { %v17154_v42 = vpack.c.bf16 %v8856_v55, %v8850_v17  ;;  %v17156_v18 = vpack.c.bf16 %v8857_v39, %v8851_v15  ;;  %v17158_v54 = vpack.c.bf16 %v8858_v25, %v8852_v2  ;;  %v17160_v30 = vpack.c.bf16 %v8859_v24, %v8853_v13  ;;  %v15629_v0 = vld [vmem:[#allocation11 + $0x144] sm:$0xf]  ;;  %v14243_v40 = vld [vmem:[#allocation11 + $0x148] sm:$0xf0]  ;;  %v14235_v23 = vld [vmem:[#allocation11 + $0x138] sm:$0xf0] }
 0x709   :  { %v8824_v44 = vmul.f32 %v8813_v35, %v8790_v4  ;;  %v8818_v50 = vmul.f32 %v17119_v58, %v8784_v29  ;;  %v8819_v12 = vmul.f32 %v17119_v58, %v8785_v8  ;;  %v14254_v21 = vor.u32 %v15631_v48, %v14251_v60  ;;  %v15645_v2 = vld [vmem:[#allocation11 + $0x1c4] sm:$0xf]  ;;  %v14307_v13 = vld [vmem:[#allocation11 + $0x1c8] sm:$0xf0]  ;;  %v15643_v3 = vld [vmem:[#allocation11 + $0x1b4] sm:$0xf] }
 0x70a   :  { %9454 = vmatmul.bf16.vlgmr.msrb.gmra.mxu0 %v17154_v42  ;;  %9468 = vmatmul.bf16.vlgmr.msrb.gmra.mxu1 %v17156_v18  ;;  %v8848_v26 = vperm.slane %v16995_v32, 6  ;;  %v14318_v35 = vor.u32 %v15647_v38, %v14315_v36  ;;  %v8843_v45 = vmul.f32 %v8831_v16, %v8825_v11  ;;  %v14382_v17 = vor.u32 %v15663_v27, %v14379_v43  ;;  %v14371_v58 = vld [vmem:[#allocation11 + $0x248] sm:$0xf0]  ;;  %v15677_v55 = vld [vmem:[#allocation11 + $0x2c4] sm:$0xf] }
 0x70b   :  { %9482 = vmatmul.bf16.vlgmr.msrb.gmra.mxu2 %v17158_v54  ;;  %9496 = vmatmul.bf16.vlgmr.msrb.gmra.mxu3 %v17160_v30  ;;  %v8842_v20 = vmul.f32 %v8830_v9, %v8824_v44  ;;  %v14446_v15 = vor.u32 %v15679_v62, %v14443_v33  ;;  %v14435_v39 = vld [vmem:[#allocation11 + $0x2c8] sm:$0xf0]  ;;  %v8836_v32 = vmul.f32 %v8830_v9, %v8818_v50  ;;  %v14427_v6 = vld [vmem:[#allocation11 + $0x2b8] sm:$0xf0]  ;;  %v15625_v29 = vld [vmem:[#allocation11 + $0x124] sm:$0xf] }
 0x70c   :  { %9558 = vmatpush.bf16.msrb.mxu0 %v14270_v57  ;;  %9572 = vmatpush.bf16.msrb.mxu1 %v14334_v22  ;;  %v8837_v25 = vmul.f32 %v8831_v16, %v8819_v12  ;;  %v14246_v24 = vor.u32 %v15629_v0, %v14243_v40  ;;  %v14310_v1 = vor.u32 %v15645_v2, %v14307_v13  ;;  %v15627_v57 = vld [vmem:[#allocation11 + $0x134] sm:$0xf]  ;;  %v14227_v9 = vld [vmem:[#allocation11 + $0x128] sm:$0xf0]  ;;  %v15641_v48 = vld [vmem:[#allocation11 + $0x1a4] sm:$0xf] }
 0x70d   :  { %9586 = vmatpush.bf16.msrb.mxu2 %v14398_v59  ;;  %9600 = vmatpush.bf16.msrb.mxu3 %v14462_v53  ;;  %v8860_v61 = vadd.f32 %v8848_v26, %v8842_v20  ;;  %v8861_v19 = vadd.f32 %v8849_v10, %v8843_v45  ;;  %v14374_v22 = vor.u32 %v15661_v7, %v14371_v58  ;;  %v14299_v59 = vld [vmem:[#allocation11 + $0x1b8] sm:$0xf0]  ;;  %v15659_v53 = vld [vmem:[#allocation11 + $0x234] sm:$0xf]  ;;  %v14291_v60 = vld [vmem:[#allocation11 + $0x1a8] sm:$0xf0] }
 0x70e   :  { %v14438_v46 = vor.u32 %v15677_v55, %v14435_v39  ;;  %v8854_v63 = vadd.f32 %v8848_v26, %v8836_v32  ;;  %v8855_v41 = vadd.f32 %v8849_v10, %v8837_v25  ;;  %v14238_v47 = vor.u32 %v15627_v57, %v14235_v23  ;;  %v15657_v44 = vld [vmem:[#allocation11 + $0x224] sm:$0xf]  ;;  %v14355_v11 = vld [vmem:[#allocation11 + $0x228] sm:$0xf0]  ;;  %v15623_v36 = vld [vmem:[#allocation11 + $0x114] sm:$0xf] }
 0x70f   :  { %v14366_v8 = vor.u32 %v15659_v53, %v14363_v34  ;;  %v15673_v16 = vld [vmem:[#allocation11 + $0x2a4] sm:$0xf]  ;;  %v14294_v38 = vor.u32 %v15641_v48, %v14291_v60  ;;  %v14219_v27 = vld [vmem:[#allocation11 + $0x118] sm:$0xf0]  ;;  %v14358_v43 = vor.u32 %v15657_v44, %v14355_v11  ;;  %v15639_v33 = vld [vmem:[#allocation11 + $0x194] sm:$0xf] }
 0x710   :  { %9559 = vmatpush.bf16.msrb.mxu0 %v14262_v37  ;;  %9573 = vmatpush.bf16.msrb.mxu1 %v14326_v49  ;;  %v17180_v4 = vpack.c.bf16 %v8860_v61, %v8854_v63  ;;  %v17182_v28 = vpack.c.bf16 %v8861_v19, %v8855_v41  ;;  %v14302_v37 = vor.u32 %v15643_v3, %v14299_v59  ;;  %v14283_v50 = vld [vmem:[#allocation11 + $0x198] sm:$0xf0]  ;;  %v15655_v12 = vld [vmem:[#allocation11 + $0x214] sm:$0xf]  ;;  %v15621_v0 = vld [vmem:[#allocation11 + $0x104] sm:$0xf] }
 0x711   :  { %9587 = vmatpush.bf16.msrb.mxu2 %v14390_v52  ;;  %9601 = vmatpush.bf16.msrb.mxu3 %v14454_v14  ;;  %v14430_v49 = vor.u32 %v15675_v5, %v14427_v6  ;;  %v14419_v52 = vld [vmem:[#allocation11 + $0x2a8] sm:$0xf0]  ;;  %v14230_v14 = vor.u32 %v15625_v29, %v14227_v9  ;;  %v15671_v26 = vld [vmem:[#allocation11 + $0x294] sm:$0xf]  ;;  %v15637_v10 = vld [vmem:[#allocation11 + $0x184] sm:$0xf] }
 0x712   :  { %v14422_v62 = vor.u32 %v15673_v16, %v14419_v52  ;;  %v14211_v40 = vld [vmem:[#allocation11 + $0x108] sm:$0xf0]  ;;  %v15669_v13 = vld [vmem:[#allocation11 + $0x284] sm:$0xf]  ;;  %v15692_v25 = vld [vmem:[#allocation13 + $0x38] sm:$0xff]  ;;  %v8964_v63 = vperm.slane %v17123_v31, 7 }
 0x713   :  { %v14339_v2 = vld [vmem:[#allocation11 + $0x208] sm:$0xf0]  ;;  %v14214_v58 = vor.u32 %v15621_v0, %v14211_v40  ;;  %v15689_v61 = vld [vmem:[#allocation13 + $0x20] sm:$0xff]  ;;  %v15688_v19 = vld [vmem:[#allocation13 + $0x18] sm:$0xff] }
 0x714   :  { %9560 = vmatpush.bf16.msrb.mxu0 %v14254_v21  ;;  %9574 = vmatpush.bf16.msrb.mxu1 %v14318_v35  ;;  %v14347_v21 = vld [vmem:[#allocation11 + $0x218] sm:$0xf0]  ;;  %v14403_v7 = vld [vmem:[#allocation11 + $0x288] sm:$0xf0]  ;;  %v15687_v57 = vld [vmem:[#allocation13 + $0x10] sm:$0xff] }
 0x715   :  { %9588 = vmatpush.bf16.msrb.mxu2 %v14382_v17  ;;  %9602 = vmatpush.bf16.msrb.mxu3 %v14446_v15  ;;  %v14411_v35 = vld [vmem:[#allocation11 + $0x298] sm:$0xf0]  ;;  %v14350_v20 = vor.u32 %v15655_v12, %v14347_v21  ;;  %v14275_v17 = vld [vmem:[#allocation11 + $0x188] sm:$0xf0]  ;;  %v15653_v15 = vld [vmem:[#allocation11 + $0x204] sm:$0xf]  ;;  %v14406_v32 = vor.u32 %v15669_v13, %v14403_v7 }
 0x716   :  { %v14414_v45 = vor.u32 %v15671_v26, %v14411_v35  ;;  %v14278_v55 = vor.u32 %v15637_v10, %v14275_v17  ;;  %v14342_v39 = vor.u32 %v15653_v15, %v14339_v2  ;;  %v15700_v23 = vld [vmem:[#allocation13 + $0x78] sm:$0xff]  ;;  %v15685_v3 = vld [vmem:[#allocation13] sm:$0xff]  ;;  %v15698_v59 = vld [vmem:[#allocation13 + $0x68] sm:$0xff]  ;;  %v8965_v26 = vperm.slane %v17126_v56, 7 }
 0x717   :  { %v15697_v53 = vld [vmem:[#allocation13 + $0x60] sm:$0xff]  ;;  %v15695_v29 = vld [vmem:[#allocation13 + $0x50] sm:$0xff]  ;;  %v15694_v11 = vld [vmem:[#allocation13 + $0x48] sm:$0xff] }
 0x718   :  { %9561 = vmatpush.bf16.msrb.mxu0 %v14246_v24  ;;  %9575 = vmatpush.bf16.msrb.mxu1 %v14310_v1  ;;  %v15691_v24 = vld [vmem:[#allocation13 + $0x30] sm:$0xff]  ;;  %v15690_v1 = vld [vmem:[#allocation13 + $0x28] sm:$0xff] }
 0x719   :  { %9589 = vmatpush.bf16.msrb.mxu2 %v14374_v22  ;;  %9603 = vmatpush.bf16.msrb.mxu3 %v14438_v46 }
 0x71a   :  { %9510 = vmatmul.bf16.vlgmr.msra.gmra.mxu0 %v17180_v4  ;;  %9524 = vmatmul.bf16.vlgmr.msra.gmra.mxu1 %v17182_v28 }
 0x71b   :  { %9538 = vmatmul.bf16.vlgmr.msra.gmra.mxu2 %v17154_v42  ;;  %9552 = vmatmul.bf16.vlgmr.msra.gmra.mxu3 %v17156_v18  ;;  %v14222_v42 = vor.u32 %v15623_v36, %v14219_v27  ;;  %v14286_v18 = vor.u32 %v15639_v33, %v14283_v50 }
 0x71c   :  { %9562 = vmatpush.bf16.msrb.mxu0 %v14238_v47  ;;  %9576 = vmatpush.bf16.msrb.mxu1 %v14302_v37 }
 0x71d   :  { %9590 = vmatpush.bf16.msrb.mxu2 %v14366_v8  ;;  %9604 = vmatpush.bf16.msrb.mxu3 %v14430_v49 }
 0x720   :  { %9563 = vmatpush.bf16.msrb.mxu0 %v14230_v14  ;;  %9577 = vmatpush.bf16.msrb.mxu1 %v14294_v38  ;;  %v15693_v14 = vld [vmem:[#allocation13 + $0x40] sm:$0xff] }
 0x721   :  { %9591 = vmatpush.bf16.msrb.mxu2 %v14358_v43  ;;  %9605 = vmatpush.bf16.msrb.mxu3 %v14422_v62 }
 0x724   :  { %9564 = vmatpush.bf16.msrb.mxu0 %v14222_v42  ;;  %9578 = vmatpush.bf16.msrb.mxu1 %v14286_v18 }
 0x725   :  { %9592 = vmatpush.bf16.msrb.mxu2 %v14350_v20  ;;  %9606 = vmatpush.bf16.msrb.mxu3 %v14414_v45 }
 0x728   :  { %9565 = vmatpush.bf16.msrb.mxu0 %v14214_v58  ;;  %9579 = vmatpush.bf16.msrb.mxu1 %v14278_v55 }
 0x729   :  { %9593 = vmatpush.bf16.msrb.mxu2 %v14342_v39  ;;  %9607 = vmatpush.bf16.msrb.mxu3 %v14406_v32 }
 0x72b   :  { %9566 = vmatmul.bf16.vlgmr.msrb.gmra.mxu0 %v17158_v54  ;;  %9580 = vmatmul.bf16.vlgmr.msrb.gmra.mxu1 %v17160_v30  ;;  %v15686_v54 = vld [vmem:[#allocation13 + $0x8] sm:$0xff]  ;;  %v15699_v30 = vld [vmem:[#allocation13 + $0x70] sm:$0xff] }
 0x72c   :  { %9594 = vmatmul.bf16.vlgmr.msrb.gmra.mxu2 %v17180_v4  ;;  %9608 = vmatmul.bf16.vlgmr.msrb.gmra.mxu3 %v17182_v28  ;;  %v15696_v4 = vld [vmem:[#allocation13 + $0x58] sm:$0xff] }
 0x72d   :  { %9749 = vmatpush.bf16.msra.mxu0 %v15692_v25  ;;  %9763 = vmatpush.bf16.msra.mxu1 %v15700_v23 }
 0x731   :  { %9750 = vmatpush.bf16.msra.mxu0 %v15691_v24  ;;  %9764 = vmatpush.bf16.msra.mxu1 %v15699_v30 }
 0x735   :  { %9751 = vmatpush.bf16.msra.mxu0 %v15690_v1  ;;  %9765 = vmatpush.bf16.msra.mxu1 %v15698_v59 }
 0x739   :  { %9752 = vmatpush.bf16.msra.mxu0 %v15689_v61  ;;  %9766 = vmatpush.bf16.msra.mxu1 %v15697_v53 }
 0x73d   :  { %9753 = vmatpush.bf16.msra.mxu0 %v15688_v19  ;;  %9767 = vmatpush.bf16.msra.mxu1 %v15696_v4 }
 0x741   :  { %9754 = vmatpush.bf16.msra.mxu0 %v15687_v57  ;;  %9768 = vmatpush.bf16.msra.mxu1 %v15695_v29 }
 0x745   :  { %9755 = vmatpush.bf16.msra.mxu0 %v15686_v54  ;;  %9769 = vmatpush.bf16.msra.mxu1 %v15694_v11 }
 0x749   :  { %9756 = vmatpush.bf16.msra.mxu0 %v15685_v3  ;;  %9770 = vmatpush.bf16.msra.mxu1 %v15693_v14  ;;  %v9652_v3 = vperm.slane %v17136_v51, 7 }
 0x787   :  { %v9455_v22 = vpop.f32.mrf.mxu0  ;;  %v9469_v46 = vpop.f32.mrf.mxu1 }
 0x788   :  { %v9456_v47 = vadd.f32 %v9455_v22, %v8964_v63  ;;  %v9777_v22 = vlaneseq }
 0x78a   :  { %v9470_v28 = vadd.f32 %v9469_v46, %v9456_v47  ;;  %v9778_v59 = vand.u32 127, %v9777_v22 }
 0x78c   :  { %vm9779_vm13 = vcmp.lt.s32.totalorder %v9778_v59, 5 }
 0x78e   :  { %v9483_v41 = vpop.f32.mrf.mxu2  ;;  %v9497_v34 = vpop.f32.mrf.mxu3 }
 0x78f   :  { %v9457_v5 = vpop.f32.mrf.mxu0  ;;  %v9471_v6 = vpop.f32.mrf.mxu1  ;;  %v9484_v9 = vadd.f32 %v9483_v41, %v9470_v28 }
 0x790   :  { %v9458_v37 = vadd.f32 %v9457_v5, %v8964_v63 }
 0x791   :  { %v9498_v31 = vadd.f32 %v9497_v34, %v9484_v9 }
 0x792   :  { %v9472_v44 = vadd.f32 %v9471_v6, %v9458_v37 }
 0x796   :  { %v9485_v8 = vpop.f32.mrf.mxu2  ;;  %v9499_v49 = vpop.f32.mrf.mxu3 }
 0x797   :  { %v9511_v48 = vpop.f32.mrf.mxu0  ;;  %v9525_v60 = vpop.f32.mrf.mxu1  ;;  %v9486_v16 = vadd.f32 %v9485_v8, %v9472_v44 }
 0x798   :  { %v9512_v52 = vadd.f32 %v9511_v48, %v9498_v31 }
 0x799   :  { %v9500_v38 = vadd.f32 %v9499_v49, %v9486_v16 }
 0x79a   :  { %v9526_v62 = vadd.f32 %v9525_v60, %v9512_v52 }
 0x79c   :  { %v9614_v21 = vmax.f32 %v9526_v62, 0.0 }
 0x79e   :  { %v9539_v36 = vpop.f32.mrf.mxu2  ;;  %v9553_v27 = vpop.f32.mrf.mxu3 }
 0x79f   :  { %v9513_v43 = vpop.f32.mrf.mxu0  ;;  %v9527_v50 = vpop.f32.mrf.mxu1  ;;  %v9540_v40 = vadd.f32 %v9539_v36, %v8965_v26 }
 0x7a0   :  { %v9514_v33 = vadd.f32 %v9513_v43, %v9500_v38 }
 0x7a1   :  { %v9554_v10 = vadd.f32 %v9553_v27, %v9540_v40 }
 0x7a2   :  { %v9528_v12 = vadd.f32 %v9527_v50, %v9514_v33 }
 0x7a4   :  { %v9616_v35 = vmax.f32 %v9528_v12, 0.0 }
 0x7a6   :  { %v9618_v42 = vpack.c.bf16 %v9616_v35, %v9614_v21  ;;  %v9541_v18 = vpop.f32.mrf.mxu2  ;;  %v9555_v0 = vpop.f32.mrf.mxu3 }
 0x7a7   :  { %v9542_v17 = vadd.f32 %v9541_v18, %v8965_v26 }
 0x7a8   :  { %v9567_v20 = vpop.f32.mrf.mxu0  ;;  %9757 = vmatmul.bf16.vlgmr.msra.gmra.mxu0 %v9618_v42  ;;  %v9581_v45 = vpop.f32.mrf.mxu1 }
 0x7a9   :  { %v9568_v15 = vadd.f32 %v9567_v20, %v9554_v10  ;;  %v9556_v7 = vadd.f32 %v9555_v0, %v9542_v17 }
 0x7ab   :  { %v9582_v55 = vadd.f32 %v9581_v45, %v9568_v15 }
 0x7af   :  { %v9595_v2 = vpop.f32.mrf.mxu2  ;;  %v9609_v13 = vpop.f32.mrf.mxu3 }
 0x7b0   :  { %v9569_v58 = vpop.f32.mrf.mxu0  ;;  %v9596_v32 = vadd.f32 %v9595_v2, %v9582_v55  ;;  %v9583_v25 = vpop.f32.mrf.mxu1 }
 0x7b1   :  { %v9570_v39 = vadd.f32 %v9569_v58, %v9556_v7 }
 0x7b2   :  { %v9610_v1 = vadd.f32 %v9609_v13, %v9596_v32 }
 0x7b3   :  { %v9584_v56 = vadd.f32 %v9583_v25, %v9570_v39 }
 0x7b4   :  { %v9615_v23 = vmax.f32 %v9610_v1, 0.0 }
 0x7b7   :  { %v9597_v24 = vpop.f32.mrf.mxu2  ;;  %v9611_v19 = vpop.f32.mrf.mxu3 }
 0x7b8   :  { %v9598_v61 = vadd.f32 %v9597_v24, %v9584_v56 }
 0x7ba   :  { %v9612_v57 = vadd.f32 %v9611_v19, %v9598_v61 }
 0x7bc   :  { %v9617_v54 = vmax.f32 %v9612_v57, 0.0 }
 0x7be   :  { %v9619_v30 = vpack.c.bf16 %v9617_v54, %v9615_v23 }
 0x7c0   :  { %9771 = vmatmul.bf16.vlgmr.msra.gmra.mxu1 %v9619_v30 }
 0x825   :  { %v9758_v46 = vpop.f32.mrf.mxu0 }
 0x826   :  { %v9759_v53 = vadd.f32 %v9758_v46, %v9652_v3 }
 0x82d   :  { %v9760_v5 = vpop.f32.mrf.mxu0 }
 0x82e   :  { %v9761_v6 = vadd.f32 %v9760_v5, %v9652_v3 }
 0x83d   :  { %v9772_v63 = vpop.f32.mrf.mxu1 }
 0x83e   :  { %v9773_v41 = vadd.f32 %v9772_v63, %v9759_v53 }
 0x840   :  { %v9780_v34 = vsel %vm9779_vm13, %v9773_v41, -1e+30 }
 0x841   :  { %9782 = vmax.xlane.f32.xlu2 %v9780_v34 }
 0x845   :  { %v9774_v47 = vpop.f32.mrf.mxu1 }
 0x846   :  { %v9775_v4 = vadd.f32 %v9774_v47, %v9761_v6 }
 0x848   :  { %v9781_v28 = vsel %vm9779_vm13, %v9775_v4, -1e+30 }
 0x849   :  { %9784 = vmax.xlane.f32.xlu0 %v9781_v28 }
 0x8b4   :  { %v9783_v37 = vpop.xlane.xlu2 %9782 }
 0x8b5   :  { %v9786_v29 = vsub.f32 %v9780_v34, %v9783_v37 }
 0x8b7   :  { %v9788_v9 = vmul.f32 1.442695, %v9786_v29 }
 0x8b9   :  { %15763 = vpow2.f32 %v9788_v9 }
 0x8bc   :  { %v9785_v51 = vpop.xlane.xlu0 %9784 }
 0x8bd   :  { %v9787_v8 = vsub.f32 %v9781_v28, %v9785_v51 }
 0x8bf   :  { %v15764_v49 = vpop.eup %15763  ;;  %v9790_v48 = vmul.f32 1.442695, %v9787_v8 }
 0x8c0   :  { %v9792_v60 = vsel %vm9779_vm13, %v15764_v49, 0.0 }
 0x8c1   :  { %15765 = vpow2.f32 %v9790_v48  ;;  %9794 = vadd.xlane.f32.xlu1 %v9792_v60 }
 0x8c7   :  { %v15766_v44 = vpop.eup %15765 }
 0x8c8   :  { %v9793_v11 = vsel %vm9779_vm13, %v15766_v44, 0.0 }
 0x8c9   :  { %9796 = vadd.xlane.f32.xlu2 %v9793_v11 }
 0x934   :  { %v9795_v31 = vpop.xlane.xlu1 %9794 }
 0x935   :  { %15767 = vlog2.f32 %v9795_v31 }
 0x93b   :  { %v15768_v16 = vpop.eup %15767 }
 0x93c   :  { %v9799_v52 = vmul.f32 0.6931472, %v15768_v16  ;;  %v9797_v14 = vpop.xlane.xlu2 %9796 }
 0x93d   :  { %15769 = vlog2.f32 %v9797_v14 }
 0x93e   :  { %v9802_v38 = vadd.f32 %v9799_v52, %v9783_v37 }
 0x940   :  { %v9804_v36 = vsub.f32 %v9773_v41, %v9802_v38 }
 0x942   :  { %9806 = vst [vmem:[#allocation16] sm:$0xff] %v9804_v36 }
 0x943   :  { %v15770_v27 = vpop.eup %15769 }
 0x944   :  { %v9801_v43 = vmul.f32 0.6931472, %v15770_v27 }
 0x946   :  { %v9803_v62 = vadd.f32 %v9801_v43, %v9785_v51 }
 0x948   :  { %v9805_v33 = vsub.f32 %v9775_v4, %v9803_v62 }
 0x94a   :  { %9807 = vst [vmem:[#allocation16 + $0x8] sm:$0xff] %v9805_v33 }
 0x94b   :  { %9820 = dma.vmem_to_hbm [thread:$0]  %s9813_s7, 256, %s9815_s29, [#allocation4], %s16027_s25, %s16027_s25, %s16028_s26  }
 0x94c   :  { %16018 = dma.done.wait [#allocation4], 256  }
 0x94d   :  { %16019 = vsyncadd [#allocation4], 4294967040 }
 0x94e   :  { %9825 = vsyncpa [#allocation3], 1 }
 0x94f   :  { %9826 = vsyncpa [#allocation6], 1 }
 0x950   :  { %9827 = vsyncpa [#allocation9], 1 }
 0x951   :  { %9828 = vsyncpa [#allocation12], 1 }
 0x952   :  { %9829 = vsyncpa [#allocation15], 1 }
 0x953   :  { %9830 = vsyncpa [#allocation4], 1 }

</bundles_post_ra>
